<compile_context>
chip_gen: v7x
topology: tpu7x:2x2x1
jax: 0.10.0
libtpu: 0.0.40
codegen_flags: <defaults>
</compile_context>

<pallas_src>
import math
import functools
import numpy as np
import jax
import jax.numpy as jnp
from jax.experimental import pallas as pl
from jax.experimental.pallas import tpu as pltpu

LRELU_SLOPE = 0.2
LRELU_GAIN = math.sqrt(2.0)   # bias_act def_gain for 'lrelu'
LANE = 128


def _round_up(v, m):
    return ((v + m - 1) // m) * m


def _vmem_capacity_bytes():
    # Physical VMEM differs per generation (v5e/v6e: 128 MiB, v7x: 64 MiB) -- derive
    # the cap from the chip instead of hard-coding a v5e/v6e assumption.
    try:
        cap = int(pltpu.get_tpu_info().vmem_capacity_bytes)
        if cap > 0:
            return cap
    except Exception:
        pass
    return 64 << 20   # conservative fallback == v7x physical VMEM


def _pick_batch_tile(N, per_sample_bytes, budget_bytes, target_rows=256):
    # Largest batch tile that divides N, obeys the (8,128) sublane rule (multiple of
    # 8 or == N), fits the per-block VMEM budget, and (when possible) keeps >= 2 grid
    # steps so both v7x TensorCores get work.  On 1-TC chips a single big tile would
    # also be fine; grid >= 2 costs only ~0.35us extra.
    cands = [d for d in range(1, N + 1) if N % d == 0 and (d % 8 == 0 or d == N)]
    cands = [d for d in cands if d <= target_rows] or [min(cands)]
    fitting = [d for d in cands if d * per_sample_bytes <= budget_bytes] or [min(cands)]
    multi = [d for d in fitting if N // d >= 2]
    return max(multi or fitting)


# ------------------------------ MinibatchStd ---------------------------------
def mbstd_feature(x, group_size):
    # Per-sample MinibatchStd scalar (num_channels == 1) in plain JAX: a tiny
    # reduction XLA fuses into the input packing -- not worth a kernel launch.
    # TODO(synk): generalize to mbstd num_channels > 1 (module default is 1).
    N, C, H, W = x.shape
    G = min(group_size, N)
    assert N % G == 0   # same implicit requirement as the torch module's reshape
    M = N // G
    y = x.reshape(G, M, C * H * W)
    y = y - jnp.mean(y, axis=0, keepdims=True)
    y = jnp.sqrt(jnp.mean(y * y, axis=0) + 1e-8)
    y = jnp.mean(y, axis=-1, keepdims=True)                 # [M, 1]
    return jnp.tile(y, (G, 1))                               # sample n = g*M + m -> y[m]


# ---------------- fused conv3x3 + bias/lrelu + FC + lrelu + out ---------------
def _epilogue_kernel(xp_ref, y_ref, wc_ref, bc_ref, sm_ref, wf_ref, bf_ref,
                     wo_ref, bo_ref, o_ref, col_ref):
    # xp : [tb, H+2, W+2, Cp] bf16  NHWC, zero spatial + channel pad
    # y  : [tb, 1]            f32   per-sample mbstd feature
    # wc : [9*Cp, Kp]         bf16  conv taps, row = (dh*3+dw)*Cp + cin
    # bc : [1, Kp]            f32
    # sm : [HW, Kp]           f32   mbstd border-aware tap-sum map
    # wf : [HW*Kp, Cf]        bf16  fc weight, row = hw*Kp + k
    # bf : [1, Cf]            f32
    # wo : [1, Cf]            f32   out weight row (fc-side lrelu gain folded in)
    # bo : [1, 1]             f32
    # o  : [tb, 1]            f32
    # col: [tb*HW, 9*Cp]      bf16  im2col scratch (VMEM)
    tb, hp2, wp2, cp = xp_ref.shape
    H, W = hp2 - 2, wp2 - 2
    HW = H * W
    kp = bc_ref.shape[1]

    # im2col: the 9 shifted NHWC windows laid side by side along the lane dim.
    for dh in range(3):
        for dw in range(3):
            tap = dh * 3 + dw
            col_ref[:, tap * cp:(tap + 1) * cp] = (
                xp_ref[:, dh:dh + H, dw:dw + W, :].reshape(tb * HW, cp))

    # conv as ONE long-K matmul (K = 9*Cp), f32 accumulation on the MXU.
    h = jnp.dot(col_ref[...], wc_ref[...],
                preferred_element_type=jnp.float32) + bc_ref[...]
    # mbstd channel contribution: spatially-constant feature x border-aware tap sums.
    h = h.reshape(tb, HW, kp) + y_ref[...][:, :, None] * sm_ref[...][None, :, :]
    # bias_act 'lrelu'.  Gain kept here on purpose: folding it into bf16 wf changes
    # the bf16 quantization of h/wf and breaks 5e-3 parity with the reference.
    h = jnp.where(h >= 0.0, h, LRELU_SLOPE * h) * LRELU_GAIN
    h = h.astype(jnp.bfloat16).reshape(tb, HW * kp)

    # fc as ONE long-K matmul (K = HW*Kp); weights stay VMEM-resident across grid steps.
    z = jnp.dot(h, wf_ref[...], preferred_element_type=jnp.float32) + bf_ref[...]
    z = jnp.where(z >= 0.0, z, LRELU_SLOPE * z)              # its lrelu gain is in wo

    # out layer (1-wide): VPU multiply + lane reduction instead of a 1-column matmul.
    o_ref[...] = jnp.sum(z * wo_ref[...], axis=-1, keepdims=True) + bo_ref[...]


def discriminator_epilogue(packed, x, mbstd_group_size=4):
    # packed: kernel-layout params from pack_params(); x: [N, C, H, W] float32 NCHW.
    N, C, H, W = x.shape
    Kp = packed['wc'].shape[1]
    Cp = packed['wc'].shape[0] // 9
    Cf = packed['bf'].shape[1]
    HW = H * W

    # MinibatchStd scalar feature (plain JAX) + one NCHW->NHWC pack with channel and
    # spatial (conv) zero padding.  The mbstd channel is NOT concatenated into xp --
    # the kernel adds its conv contribution analytically (y * sm), so Cp == pad(C).
    y = mbstd_feature(x, mbstd_group_size)                            # [N, 1] f32
    x_nhwc = jnp.transpose(x, (0, 2, 3, 1))
    xp = jnp.pad(x_nhwc, ((0, 0), (1, 1), (1, 1), (0, Cp - C))).astype(jnp.bfloat16)

    # --- VMEM budgeting & per-chip batch-tile selection ---
    cap = _vmem_capacity_bytes()
    weight_bytes = (packed['wc'].size * 2 + packed['bc'].size * 4
                    + packed['sm'].size * 4 + packed['wf'].size * 2
                    + packed['bf'].size * 4 + packed['wo'].size * 4
                    + packed['bo'].size * 4)
    # TODO(synk): mark the constant-index weight specs pipeline_mode=pl.Buffered(1)
    # (single-buffered residents) once verified on this JAX version; budget 2x now.
    per_sample_bytes = (2 * (H + 2) * (W + 2) * Cp * 2       # xp block, double-buffered
                        + HW * 9 * Cp * 2                    # im2col scratch share
                        + HW * Kp * 6 + Cf * 16 + 64)        # conv act f32 + fc in bf16
    budget = int(0.75 * cap) - 2 * weight_bytes - (4 << 20)
    tb = _pick_batch_tile(N, per_sample_bytes, max(budget, per_sample_bytes))

    vmem_need = 2 * weight_bytes + tb * per_sample_bytes + (8 << 20)
    vmem_limit = int(min(vmem_need, cap - (8 << 20)))

    flops = 2 * N * HW * (9 * Cp * Kp + Kp * Cf) + 5 * N * HW * Kp + 4 * N * Cf
    bytes_accessed = xp.size * 2 + N * 4 + weight_bytes + N * 4

    return pl.pallas_call(
        _epilogue_kernel,
        out_shape=jax.ShapeDtypeStruct((N, 1), jnp.float32),
        grid_spec=pltpu.PrefetchScalarGridSpec(
            num_scalar_prefetch=0,
            grid=(N // tb,),
            in_specs=[
                pl.BlockSpec((tb, H + 2, W + 2, Cp), lambda i: (i, 0, 0, 0)),
                pl.BlockSpec((tb, 1), lambda i: (i, 0)),
                # Resident weights: constant index_map -> fetched once, reused.
                pl.BlockSpec((9 * Cp, Kp), lambda i: (0, 0)),
                pl.BlockSpec((1, Kp), lambda i: (0, 0)),
                pl.BlockSpec((HW, Kp), lambda i: (0, 0)),
                pl.BlockSpec((HW * Kp, Cf), lambda i: (0, 0)),
                pl.BlockSpec((1, Cf), lambda i: (0, 0)),
                pl.BlockSpec((1, Cf), lambda i: (0, 0)),
                pl.BlockSpec((1, 1), lambda i: (0, 0)),
            ],
            out_specs=pl.BlockSpec((tb, 1), lambda i: (i, 0)),
            scratch_shapes=[pltpu.VMEM((tb * HW, 9 * Cp), jnp.bfloat16)],
        ),
        compiler_params=pltpu.CompilerParams(
            dimension_semantics=("parallel",),
            vmem_limit_bytes=vmem_limit),
        cost_estimate=pl.CostEstimate(
            flops=int(flops), transcendentals=0,
            bytes_accessed=int(bytes_accessed)),
    )(xp, y, packed['wc'], packed['bc'], packed['sm'],
      packed['wf'], packed['bf'], packed['wo'], packed['bo'])


# --------------------------- parameter construction --------------------------
def init_params(key, in_channels, resolution, mbstd_num_channels=1):
    # Raw parameters in the PyTorch module's layout, weight gains (1/sqrt(fan_in))
    # folded in (equivalent to the module's runtime scaling).
    C = in_channels
    H, W = resolution
    D = C * H * W
    Cin = C + mbstd_num_channels
    k1, k2, k3 = jax.random.split(key, 3)
    conv_w = jax.random.normal(k1, (C, Cin, 3, 3), jnp.float32) * (1.0 / np.sqrt(Cin * 9))
    conv_b = jnp.zeros((C,), jnp.float32)
    fc_w = (jax.random.normal(k2, (C, D), jnp.float32) * (1.0 / np.sqrt(D))).T   # [D, C]
    fc_b = jnp.zeros((C,), jnp.float32)
    out_w = (jax.random.normal(k3, (1, C), jnp.float32) * (1.0 / np.sqrt(C))).T  # [C, 1]
    out_b = jnp.zeros((1,), jnp.float32)
    return dict(conv_w=conv_w, conv_b=conv_b, fc_w=fc_w, fc_b=fc_b,
                out_w=out_w, out_b=out_b,
                in_channels=C, resolution=(H, W),
                mbstd_num_channels=mbstd_num_channels)


def pack_params(params):
    # Repack raw params into the padded / permuted / flattened layout the kernel uses.
    C = params['in_channels']
    H, W = params['resolution']
    Fm = params['mbstd_num_channels']
    assert Fm == 1  # TODO(synk): generalize the mbstd additive-term packing to F > 1.
    HW = H * W
    Cp = _round_up(C, LANE)   # conv input channels (x only; mbstd handled additively)
    Kp = _round_up(C, LANE)   # conv output channels
    Cf = _round_up(C, LANE)   # fc output features

    # conv weight, real input channels only: [Cout, Cin, 3, 3] -> [9*Cp, Kp],
    # row index = (dh*3 + dw)*Cp + cin  (matches the im2col lane layout).
    wc = jnp.transpose(params['conv_w'][:, :C, :, :], (2, 3, 1, 0)).reshape(9, C, C)
    wc = jnp.pad(wc, ((0, 0), (0, Cp - C), (0, Kp - C)))
    wc = wc.reshape(9 * Cp, Kp).astype(jnp.bfloat16)
    bc = jnp.pad(params['conv_b'], (0, Kp - C)).reshape(1, Kp).astype(jnp.float32)

    # mbstd channel: its feature is spatially constant inside the image and zero in
    # the conv padding ring, so its conv contribution at (i, j) is
    # y * sum(mbstd taps landing inside the image) -- a per-position per-channel map.
    wm = params['conv_w'][:, C, :, :]                        # [Cout, 3, 3]
    ri, cj = jnp.arange(H), jnp.arange(W)
    sm = jnp.zeros((H, W, C), jnp.float32)
    for kh in range(3):
        rv = ((ri + kh - 1 >= 0) & (ri + kh - 1 < H)).astype(jnp.float32)
        for kw in range(3):
            cv = ((cj + kw - 1 >= 0) & (cj + kw - 1 < W)).astype(jnp.float32)
            sm = sm + (rv[:, None] * cv[None, :])[:, :, None] * wm[:, kh, kw][None, None, :]
    sm = jnp.pad(sm.reshape(HW, C), ((0, 0), (0, Kp - C))).astype(jnp.float32)

    # fc weight rows are NCHW-flatten (c, hw); kernel consumes (hw, k) order flattened
    # into a single long-K operand [HW*Kp, Cf].
    wf = params['fc_w'].reshape(C, HW, C)                    # [c, hw, out]
    wf = jnp.transpose(wf, (1, 0, 2))                        # [hw, c, out]
    wf = jnp.pad(wf, ((0, 0), (0, Kp - C), (0, Cf - C)))
    wf = wf.reshape(HW * Kp, Cf).astype(jnp.bfloat16)
    bf = jnp.pad(params['fc_b'], (0, Cf - C)).reshape(1, Cf).astype(jnp.float32)

    # out layer stays f32; fold the fc-side lrelu gain here (numerically free in f32).
    wo = (jnp.pad(params['out_w'][:, 0], (0, Cf - C)) * LRELU_GAIN).reshape(1, Cf)
    wo = wo.astype(jnp.float32)
    bo = params['out_b'].reshape(1, 1).astype(jnp.float32)
    return dict(wc=wc, bc=bc, sm=sm, wf=wf, bf=bf, wo=wo, bo=bo)


# ------------------------------ pure-JAX reference ---------------------------
def reference(params, x, mbstd_group_size=4, match_kernel_dtype=True):
    # Mirrors the PyTorch module; with match_kernel_dtype the MXU operands are cast
    # to bf16 (f32 accumulation), like the Pallas kernel path.
    N, C, H, W = x.shape
    md = jnp.bfloat16 if match_kernel_dtype else jnp.float32
    G = min(mbstd_group_size, N)
    M = N // G
    y = x.reshape(G, M, 1, C, H, W)
    y = y - y.mean(axis=0)
    y = (y ** 2).mean(axis=0)
    y = jnp.sqrt(y + 1e-8)
    y = y.mean(axis=(2, 3, 4))                                        # [M, 1]
    y = jnp.tile(y.reshape(M, 1, 1, 1), (G, 1, H, W))
    xc = jnp.concatenate([x, y], axis=1)
    h = jax.lax.conv_general_dilated(
        xc.astype(md), params['conv_w'].astype(md), (1, 1), ((1, 1), (1, 1)),
        dimension_numbers=('NCHW', 'OIHW', 'NCHW'),
        preferred_element_type=jnp.float32)
    h = h + params['conv_b'].reshape(1, -1, 1, 1)
    h = jnp.where(h >= 0, h, LRELU_SLOPE * h) * LRELU_GAIN
    z = jnp.dot(h.reshape(N, -1).astype(md), params['fc_w'].astype(md),
                preferred_element_type=jnp.float32) + params['fc_b']
    z = jnp.where(z >= 0, z, LRELU_SLOPE * z) * LRELU_GAIN
    return jnp.dot(z, params['out_w']) + params['out_b']


if __name__ == "__main__":
    N, C, H, W = 16, 8, 8, 8          # batch, in_channels, resolution (small test)
    key = jax.random.PRNGKey(0)
    key_p, key_x = jax.random.split(key)
    params = init_params(key_p, C, (H, W), mbstd_num_channels=1)
    packed = pack_params(params)
    x = jax.random.normal(key_x, (N, C, H, W), jnp.float32)

    fwd = jax.jit(functools.partial(discriminator_epilogue, mbstd_group_size=4))
    out = jax.block_until_ready(fwd(packed, x))

    ref = jax.block_until_ready(reference(params, x, mbstd_group_size=4))
    assert out.shape == (N, 1)
    np.testing.assert_allclose(np.asarray(out), np.asarray(ref), atol=5e-3, rtol=5e-3)
    print("KERNEL_OK")
</pallas_src>

<mosaic_0001>
module attributes {stable_mosaic.version = 11 : i64} {
  func.func @_epilogue_kernel(%arg0: i32, %arg1: memref<8x10x10x128xbf16, #tpu.memory_space<vmem>>, %arg2: memref<8x1xf32, #tpu.memory_space<vmem>>, %arg3: memref<1152x128xbf16, #tpu.memory_space<vmem>>, %arg4: memref<1x128xf32, #tpu.memory_space<vmem>>, %arg5: memref<64x128xf32, #tpu.memory_space<vmem>>, %arg6: memref<8192x128xbf16, #tpu.memory_space<vmem>>, %arg7: memref<1x128xf32, #tpu.memory_space<vmem>>, %arg8: memref<1x128xf32, #tpu.memory_space<vmem>>, %arg9: memref<1x1xf32, #tpu.memory_space<vmem>>, %arg10: memref<8x1xf32, #tpu.memory_space<vmem>>, %arg11: memref<512x1152xbf16, #tpu.memory_space<vmem>>) attributes {dimension_semantics = [#tpu.dimension_semantics<parallel>], iteration_bounds = array<i64: 2>, scalar_prefetch = 0 : i64, scratch_operands = 1 : i64, tpu.core_type = #tpu.core_type<tc>, window_params = [{transform_indices = @transform_0, window_bounds = array<i64: 8, 10, 10, 128>}, {transform_indices = @transform_1, window_bounds = array<i64: 8, 1>}, {pipeline_mode = #tpu.pipeline_mode<synchronous>, transform_indices = @transform_2, window_bounds = array<i64: 1152, 128>}, {pipeline_mode = #tpu.pipeline_mode<synchronous>, transform_indices = @transform_3, window_bounds = array<i64: 1, 128>}, {pipeline_mode = #tpu.pipeline_mode<synchronous>, transform_indices = @transform_4, window_bounds = array<i64: 64, 128>}, {pipeline_mode = #tpu.pipeline_mode<synchronous>, transform_indices = @transform_5, window_bounds = array<i64: 8192, 128>}, {pipeline_mode = #tpu.pipeline_mode<synchronous>, transform_indices = @transform_6, window_bounds = array<i64: 1, 128>}, {pipeline_mode = #tpu.pipeline_mode<synchronous>, transform_indices = @transform_7, window_bounds = array<i64: 1, 128>}, {pipeline_mode = #tpu.pipeline_mode<synchronous>, transform_indices = @transform_8, window_bounds = array<i64: 1, 1>}, {transform_indices = @transform_9, window_bounds = array<i64: 8, 1>}]} {
    %c0 = arith.constant 0 : index
    %c0_0 = arith.constant 0 : index
    %c0_1 = arith.constant 0 : index
    %c0_2 = arith.constant 0 : index
    %0 = vector.load %arg1[%c0, %c0_0, %c0_1, %c0_2] : memref<8x10x10x128xbf16, #tpu.memory_space<vmem>>, vector<8x8x8x128xbf16>
    %1 = vector.shape_cast %0 : vector<8x8x8x128xbf16> to vector<512x128xbf16>
    %c0_3 = arith.constant 0 : index
    %c0_4 = arith.constant 0 : index
    %2 = vector.load %arg11[%c0_3, %c0_4] : memref<512x1152xbf16, #tpu.memory_space<vmem>>, vector<512x128xbf16>
    tpu.vector_store %arg11[%c0_3, %c0_4], %1 {strides = array<i32>} : memref<512x1152xbf16, #tpu.memory_space<vmem>>, vector<512x128xbf16>,
    %c0_5 = arith.constant 0 : index
    %c0_6 = arith.constant 0 : index
    %c1 = arith.constant 1 : index
    %c0_7 = arith.constant 0 : index
    %3 = vector.load %arg1[%c0_5, %c0_6, %c1, %c0_7] : memref<8x10x10x128xbf16, #tpu.memory_space<vmem>>, vector<8x8x8x128xbf16>
    %4 = vector.shape_cast %3 : vector<8x8x8x128xbf16> to vector<512x128xbf16>
    %c0_8 = arith.constant 0 : index
    %c128 = arith.constant 128 : index
    %5 = vector.load %arg11[%c0_8, %c128] : memref<512x1152xbf16, #tpu.memory_space<vmem>>, vector<512x128xbf16>
    tpu.vector_store %arg11[%c0_8, %c128], %4 {strides = array<i32>} : memref<512x1152xbf16, #tpu.memory_space<vmem>>, vector<512x128xbf16>,
    %c0_9 = arith.constant 0 : index
    %c0_10 = arith.constant 0 : index
    %c2 = arith.constant 2 : index
    %c0_11 = arith.constant 0 : index
    %6 = vector.load %arg1[%c0_9, %c0_10, %c2, %c0_11] : memref<8x10x10x128xbf16, #tpu.memory_space<vmem>>, vector<8x8x8x128xbf16>
    %7 = vector.shape_cast %6 : vector<8x8x8x128xbf16> to vector<512x128xbf16>
    %c0_12 = arith.constant 0 : index
    %c256 = arith.constant 256 : index
    %8 = vector.load %arg11[%c0_12, %c256] : memref<512x1152xbf16, #tpu.memory_space<vmem>>, vector<512x128xbf16>
    tpu.vector_store %arg11[%c0_12, %c256], %7 {strides = array<i32>} : memref<512x1152xbf16, #tpu.memory_space<vmem>>, vector<512x128xbf16>,
    %c0_13 = arith.constant 0 : index
    %c1_14 = arith.constant 1 : index
    %c0_15 = arith.constant 0 : index
    %c0_16 = arith.constant 0 : index
    %9 = vector.load %arg1[%c0_13, %c1_14, %c0_15, %c0_16] : memref<8x10x10x128xbf16, #tpu.memory_space<vmem>>, vector<8x8x8x128xbf16>
    %10 = vector.shape_cast %9 : vector<8x8x8x128xbf16> to vector<512x128xbf16>
    %c0_17 = arith.constant 0 : index
    %c384 = arith.constant 384 : index
    %11 = vector.load %arg11[%c0_17, %c384] : memref<512x1152xbf16, #tpu.memory_space<vmem>>, vector<512x128xbf16>
    tpu.vector_store %arg11[%c0_17, %c384], %10 {strides = array<i32>} : memref<512x1152xbf16, #tpu.memory_space<vmem>>, vector<512x128xbf16>,
    %c0_18 = arith.constant 0 : index
    %c1_19 = arith.constant 1 : index
    %c1_20 = arith.constant 1 : index
    %c0_21 = arith.constant 0 : index
    %12 = vector.load %arg1[%c0_18, %c1_19, %c1_20, %c0_21] : memref<8x10x10x128xbf16, #tpu.memory_space<vmem>>, vector<8x8x8x128xbf16>
    %13 = vector.shape_cast %12 : vector<8x8x8x128xbf16> to vector<512x128xbf16>
    %c0_22 = arith.constant 0 : index
    %c512 = arith.constant 512 : index
    %14 = vector.load %arg11[%c0_22, %c512] : memref<512x1152xbf16, #tpu.memory_space<vmem>>, vector<512x128xbf16>
    tpu.vector_store %arg11[%c0_22, %c512], %13 {strides = array<i32>} : memref<512x1152xbf16, #tpu.memory_space<vmem>>, vector<512x128xbf16>,
    %c0_23 = arith.constant 0 : index
    %c1_24 = arith.constant 1 : index
    %c2_25 = arith.constant 2 : index
    %c0_26 = arith.constant 0 : index
    %15 = vector.load %arg1[%c0_23, %c1_24, %c2_25, %c0_26] : memref<8x10x10x128xbf16, #tpu.memory_space<vmem>>, vector<8x8x8x128xbf16>
    %16 = vector.shape_cast %15 : vector<8x8x8x128xbf16> to vector<512x128xbf16>
    %c0_27 = arith.constant 0 : index
    %c640 = arith.constant 640 : index
    %17 = vector.load %arg11[%c0_27, %c640] : memref<512x1152xbf16, #tpu.memory_space<vmem>>, vector<512x128xbf16>
    tpu.vector_store %arg11[%c0_27, %c640], %16 {strides = array<i32>} : memref<512x1152xbf16, #tpu.memory_space<vmem>>, vector<512x128xbf16>,
    %c0_28 = arith.constant 0 : index
    %c2_29 = arith.constant 2 : index
    %c0_30 = arith.constant 0 : index
    %c0_31 = arith.constant 0 : index
    %18 = vector.load %arg1[%c0_28, %c2_29, %c0_30, %c0_31] : memref<8x10x10x128xbf16, #tpu.memory_space<vmem>>, vector<8x8x8x128xbf16>
    %19 = vector.shape_cast %18 : vector<8x8x8x128xbf16> to vector<512x128xbf16>
    %c0_32 = arith.constant 0 : index
    %c768 = arith.constant 768 : index
    %20 = vector.load %arg11[%c0_32, %c768] : memref<512x1152xbf16, #tpu.memory_space<vmem>>, vector<512x128xbf16>
    tpu.vector_store %arg11[%c0_32, %c768], %19 {strides = array<i32>} : memref<512x1152xbf16, #tpu.memory_space<vmem>>, vector<512x128xbf16>,
    %c0_33 = arith.constant 0 : index
    %c2_34 = arith.constant 2 : index
    %c1_35 = arith.constant 1 : index
    %c0_36 = arith.constant 0 : index
    %21 = vector.load %arg1[%c0_33, %c2_34, %c1_35, %c0_36] : memref<8x10x10x128xbf16, #tpu.memory_space<vmem>>, vector<8x8x8x128xbf16>
    %22 = vector.shape_cast %21 : vector<8x8x8x128xbf16> to vector<512x128xbf16>
    %c0_37 = arith.constant 0 : index
    %c896 = arith.constant 896 : index
    %23 = vector.load %arg11[%c0_37, %c896] : memref<512x1152xbf16, #tpu.memory_space<vmem>>, vector<512x128xbf16>
    tpu.vector_store %arg11[%c0_37, %c896], %22 {strides = array<i32>} : memref<512x1152xbf16, #tpu.memory_space<vmem>>, vector<512x128xbf16>,
    %c0_38 = arith.constant 0 : index
    %c2_39 = arith.constant 2 : index
    %c2_40 = arith.constant 2 : index
    %c0_41 = arith.constant 0 : index
    %24 = vector.load %arg1[%c0_38, %c2_39, %c2_40, %c0_41] : memref<8x10x10x128xbf16, #tpu.memory_space<vmem>>, vector<8x8x8x128xbf16>
    %25 = vector.shape_cast %24 : vector<8x8x8x128xbf16> to vector<512x128xbf16>
    %c0_42 = arith.constant 0 : index
    %c1024 = arith.constant 1024 : index
    %26 = vector.load %arg11[%c0_42, %c1024] : memref<512x1152xbf16, #tpu.memory_space<vmem>>, vector<512x128xbf16>
    tpu.vector_store %arg11[%c0_42, %c1024], %25 {strides = array<i32>} : memref<512x1152xbf16, #tpu.memory_space<vmem>>, vector<512x128xbf16>,
    %c0_43 = arith.constant 0 : index
    %c0_44 = arith.constant 0 : index
    %27 = vector.load %arg11[%c0_43, %c0_44] : memref<512x1152xbf16, #tpu.memory_space<vmem>>, vector<512x1152xbf16>
    %c0_45 = arith.constant 0 : index
    %c0_46 = arith.constant 0 : index
    %28 = vector.load %arg3[%c0_45, %c0_46] : memref<1152x128xbf16, #tpu.memory_space<vmem>>, vector<1152x128xbf16>
    %cst = arith.constant dense<0.000000e+00> : vector<512x128xf32>
    %29 = tpu.matmul %27, %28, %cst {dimension_numbers = #tpu.dot_dimension_numbers<[1], [0], [0], [1], [0, 0, 1, 1], [], []>} : vector<512x1152xbf16>, vector<1152x128xbf16>, vector<512x128xf32> -> vector<512x128xf32>
    %c0_47 = arith.constant 0 : index
    %c0_48 = arith.constant 0 : index
    %30 = vector.load %arg4[%c0_47, %c0_48] : memref<1x128xf32, #tpu.memory_space<vmem>>, vector<1x128xf32>
    %31 = vector.broadcast %30 : vector<1x128xf32> to vector<512x128xf32>
    %32 = arith.addf %29, %31 : vector<512x128xf32>
    %33 = vector.shape_cast %32 : vector<512x128xf32> to vector<8x64x128xf32>
    %c0_49 = arith.constant 0 : index
    %c0_50 = arith.constant 0 : index
    %34 = vector.load %arg2[%c0_49, %c0_50] : memref<8x1xf32, #tpu.memory_space<vmem>>, vector<8x1xf32>
    %35 = vector.shape_cast %34 : vector<8x1xf32> to vector<8x1x1xf32>
    %c0_51 = arith.constant 0 : index
    %c0_52 = arith.constant 0 : index
    %36 = vector.load %arg5[%c0_51, %c0_52] : memref<64x128xf32, #tpu.memory_space<vmem>>, vector<64x128xf32>
    %37 = vector.shape_cast %36 : vector<64x128xf32> to vector<1x64x128xf32>
    %38 = vector.broadcast %35 : vector<8x1x1xf32> to vector<8x64x128xf32>
    %39 = vector.broadcast %37 : vector<1x64x128xf32> to vector<8x64x128xf32>
    %40 = arith.mulf %38, %39 : vector<8x64x128xf32>
    %41 = arith.addf %33, %40 : vector<8x64x128xf32>
    %cst_53 = arith.constant 0.000000e+00 : f32
    %42 = vector.broadcast %cst_53 : f32 to vector<8x64x128xf32>
    %43 = arith.cmpf oge, %41, %42 : vector<8x64x128xf32>
    %cst_54 = arith.constant 2.000000e-01 : f32
    %44 = vector.broadcast %cst_54 : f32 to vector<8x64x128xf32>
    %45 = arith.mulf %44, %41 : vector<8x64x128xf32>
    %46 = arith.select %43, %41, %45 : vector<8x64x128xi1>, vector<8x64x128xf32>
    %cst_55 = arith.constant 1.41421354 : f32
    %47 = vector.broadcast %cst_55 : f32 to vector<8x64x128xf32>
    %48 = arith.mulf %46, %47 : vector<8x64x128xf32>
    %49 = arith.truncf %48 : vector<8x64x128xf32> to vector<8x64x128xbf16>
    %50 = vector.shape_cast %49 : vector<8x64x128xbf16> to vector<8x8192xbf16>
    %c0_56 = arith.constant 0 : index
    %c0_57 = arith.constant 0 : index
    %51 = vector.load %arg6[%c0_56, %c0_57] : memref<8192x128xbf16, #tpu.memory_space<vmem>>, vector<8192x128xbf16>
    %cst_58 = arith.constant dense<0.000000e+00> : vector<8x128xf32>
    %52 = tpu.matmul %50, %51, %cst_58 {dimension_numbers = #tpu.dot_dimension_numbers<[1], [0], [0], [1], [0, 0, 1, 1], [], []>} : vector<8x8192xbf16>, vector<8192x128xbf16>, vector<8x128xf32> -> vector<8x128xf32>
    %c0_59 = arith.constant 0 : index
    %c0_60 = arith.constant 0 : index
    %53 = vector.load %arg7[%c0_59, %c0_60] : memref<1x128xf32, #tpu.memory_space<vmem>>, vector<1x128xf32>
    %54 = vector.broadcast %53 : vector<1x128xf32> to vector<8x128xf32>
    %55 = arith.addf %52, %54 : vector<8x128xf32>
    %cst_61 = arith.constant 0.000000e+00 : f32
    %56 = vector.broadcast %cst_61 : f32 to vector<8x128xf32>
    %57 = arith.cmpf oge, %55, %56 : vector<8x128xf32>
    %cst_62 = arith.constant 2.000000e-01 : f32
    %58 = vector.broadcast %cst_62 : f32 to vector<8x128xf32>
    %59 = arith.mulf %58, %55 : vector<8x128xf32>
    %60 = arith.select %57, %55, %59 : vector<8x128xi1>, vector<8x128xf32>
    %c0_63 = arith.constant 0 : index
    %c0_64 = arith.constant 0 : index
    %61 = vector.load %arg8[%c0_63, %c0_64] : memref<1x128xf32, #tpu.memory_space<vmem>>, vector<1x128xf32>
    %62 = vector.broadcast %61 : vector<1x128xf32> to vector<8x128xf32>
    %63 = arith.mulf %60, %62 : vector<8x128xf32>
    %cst_65 = arith.constant dense<0.000000e+00> : vector<8xf32>
    %64 = vector.multi_reduction <add>, %63, %cst_65 [1] : vector<8x128xf32> to vector<8xf32>
    %65 = vector.shape_cast %64 : vector<8xf32> to vector<8x1xf32>
    %c0_66 = arith.constant 0 : index
    %c0_67 = arith.constant 0 : index
    %66 = vector.load %arg9[%c0_66, %c0_67] : memref<1x1xf32, #tpu.memory_space<vmem>>, vector<1x1xf32>
    %67 = vector.broadcast %66 : vector<1x1xf32> to vector<8x1xf32>
    %68 = arith.addf %65, %67 : vector<8x1xf32>
    %c0_68 = arith.constant 0 : index
    %c0_69 = arith.constant 0 : index
    %69 = vector.load %arg10[%c0_68, %c0_69] : memref<8x1xf32, #tpu.memory_space<vmem>>, vector<8x1xf32>
    tpu.vector_store %arg10[%c0_68, %c0_69], %68 {strides = array<i32>} : memref<8x1xf32, #tpu.memory_space<vmem>>, vector<8x1xf32>,
    return
  }
  func.func @transform_0(%arg0: i32) -> (i32, i32, i32, i32) {
    %c0_i32 = arith.constant 0 : i32
    %c0_i32_0 = arith.constant 0 : i32
    %c0_i32_1 = arith.constant 0 : i32
    %c0_i32_2 = arith.constant 0 : i32
    return %arg0, %c0_i32, %c0_i32_0, %c0_i32_1 : i32, i32, i32, i32
  }
  func.func @transform_1(%arg0: i32) -> (i32, i32) {
    %c0_i32 = arith.constant 0 : i32
    %c0_i32_0 = arith.constant 0 : i32
    return %arg0, %c0_i32 : i32, i32
  }
  func.func @transform_2(%arg0: i32) -> (i32, i32) {
    %c0_i32 = arith.constant 0 : i32
    %c0_i32_0 = arith.constant 0 : i32
    %c0_i32_1 = arith.constant 0 : i32
    return %c0_i32, %c0_i32_0 : i32, i32
  }
  func.func @transform_3(%arg0: i32) -> (i32, i32) {
    %c0_i32 = arith.constant 0 : i32
    %c0_i32_0 = arith.constant 0 : i32
    %c0_i32_1 = arith.constant 0 : i32
    return %c0_i32, %c0_i32_0 : i32, i32
  }
  func.func @transform_4(%arg0: i32) -> (i32, i32) {
    %c0_i32 = arith.constant 0 : i32
    %c0_i32_0 = arith.constant 0 : i32
    %c0_i32_1 = arith.constant 0 : i32
    return %c0_i32, %c0_i32_0 : i32, i32
  }
  func.func @transform_5(%arg0: i32) -> (i32, i32) {
    %c0_i32 = arith.constant 0 : i32
    %c0_i32_0 = arith.constant 0 : i32
    %c0_i32_1 = arith.constant 0 : i32
    return %c0_i32, %c0_i32_0 : i32, i32
  }
  func.func @transform_6(%arg0: i32) -> (i32, i32) {
    %c0_i32 = arith.constant 0 : i32
    %c0_i32_0 = arith.constant 0 : i32
    %c0_i32_1 = arith.constant 0 : i32
    return %c0_i32, %c0_i32_0 : i32, i32
  }
  func.func @transform_7(%arg0: i32) -> (i32, i32) {
    %c0_i32 = arith.constant 0 : i32
    %c0_i32_0 = arith.constant 0 : i32
    %c0_i32_1 = arith.constant 0 : i32
    return %c0_i32, %c0_i32_0 : i32, i32
  }
  func.func @transform_8(%arg0: i32) -> (i32, i32) {
    %c0_i32 = arith.constant 0 : i32
    %c0_i32_0 = arith.constant 0 : i32
    %c0_i32_1 = arith.constant 0 : i32
    return %c0_i32, %c0_i32_0 : i32, i32
  }
  func.func @transform_9(%arg0: i32) -> (i32, i32) {
    %c0_i32 = arith.constant 0 : i32
    %c0_i32_0 = arith.constant 0 : i32
    return %arg0, %c0_i32 : i32, i32
  }
}

</mosaic_0001>

<bundles_post_ra>
// kernel: discriminator_epilogue.1
= control target key start
LH: loop header
LB: loop body
LE: loop exit
PB: predicated region body
PF: predicated region fallthrough
CT: control target
= control target key end

     0   :  { %s19558_s11 = smov 0   ;;  %s26248_s0 = inlined_call_operand.vmem [shape: bf16[16,10,10,128], index: 0, kind: input, shape index: {}]   ;;  %s26249_s1 = inlined_call_operand.vmem [shape: f32[16,1], index: 1, kind: input, shape index: {}]   ;;  %s26250_s2 = inlined_call_operand.vmem [shape: bf16[1152,128], index: 2, kind: input, shape index: {}]   ;;  %s26251_s3 = inlined_call_operand.vmem [shape: f32[1,128], index: 3, kind: input, shape index: {}]   ;;  %s26252_s4 = inlined_call_operand.vmem [shape: f32[64,128], index: 4, kind: input, shape index: {}]   ;;  %s26253_s5 = inlined_call_operand.vmem [shape: bf16[8192,128], index: 5, kind: input, shape index: {}]   ;;  %s26254_s6 = inlined_call_operand.vmem [shape: f32[1,128], index: 6, kind: input, shape index: {}]   ;;  %s26255_s7 = inlined_call_operand.vmem [shape: f32[1,128], index: 7, kind: input, shape index: {}]   ;;  %s26256_s8 = inlined_call_operand.<no memory space> [shape: f32[1,1], index: 8, kind: input, shape index: {}]   ;;  %s26257_s9 = inlined_call_operand.vmem [shape: f32[16,1], index: 9, kind: output, shape index: {}]  }
   0x1   :  { %v14_v0 = vstv %s26256_s8 }
   0x2   :  { %15 = vst [vmem:[#allocation3] sm:$0x1] %v14_v0 }
   0x3 LB: > { %s19564_s12 = sadd.s32 4294967295, %s19499_s11   ;;  %p15798_p0 = scmp.ge.s32.totalorder %s19499_s11, 1  ;;  %s19499_s11 = sphi %s19558_s11, %s21_s11  }
   0x4   : > { %p300_p1 = scmp.lt.s32.totalorder %s19499_s11, 3 }
   0x6   : > { %p301_p2 = pnand %p15798_p0, %p300_p1 }
   0x8   : > { %304 = sbr.rel (%p301_p2) target bundleno = 2620 (0xa3c), region = 56 }
   0xf   : > { %v18800_v1 = vld [vmem:[%s26250_s2] sm:$0xff]   ;;  %v26258_v2 = vmov 0   ;;  %s15799_s8 = sshll.u32 %s19564_s12, 3  ;;  %v18801_v3 = vld [vmem:[%s26250_s2 + $0x8] sm:$0xff]   ;;  %v18802_v4 = vld [vmem:[%s26250_s2 + $0x10] sm:$0xff]   ;;  %v26387_v25 = vmov 0 }
  0x10   : > { %7667 = vmatprep.subr.bf16.mxu0 %v26258_v2  ;;  %18798 = vset.pattern.permute.xlu0 %v26258_v2  ;;  %p341_p3 = scmp.lt.s32.totalorder %s15799_s8, 15  ;;  %v18803_v5 = vld [vmem:[%s26250_s2 + $0x18] sm:$0xff]   ;;  %v18804_v6 = vld [vmem:[%s26250_s2 + $0x20] sm:$0xff]   ;;  %v18805_v10 = vld [vmem:[%s26250_s2 + $0x28] sm:$0xff]   ;;  %vm772_vm0 = vsmask.f32 3328 }
  0x11   : > { %7668 = vmatpush1.bf16.msra.mxu0 %v18800_v1  ;;  %18799 = vset.pattern.permute.xlu1 %v26258_v2  ;;  %vm773_vm1 = vsmask.f32 7440  ;;  %v18806_v22 = vld [vmem:[%s26250_s2 + $0x30] sm:$0xff]   ;;  %v18807_v30 = vld [vmem:[%s26250_s2 + $0x38] sm:$0xff]   ;;  %v18808_v34 = vld [vmem:[%s26250_s2 + $0x40] sm:$0xff]   ;;  %vm2087_vm3 = vcmask 1042432  }
  0x12   : > { %7669 = vmatprep.subr.bf16.mxu0 %v26258_v2  ;;  %s27092_s8 = smov (!%p341_p3, %s15799_s8), 15  ;;  %vm19609_vm2 = vmor %vm772_vm0, %vm773_vm1  ;;  %v18809_v35 = vld [vmem:[%s26250_s2 + $0x48] sm:$0xff]   ;;  %v18810_v36 = vld [vmem:[%s26250_s2 + $0x50] sm:$0xff]   ;;  %vm2088_vm4 = vcmask 1046532   ;;  %p347_p4 = scmp.lt.s32.totalorder %s19564_s12, 1 }
  0x13   : > { %s18785_s19 = smul.u32 80, %s27092_s8  ;;  %v26388_v25 = vsel %vm19609_vm2, 4294967295, %v26387_v25  ;;  %v18811_v39 = vld [vmem:[%s26250_s2 + $0x58] sm:$0xff]   ;;  %v18812_v44 = vld [vmem:[%s26250_s2 + $0x60] sm:$0xff]   ;;  %v18813_v53 = vld [vmem:[%s26250_s2 + $0x68] sm:$0xff]  }
  0x14   : > { %26389 = vst [vmem:[#allocation4_spill] sm:$0xff] %v26388_v25  ;;  %v18814_v62 = vld [vmem:[%s26250_s2 + $0x70] sm:$0xff]   ;;  %vm20120_vm5 = vmor %vm2087_vm3, %vm2088_vm4  ;;  %s27094_s12 = smov (!%p347_p4, %s19564_s12), 1 }
  0x15   : > { %7670 = vmatpush1.bf16.msra.mxu0 %v18801_v3  ;;  %s19590_s24 = scalar_lea.vmem %s26248_s0, %s18785_s19  ;;  %s15801_s28 = sshll.u32 %s27094_s12, 3 }
  0x16   : > { %7671 = vmatprep.subr.bf16.mxu0 %v26258_v2  ;;  %v644_v7 = vld [vmem:[%s19590_s24] sm:$0xf]  ;;  %v645_v8 = vld [vmem:[%s19590_s24 + $0x4] sm:$0x1]  ;;  %v646_v9 = vld [vmem:[%s19590_s24 + $0x8] sm:$0xf]  ;;  %s22713_s10 = scalar_lea.vmem %s26249_s1, %s15801_s28  ;;  %s354_s17 = scalar_lea.vmem %s26257_s9, %s15801_s28 }
  0x17   : > { %v647_v11 = vld [vmem:[%s19590_s24 + $0xc] sm:$0x1]  ;;  %v776_v12 = vshrl.u32 %v644_v7, 16  ;;  %v779_v13 = vshll.u32 %v644_v7, 16  ;;  %v785_v14 = vshll.u32 %v645_v8, 16  ;;  %v790_v15 = vshrl.u32 %v646_v9, 16 }
  0x18   : > { %v793_v16 = vshll.u32 %v646_v9, 16  ;;  %v799_v17 = vshll.u32 %v647_v11, 16  ;;  %v648_v37 = vld [vmem:[%s19590_s24 + $0x10] sm:$0xf]  ;;  %v650_v38 = vld [vmem:[%s19590_s24 + $0x18] sm:$0xf] }
  0x19   : > { %7672 = vmatpush1.bf16.msra.mxu0 %v18802_v4  ;;  %v778_v18 = vrot.slane %v776_v12, 4  ;;  %v781_v19 = vrot.slane %v779_v13, 5  ;;  %v792_v20 = vrot.slane %v790_v15, 4  ;;  %v787_v24 = vrot.slane %v785_v14, 5  ;;  %v649_v49 = vld [vmem:[%s19590_s24 + $0x14] sm:$0x1] }
  0x1a   : > { %7673 = vmatprep.subr.bf16.mxu0 %v26258_v2  ;;  %v795_v21 = vrot.slane %v793_v16, 5  ;;  %v801_v27 = vrot.slane %v799_v17, 5  ;;  %v804_v40 = vshrl.u32 %v648_v37, 16  ;;  %v807_v41 = vshll.u32 %v648_v37, 16  ;;  %v651_v50 = vld [vmem:[%s19590_s24 + $0x1c] sm:$0x1] }
  0x1b   : > { %v782_v23 = vor.u32 %v781_v19, %v778_v18  ;;  %v818_v42 = vshrl.u32 %v650_v38, 16  ;;  %v821_v43 = vshll.u32 %v650_v38, 16  ;;  %v652_v51 = vld [vmem:[%s19590_s24 + $0x20] sm:$0xf]  ;;  %v654_v52 = vld [vmem:[%s19590_s24 + $0x28] sm:$0xf] }
  0x1c   : > { %v796_v26 = vor.u32 %v795_v21, %v792_v20  ;;  %v806_v45 = vrot.slane %v804_v40, 4  ;;  %v809_v46 = vrot.slane %v807_v41, 5  ;;  %v813_v55 = vshll.u32 %v649_v49, 16  ;;  %v656_v63 = vld [vmem:[%s19590_s24 + $0x30] sm:$0xf]  ;;  %v18815_v16 = vld [vmem:[%s26250_s2 + $0x78] sm:$0xff]  }
  0x1d   : > { %7674 = vmatpush1.bf16.msra.mxu0 %v18803_v5  ;;  %v783_v28 = vrot.slane %v782_v23, 4  ;;  %v820_v47 = vrot.slane %v818_v42, 4  ;;  %v823_v48 = vrot.slane %v821_v43, 5  ;;  %v827_v57 = vshll.u32 %v651_v50, 16  ;;  %v658_v0 = vld [vmem:[%s19590_s24 + $0x38] sm:$0xf] }
  0x1e   : > { %7675 = vmatprep.subr.bf16.mxu0 %v26258_v2  ;;  %v797_v29 = vrot.slane %v796_v26, 4  ;;  %v810_v54 = vor.u32 %v809_v46, %v806_v45  ;;  %v832_v58 = vshrl.u32 %v652_v51, 16  ;;  %v835_v59 = vshll.u32 %v652_v51, 16  ;;  %v655_v7 = vld [vmem:[%s19590_s24 + $0x2c] sm:$0x1] }
  0x1f   : > { %v788_v31 = vsel %vm19609_vm2, %v783_v28, %v787_v24  ;;  %v824_v56 = vor.u32 %v823_v48, %v820_v47  ;;  %v846_v60 = vshrl.u32 %v654_v52, 16  ;;  %v849_v61 = vshll.u32 %v654_v52, 16  ;;  %v18816_v19 = vld [vmem:[%s19590_s24] ss:$8 sps:$4 sm:$0xff]   ;;  %v18818_v48 = vld [vmem:[%s19590_s24 + $0x10] ss:$8 sps:$4 sm:$0xff]  }
  0x20   : > { %v802_v32 = vsel %vm19609_vm2, %v797_v29, %v801_v27  ;;  %v811_v1 = vrot.slane %v810_v54, 4  ;;  %v815_v3 = vrot.slane %v813_v55, 5  ;;  %v829_v5 = vrot.slane %v827_v57, 5  ;;  %v18817_v24 = vld [vmem:[%s26250_s2 + $0x80] sm:$0xff]   ;;  %v18820_v47 = vld [vmem:[%s26250_s2 + $0x88] sm:$0xff]  }
  0x21   : > { %7676 = vmatpush1.bf16.msra.mxu0 %v18804_v6  ;;  %v15835_v33 = vcombine.low %v788_v31, %v802_v32  ;;  %v825_v4 = vrot.slane %v824_v56, 4  ;;  %v653_v6 = vld [vmem:[%s19590_s24 + $0x24] sm:$0x1]  ;;  %v834_v8 = vrot.slane %v832_v58, 4  ;;  %v837_v9 = vrot.slane %v835_v59, 5 }
  0x22   : > { %7677 = vmatprep.subr.bf16.mxu0 %v26258_v2  ;;  %v851_v11 = vrot.slane %v849_v61, 5  ;;  %v860_v12 = vshrl.u32 %v656_v63, 16  ;;  %v863_v13 = vshll.u32 %v656_v63, 16  ;;  %v874_v14 = vshrl.u32 %v658_v0, 16  ;;  %v659_v31 = vld [vmem:[%s19590_s24 + $0x3c] sm:$0x1] }
  0x23   : > { %7699 = vmatprep.mubr.bf16.mxu0 %v15835_v33  ;;  %v877_v15 = vshll.u32 %v658_v0, 16  ;;  %v841_v17 = vshll.u32 %v653_v6, 16  ;;  %v855_v18 = vshll.u32 %v655_v7, 16  ;;  %v816_v20 = vsel %vm19609_vm2, %v811_v1, %v815_v3  ;;  %v660_v33 = vld [vmem:[%s19590_s24 + $0x50] sm:$0xf] }
  0x24   : > { %v830_v21 = vsel %vm19609_vm2, %v825_v4, %v829_v5  ;;  %v862_v26 = vrot.slane %v860_v12, 4  ;;  %v865_v27 = vrot.slane %v863_v13, 5  ;;  %v876_v28 = vrot.slane %v874_v14, 4  ;;  %v661_v55 = vld [vmem:[%s19590_s24 + $0x54] sm:$0x1] }
  0x25   : > { %7678 = vmatpush1.bf16.msra.mxu0 %v18805_v10  ;;  %v848_v10 = vrot.slane %v846_v60, 4  ;;  %v879_v29 = vrot.slane %v877_v15, 5  ;;  %v15836_v32 = vcombine.low %v816_v20, %v830_v21  ;;  %v857_v38 = vrot.slane %v855_v18, 5  ;;  %v663_v56 = vld [vmem:[%s19590_s24 + $0x5c] sm:$0x1] }
  0x26   : > { %7679 = vmatprep.subr.bf16.mxu0 %v26258_v2  ;;  %v883_v42 = vshll.u32 %v659_v31, 16  ;;  %v888_v43 = vshrl.u32 %v660_v33, 16  ;;  %v664_v63 = vld [vmem:[%s19590_s24 + $0x60] sm:$0xf]  ;;  %v666_v0 = vld [vmem:[%s19590_s24 + $0x68] sm:$0xf] }
  0x27   : > { %v852_v23 = vor.u32 %v851_v11, %v848_v10  ;;  %v880_v41 = vor.u32 %v879_v29, %v876_v28  ;;  %v897_v1 = vshll.u32 %v661_v55, 16  ;;  %v911_v3 = vshll.u32 %v663_v56, 16  ;;  %v18819_v13 = vld [vmem:[%s19590_s24 + $0x20] ss:$8 sps:$4 sm:$0xff]   ;;  %v665_v20 = vld [vmem:[%s19590_s24 + $0x64] sm:$0x1] }
  0x28   : > { %v885_v54 = vrot.slane %v883_v42, 5  ;;  %v890_v57 = vrot.slane %v888_v43, 4  ;;  %v919_v10 = vshll.u32 %v664_v63, 16  ;;  %v930_v11 = vshrl.u32 %v666_v0, 16  ;;  %v668_v28 = vld [vmem:[%s19590_s24 + $0x70] sm:$0xf] }
  0x29   : > { %7680 = vmatpush1.bf16.msra.mxu0 %v18806_v22  ;;  %v838_v22 = vor.u32 %v837_v9, %v834_v8  ;;  %v853_v37 = vrot.slane %v852_v23, 4  ;;  %v18826_v8 = vld [vmem:[%s26250_s2 + $0x98] sm:$0xff]   ;;  %v916_v9 = vshrl.u32 %v664_v63, 16  ;;  %v933_v12 = vshll.u32 %v666_v0, 16  ;;  %v672_v42 = vld [vmem:[%s19590_s24 + $0x80] sm:$0xf] }
  0x2a   : > { %7681 = vmatprep.subr.bf16.mxu0 %v26258_v2  ;;  %v899_v14 = vrot.slane %v897_v1, 5  ;;  %v913_v15 = vrot.slane %v911_v3, 5  ;;  %v932_v23 = vrot.slane %v930_v11, 4  ;;  %v670_v29 = vld [vmem:[%s19590_s24 + $0x78] sm:$0xf]  ;;  %v972_v55 = vshrl.u32 %v672_v42, 16 }
  0x2b   : > { %v858_v50 = vsel %vm19609_vm2, %v853_v37, %v857_v38  ;;  %v918_v21 = vrot.slane %v916_v9, 4  ;;  %v947_v37 = vshll.u32 %v668_v28, 16  ;;  %v958_v38 = vshrl.u32 %v670_v29, 16  ;;  %v674_v43 = vld [vmem:[%s19590_s24 + $0x88] sm:$0xf] }
  0x2c   : > { %v975_v56 = vshll.u32 %v672_v42, 16  ;;  %v675_v9 = vld [vmem:[%s19590_s24 + $0x8c] sm:$0x1]  ;;  %v18847_v42 = vld [vmem:[%s26250_s2 + $0xd0] sm:$0xff]  }
  0x2d   : > { %7682 = vmatpush1.bf16.msra.mxu0 %v18807_v30  ;;  %v657_v30 = vld [vmem:[%s19590_s24 + $0x34] sm:$0x1] }
  0x2e   : > { %7683 = vmatprep.subr.bf16.mxu0 %v26258_v2  ;;  %v869_v40 = vshll.u32 %v657_v30, 16 }
  0x30   : > { %v871_v52 = vrot.slane %v869_v40, 5  ;;  %v18821_v40 = vld [vmem:[%s19590_s24 + $0x30] ss:$8 sps:$4 sm:$0xff]  }
  0x31   : > { %7684 = vmatpush1.bf16.msra.mxu0 %v18808_v34  ;;  %v662_v34 = vld [vmem:[%s19590_s24 + $0x58] sm:$0xf] }
  0x32   : > { %7685 = vmatprep.subr.bf16.mxu0 %v26258_v2  ;;  %v902_v45 = vshrl.u32 %v662_v34, 16  ;;  %v905_v46 = vshll.u32 %v662_v34, 16 }
  0x34   : > { %v904_v59 = vrot.slane %v902_v45, 4  ;;  %v907_v60 = vrot.slane %v905_v46, 5 }
  0x35   : > { %7686 = vmatpush1.bf16.msra.mxu0 %v18809_v35  ;;  %v839_v35 = vrot.slane %v838_v22, 4  ;;  %v921_v22 = vrot.slane %v919_v10, 5  ;;  %v676_v10 = vld [vmem:[%s19590_s24 + $0xa0] sm:$0xf] }
  0x36   : > { %7687 = vmatprep.subr.bf16.mxu0 %v26258_v2  ;;  %v908_v7 = vor.u32 %v907_v60, %v904_v59 }
  0x39   : > { %7688 = vmatpush1.bf16.msra.mxu0 %v18810_v36  ;;  %v843_v36 = vrot.slane %v841_v17, 5 }
  0x3a   : > { %7689 = vmatprep.subr.bf16.mxu0 %v26258_v2 }
  0x3b   : > { %v844_v49 = vsel %vm19609_vm2, %v839_v35, %v843_v36  ;;  %v18832_v35 = vld [vmem:[%s26250_s2 + $0xa8] sm:$0xff]   ;;  %v944_v36 = vshrl.u32 %v668_v28, 16 }
  0x3c   : > { %v15837_v61 = vcombine.low %v844_v49, %v858_v50  ;;  %v18835_v49 = vld [vmem:[%s26250_s2 + $0xb0] sm:$0xff]   ;;  %v671_v50 = vld [vmem:[%s19590_s24 + $0x7c] sm:$0x1]  ;;  %v18824_v28 = vld [vmem:[%s19590_s24 + $0x60] ss:$8 sps:$4 sm:$0xff]  }
  0x3d   : > { %7690 = vmatpush1.bf16.msra.mxu0 %v18811_v39  ;;  %v866_v39 = vor.u32 %v865_v27, %v862_v26  ;;  %v667_v26 = vld [vmem:[%s19590_s24 + $0x6c] sm:$0x1]  ;;  %v925_v27 = vshll.u32 %v665_v20, 16  ;;  %v967_v60 = vshll.u32 %v671_v50, 16 }
  0x3e   : > { %7691 = vmatprep.subr.bf16.mxu0 %v26258_v2  ;;  %v939_v34 = vshll.u32 %v667_v26, 16 }
  0x3f   : > { %v867_v51 = vrot.slane %v866_v39, 4  ;;  %v961_v39 = vshll.u32 %v670_v29, 16 }
  0x41   : > { %7692 = vmatpush1.bf16.msra.mxu0 %v18812_v44  ;;  %v891_v44 = vshll.u32 %v660_v33, 16  ;;  %v872_v4 = vsel %vm19609_vm2, %v867_v51, %v871_v52  ;;  %v946_v51 = vrot.slane %v944_v36, 4  ;;  %v949_v52 = vrot.slane %v947_v37, 5  ;;  %v679_v36 = vld [vmem:[%s19590_s24 + $0xac] sm:$0x1] }
  0x42   : > { %7693 = vmatprep.subr.bf16.mxu0 %v26258_v2 }
  0x43   : > { %v893_v58 = vrot.slane %v891_v44, 5  ;;  %v950_v1 = vor.u32 %v949_v52, %v946_v51 }
  0x45   : > { %7694 = vmatpush1.bf16.msra.mxu0 %v18813_v53  ;;  %v881_v53 = vrot.slane %v880_v41, 4  ;;  %v894_v6 = vor.u32 %v893_v58, %v890_v57  ;;  %v927_v41 = vrot.slane %v925_v27, 5  ;;  %v986_v57 = vshrl.u32 %v674_v43, 16  ;;  %v18844_v27 = vld [vmem:[%s26250_s2 + $0xc8] sm:$0xff]  }
  0x46   : > { %7695 = vmatprep.subr.bf16.mxu0 %v26258_v2  ;;  %v989_v58 = vshll.u32 %v674_v43, 16  ;;  %v680_v43 = vld [vmem:[%s19590_s24 + $0xb0] sm:$0xf] }
  0x47   : > { %v886_v5 = vsel %vm19609_vm2, %v881_v53, %v885_v54  ;;  %v895_v18 = vrot.slane %v894_v6, 4  ;;  %v960_v53 = vrot.slane %v958_v38, 4  ;;  %v963_v54 = vrot.slane %v961_v39, 5 }
  0x48   : > { %v15838_v17 = vcombine.low %v872_v4, %v886_v5  ;;  %v673_v4 = vld [vmem:[%s19590_s24 + $0x84] sm:$0x1]  ;;  %v974_v5 = vrot.slane %v972_v55, 4  ;;  %v977_v6 = vrot.slane %v975_v56, 5  ;;  %v1028_v51 = vshrl.u32 %v680_v43, 16 }
  0x49   : > { %7696 = vmatpush1.bf16.msra.mxu0 %v18814_v62  ;;  %v18823_v62 = vld [vmem:[%s26250_s2 + $0x90] sm:$0xff]   ;;  %v900_v30 = vsel %vm19609_vm2, %v895_v18, %v899_v14  ;;  %v964_v3 = vor.u32 %v963_v54, %v960_v53  ;;  %v951_v14 = vrot.slane %v950_v1, 4  ;;  %v1031_v52 = vshll.u32 %v680_v43, 16 }
  0x4a   : > { %7697 = vmatprep.subr.bf16.mxu0 %v26258_v2  ;;  %v978_v18 = vor.u32 %v977_v6, %v974_v5  ;;  %v18825_v55 = vld [vmem:[%s19590_s24 + $0x70] ss:$8 sps:$4 sm:$0xff]   ;;  %v684_v6 = vld [vmem:[%s19590_s24 + $0xc0] sm:$0xf] }
  0x4d   : > { %7698 = vmatpush1.bf16.msra.mxu0 %v18815_v16  ;;  %v18829_v16 = vld [vmem:[%s26250_s2 + $0xa0] sm:$0xff]  }
  0x4e   : > { %7956 = vmatprep.subr.bf16.mxu0 %v26258_v2 }
  0x50   : > { %7700 = vmatmul.mubr.bf16.vlgmr.msra.gmra.mrb[0].mxu0 %v18816_v19  ;;  %v909_v19 = vrot.slane %v908_v7, 4  ;;  %v988_v7 = vrot.slane %v986_v57, 4 }
  0x51   : > { %7957 = vmatpush1.bf16.msra.mxu0 %v18817_v24  ;;  %7707 = vmatprep.mubr.bf16.mxu0 %v15836_v32  ;;  %v935_v24 = vrot.slane %v933_v12, 5  ;;  %v922_v32 = vor.u32 %v921_v22, %v918_v21  ;;  %v678_v12 = vld [vmem:[%s19590_s24 + $0xa8] sm:$0xf]  ;;  %v995_v21 = vshll.u32 %v675_v9, 16  ;;  %v1000_v22 = vshrl.u32 %v676_v10, 16 }
  0x52   : > { %7958 = vmatprep.subr.bf16.mxu0 %v26258_v2  ;;  %v914_v31 = vsel %vm19609_vm2, %v909_v19, %v913_v15  ;;  %v981_v19 = vshll.u32 %v673_v4, 16  ;;  %v1017_v26 = vshll.u32 %v678_v12, 16 }
  0x53   : > { %v936_v33 = vor.u32 %v935_v24, %v932_v23  ;;  %v15839_v44 = vcombine.low %v900_v30, %v914_v31  ;;  %v923_v45 = vrot.slane %v922_v32, 4  ;;  %v1003_v23 = vshll.u32 %v676_v10, 16 }
  0x54   : > { %v1014_v24 = vshrl.u32 %v678_v12, 16  ;;  %v979_v31 = vrot.slane %v978_v18, 4  ;;  %v983_v32 = vrot.slane %v981_v19, 5  ;;  %v1002_v37 = vrot.slane %v1000_v22, 4  ;;  %v18850_v19 = vld [vmem:[%s26250_s2 + $0xd8] sm:$0xff]  }
  0x55   : > { %7959 = vmatpush1.bf16.msra.mxu0 %v18820_v47  ;;  %v937_v46 = vrot.slane %v936_v33, 4  ;;  %v941_v47 = vrot.slane %v939_v34, 5  ;;  %v928_v63 = vsel %vm19609_vm2, %v923_v45, %v927_v41  ;;  %v997_v34 = vrot.slane %v995_v21, 5 }
  0x56   : > { %7960 = vmatprep.subr.bf16.mxu0 %v26258_v2  ;;  %v1005_v38 = vrot.slane %v1003_v23, 5  ;;  %v1016_v39 = vrot.slane %v1014_v24, 4  ;;  %v1056_v12 = vshrl.u32 %v684_v6, 16  ;;  %v687_v24 = vld [vmem:[%s19590_s24 + $0xcc] sm:$0x1] }
  0x57   : > { %v942_v0 = vsel %vm19609_vm2, %v937_v46, %v941_v47  ;;  %v1023_v46 = vshll.u32 %v679_v36, 16  ;;  %v984_v47 = vsel %vm19609_vm2, %v979_v31, %v983_v32  ;;  %v690_v31 = vld [vmem:[%s19590_s24 + $0xd8] sm:$0xf] }
  0x58   : > { %7708 = vmatmul.mubr.bf16.gmra.mrb[4].mxu0 %v18818_v48  ;;  %v669_v48 = vld [vmem:[%s19590_s24 + $0x74] sm:$0x1]  ;;  %v15840_v11 = vcombine.low %v928_v63, %v942_v0  ;;  %v1030_v63 = vrot.slane %v1028_v51, 4  ;;  %v1033_v0 = vrot.slane %v1031_v52, 5  ;;  %v1098_v36 = vshrl.u32 %v690_v31, 16 }
  0x59   : > { %7715 = vmatprep.mubr.bf16.mxu0 %v15837_v61  ;;  %7961 = vmatpush1.bf16.msra.mxu0 %v18823_v62  ;;  %v953_v59 = vshll.u32 %v669_v48, 16  ;;  %v18838_v61 = vld [vmem:[%s26250_s2 + $0xb8] sm:$0xff]   ;;  %v1025_v57 = vrot.slane %v1023_v46, 5 }
  0x5a   : > { %7962 = vmatprep.subr.bf16.mxu0 %v26258_v2  ;;  %v18822_v62 = vld [vmem:[%s19590_s24 + $0x50] ss:$8 sps:$4 sm:$0xff]   ;;  %v1034_v10 = vor.u32 %v1033_v0, %v1030_v63 }
  0x5b   : > { %v955_v15 = vrot.slane %v953_v59, 5  ;;  %v694_v51 = vld [vmem:[%s19590_s24 + $0xf8] sm:$0xf] }
  0x5c   : > { %v1035_v22 = vrot.slane %v1034_v10, 4  ;;  %v18830_v0 = vld [vmem:[%s19590_s24 + $0xb0] ss:$8 sps:$4 sm:$0xff]  }
  0x5d   : > { %7963 = vmatpush1.bf16.msra.mxu0 %v18826_v8  ;;  %v991_v8 = vrot.slane %v989_v58, 5  ;;  %v956_v29 = vsel %vm19609_vm2, %v951_v14, %v955_v15  ;;  %v681_v58 = vld [vmem:[%s19590_s24 + $0xb4] sm:$0x1] }
  0x5e   : > { %7964 = vmatprep.subr.bf16.mxu0 %v26258_v2  ;;  %v1037_v4 = vshll.u32 %v681_v58, 16 }
  0x5f   : > { %v992_v20 = vor.u32 %v991_v8, %v988_v7  ;;  %v686_v7 = vld [vmem:[%s19590_s24 + $0xc8] sm:$0xf] }
  0x60   : > { %7716 = vmatmul.mubr.bf16.gmra.mrb[8].mxu0 %v18819_v13  ;;  %v18841_v13 = vld [vmem:[%s26250_s2 + $0xc0] sm:$0xff]   ;;  %v1070_v14 = vshrl.u32 %v686_v7, 16  ;;  %v1073_v15 = vshll.u32 %v686_v7, 16 }
  0x61   : > { %7723 = vmatprep.mubr.bf16.mxu0 %v15838_v17  ;;  %7965 = vmatpush1.bf16.msra.mxu0 %v18829_v16  ;;  %v965_v16 = vrot.slane %v964_v3, 4  ;;  %v969_v17 = vrot.slane %v967_v60, 5  ;;  %v993_v33 = vrot.slane %v992_v20, 4  ;;  %v685_v20 = vld [vmem:[%s19590_s24 + $0xc4] sm:$0x1] }
  0x62   : > { %7966 = vmatprep.subr.bf16.mxu0 %v26258_v2  ;;  %v1065_v32 = vshll.u32 %v685_v20, 16 }
  0x63   : > { %v970_v30 = vsel %vm19609_vm2, %v965_v16, %v969_v17  ;;  %v998_v48 = vsel %vm19609_vm2, %v993_v33, %v997_v34  ;;  %v18827_v16 = vld [vmem:[%s19590_s24 + $0x80] ss:$8 sps:$4 sm:$0xff]   ;;  %v1039_v17 = vrot.slane %v1037_v4, 5 }
  0x64   : > { %v15841_v41 = vcombine.low %v956_v29, %v970_v30  ;;  %v15842_v59 = vcombine.low %v984_v47, %v998_v48  ;;  %v1072_v29 = vrot.slane %v1070_v14, 4  ;;  %v1075_v30 = vrot.slane %v1073_v15, 5  ;;  %v692_v47 = vld [vmem:[%s19590_s24 + $0xf0] sm:$0xf] }
  0x65   : > { %7967 = vmatpush1.bf16.msra.mxu0 %v18832_v35  ;;  %v677_v35 = vld [vmem:[%s19590_s24 + $0xa4] sm:$0x1]  ;;  %v1067_v43 = vrot.slane %v1065_v32, 5  ;;  %v1115_v58 = vshll.u32 %v692_v47, 16  ;;  %v700_v32 = vld [vmem:[%s19590_s24 + $0x110] sm:$0xf] }
  0x66   : > { %7968 = vmatprep.subr.bf16.mxu0 %v26258_v2  ;;  %v1009_v45 = vshll.u32 %v677_v35, 16  ;;  %v1079_v35 = vshll.u32 %v687_v24, 16 }
  0x67   : > { %v1117_v7 = vrot.slane %v1115_v58, 5  ;;  %v18833_v58 = vld [vmem:[%s19590_s24 + $0xd0] ss:$8 sps:$4 sm:$0xff]  }
  0x68   : > { %7724 = vmatmul.mubr.bf16.gmra.mrb[12].mxu0 %v18821_v40  ;;  %v1019_v40 = vrot.slane %v1017_v26, 5  ;;  %v1011_v56 = vrot.slane %v1009_v45, 5  ;;  %v688_v26 = vld [vmem:[%s19590_s24 + $0xd0] sm:$0xf] }
  0x69   : > { %7731 = vmatprep.mubr.bf16.mxu0 %v15839_v44  ;;  %7969 = vmatpush1.bf16.msra.mxu0 %v18835_v49  ;;  %v682_v44 = vld [vmem:[%s19590_s24 + $0xb8] sm:$0xf]  ;;  %v1006_v49 = vor.u32 %v1005_v38, %v1002_v37  ;;  %v1084_v33 = vshrl.u32 %v688_v26, 16  ;;  %v1087_v34 = vshll.u32 %v688_v26, 16  ;;  %v1101_v37 = vshll.u32 %v690_v31, 16 }
  0x6a   : > { %7970 = vmatprep.subr.bf16.mxu0 %v26258_v2  ;;  %v1020_v50 = vor.u32 %v1019_v40, %v1016_v39  ;;  %v1042_v53 = vshrl.u32 %v682_v44, 16  ;;  %v1045_v54 = vshll.u32 %v682_v44, 16  ;;  %v1040_v38 = vsel %vm19609_vm2, %v1035_v22, %v1039_v17  ;;  %v689_v44 = vld [vmem:[%s19590_s24 + $0xd4] sm:$0x1] }
  0x6b   : > { %v1007_v60 = vrot.slane %v1006_v49, 4  ;;  %v1086_v45 = vrot.slane %v1084_v33, 4  ;;  %v1089_v46 = vrot.slane %v1087_v34, 5  ;;  %v1100_v49 = vrot.slane %v1098_v36, 4 }
  0x6c   : > { %v1044_v1 = vrot.slane %v1042_v53, 4  ;;  %v1047_v3 = vrot.slane %v1045_v54, 5  ;;  %v1081_v54 = vrot.slane %v1079_v35, 5  ;;  %v699_v35 = vld [vmem:[%s19590_s24 + $0x10c] sm:$0x1] }
  0x6d   : > { %7971 = vmatpush1.bf16.msra.mxu0 %v18838_v61  ;;  %v1021_v61 = vrot.slane %v1020_v50, 4  ;;  %v1012_v8 = vsel %vm19609_vm2, %v1007_v60, %v1011_v56  ;;  %v1103_v50 = vrot.slane %v1101_v37, 5  ;;  %v1093_v56 = vshll.u32 %v689_v44, 16 }
  0x6e   : > { %7972 = vmatprep.subr.bf16.mxu0 %v26258_v2  ;;  %v1129_v60 = vshll.u32 %v694_v51, 16  ;;  %v1168_v44 = vshrl.u32 %v700_v32, 16 }
  0x6f   : > { %v1026_v9 = vsel %vm19609_vm2, %v1021_v61, %v1025_v57  ;;  %v1112_v57 = vshrl.u32 %v692_v47, 16  ;;  %v1090_v61 = vor.u32 %v1089_v46, %v1086_v45  ;;  %v1095_v4 = vrot.slane %v1093_v56, 5 }
  0x70   : > { %7732 = vmatmul.mubr.bf16.gmra.mrb[16].mxu0 %v18822_v62  ;;  %v683_v62 = vld [vmem:[%s19590_s24 + $0xbc] sm:$0x1]  ;;  %v15843_v21 = vcombine.low %v1012_v8, %v1026_v9  ;;  %v18853_v8 = vld [vmem:[%s26250_s2 + $0xe0] sm:$0xff]   ;;  %v1171_v45 = vshll.u32 %v700_v32, 16  ;;  %v1163_v46 = vshll.u32 %v699_v35, 16  ;;  %v1170_v56 = vrot.slane %v1168_v44, 4 }
  0x71   : > { %7739 = vmatprep.mubr.bf16.mxu0 %v15840_v11  ;;  %7973 = vmatpush1.bf16.msra.mxu0 %v18841_v13  ;;  %v1051_v5 = vshll.u32 %v683_v62, 16  ;;  %v1048_v11 = vor.u32 %v1047_v3, %v1044_v1  ;;  %v1059_v13 = vshll.u32 %v684_v6, 16  ;;  %v1104_v62 = vor.u32 %v1103_v50, %v1100_v49  ;;  %v695_v9 = vld [vmem:[%s19590_s24 + $0xfc] sm:$0x1] }
  0x72   : > { %7974 = vmatprep.subr.bf16.mxu0 %v26258_v2  ;;  %v1114_v6 = vrot.slane %v1112_v57, 4  ;;  %v1091_v14 = vrot.slane %v1090_v61, 4  ;;  %v1135_v20 = vshll.u32 %v695_v9, 16  ;;  %v703_v49 = vld [vmem:[%s19590_s24 + $0x11c] sm:$0x1]  ;;  %v1173_v57 = vrot.slane %v1171_v45, 5 }
  0x73   : > { %v1053_v18 = vrot.slane %v1051_v5, 5  ;;  %v1049_v23 = vrot.slane %v1048_v11, 4  ;;  %v693_v5 = vld [vmem:[%s19590_s24 + $0xf4] sm:$0x1]  ;;  %v1131_v11 = vrot.slane %v1129_v60, 5  ;;  %v1105_v15 = vrot.slane %v1104_v62, 4 }
  0x74   : > { %v1121_v17 = vshll.u32 %v693_v5, 16  ;;  %v1096_v24 = vsel %vm19609_vm2, %v1091_v14, %v1095_v4  ;;  %v1137_v34 = vrot.slane %v1135_v20, 5  ;;  %v1191_v60 = vshll.u32 %v703_v49, 16  ;;  %v704_v61 = vld [vmem:[%s19590_s24 + $0x120] sm:$0xf] }
  0x75   : > { %7975 = vmatpush1.bf16.msra.mxu0 %v18844_v27  ;;  %v1058_v27 = vrot.slane %v1056_v12, 4  ;;  %v1054_v39 = vsel %vm19609_vm2, %v1049_v23, %v1053_v18  ;;  %v696_v12 = vld [vmem:[%s19590_s24 + $0x100] sm:$0xf]  ;;  %v698_v18 = vld [vmem:[%s19590_s24 + $0x108] sm:$0xf]  ;;  %v1199_v9 = vshll.u32 %v704_v61, 16 }
  0x76   : > { %7976 = vmatprep.subr.bf16.mxu0 %v26258_v2  ;;  %v15844_v48 = vcombine.low %v1040_v38, %v1054_v39  ;;  %v1143_v22 = vshll.u32 %v696_v12, 16  ;;  %v1123_v31 = vrot.slane %v1121_v17, 5  ;;  %v706_v5 = vld [vmem:[%s19590_s24 + $0x128] sm:$0xf] }
  0x77   : > { %v1210_v14 = vshrl.u32 %v706_v5, 16 }
  0x78   : > { %7740 = vmatmul.mubr.bf16.gmra.mrb[20].mxu0 %v18824_v28  ;;  %v1061_v28 = vrot.slane %v1059_v13, 5  ;;  %v1145_v37 = vrot.slane %v1143_v22, 5 }
  0x79   : > { %7747 = vmatprep.mubr.bf16.mxu0 %v15841_v41  ;;  %7977 = vmatpush1.bf16.msra.mxu0 %v18847_v42  ;;  %v1076_v41 = vor.u32 %v1075_v30, %v1072_v29  ;;  %v18828_v42 = vld [vmem:[%s19590_s24 + $0xa0] ss:$8 sps:$4 sm:$0xff]   ;;  %v1157_v29 = vshll.u32 %v698_v18, 16 }
  0x7a   : > { %7978 = vmatprep.subr.bf16.mxu0 %v26258_v2  ;;  %v1062_v40 = vor.u32 %v1061_v28, %v1058_v27  ;;  %v697_v27 = vld [vmem:[%s19590_s24 + $0x104] sm:$0x1]  ;;  %v1154_v28 = vshrl.u32 %v698_v18, 16  ;;  %v18831_v30 = vld [vmem:[%s19590_s24 + $0xc0] ss:$8 sps:$4 sm:$0xff]  }
  0x7b   : > { %v1077_v53 = vrot.slane %v1076_v41, 4  ;;  %v702_v41 = vld [vmem:[%s19590_s24 + $0x118] sm:$0xf]  ;;  %v705_v18 = vld [vmem:[%s19590_s24 + $0x124] sm:$0x1] }
  0x7c   : > { %v1063_v52 = vrot.slane %v1062_v40, 4  ;;  %v1149_v40 = vshll.u32 %v697_v27, 16  ;;  %v1182_v50 = vshrl.u32 %v702_v41, 16  ;;  %v18834_v27 = vld [vmem:[%s19590_s24 + $0xf0] ss:$8 sps:$4 sm:$0xff]  }
  0x7d   : > { %7979 = vmatpush1.bf16.msra.mxu0 %v18850_v19  ;;  %v1082_v3 = vsel %vm19609_vm2, %v1077_v53, %v1081_v54  ;;  %v1118_v19 = vor.u32 %v1117_v7, %v1114_v6  ;;  %v1174_v7 = vor.u32 %v1173_v57, %v1170_v56  ;;  %v715_v56 = vld [vmem:[%s19590_s24 + $0x15c] sm:$0x1]  ;;  %v716_v57 = vld [vmem:[%s19590_s24 + $0x160] sm:$0xf] }
  0x7e   : > { %7980 = vmatprep.subr.bf16.mxu0 %v26258_v2  ;;  %v1068_v1 = vsel %vm19609_vm2, %v1063_v52, %v1067_v43  ;;  %v1159_v43 = vrot.slane %v1157_v29, 5  ;;  %v1151_v53 = vrot.slane %v1149_v40, 5 }
  0x7f   : > { %v15845_v13 = vcombine.low %v1068_v1, %v1082_v3  ;;  %v1119_v33 = vrot.slane %v1118_v19, 4  ;;  %v18856_v3 = vld [vmem:[%s26250_s2 + $0xe8] sm:$0xff]   ;;  %v1175_v22 = vrot.slane %v1174_v7, 4  ;;  %v18859_v7 = vld [vmem:[%s26250_s2 + $0xf0] sm:$0xff]  }
  0x80   : > { %7748 = vmatmul.mubr.bf16.gmra.mrb[24].mxu0 %v18825_v55  ;;  %v691_v55 = vld [vmem:[%s19590_s24 + $0xdc] sm:$0x1] }
  0x81   : > { %7755 = vmatprep.mubr.bf16.mxu0 %v15842_v59  ;;  %v1126_v59 = vshrl.u32 %v694_v51, 16  ;;  %v1107_v63 = vshll.u32 %v691_v55, 16  ;;  %7981 = vmatpush1.bf16.msra.mxu0 %v18853_v8  ;;  %v1185_v51 = vshll.u32 %v702_v41, 16  ;;  %v1124_v52 = vsel %vm19609_vm2, %v1119_v33, %v1123_v31  ;;  %v714_v31 = vld [vmem:[%s19590_s24 + $0x158] sm:$0xf] }
  0x82   : > { %7982 = vmatprep.subr.bf16.mxu0 %v26258_v2  ;;  %v1196_v8 = vshrl.u32 %v704_v61, 16  ;;  %v1205_v33 = vshll.u32 %v705_v18, 16  ;;  %v1269_v44 = vshll.u32 %v714_v31, 16 }
  0x83   : > { %v1128_v10 = vrot.slane %v1126_v59, 4  ;;  %v1187_v1 = vrot.slane %v1185_v51, 5 }
  0x84   : > { %v1271_v61 = vrot.slane %v1269_v44, 5  ;;  %v726_v44 = vld [vmem:[%s19590_s24 + $0x198] sm:$0xf] }
  0x85   : > { %v1132_v23 = vor.u32 %v1131_v11, %v1128_v10  ;;  %v708_v10 = vld [vmem:[%s19590_s24 + $0x140] sm:$0xf]  ;;  %7983 = vmatpush1.bf16.msra.mxu0 %v18856_v3 }
  0x86   : > { %7984 = vmatprep.subr.bf16.mxu0 %v26258_v2  ;;  %v1224_v19 = vshrl.u32 %v708_v10, 16  ;;  %v1227_v20 = vshll.u32 %v708_v10, 16 }
  0x87   : > { %v1133_v39 = vrot.slane %v1132_v23, 4  ;;  %v707_v23 = vld [vmem:[%s19590_s24 + $0x12c] sm:$0x1] }
  0x88   : > { %7756 = vmatmul.mubr.bf16.gmra.mrb[28].mxu0 %v18827_v16  ;;  %v1109_v16 = vrot.slane %v1107_v63, 5  ;;  %v1165_v63 = vrot.slane %v1163_v46, 5  ;;  %v1229_v40 = vrot.slane %v1227_v20, 5  ;;  %v1219_v46 = vshll.u32 %v707_v23, 16 }
  0x89   : > { %7763 = vmatprep.mubr.bf16.mxu0 %v15843_v21  ;;  %v1140_v21 = vshrl.u32 %v696_v12, 16  ;;  %v1138_v54 = vsel %vm19609_vm2, %v1133_v39, %v1137_v34  ;;  %v19830_v12 = vrot.slane %v1191_v60, 5  ;;  %v1212_v34 = vrot.slane %v1210_v14, 4  ;;  %7985 = vmatpush1.bf16.msra.mxu0 %v18859_v7  ;;  %v727_v7 = vld [vmem:[%s19590_s24 + $0x19c] sm:$0x1] }
  0x8a   : > { %v1110_v26 = vsel %vm19609_vm2, %v1105_v15, %v1109_v16  ;;  %v15847_v4 = vcombine.low %v1124_v52, %v1138_v54  ;;  %v1213_v15 = vshll.u32 %v706_v5, 16  ;;  %v710_v16 = vld [vmem:[%s19590_s24 + $0x148] sm:$0xf]  ;;  %v1226_v39 = vrot.slane %v1224_v19, 4  ;;  %v717_v19 = vld [vmem:[%s19590_s24 + $0x164] sm:$0x1]  ;;  %7986 = vmatprep.subr.bf16.mxu0 %v26258_v2 }
  0x8b   : > { %v1142_v36 = vrot.slane %v1140_v21, 4  ;;  %v15846_v38 = vcombine.low %v1096_v24, %v1110_v26  ;;  %v1198_v24 = vrot.slane %v1196_v8, 4  ;;  %v1201_v26 = vrot.slane %v1199_v9, 5  ;;  %v18836_v8 = vld [vmem:[%s19590_s24 + $0x100] ss:$8 sps:$4 sm:$0xff]  }
  0x8c   : > { %v1241_v29 = vshll.u32 %v710_v16, 16  ;;  %v1215_v35 = vrot.slane %v1213_v15, 5  ;;  %v1230_v54 = vor.u32 %v1229_v40, %v1226_v39  ;;  %v1280_v5 = vshrl.u32 %v716_v57, 16  ;;  %v724_v39 = vld [vmem:[%s19590_s24 + $0x190] sm:$0xf] }
  0x8d   : > { %v1146_v47 = vor.u32 %v1145_v37, %v1142_v36  ;;  %v709_v36 = vld [vmem:[%s19590_s24 + $0x144] sm:$0x1]  ;;  %v1202_v45 = vor.u32 %v1201_v26, %v1198_v24  ;;  %v722_v26 = vld [vmem:[%s19590_s24 + $0x178] sm:$0xf] }
  0x8e   : > { %v1216_v49 = vor.u32 %v1215_v35, %v1212_v34  ;;  %v1282_v23 = vrot.slane %v1280_v5, 4  ;;  %v1289_v34 = vshll.u32 %v717_v19, 16  ;;  %v18862_v19 = vld [vmem:[%s26250_s2 + $0xf8] sm:$0xff]  }
  0x8f   : > { %v1147_v62 = vrot.slane %v1146_v47, 4  ;;  %7987 = vmatpush1.bf16.msra.mxu0 %v18862_v19 }
  0x90   : > { %7764 = vmatmul.mubr.bf16.gmra.mrb[32].mxu0 %v18828_v42  ;;  %v1156_v42 = vrot.slane %v1154_v28, 4  ;;  %v1238_v28 = vshrl.u32 %v710_v16, 16  ;;  %v1217_v3 = vrot.slane %v1216_v49, 4  ;;  %8245 = vmatprep.subr.bf16.mxu0 %v26258_v2 }
  0x91   : > { %7771 = vmatprep.mubr.bf16.mxu0 %v15844_v48  ;;  %v701_v48 = vld [vmem:[%s19590_s24 + $0x114] sm:$0x1]  ;;  %v1152_v17 = vsel %vm19609_vm2, %v1147_v62, %v1151_v53  ;;  %v1203_v62 = vrot.slane %v1202_v45, 4 }
  0x92   : > { %v1160_v55 = vor.u32 %v1159_v43, %v1156_v42  ;;  %v1177_v59 = vshll.u32 %v701_v48, 16  ;;  %v1266_v43 = vshrl.u32 %v714_v31, 16  ;;  %v1240_v47 = vrot.slane %v1238_v28, 4 }
  0x93   : > { %v1243_v48 = vrot.slane %v1241_v29, 5  ;;  %v719_v29 = vld [vmem:[%s19590_s24 + $0x16c] sm:$0x1] }
  0x94   : > { %v1161_v6 = vrot.slane %v1160_v55, 4  ;;  %v19828_v11 = vrot.slane %v1177_v59, 5  ;;  %v713_v55 = vld [vmem:[%s19590_s24 + $0x154] sm:$0x1]  ;;  %v1268_v60 = vrot.slane %v1266_v43, 4 }
  0x95   : > { %v721_v43 = vld [vmem:[%s19590_s24 + $0x174] sm:$0x1] }
  0x96   : > { %v1166_v21 = vsel %vm19609_vm2, %v1161_v6, %v1165_v63  ;;  %v1180_v52 = vsel %vm19609_vm2, %v1175_v22, %v19828_v11  ;;  %v1207_v63 = vrot.slane %v1205_v33, 5  ;;  %v1283_v6 = vshll.u32 %v716_v57, 16 }
  0x97   : > { %v15848_v37 = vcombine.low %v1152_v17, %v1166_v21  ;;  %v1261_v11 = vshll.u32 %v713_v55, 16  ;;  %v1272_v16 = vor.u32 %v1271_v61, %v1268_v60  ;;  %v720_v17 = vld [vmem:[%s19590_s24 + $0x170] sm:$0xf]  ;;  %v1339_v57 = vshll.u32 %v724_v39, 16 }
  0x98   : > { %7772 = vmatmul.mubr.bf16.gmra.mrb[36].mxu0 %v18830_v0  ;;  %v1184_v0 = vrot.slane %v1182_v50, 4  ;;  %v1233_v50 = vshll.u32 %v709_v36, 16  ;;  %v1208_v21 = vsel %vm19609_vm2, %v1203_v62, %v1207_v63  ;;  %v1285_v24 = vrot.slane %v1283_v6, 5  ;;  %v18837_v36 = vld [vmem:[%s19590_s24 + $0x110] ss:$8 sps:$4 sm:$0xff]  }
  0x99   : > { %7779 = vmatprep.mubr.bf16.mxu0 %v15845_v13  ;;  %v1308_v31 = vshrl.u32 %v720_v17, 16  ;;  %v19882_v33 = vrot.slane %v1272_v16, 4  ;;  %v1311_v35 = vshll.u32 %v720_v17, 16  ;;  %v19901_v60 = vrot.slane %v1289_v34, 5 }
  0x9a   : > { %v1188_v13 = vor.u32 %v1187_v1, %v1184_v0  ;;  %v1221_v0 = vrot.slane %v1219_v46, 5  ;;  %v1244_v1 = vor.u32 %v1243_v48, %v1240_v47  ;;  %v19859_v10 = vrot.slane %v1233_v50, 5  ;;  %v723_v47 = vld [vmem:[%s19590_s24 + $0x17c] sm:$0x1] }
  0x9b   : > { %v1286_v40 = vor.u32 %v1285_v24, %v1282_v23  ;;  %v1310_v48 = vrot.slane %v1308_v31, 4  ;;  %v1353_v62 = vshll.u32 %v726_v44, 16  ;;  %v1317_v63 = vshll.u32 %v721_v43, 16 }
  0x9c   : > { %v1189_v32 = vrot.slane %v1188_v13, 4  ;;  %v19861_v13 = vrot.slane %v1230_v54, 4  ;;  %v19866_v18 = vrot.slane %v1244_v1, 4  ;;  %v1222_v22 = vsel %vm19609_vm2, %v1217_v3, %v1221_v0  ;;  %v730_v1 = vld [vmem:[%s19590_s24 + $0x1a8] sm:$0xf] }
  0x9d   : > { %v15850_v45 = vcombine.low %v1208_v21, %v1222_v22  ;;  %v1331_v0 = vshll.u32 %v723_v47, 16  ;;  %v1378_v16 = vshrl.u32 %v730_v1, 16  ;;  %v1381_v17 = vshll.u32 %v730_v1, 16  ;;  %v735_v47 = vld [vmem:[%s19590_s24 + $0x1bc] sm:$0x1] }
  0x9e   : > { %v1194_v53 = vsel %vm19609_vm2, %v1189_v32, %v19830_v12  ;;  %v1275_v12 = vshll.u32 %v715_v56, 16  ;;  %v1236_v49 = vsel %vm19609_vm2, %v19861_v13, %v19859_v10  ;;  %v725_v56 = vld [vmem:[%s19590_s24 + $0x194] sm:$0x1]  ;;  %v18839_v10 = vld [vmem:[%s19590_s24 + $0x120] ss:$8 sps:$4 sm:$0xff]   ;;  %v1359_v34 = vshll.u32 %v727_v7, 16 }
  0x9f   : > { %v15849_v9 = vcombine.low %v1180_v52, %v1194_v53  ;;  %v1336_v52 = vshrl.u32 %v724_v39, 16  ;;  %v728_v53 = vld [vmem:[%s19590_s24 + $0x1a0] sm:$0xf]  ;;  %v1383_v43 = vrot.slane %v1381_v17, 5  ;;  %v739_v17 = vld [vmem:[%s19590_s24 + $0x1cc] sm:$0x1] }
  0xa0   : > { %7780 = vmatmul.mubr.bf16.gmra.mrb[40].mxu0 %v18831_v30  ;;  %v712_v30 = vld [vmem:[%s19590_s24 + $0x150] sm:$0xf]  ;;  %v19877_v28 = vrot.slane %v1275_v12, 5  ;;  %v1364_v3 = vshrl.u32 %v728_v53, 16  ;;  %v1341_v12 = vrot.slane %v1339_v57, 5 }
  0xa1   : > { %7787 = vmatprep.mubr.bf16.mxu0 %v15846_v38  ;;  %v711_v38 = vld [vmem:[%s19590_s24 + $0x14c] sm:$0x1]  ;;  %v1252_v41 = vshrl.u32 %v712_v30, 16  ;;  %v1255_v42 = vshll.u32 %v712_v30, 16 }
  0xa2   : > { %v1247_v51 = vshll.u32 %v711_v38, 16  ;;  %v1325_v38 = vshll.u32 %v722_v26, 16  ;;  %v1366_v21 = vrot.slane %v1364_v3, 4  ;;  %v737_v3 = vld [vmem:[%s19590_s24 + $0x1c4] sm:$0x1] }
  0xa3   : > { %v1257_v59 = vrot.slane %v1255_v42, 5  ;;  %v1303_v42 = vshll.u32 %v719_v29, 16  ;;  %v19917_v29 = vrot.slane %v1331_v0, 5  ;;  %v736_v0 = vld [vmem:[%s19590_s24 + $0x1c0] sm:$0xf] }
  0xa4   : > { %v19863_v14 = vrot.slane %v1247_v51, 5  ;;  %v1313_v51 = vrot.slane %v1311_v35, 5  ;;  %v1327_v55 = vrot.slane %v1325_v38, 5 }
  0xa5   : > { %v19903_v61 = vrot.slane %v1303_v42, 5  ;;  %v1380_v42 = vrot.slane %v1378_v16, 4 }
  0xa6   : > { %v1250_v50 = vsel %vm19609_vm2, %v19866_v18, %v19863_v14  ;;  %v1314_v6 = vor.u32 %v1313_v51, %v1310_v48  ;;  %v729_v14 = vld [vmem:[%s19590_s24 + $0x1a4] sm:$0x1]  ;;  %v732_v18 = vld [vmem:[%s19590_s24 + $0x1b0] sm:$0xf] }
  0xa7   : > { %v1392_v35 = vshrl.u32 %v732_v18, 16 }
  0xa8   : > { %7788 = vmatmul.mubr.bf16.gmra.mrb[44].mxu0 %v18833_v58  ;;  %v1254_v58 = vrot.slane %v1252_v41, 4  ;;  %v19913_v24 = vrot.slane %v1314_v6, 4  ;;  %v738_v6 = vld [vmem:[%s19590_s24 + $0x1c8] sm:$0xf] }
  0xa9   : > { %7795 = vmatprep.mubr.bf16.mxu0 %v15847_v4  ;;  %v718_v4 = vld [vmem:[%s19590_s24 + $0x168] sm:$0xf] }
  0xaa   : > { %v1258_v15 = vor.u32 %v1257_v59, %v1254_v58  ;;  %v1294_v20 = vshrl.u32 %v718_v4, 16  ;;  %v1297_v30 = vshll.u32 %v718_v4, 16  ;;  %v1350_v58 = vshrl.u32 %v726_v44, 16 }
  0xab   : > { %v19899_v59 = vrot.slane %v1286_v40, 4  ;;  %v1367_v4 = vshll.u32 %v728_v53, 16  ;;  %v1373_v40 = vshll.u32 %v729_v14, 16  ;;  %v1434_v14 = vshrl.u32 %v738_v6, 16 }
  0xac   : > { %v19880_v32 = vrot.slane %v1258_v15, 4  ;;  %v1296_v41 = vrot.slane %v1294_v20, 4  ;;  %v1299_v46 = vrot.slane %v1297_v30, 5  ;;  %v1352_v13 = vrot.slane %v1350_v58, 4  ;;  %v731_v30 = vld [vmem:[%s19590_s24 + $0x1ac] sm:$0x1] }
  0xad   : > { %v1355_v15 = vrot.slane %v1353_v62, 5  ;;  %v15851_v20 = vcombine.low %v1236_v49, %v1250_v50  ;;  %v1369_v22 = vrot.slane %v1367_v4, 5  ;;  %v1387_v44 = vshll.u32 %v731_v30, 16 }
  0xae   : > { %v1300_v5 = vor.u32 %v1299_v46, %v1296_v41  ;;  %v734_v46 = vld [vmem:[%s19590_s24 + $0x1b8] sm:$0xf]  ;;  %v1278_v49 = vsel %vm19609_vm2, %v19882_v33, %v19877_v28  ;;  %v1394_v50 = vrot.slane %v1392_v35, 4  ;;  %v1384_v58 = vor.u32 %v1383_v43, %v1380_v42  ;;  %v18843_v35 = vld [vmem:[%s19590_s24 + $0x160] ss:$8 sps:$4 sm:$0xff]  }
  0xaf   : > { %v1356_v39 = vor.u32 %v1355_v15, %v1352_v13  ;;  %v1370_v41 = vor.u32 %v1369_v22, %v1366_v21  ;;  %v1406_v28 = vshrl.u32 %v734_v46, 16  ;;  %v1409_v62 = vshll.u32 %v734_v46, 16  ;;  %v742_v21 = vld [vmem:[%s19590_s24 + $0x1e8] sm:$0xf]  ;;  %v741_v43 = vld [vmem:[%s19590_s24 + $0x1e4] sm:$0x1] }
  0xb0   : > { %7796 = vmatmul.mubr.bf16.gmra.mrb[48].mxu0 %v18834_v27  ;;  %v19875_v27 = vrot.slane %v1261_v11, 5  ;;  %v1301_v23 = vrot.slane %v1300_v5, 4  ;;  %v1292_v4 = vsel %vm19609_vm2, %v19899_v59, %v19901_v60  ;;  %v19959_v7 = vrot.slane %v1384_v58, 4  ;;  %v745_v58 = vld [vmem:[%s19590_s24 + $0x1f4] sm:$0x1] }
  0xb1   : > { %7803 = vmatprep.mubr.bf16.mxu0 %v15848_v37  ;;  %v1322_v37 = vshrl.u32 %v722_v26, 16  ;;  %v19915_v26 = vrot.slane %v1317_v63, 5  ;;  %v19938_v53 = vrot.slane %v1356_v39, 4  ;;  %v1415_v63 = vshll.u32 %v735_v47, 16 }
  0xb2   : > { %v1264_v48 = vsel %vm19609_vm2, %v19880_v32, %v19875_v27  ;;  %v19945_v27 = vrot.slane %v1370_v41, 4  ;;  %v19947_v32 = vrot.slane %v1387_v44, 5  ;;  %v1306_v5 = vsel %vm19609_vm2, %v1301_v23, %v19903_v61  ;;  %v743_v44 = vld [vmem:[%s19590_s24 + $0x1ec] sm:$0x1] }
  0xb3   : > { %v1324_v54 = vrot.slane %v1322_v37, 4  ;;  %v15852_v33 = vcombine.low %v1264_v48, %v1278_v49  ;;  %v19966_v13 = vrot.slane %v1415_v63, 5  ;;  %v1420_v59 = vshrl.u32 %v736_v0, 16  ;;  %v18845_v49 = vld [vmem:[%s19590_s24 + $0x170] ss:$8 sps:$4 sm:$0xff]  }
  0xb4   : > { %v1423_v60 = vshll.u32 %v736_v0, 16  ;;  %v1429_v61 = vshll.u32 %v737_v3, 16  ;;  %v15853_v15 = vcombine.low %v1292_v4, %v1306_v5  ;;  %v1320_v19 = vsel %vm19609_vm2, %v19913_v24, %v19915_v26 }
  0xb5   : > { %v1328_v11 = vor.u32 %v1327_v55, %v1324_v54  ;;  %v19940_v54 = vrot.slane %v1359_v34, 5  ;;  %v19942_v55 = vrot.slane %v1373_v40, 5  ;;  %v1422_v23 = vrot.slane %v1420_v59, 4 }
  0xb6   : > { %v1425_v30 = vrot.slane %v1423_v60, 5  ;;  %v1437_v34 = vshll.u32 %v738_v6, 16  ;;  %v1462_v26 = vshrl.u32 %v742_v21, 16  ;;  %v1465_v40 = vshll.u32 %v742_v21, 16 }
  0xb7   : > { %v19920_v31 = vrot.slane %v1328_v11, 4  ;;  %v18842_v11 = vld [vmem:[%s19590_s24 + $0x150] ss:$8 sps:$4 sm:$0xff]   ;;  %v1362_v42 = vsel %vm19609_vm2, %v19938_v53, %v19940_v54  ;;  %v1376_v63 = vsel %vm19609_vm2, %v19945_v27, %v19942_v55  ;;  %v1390_v0 = vsel %vm19609_vm2, %v19959_v7, %v19947_v32  ;;  %v747_v32 = vld [vmem:[%s19590_s24 + $0x1fc] sm:$0x1] }
  0xb8   : > { %7804 = vmatmul.mubr.bf16.gmra.mrb[52].mxu0 %v18836_v8  ;;  %v1338_v8 = vrot.slane %v1336_v52, 4  ;;  %v1439_v46 = vrot.slane %v1437_v34, 5  ;;  %v15856_v60 = vcombine.low %v1376_v63, %v1390_v0 }
  0xb9   : > { %7811 = vmatprep.mubr.bf16.mxu0 %v15849_v9  ;;  %v1345_v9 = vshll.u32 %v725_v56, 16  ;;  %v18840_v56 = vld [vmem:[%s19590_s24 + $0x140] ss:$8 sps:$4 sm:$0xff]  }
  0xba   : > { %v1342_v37 = vor.u32 %v1341_v12, %v1338_v8 }
  0xbb   : > { %v19923_v38 = vrot.slane %v1345_v9, 5  ;;  %v1408_v9 = vrot.slane %v1406_v28, 4 }
  0xbc   : > { %v19936_v52 = vrot.slane %v1342_v37, 4  ;;  %v1443_v37 = vshll.u32 %v739_v17, 16 }
  0xc0   : > { %7812 = vmatmul.mubr.bf16.gmra.mrb[56].mxu0 %v18837_v36  ;;  %v1395_v36 = vshll.u32 %v732_v18, 16  ;;  %v740_v18 = vld [vmem:[%s19590_s24 + $0x1e0] sm:$0xf] }
  0xc1   : > { %7819 = vmatprep.mubr.bf16.mxu0 %v15850_v45  ;;  %v733_v45 = vld [vmem:[%s19590_s24 + $0x1b4] sm:$0x1]  ;;  %v1448_v39 = vshrl.u32 %v740_v18, 16  ;;  %v1451_v24 = vshll.u32 %v740_v18, 16 }
  0xc2   : > { %v1397_v51 = vrot.slane %v1395_v36, 5  ;;  %v1401_v57 = vshll.u32 %v733_v45, 16  ;;  %v19982_v36 = vrot.slane %v1429_v61, 5  ;;  %v1436_v45 = vrot.slane %v1434_v14, 4  ;;  %v748_v61 = vld [vmem:[%s19590_s24 + $0x200] sm:$0xf] }
  0xc3   : > { %v1450_v47 = vrot.slane %v1448_v39, 4  ;;  %v1453_v48 = vrot.slane %v1451_v24, 5  ;;  %v749_v14 = vld [vmem:[%s19590_s24 + $0x204] sm:$0x1] }
  0xc4   : > { %v1398_v1 = vor.u32 %v1397_v51, %v1394_v50  ;;  %v19961_v8 = vrot.slane %v1401_v57, 5  ;;  %v19997_v51 = vrot.slane %v1443_v37, 5  ;;  %v1471_v57 = vshll.u32 %v743_v44, 16 }
  0xc5   : > { %v1440_v54 = vor.u32 %v1439_v46, %v1436_v45  ;;  %v1454_v28 = vor.u32 %v1453_v48, %v1450_v47  ;;  %v1513_v37 = vshll.u32 %v749_v14, 16  ;;  %v18849_v47 = vld [vmem:[%s19590_s24 + $0x1b0] ss:$8 sps:$4 sm:$0xff]   ;;  %v759_v14 = vld [vmem:[%s19590_s24 + $0x23c] sm:$0x1] }
  0xc6   : > { %v19964_v12 = vrot.slane %v1398_v1, 4  ;;  %v746_v1 = vld [vmem:[%s19590_s24 + $0x1f8] sm:$0xf]  ;;  %v20014_v6 = vrot.slane %v1471_v57, 5 }
  0xc7   : > { %v1441_v3 = vrot.slane %v1440_v54, 4  ;;  %v20010_v4 = vrot.slane %v1454_v28, 4  ;;  %v1490_v7 = vshrl.u32 %v746_v1, 16  ;;  %v1493_v59 = vshll.u32 %v746_v1, 16 }
  0xc8   : > { %7820 = vmatmul.mubr.bf16.gmra.mrb[60].mxu0 %v18839_v10  ;;  %v1411_v10 = vrot.slane %v1409_v62, 5  ;;  %v1515_v0 = vrot.slane %v1513_v37, 5  ;;  %v1583_v37 = vshll.u32 %v759_v14, 16 }
  0xc9   : > { %7827 = vmatprep.mubr.bf16.mxu0 %v15851_v20  ;;  %v1334_v20 = vsel %vm19609_vm2, %v19920_v31, %v19917_v29  ;;  %v1426_v29 = vor.u32 %v1425_v30, %v1422_v23  ;;  %v1348_v31 = vsel %vm19609_vm2, %v19936_v52, %v19923_v38  ;;  %v1464_v38 = vrot.slane %v1462_v26, 4  ;;  %v752_v26 = vld [vmem:[%s19590_s24 + $0x210] sm:$0xf] }
  0xca   : > { %v1412_v16 = vor.u32 %v1411_v10, %v1408_v9  ;;  %v15854_v41 = vcombine.low %v1320_v19, %v1334_v20  ;;  %v1467_v52 = vrot.slane %v1465_v40, 5  ;;  %v15855_v53 = vcombine.low %v1348_v31, %v1362_v42  ;;  %v18846_v9 = vld [vmem:[%s19590_s24 + $0x190] ss:$8 sps:$4 sm:$0xff]   ;;  %v751_v20 = vld [vmem:[%s19590_s24 + $0x20c] sm:$0x1] }
  0xcb   : > { %v19995_v50 = vrot.slane %v1426_v29, 4  ;;  %v1499_v19 = vshll.u32 %v747_v32, 16  ;;  %v1492_v30 = vrot.slane %v1490_v7, 4  ;;  %v1495_v34 = vrot.slane %v1493_v59, 5  ;;  %v753_v40 = vld [vmem:[%s19590_s24 + $0x214] sm:$0x1] }
  0xcc   : > { %v19979_v22 = vrot.slane %v1412_v16, 4  ;;  %v1468_v62 = vor.u32 %v1467_v52, %v1464_v38  ;;  %v1404_v16 = vsel %vm19609_vm2, %v19964_v12, %v19961_v8  ;;  %v1504_v8 = vshrl.u32 %v748_v61, 16  ;;  %v755_v42 = vld [vmem:[%s19590_s24 + $0x21c] sm:$0x1]  ;;  %v757_v7 = vld [vmem:[%s19590_s24 + $0x234] sm:$0x1] }
  0xcd   : > { %v1507_v12 = vshll.u32 %v748_v61, 16  ;;  %v1432_v29 = vsel %vm19609_vm2, %v19995_v50, %v19982_v36  ;;  %v1446_v31 = vsel %vm19609_vm2, %v1441_v3, %v19997_v51  ;;  %v1532_v48 = vshrl.u32 %v752_v26, 16  ;;  %v758_v61 = vld [vmem:[%s19590_s24 + $0x238] sm:$0xf] }
  0xce   : > { %v20017_v10 = vrot.slane %v1468_v62, 4  ;;  %v1418_v17 = vsel %vm19609_vm2, %v19979_v22, %v19966_v13  ;;  %v1527_v22 = vshll.u32 %v751_v20, 16  ;;  %v1541_v38 = vshll.u32 %v753_v40, 16 }
  0xcf   : > { %v15857_v24 = vcombine.low %v1404_v16, %v1418_v17  ;;  %v1509_v44 = vrot.slane %v1507_v12, 5  ;;  %v1555_v57 = vshll.u32 %v755_v42, 16  ;;  %v1496_v36 = vor.u32 %v1495_v34, %v1492_v30  ;;  %v18852_v34 = vld [vmem:[%s19590_s24 + $0x1e0] ss:$8 sps:$4 sm:$0xff]  }
  0xd0   : > { %7828 = vmatmul.mubr.bf16.gmra.mrb[64].mxu0 %v18840_v56  ;;  %v1457_v56 = vshll.u32 %v741_v43, 16  ;;  %v1506_v43 = vrot.slane %v1504_v8, 4  ;;  %v15858_v50 = vcombine.low %v1432_v29, %v1446_v31  ;;  %v1501_v63 = vrot.slane %v1499_v19, 5  ;;  %v763_v31 = vld [vmem:[%s19590_s24 + $0x24c] sm:$0x1] }
  0xd1   : > { %7835 = vmatprep.mubr.bf16.mxu0 %v15852_v33  ;;  %v744_v33 = vld [vmem:[%s19590_s24 + $0x1f0] sm:$0xf]  ;;  %v1497_v62 = vrot.slane %v1496_v36, 4  ;;  %v1529_v1 = vrot.slane %v1527_v22, 5  ;;  %v1534_v3 = vrot.slane %v1532_v48, 4  ;;  %v20056_v32 = vrot.slane %v1541_v38, 5 }
  0xd2   : > { %v20012_v5 = vrot.slane %v1457_v56, 5  ;;  %v1476_v55 = vshrl.u32 %v744_v33, 16  ;;  %v1479_v27 = vshll.u32 %v744_v33, 16  ;;  %v1510_v54 = vor.u32 %v1509_v44, %v1506_v43  ;;  %v761_v22 = vld [vmem:[%s19590_s24 + $0x244] sm:$0x1] }
  0xd3   : > { %v1474_v33 = vsel %vm19609_vm2, %v20017_v10, %v20014_v6  ;;  %v20058_v6 = vrot.slane %v1555_v57, 5  ;;  %v756_v10 = vld [vmem:[%s19590_s24 + $0x230] sm:$0xf]  ;;  %v1502_v17 = vsel %vm19609_vm2, %v1497_v62, %v1501_v63  ;;  %v1569_v30 = vshll.u32 %v757_v7, 16  ;;  %v768_v7 = vld [vmem:[%s19590_s24 + $0x260] sm:$0xf] }
  0xd4   : > { %v1478_v18 = vrot.slane %v1476_v55, 4  ;;  %v1481_v21 = vrot.slane %v1479_v27, 5  ;;  %v1460_v51 = vsel %vm19609_vm2, %v20010_v4, %v20012_v5  ;;  %v18851_v55 = vld [vmem:[%s19590_s24 + $0x1c0] ss:$8 sps:$4 sm:$0xff]   ;;  %v1511_v4 = vrot.slane %v1510_v54, 4 }
  0xd5   : > { %v15859_v59 = vcombine.low %v1460_v51, %v1474_v33  ;;  %v1560_v20 = vshrl.u32 %v756_v10, 16  ;;  %v1574_v8 = vshrl.u32 %v758_v61, 16  ;;  %v1577_v12 = vshll.u32 %v758_v61, 16  ;;  %v766_v51 = vld [vmem:[%s19590_s24 + $0x258] sm:$0xf] }
  0xd6   : > { %v1571_v42 = vrot.slane %v1569_v30, 5  ;;  %v1597_v48 = vshll.u32 %v761_v22, 16 }
  0xd7   : > { %v1576_v43 = vrot.slane %v1574_v8, 4  ;;  %v1579_v44 = vrot.slane %v1577_v12, 5 }
  0xd8   : > { %7836 = vmatmul.mubr.bf16.gmra.mrb[68].mxu0 %v18842_v11  ;;  %v1485_v11 = vshll.u32 %v745_v58, 16 }
  0xd9   : > { %7843 = vmatprep.mubr.bf16.mxu0 %v15853_v15  ;;  %v750_v15 = vld [vmem:[%s19590_s24 + $0x208] sm:$0xf]  ;;  %v1580_v36 = vor.u32 %v1579_v44, %v1576_v43 }
  0xda   : > { %v20032_v23 = vrot.slane %v1485_v11, 5  ;;  %v1518_v39 = vshrl.u32 %v750_v15, 16  ;;  %v1521_v13 = vshll.u32 %v750_v15, 16 }
  0xdc   : > { %v1520_v45 = vrot.slane %v1518_v39, 4  ;;  %v1523_v46 = vrot.slane %v1521_v13, 5 }
  0xde   : > { %v1524_v28 = vor.u32 %v1523_v46, %v1520_v45  ;;  %v1585_v45 = vrot.slane %v1583_v37, 5  ;;  %v18854_v46 = vld [vmem:[%s19590_s24 + $0x1f0] ss:$8 sps:$4 sm:$0xff]   ;;  %v769_v37 = vld [vmem:[%s19590_s24 + $0x264] sm:$0x1] }
  0xe0   : > { %7844 = vmatmul.mubr.bf16.gmra.mrb[72].mxu0 %v18843_v35  ;;  %v18848_v35 = vld [vmem:[%s19590_s24 + $0x1a0] ss:$8 sps:$4 sm:$0xff]   ;;  %v1525_v5 = vrot.slane %v1524_v28, 4 }
  0xe1   : > { %7851 = vmatprep.mubr.bf16.mxu0 %v15854_v41  ;;  %v754_v41 = vld [vmem:[%s19590_s24 + $0x218] sm:$0xf] }
  0xe2   : > { %v1546_v52 = vshrl.u32 %v754_v41, 16  ;;  %v1549_v56 = vshll.u32 %v754_v41, 16  ;;  %v1530_v40 = vsel %vm19609_vm2, %v1525_v5, %v1529_v1  ;;  %v1562_v41 = vrot.slane %v1560_v20, 4  ;;  %v18857_v20 = vld [vmem:[%s19590_s24 + $0x210] ss:$8 sps:$4 sm:$0xff]  }
  0xe3   : > { %v1599_v1 = vrot.slane %v1597_v48, 5  ;;  %v1630_v5 = vshrl.u32 %v766_v51, 16 }
  0xe4   : > { %v1548_v27 = vrot.slane %v1546_v52, 4  ;;  %v1551_v11 = vrot.slane %v1549_v56, 5  ;;  %v1611_v56 = vshll.u32 %v763_v31, 16  ;;  %v1653_v31 = vshll.u32 %v769_v37, 16 }
  0xe6   : > { %v1552_v15 = vor.u32 %v1551_v11, %v1548_v27  ;;  %v1633_v27 = vshll.u32 %v766_v51, 16 }
  0xe8   : > { %7852 = vmatmul.mubr.bf16.gmra.mrb[76].mxu0 %v18845_v49  ;;  %v1535_v49 = vshll.u32 %v752_v26, 16  ;;  %v1516_v26 = vsel %vm19609_vm2, %v1511_v4, %v1515_v0  ;;  %v18855_v0 = vld [vmem:[%s19590_s24 + $0x200] ss:$8 sps:$4 sm:$0xff]   ;;  %v765_v4 = vld [vmem:[%s19590_s24 + $0x254] sm:$0x1]  ;;  %v1635_v30 = vrot.slane %v1633_v27, 5 }
  0xe9   : > { %7859 = vmatprep.mubr.bf16.mxu0 %v15855_v53  ;;  %v1482_v53 = vor.u32 %v1481_v21, %v1478_v18  ;;  %v760_v18 = vld [vmem:[%s19590_s24 + $0x240] sm:$0xf]  ;;  %v1563_v21 = vshll.u32 %v756_v10, 16  ;;  %v15861_v57 = vcombine.low %v1516_v26, %v1530_v40  ;;  %v1625_v14 = vshll.u32 %v765_v4, 16  ;;  %v18864_v27 = vld [vmem:[%s19590_s24 + $0x8] ss:$8 sps:$4 sm:$0xff]  }
  0xea   : > { %v1588_v39 = vshrl.u32 %v760_v18, 16 }
  0xeb   : > { %v1483_v58 = vrot.slane %v1482_v53, 4  ;;  %v1565_v29 = vrot.slane %v1563_v21, 5  ;;  %v1632_v21 = vrot.slane %v1630_v5, 4  ;;  %v1627_v26 = vrot.slane %v1625_v14, 5 }
  0xed   : > { %v1488_v16 = vsel %vm19609_vm2, %v1483_v58, %v20032_v23  ;;  %v1591_v23 = vshll.u32 %v760_v18, 16  ;;  %v1566_v53 = vor.u32 %v1565_v29, %v1562_v41  ;;  %v1581_v58 = vrot.slane %v1580_v36, 4 }
  0xee   : > { %v15860_v13 = vcombine.low %v1488_v16, %v1502_v17  ;;  %v1636_v22 = vor.u32 %v1635_v30, %v1632_v21  ;;  %v1655_v36 = vrot.slane %v1653_v31, 5  ;;  %v1839_v30 = vld [vmem:[%s19590_s24 + $0x20] sm:$0xe]  ;;  %v1844_v31 = vld [vmem:[%s19590_s24 + $0x34] sm:$0x1] }
  0xef   : > { %v1593_v52 = vrot.slane %v1591_v23, 5  ;;  %v1567_v33 = vrot.slane %v1566_v53, 4 }
  0xf0   : > { %7860 = vmatmul.mubr.bf16.gmra.mrb[80].mxu0 %v18846_v9  ;;  %v1537_v9 = vrot.slane %v1535_v49, 5  ;;  %v1637_v43 = vrot.slane %v1636_v22, 4 }
  0xf1   : > { %7867 = vmatprep.mubr.bf16.mxu0 %v15856_v60 }
  0xf2   : > { %v1538_v60 = vor.u32 %v1537_v9, %v1534_v3  ;;  %v1613_v3 = vrot.slane %v1611_v56, 5  ;;  %v18860_v56 = vld [vmem:[%s19590_s24 + $0x240] ss:$8 sps:$4 sm:$0xff]  }
  0xf4   : > { %v1539_v19 = vrot.slane %v1538_v60, 4  ;;  %v1586_v60 = vsel %vm19609_vm2, %v1581_v58, %v1585_v45 }
  0xf6   : > { %v1544_v54 = vsel %vm19609_vm2, %v1539_v19, %v20056_v32  ;;  %v767_v32 = vld [vmem:[%s19590_s24 + $0x25c] sm:$0x1] }
  0xf7   : > { %v1639_v19 = vshll.u32 %v767_v32, 16 }
  0xf8   : > { %7868 = vmatmul.mubr.bf16.gmra.mrb[84].mxu0 %v18848_v35  ;;  %v1553_v35 = vrot.slane %v1552_v15, 4  ;;  %v770_v15 = vld [vmem:[%s19590_s24 + $0x268] sm:$0xf] }
  0xf9   : > { %7875 = vmatprep.mubr.bf16.mxu0 %v15857_v24  ;;  %v762_v24 = vld [vmem:[%s19590_s24 + $0x248] sm:$0xf]  ;;  %v1658_v8 = vshrl.u32 %v770_v15, 16  ;;  %v1661_v12 = vshll.u32 %v770_v15, 16  ;;  %v1641_v29 = vrot.slane %v1639_v19, 5 }
  0xfa   : > { %v1602_v49 = vshrl.u32 %v762_v24, 16  ;;  %v1605_v38 = vshll.u32 %v762_v24, 16  ;;  %v1558_v28 = vsel %vm19609_vm2, %v1553_v35, %v20058_v6  ;;  %v1647_v35 = vshll.u32 %v768_v7, 16 }
  0xfb   : > { %v15862_v6 = vcombine.low %v1544_v54, %v1558_v28  ;;  %v1663_v48 = vrot.slane %v1661_v12, 5  ;;  %v1642_v53 = vsel %vm19609_vm2, %v1637_v43, %v1641_v29  ;;  %v1843_v29 = vld [vmem:[%s19590_s24 + $0x30] sm:$0xe]  ;;  %v1846_v43 = vld [vmem:[%s19590_s24 + $0x3c] sm:$0x1] }
  0xfc   : > { %v1604_v62 = vrot.slane %v1602_v49, 4  ;;  %v1607_v63 = vrot.slane %v1605_v38, 5  ;;  %v1649_v45 = vrot.slane %v1647_v35, 5  ;;  %v1841_v35 = vld [vmem:[%s19590_s24 + $0x28] sm:$0xe] }
  0xfd   : > { %v15872_v22 = vrot.slane %v1841_v35, 9 }
  0xfe   : > { %v1608_v10 = vor.u32 %v1607_v63, %v1604_v62  ;;  %v18861_v62 = vld [vmem:[%s19590_s24 + $0x250] ss:$8 sps:$4 sm:$0xff]  }
 0x100   : > { %7876 = vmatmul.mubr.bf16.gmra.mrb[88].mxu0 %v18849_v47  ;;  %v1590_v47 = vrot.slane %v1588_v39, 4  ;;  %v1609_v16 = vrot.slane %v1608_v10, 4  ;;  %v1835_v10 = vld [vmem:[%s19590_s24 + $0x10] sm:$0xe] }
 0x101   : > { %7883 = vmatprep.mubr.bf16.mxu0 %v15858_v50  ;;  %v764_v50 = vld [vmem:[%s19590_s24 + $0x250] sm:$0xf]  ;;  %v15869_v15 = vrot.slane %v1835_v10, 9  ;;  %v18886_v10 = vld [vmem:[%s26250_s2 + $0x138] sm:$0xff]  }
 0x102   : > { %v1616_v9 = vshrl.u32 %v764_v50, 16  ;;  %v1594_v11 = vor.u32 %v1593_v52, %v1590_v47  ;;  %v1614_v40 = vsel %vm19609_vm2, %v1609_v16, %v1613_v3  ;;  %v1660_v47 = vrot.slane %v1658_v8, 4  ;;  %v1833_v3 = vld [vmem:[%s19590_s24 + $0x8] sm:$0xe]  ;;  %v1842_v8 = vld [vmem:[%s19590_s24 + $0x2c] sm:$0x1] }
 0x103   : > { %v15868_v32 = vrot.slane %v1833_v3, 9  ;;  %v18883_v3 = vld [vmem:[%s26250_s2 + $0x130] sm:$0xff]  }
 0x104   : > { %v1595_v61 = vrot.slane %v1594_v11, 4  ;;  %v1618_v17 = vrot.slane %v1616_v9, 4  ;;  %v1664_v52 = vor.u32 %v1663_v48, %v1660_v47  ;;  %v1834_v9 = vld [vmem:[%s19590_s24 + $0xc] sm:$0x1]  ;;  %v15873_v47 = vrot.slane %v1843_v29, 9 }
 0x105   : > { %v2116_v48 = vrot.slane %v1844_v31, 5 }
 0x106   : > { %v1600_v24 = vsel %vm19609_vm2, %v1595_v61, %v1599_v1  ;;  %v1665_v28 = vrot.slane %v1664_v52, 4  ;;  %v1832_v1 = vld [vmem:[%s19590_s24 + $0x4] sm:$0x1]  ;;  %v2120_v52 = vrot.slane %v1846_v43, 5  ;;  %v18875_v43 = vld [vmem:[%s19590_s24 + $0x88] ss:$8 sps:$4 sm:$0xff]  }
 0x107   : > { %v15864_v49 = vcombine.low %v1600_v24, %v1614_v40  ;;  %v2092_v5 = vrot.slane %v1832_v1, 5  ;;  %v18867_v24 = vld [vmem:[%s19590_s24 + $0x28] ss:$8 sps:$4 sm:$0xff]  }
 0x108   : > { %7884 = vmatmul.mubr.bf16.gmra.mrb[92].mxu0 %v18851_v55  ;;  %v1619_v55 = vshll.u32 %v764_v50, 16  ;;  %v18871_v40 = vld [vmem:[%s26250_s2 + $0x110] sm:$0xff]  }
 0x109   : > { %7891 = vmatprep.mubr.bf16.mxu0 %v15859_v59  ;;  %v1572_v59 = vsel %vm19609_vm2, %v1567_v33, %v1571_v42  ;;  %v18858_v42 = vld [vmem:[%s19590_s24 + $0x230] ss:$8 sps:$4 sm:$0xff]  }
 0x10a   : > { %v1621_v18 = vrot.slane %v1619_v55, 5  ;;  %v15863_v39 = vcombine.low %v1572_v59, %v1586_v60  ;;  %v18863_v55 = vld [vmem:[%s19590_s24 + $0x260] ss:$8 sps:$4 sm:$0xff]   ;;  %v1837_v59 = vld [vmem:[%s19590_s24 + $0x18] sm:$0xe] }
 0x10b   : > { %v1838_v60 = vld [vmem:[%s19590_s24 + $0x1c] sm:$0x1]  ;;  %v15870_v19 = vrot.slane %v1837_v59, 9 }
 0x10c   : > { %v1622_v23 = vor.u32 %v1621_v18, %v1618_v17  ;;  %v18865_v17 = vld [vmem:[%s26250_s2 + $0x100] sm:$0xff]  }
 0x10d   : > { %v18866_v18 = vld [vmem:[%s19590_s24 + $0x18] ss:$8 sps:$4 sm:$0xff]  }
 0x10e   : > { %v1623_v41 = vrot.slane %v1622_v23, 4  ;;  %v15871_v23 = vrot.slane %v1839_v30, 9 }
 0x110   : > { %7892 = vmatmul.mubr.bf16.gmra.mrb[96].mxu0 %v18852_v34  ;;  %v1644_v34 = vshrl.u32 %v768_v7, 16  ;;  %v1836_v7 = vld [vmem:[%s19590_s24 + $0x14] sm:$0x1] }
 0x111   : > { %7899 = vmatprep.mubr.bf16.mxu0 %v15860_v13  ;;  %v771_v13 = vld [vmem:[%s19590_s24 + $0x26c] sm:$0x1]  ;;  %v2100_v16 = vrot.slane %v1836_v7, 5 }
 0x112   : > { %v1646_v44 = vrot.slane %v1644_v34, 4  ;;  %v1840_v34 = vld [vmem:[%s19590_s24 + $0x24] sm:$0x1] }
 0x113   : > { %v2101_v12 = vsel %vm20120_vm5, %v15869_v15, %v2100_v16  ;;  %v18889_v15 = vld [vmem:[%s26250_s2 + $0x140] sm:$0xff]  }
 0x114   : > { %v1650_v38 = vor.u32 %v1649_v45, %v1646_v44 }
 0x116   : > { %v1651_v54 = vrot.slane %v1650_v38, 4  ;;  %v18869_v38 = vld [vmem:[%s19590_s24 + $0x38] ss:$8 sps:$4 sm:$0xff]  }
 0x118   : > { %7900 = vmatmul.mubr.bf16.gmra.mrb[100].mxu0 %v18854_v46  ;;  %v1667_v46 = vshll.u32 %v771_v13, 16  ;;  %v1656_v33 = vsel %vm19609_vm2, %v1651_v54, %v1655_v36  ;;  %v2108_v13 = vrot.slane %v1840_v34, 5  ;;  %v1848_v36 = vld [vmem:[%s19590_s24 + $0x54] sm:$0x1]  ;;  %v1850_v54 = vld [vmem:[%s19590_s24 + $0x5c] sm:$0x1] }
 0x119   : > { %7907 = vmatprep.mubr.bf16.mxu0 %v15861_v57  ;;  %v1628_v57 = vsel %vm19609_vm2, %v1623_v41, %v1627_v26  ;;  %v2112_v26 = vrot.slane %v1842_v8, 5  ;;  %v2128_v1 = vrot.slane %v1850_v54, 5  ;;  %v18892_v34 = vld [vmem:[%s26250_s2 + $0x148] sm:$0xff]  }
 0x11a   : > { %v1669_v50 = vrot.slane %v1667_v46, 5  ;;  %v15865_v51 = vcombine.low %v1628_v57, %v1642_v53  ;;  %v2109_v44 = vsel %vm20120_vm5, %v15871_v23, %v2108_v13  ;;  %v18874_v46 = vld [vmem:[%s26250_s2 + $0x118] sm:$0xff]   ;;  %v1847_v53 = vld [vmem:[%s19590_s24 + $0x50] sm:$0xe] }
 0x11b   : > { %v2113_v45 = vsel %vm20120_vm5, %v15872_v22, %v2112_v26  ;;  %v18895_v23 = vld [vmem:[%s26250_s2 + $0x150] sm:$0xff]   ;;  %v1859_v22 = vld [vmem:[%s19590_s24 + $0x80] sm:$0xe]  ;;  %v1861_v26 = vld [vmem:[%s19590_s24 + $0x88] sm:$0xe] }
 0x11c   : > { %v1670_v58 = vsel %vm19609_vm2, %v1665_v28, %v1669_v50  ;;  %v15933_v57 = vcombine.low %v2109_v44, %v2113_v45  ;;  %v1849_v50 = vld [vmem:[%s19590_s24 + $0x58] sm:$0xe]  ;;  %v2117_v28 = vsel %vm20120_vm5, %v15873_v47, %v2116_v48  ;;  %v15881_v31 = vrot.slane %v1859_v22, 9  ;;  %v1863_v47 = vld [vmem:[%s19590_s24 + $0xa0] sm:$0xe] }
 0x11d   : > { %v15866_v63 = vcombine.low %v1656_v33, %v1670_v58  ;;  %v18880_v33 = vld [vmem:[%s26250_s2 + $0x128] sm:$0xff]   ;;  %v15875_v58 = vrot.slane %v1847_v53, 9  ;;  %v15882_v44 = vrot.slane %v1861_v26, 9  ;;  %v1864_v48 = vld [vmem:[%s19590_s24 + $0xa4] sm:$0x1]  ;;  %v15883_v53 = vrot.slane %v1863_v47, 9 }
 0x11e   : > { %v1880_v26 = vld [vmem:[%s19590_s24 + $0xf4] sm:$0x1] }
 0x120   : > { %7908 = vmatmul.mubr.bf16.gmra.mrb[104].mxu0 %v18855_v0  ;;  %v1831_v0 = vld [vmem:[%s19590_s24] sm:$0xe] }
 0x121   : > { %7915 = vmatprep.mubr.bf16.mxu0 %v15862_v6  ;;  %v15867_v4 = vrot.slane %v1831_v0, 9  ;;  %v2096_v6 = vrot.slane %v1834_v9, 5  ;;  %v18870_v0 = vld [vmem:[%s19590_s24 + $0x58] ss:$8 sps:$4 sm:$0xff]  }
 0x123   : > { %v2093_v61 = vsel %vm20120_vm5, %v15867_v4, %v2092_v5  ;;  %v2097_v14 = vsel %vm20120_vm5, %v15868_v32, %v2096_v6  ;;  %v1852_v4 = vld [vmem:[%s19590_s24 + $0x64] sm:$0x1]  ;;  %v1853_v5 = vld [vmem:[%s19590_s24 + $0x68] sm:$0xe] }
 0x124   : > { %v15931_v21 = vcombine.low %v2093_v61, %v2097_v14  ;;  %v2132_v59 = vrot.slane %v1852_v4, 5  ;;  %v18872_v61 = vld [vmem:[%s19590_s24 + $0x68] ss:$8 sps:$4 sm:$0xff]  }
 0x128   : > { %7916 = vmatmul.mubr.bf16.gmra.mrb[108].mxu0 %v18857_v20  ;;  %v2104_v20 = vrot.slane %v1838_v60, 5  ;;  %v15878_v60 = vrot.slane %v1853_v5, 9 }
 0x129   : > { %7923 = vmatprep.mubr.bf16.mxu0 %v15863_v39  ;;  %v18868_v39 = vld [vmem:[%s26250_s2 + $0x108] sm:$0xff]  }
 0x12a   : > { %v2105_v37 = vsel %vm20120_vm5, %v15870_v19, %v2104_v20  ;;  %v1857_v19 = vld [vmem:[%s19590_s24 + $0x78] sm:$0xe]  ;;  %v1858_v20 = vld [vmem:[%s19590_s24 + $0x7c] sm:$0x1] }
 0x12b   : > { %v15932_v41 = vcombine.low %v2101_v12, %v2105_v37  ;;  %v15880_v12 = vrot.slane %v1857_v19, 9  ;;  %v18873_v37 = vld [vmem:[%s19590_s24 + $0x78] ss:$8 sps:$4 sm:$0xff]  }
 0x130   : > { %7924 = vmatmul.mubr.bf16.gmra.mrb[112].mxu0 %v18858_v42  ;;  %v1845_v42 = vld [vmem:[%s19590_s24 + $0x38] sm:$0xe] }
 0x131   : > { %7931 = vmatprep.mubr.bf16.mxu0 %v15864_v49  ;;  %v15874_v49 = vrot.slane %v1845_v42, 9 }
 0x138   : > { %7932 = vmatmul.mubr.bf16.gmra.mrb[116].mxu0 %v18860_v56  ;;  %v18877_v56 = vld [vmem:[%s26250_s2 + $0x120] sm:$0xff]  }
 0x139   : > { %7939 = vmatprep.mubr.bf16.mxu0 %v15865_v51  ;;  %v2121_v51 = vsel %vm20120_vm5, %v15874_v49, %v2120_v52  ;;  %v1865_v49 = vld [vmem:[%s19590_s24 + $0xa8] sm:$0xe]  ;;  %v18898_v52 = vld [vmem:[%s26250_s2 + $0x158] sm:$0xff]  }
 0x13a   : > { %v15934_v9 = vcombine.low %v2117_v28, %v2121_v51  ;;  %v15884_v54 = vrot.slane %v1865_v49, 9  ;;  %v1883_v49 = vld [vmem:[%s19590_s24 + $0x100] sm:$0xe] }
 0x140   : > { %7940 = vmatmul.mubr.bf16.gmra.mrb[120].mxu0 %v18861_v62  ;;  %v2124_v62 = vrot.slane %v1848_v36, 5  ;;  %v2156_v36 = vrot.slane %v1864_v48, 5 }
 0x141   : > { %7947 = vmatprep.mubr.bf16.mxu0 %v15866_v63  ;;  %v15876_v63 = vrot.slane %v1849_v50, 9  ;;  %v18876_v50 = vld [vmem:[%s19590_s24 + $0xa8] ss:$8 sps:$4 sm:$0xff]  }
 0x142   : > { %v2125_v32 = vsel %vm20120_vm5, %v15875_v58, %v2124_v62  ;;  %v1868_v58 = vld [vmem:[%s19590_s24 + $0xb4] sm:$0x1]  ;;  %v1869_v62 = vld [vmem:[%s19590_s24 + $0xb8] sm:$0xe] }
 0x143   : > { %v2129_v6 = vsel %vm20120_vm5, %v15876_v63, %v2128_v1  ;;  %v1870_v63 = vld [vmem:[%s19590_s24 + $0xbc] sm:$0x1]  ;;  %v15886_v4 = vrot.slane %v1869_v62, 9  ;;  %v1888_v62 = vld [vmem:[%s19590_s24 + $0x114] sm:$0x1] }
 0x144   : > { %v15935_v16 = vcombine.low %v2125_v32, %v2129_v6  ;;  %v2168_v5 = vrot.slane %v1870_v63, 5  ;;  %v1871_v32 = vld [vmem:[%s19590_s24 + $0xc0] sm:$0xe]  ;;  %v1872_v6 = vld [vmem:[%s19590_s24 + $0xc4] sm:$0x1] }
 0x145   : > { %v1889_v63 = vld [vmem:[%s19590_s24 + $0x118] sm:$0xe] }
 0x148   : > { %7948 = vmatmul.mubr.bf16.gmra.mrb[124].mxu0 %v18863_v55  ;;  %v1851_v55 = vld [vmem:[%s19590_s24 + $0x60] sm:$0xe] }
 0x149   : > { %7988 = vmatprep.mubr.bf16.mxu0 %v18864_v27  ;;  %v1854_v27 = vld [vmem:[%s19590_s24 + $0x6c] sm:$0x1]  ;;  %v15877_v7 = vrot.slane %v1851_v55, 9  ;;  %v18878_v55 = vld [vmem:[%s19590_s24 + $0xb8] ss:$8 sps:$4 sm:$0xff]  }
 0x14a   : > { %v2136_v14 = vrot.slane %v1854_v27, 5 }
 0x14c   : > { %v2137_v30 = vsel %vm20120_vm5, %v15878_v60, %v2136_v14  ;;  %v15887_v14 = vrot.slane %v1871_v32, 9  ;;  %v18885_v32 = vld [vmem:[%s19590_s24 + $0x118] ss:$8 sps:$4 sm:$0xff]  }
 0x150   : > { %7989 = vmatmul.mubr.bf16.vlgmr.msra.gmra.mrb[0].mxu0 %v15931_v21  ;;  %v2133_v21 = vsel %vm20120_vm5, %v15877_v7, %v2132_v59  ;;  %v1874_v7 = vld [vmem:[%s19590_s24 + $0xcc] sm:$0x1]  ;;  %v18901_v59 = vld [vmem:[%s26250_s2 + $0x160] sm:$0xff]  }
 0x151   : > { %8246 = vmatpush1.bf16.msra.mxu0 %v18865_v17  ;;  %7996 = vmatprep.mubr.bf16.mxu0 %v18866_v18  ;;  %v1855_v17 = vld [vmem:[%s19590_s24 + $0x70] sm:$0xe]  ;;  %v1856_v18 = vld [vmem:[%s19590_s24 + $0x74] sm:$0x1]  ;;  %v15936_v13 = vcombine.low %v2133_v21, %v2137_v30  ;;  %v1877_v30 = vld [vmem:[%s19590_s24 + $0xd8] sm:$0xe] }
 0x152   : > { %8247 = vmatprep.subr.bf16.mxu0 %v26258_v2  ;;  %v15879_v35 = vrot.slane %v1855_v17, 9  ;;  %v2140_v8 = vrot.slane %v1856_v18, 5  ;;  %v2176_v18 = vrot.slane %v1874_v7, 5  ;;  %v1876_v21 = vld [vmem:[%s19590_s24 + $0xd4] sm:$0x1] }
 0x153   : > { %v1893_v7 = vld [vmem:[%s19590_s24 + $0x128] sm:$0xe] }
 0x155   : > { %8248 = vmatpush1.bf16.msra.mxu0 %v18868_v39  ;;  %v2144_v39 = vrot.slane %v1858_v20, 5  ;;  %v1875_v20 = vld [vmem:[%s19590_s24 + $0xd0] sm:$0xe] }
 0x156   : > { %8249 = vmatprep.subr.bf16.mxu0 %v26258_v2 }
 0x157   : > { %v2145_v29 = vsel %vm20120_vm5, %v15880_v12, %v2144_v39  ;;  %v15889_v12 = vrot.slane %v1875_v20, 9  ;;  %v18881_v39 = vld [vmem:[%s19590_s24 + $0xd8] ss:$8 sps:$4 sm:$0xff]  }
 0x158   : > { %7997 = vmatmul.mubr.bf16.gmra.mrb[4].mxu0 %v15932_v41  ;;  %v2141_v41 = vsel %vm20120_vm5, %v15879_v35, %v2140_v8  ;;  %v20333_v20 = vld [vmem:[%s19590_s24 + $0x158] sm:$0xe] }
 0x159   : > { %8004 = vmatprep.mubr.bf16.mxu0 %v18867_v24  ;;  %8250 = vmatpush1.bf16.msra.mxu0 %v18871_v40  ;;  %v1860_v24 = vld [vmem:[%s19590_s24 + $0x84] sm:$0x1]  ;;  %v1862_v40 = vld [vmem:[%s19590_s24 + $0x8c] sm:$0x1] }
 0x15a   : > { %8251 = vmatprep.subr.bf16.mxu0 %v26258_v2  ;;  %v2148_v42 = vrot.slane %v1860_v24, 5  ;;  %v2152_v45 = vrot.slane %v1862_v40, 5  ;;  %v1879_v24 = vld [vmem:[%s19590_s24 + $0xf0] sm:$0xe]  ;;  %v1881_v40 = vld [vmem:[%s19590_s24 + $0xf8] sm:$0xe] }
 0x15d   : > { %8252 = vmatpush1.bf16.msra.mxu0 %v18874_v46  ;;  %v15937_v46 = vcombine.low %v2141_v41, %v2145_v29  ;;  %v1882_v41 = vld [vmem:[%s19590_s24 + $0xfc] sm:$0x1]  ;;  %v18904_v29 = vld [vmem:[%s26250_s2 + $0x168] sm:$0xff]  }
 0x15e   : > { %8253 = vmatprep.subr.bf16.mxu0 %v26258_v2  ;;  %v2192_v47 = vrot.slane %v1882_v41, 5  ;;  %v20351_v41 = vld [vmem:[%s19590_s24 + $0x160] sm:$0xe] }
 0x160   : > { %8005 = vmatmul.mubr.bf16.gmra.mrb[8].mxu0 %v15933_v57  ;;  %v2153_v57 = vsel %vm20120_vm5, %v15882_v44, %v2152_v45  ;;  %v2188_v44 = vrot.slane %v1880_v26, 5  ;;  %v18882_v45 = vld [vmem:[%s19590_s24 + $0xf8] ss:$8 sps:$4 sm:$0xff]   ;;  %v18887_v26 = vld [vmem:[%s19590_s24 + $0x128] ss:$8 sps:$4 sm:$0xff]  }
 0x161   : > { %8012 = vmatprep.mubr.bf16.mxu0 %v18869_v38  ;;  %8254 = vmatpush1.bf16.msra.mxu0 %v18877_v56  ;;  %v1866_v38 = vld [vmem:[%s19590_s24 + $0xac] sm:$0x1]  ;;  %v2149_v56 = vsel %vm20120_vm5, %v15881_v31, %v2148_v42 }
 0x162   : > { %8255 = vmatprep.subr.bf16.mxu0 %v26258_v2  ;;  %v2160_v28 = vrot.slane %v1866_v38, 5  ;;  %v15938_v51 = vcombine.low %v2149_v56, %v2153_v57  ;;  %v1884_v38 = vld [vmem:[%s19590_s24 + $0x104] sm:$0x1]  ;;  %v1886_v56 = vld [vmem:[%s19590_s24 + $0x10c] sm:$0x1] }
 0x164   : > { %v2161_v1 = vsel %vm20120_vm5, %v15884_v54, %v2160_v28  ;;  %v18884_v54 = vld [vmem:[%s19590_s24 + $0x108] ss:$8 sps:$4 sm:$0xff]  }
 0x165   : > { %8256 = vmatpush1.bf16.msra.mxu0 %v18880_v33  ;;  %v1867_v33 = vld [vmem:[%s19590_s24 + $0xb0] sm:$0xe] }
 0x166   : > { %8257 = vmatprep.subr.bf16.mxu0 %v26258_v2 }
 0x168   : > { %8013 = vmatmul.mubr.bf16.gmra.mrb[12].mxu0 %v15934_v9  ;;  %v2164_v9 = vrot.slane %v1868_v58, 5  ;;  %v1887_v58 = vld [vmem:[%s19590_s24 + $0x110] sm:$0xe] }
 0x169   : > { %8020 = vmatprep.mubr.bf16.mxu0 %v18870_v0  ;;  %8258 = vmatpush1.bf16.msra.mxu0 %v18883_v3  ;;  %v2157_v0 = vsel %vm20120_vm5, %v15883_v53, %v2156_v36  ;;  %v15885_v3 = vrot.slane %v1867_v33, 9  ;;  %v15893_v36 = vrot.slane %v1883_v49, 9  ;;  %v20378_v49 = vld [vmem:[%s19590_s24 + $0x194] sm:$0x1] }
 0x16a   : > { %8259 = vmatprep.subr.bf16.mxu0 %v26258_v2  ;;  %v15939_v27 = vcombine.low %v2157_v0, %v2161_v1  ;;  %v1890_v0 = vld [vmem:[%s19590_s24 + $0x11c] sm:$0x1]  ;;  %v1891_v1 = vld [vmem:[%s19590_s24 + $0x120] sm:$0xe] }
 0x16b   : > { %v2165_v60 = vsel %vm20120_vm5, %v15885_v3, %v2164_v9  ;;  %v18907_v3 = vld [vmem:[%s26250_s2 + $0x170] sm:$0xff]  }
 0x16d   : > { %8260 = vmatpush1.bf16.msra.mxu0 %v18886_v10  ;;  %v1873_v10 = vld [vmem:[%s19590_s24 + $0xc8] sm:$0xe] }
 0x16e   : > { %8261 = vmatprep.subr.bf16.mxu0 %v26258_v2  ;;  %v15888_v17 = vrot.slane %v1873_v10, 9  ;;  %v1892_v10 = vld [vmem:[%s19590_s24 + $0x124] sm:$0x1] }
 0x170   : > { %8021 = vmatmul.mubr.bf16.gmra.mrb[16].mxu0 %v15935_v16  ;;  %v18879_v16 = vld [vmem:[%s19590_s24 + $0xc8] ss:$8 sps:$4 sm:$0xff]   ;;  %v2177_v8 = vsel %vm20120_vm5, %v15888_v17, %v2176_v18  ;;  %v20324_v17 = vld [vmem:[%s19590_s24 + $0x14c] sm:$0x1] }
 0x171   : > { %8028 = vmatprep.mubr.bf16.mxu0 %v18872_v61  ;;  %8262 = vmatpush1.bf16.msra.mxu0 %v18889_v15  ;;  %v2169_v61 = vsel %vm20120_vm5, %v15886_v4, %v2168_v5  ;;  %v2172_v15 = vrot.slane %v1872_v6, 5  ;;  %v15895_v4 = vrot.slane %v1887_v58, 9  ;;  %v2204_v5 = vrot.slane %v1888_v62, 5  ;;  %v20327_v18 = vld [vmem:[%s19590_s24 + $0x150] sm:$0xe] }
 0x172   : > { %8263 = vmatprep.subr.bf16.mxu0 %v26258_v2  ;;  %v15940_v19 = vcombine.low %v2165_v60, %v2169_v61  ;;  %v2208_v6 = vrot.slane %v1890_v0, 5  ;;  %v1894_v61 = vld [vmem:[%s19590_s24 + $0x12c] sm:$0x1]  ;;  %v18888_v0 = vld [vmem:[%s19590_s24 + $0x148] ss:$8 sps:$4 sm:$0xff]  }
 0x173   : > { %v2173_v35 = vsel %vm20120_vm5, %v15887_v14, %v2172_v15  ;;  %v20315_v14 = vld [vmem:[%s19590_s24 + $0x140] sm:$0xe]  ;;  %v20318_v15 = vld [vmem:[%s19590_s24 + $0x144] sm:$0x1]  ;;  %v20602_v62 = vld [vmem:[%s19590_s24 + $0x26c] sm:$0x1] }
 0x174   : > { %v15941_v22 = vcombine.low %v2173_v35, %v2177_v8  ;;  %v15898_v35 = vrot.slane %v1893_v7, 9  ;;  %v2216_v8 = vrot.slane %v1894_v61, 5  ;;  %v20428_v7 = vld [vmem:[%s19590_s24 + $0x1bc] sm:$0x1]  ;;  %v20435_v61 = vld [vmem:[%s19590_s24 + $0x1c0] sm:$0xe] }
 0x175   : > { %8264 = vmatpush1.bf16.msra.mxu0 %v18892_v34  ;;  %v1878_v34 = vld [vmem:[%s19590_s24 + $0xdc] sm:$0x1]  ;;  %26400 = vst [vmem:[#allocation13_spill] sm:$0xff] %v20602_v62 }
 0x176   : > { %8265 = vmatprep.subr.bf16.mxu0 %v26258_v2 }
 0x178   : > { %8029 = vmatmul.mubr.bf16.gmra.mrb[20].mxu0 %v15936_v13  ;;  %v2184_v13 = vrot.slane %v1878_v34, 5  ;;  %v2212_v34 = vrot.slane %v1892_v10, 5  ;;  %v20425_v10 = vld [vmem:[%s19590_s24 + $0x1b8] sm:$0xe] }
 0x179   : > { %8036 = vmatprep.mubr.bf16.mxu0 %v18873_v37  ;;  %8266 = vmatpush1.bf16.msra.mxu0 %v18895_v23  ;;  %v2180_v37 = vrot.slane %v1876_v21, 5  ;;  %v15890_v23 = vrot.slane %v1877_v30, 9  ;;  %v2205_v21 = vsel %vm20120_vm5, %v15895_v4, %v2204_v5  ;;  %v20413_v5 = vld [vmem:[%s19590_s24 + $0x1a8] sm:$0xe] }
 0x17a   : > { %8267 = vmatprep.subr.bf16.mxu0 %v26258_v2 }
 0x17b   : > { %v2181_v31 = vsel %vm20120_vm5, %v15889_v12, %v2180_v37  ;;  %v2185_v42 = vsel %vm20120_vm5, %v15890_v23, %v2184_v13  ;;  %v15899_v12 = vrot.slane %v20315_v14, 9  ;;  %v2220_v37 = vrot.slane %v20318_v15, 5  ;;  %v20438_v14 = vld [vmem:[%s19590_s24 + $0x1c4] sm:$0x1]  ;;  %v20586_v15 = vld [vmem:[%s19590_s24 + $0x258] sm:$0xe] }
 0x17c   : > { %v15942_v48 = vcombine.low %v2181_v31, %v2185_v42  ;;  %v2224_v23 = vrot.slane %v20324_v17, 5  ;;  %v15901_v13 = vrot.slane %v20327_v18, 9  ;;  %v20357_v42 = vld [vmem:[%s19590_s24 + $0x168] sm:$0xe]  ;;  %v20531_v18 = vld [vmem:[%s19590_s24 + $0x230] sm:$0xe] }
 0x17d   : > { %8268 = vmatpush1.bf16.msra.mxu0 %v18898_v52  ;;  %v1885_v52 = vld [vmem:[%s19590_s24 + $0x108] sm:$0xe]  ;;  %26395 = vst [vmem:[#allocation8_spill] sm:$0xff] %v20586_v15 }
 0x17e   : > { %8269 = vmatprep.subr.bf16.mxu0 %v26258_v2  ;;  %v15894_v28 = vrot.slane %v1885_v52, 9  ;;  %v2217_v52 = vsel %vm20120_vm5, %v15898_v35, %v2216_v8  ;;  %v20497_v35 = vld [vmem:[%s19590_s24 + $0x204] sm:$0x1]  ;;  %v20513_v8 = vld [vmem:[%s19590_s24 + $0x208] sm:$0xe] }
 0x180   : > { %8037 = vmatmul.mubr.bf16.gmra.mrb[24].mxu0 %v15937_v46  ;;  %v15892_v46 = vrot.slane %v1881_v40, 9  ;;  %v20348_v40 = vld [vmem:[%s19590_s24 + $0x15c] sm:$0x1] }
 0x181   : > { %8044 = vmatprep.mubr.bf16.mxu0 %v18875_v43  ;;  %8270 = vmatpush1.bf16.msra.mxu0 %v18901_v59  ;;  %v15891_v43 = vrot.slane %v1879_v24, 9  ;;  %v15897_v59 = vrot.slane %v1891_v1, 9  ;;  %v15902_v24 = vrot.slane %v20333_v20, 9  ;;  %v20400_v1 = vld [vmem:[%s19590_s24 + $0x198] sm:$0xe] }
 0x182   : > { %8271 = vmatprep.subr.bf16.mxu0 %v26258_v2  ;;  %v2193_v53 = vsel %vm20120_vm5, %v15892_v46, %v2192_v47  ;;  %v20369_v46 = vld [vmem:[%s19590_s24 + $0x178] sm:$0xe]  ;;  %v20372_v47 = vld [vmem:[%s19590_s24 + $0x17c] sm:$0x1]  ;;  %v18891_v20 = vld [vmem:[%s19590_s24 + $0x168] ss:$8 sps:$4 sm:$0xff]  }
 0x183   : > { %v2189_v57 = vsel %vm20120_vm5, %v15891_v43, %v2188_v44  ;;  %v20360_v43 = vld [vmem:[%s19590_s24 + $0x16c] sm:$0x1]  ;;  %v20363_v44 = vld [vmem:[%s19590_s24 + $0x170] sm:$0xe]  ;;  %v2248_v58 = vrot.slane %v20372_v47, 5 }
 0x184   : > { %v15943_v33 = vcombine.low %v2189_v57, %v2193_v53  ;;  %v15903_v57 = vrot.slane %v20351_v41, 9  ;;  %v20574_v41 = vld [vmem:[%s19590_s24 + $0x248] sm:$0xe]  ;;  %v16063_v47 = vld [vmem:[%s19590_s24 + $0x18] sm:$0xf] }
 0x185   : > { %8272 = vmatpush1.bf16.msra.mxu0 %v18904_v29  ;;  %v20354_v29 = vld [vmem:[%s19590_s24 + $0x164] sm:$0x1] }
 0x186   : > { %8273 = vmatprep.subr.bf16.mxu0 %v26258_v2  ;;  %v2236_v53 = vrot.slane %v20354_v29, 5  ;;  %v20583_v29 = vld [vmem:[%s19590_s24 + $0x254] sm:$0x1] }
 0x187   : > { %26394 = vst [vmem:[#allocation7_spill] sm:$0xff] %v20583_v29  ;;  %v20631_v29 = vld [vmem:[%s19590_s24 + $0x8] sm:$0xe] }
 0x188   : > { %8045 = vmatmul.mubr.bf16.gmra.mrb[28].mxu0 %v15938_v51  ;;  %v2200_v51 = vrot.slane %v1886_v56, 5  ;;  %v2232_v56 = vrot.slane %v20348_v40, 5  ;;  %v20454_v40 = vld [vmem:[%s19590_s24 + $0x1c8] sm:$0xe]  ;;  %v2237_v17 = vsel %vm20120_vm5, %v15903_v57, %v2236_v53  ;;  %v18893_v57 = vld [vmem:[%s19590_s24 + $0x178] ss:$8 sps:$4 sm:$0xff]  }
 0x189   : > { %8052 = vmatprep.mubr.bf16.mxu0 %v18876_v50  ;;  %v2196_v50 = vrot.slane %v1884_v38, 5  ;;  %8274 = vmatpush1.bf16.msra.mxu0 %v18907_v3  ;;  %v2213_v38 = vsel %vm20120_vm5, %v15897_v59, %v2212_v34  ;;  %v20403_v3 = vld [vmem:[%s19590_s24 + $0x19c] sm:$0x1]  ;;  %v2221_v59 = vsel %vm20120_vm5, %v15899_v12, %v2220_v37  ;;  %v20484_v37 = vld [vmem:[%s19590_s24 + $0x200] sm:$0xe]  ;;  %26401 = vst [vmem:[#allocation14_spill] sm:$0xff] %v20631_v29 }
 0x18a   : > { %8275 = vmatprep.subr.bf16.mxu0 %v26258_v2  ;;  %v15946_v4 = vcombine.low %v2213_v38, %v2217_v52  ;;  %v20460_v38 = vld [vmem:[%s19590_s24 + $0x1e0] sm:$0xe]  ;;  %v20463_v52 = vld [vmem:[%s19590_s24 + $0x1e4] sm:$0x1]  ;;  %v20481_v12 = vld [vmem:[%s19590_s24 + $0x1fc] sm:$0x1] }
 0x18b   : > { %v2197_v9 = vsel %vm20120_vm5, %v15893_v36, %v2196_v50  ;;  %v18910_v36 = vld [vmem:[%s26250_s2 + $0x178] sm:$0xff]   ;;  %v15904_v50 = vrot.slane %v20357_v42, 9  ;;  %v20577_v53 = vld [vmem:[%s19590_s24 + $0x24c] sm:$0x1]  ;;  %v20599_v42 = vld [vmem:[%s19590_s24 + $0x268] sm:$0xe] }
 0x18c   : > { %v20540_v34 = vld [vmem:[%s19590_s24 + $0x23c] sm:$0x1]  ;;  %26399 = vst [vmem:[#allocation12_spill] sm:$0xff] %v20599_v42  ;;  %v16060_v42 = vld [vmem:[%s19590_s24 + $0xc] sm:$0x1] }
 0x18d   : > { %8276 = vmatpush1.bf16.msra.mxu0 %v18910_v36 }
 0x18e   : > { %8534 = vmatprep.subr.bf16.mxu0 %v26258_v2  ;;  %v20472_v2 = vld [vmem:[%s19590_s24 + $0x1f0] sm:$0xe] }
 0x190   : > { %8053 = vmatmul.mubr.bf16.gmra.mrb[32].mxu0 %v15939_v27  ;;  %v15896_v27 = vrot.slane %v1889_v63, 9  ;;  %v16061_v63 = vld [vmem:[%s19590_s24 + $0x10] sm:$0xf] }
 0x191   : > { %8060 = vmatprep.mubr.bf16.mxu0 %v18878_v55  ;;  %v2201_v55 = vsel %vm20120_vm5, %v15894_v28, %v2200_v51  ;;  %v15905_v28 = vrot.slane %v20363_v44, 9  ;;  %v18894_v44 = vld [vmem:[%s19590_s24 + $0x198] ss:$8 sps:$4 sm:$0xff]  }
 0x192   : > { %v15944_v60 = vcombine.low %v2197_v9, %v2201_v55  ;;  %v2209_v30 = vsel %vm20120_vm5, %v15896_v27, %v2208_v6  ;;  %v20406_v9 = vld [vmem:[%s19590_s24 + $0x1a0] sm:$0xe]  ;;  %v20409_v55 = vld [vmem:[%s19590_s24 + $0x1a4] sm:$0x1]  ;;  %v20416_v27 = vld [vmem:[%s19590_s24 + $0x1ac] sm:$0x1] }
 0x193   : > { %v15945_v31 = vcombine.low %v2205_v21, %v2209_v30  ;;  %v20422_v6 = vld [vmem:[%s19590_s24 + $0x1b4] sm:$0x1]  ;;  %v20525_v30 = vld [vmem:[%s19590_s24 + $0x218] sm:$0xe]  ;;  %v20558_v21 = vld [vmem:[%s19590_s24 + $0x244] sm:$0x1] }
 0x198   : > { %8061 = vmatmul.mubr.bf16.gmra.mrb[36].mxu0 %v15940_v19  ;;  %v20330_v19 = vld [vmem:[%s19590_s24 + $0x154] sm:$0x1] }
 0x199   : > { %8068 = vmatprep.mubr.bf16.mxu0 %v18879_v16  ;;  %v20321_v16 = vld [vmem:[%s19590_s24 + $0x148] sm:$0xe] }
 0x1a0   : > { %8069 = vmatmul.mubr.bf16.gmra.mrb[40].mxu0 %v15941_v22  ;;  %v2228_v22 = vrot.slane %v20330_v19, 5  ;;  %v20522_v19 = vld [vmem:[%s19590_s24 + $0x214] sm:$0x1] }
 0x1a1   : > { %8076 = vmatprep.mubr.bf16.mxu0 %v18881_v39  ;;  %v15900_v39 = vrot.slane %v20321_v16, 9  ;;  %v20596_v16 = vld [vmem:[%s19590_s24 + $0x264] sm:$0x1] }
 0x1a2   : > { %26398 = vst [vmem:[#allocation11_spill] sm:$0xff] %v20596_v16  ;;  %v26407_v16 = vrot.slane %v20400_v1, 9 }
 0x1a8   : > { %8077 = vmatmul.mubr.bf16.gmra.mrb[44].mxu0 %v15942_v48  ;;  %v20375_v48 = vld [vmem:[%s19590_s24 + $0x190] sm:$0xe] }
 0x1a9   : > { %8084 = vmatprep.mubr.bf16.mxu0 %v18882_v45  ;;  %v20366_v45 = vld [vmem:[%s19590_s24 + $0x174] sm:$0x1] }
 0x1aa   : > { %v2244_v51 = vrot.slane %v20366_v45, 5  ;;  %v2941_v45 = vshll.u32 %v16061_v63, 16 }
 0x1b0   : > { %8085 = vmatmul.mubr.bf16.gmra.mrb[48].mxu0 %v15943_v33  ;;  %v15906_v33 = vrot.slane %v20369_v46, 9  ;;  %v16065_v46 = vld [vmem:[%s19590_s24 + $0x20] sm:$0xf] }
 0x1b1   : > { %8092 = vmatprep.mubr.bf16.mxu0 %v18884_v54  ;;  %v2240_v54 = vrot.slane %v20360_v43, 5  ;;  %v20592_v43 = vld [vmem:[%s19590_s24 + $0x260] sm:$0xe]  ;;  %v2969_v62 = vshll.u32 %v16065_v46, 16 }
 0x1b2   : > { %26397 = vst [vmem:[#allocation10_spill] sm:$0xff] %v20592_v43  ;;  %v26406_v43 = vrot.slane %v20403_v3, 5  ;;  %v2933_v3 = vshll.u32 %v16060_v42, 16  ;;  %v20670_v42 = vld [vmem:[%s19590_s24 + $0x20] sm:$0xe] }
 0x1b8   : > { %8093 = vmatmul.mubr.bf16.gmra.mrb[52].mxu0 %v15944_v60  ;;  %v2225_v60 = vsel %vm20120_vm5, %v15900_v39, %v2224_v23  ;;  %v20475_v39 = vld [vmem:[%s19590_s24 + $0x1f4] sm:$0x1]  ;;  %v20478_v23 = vld [vmem:[%s19590_s24 + $0x1f8] sm:$0xe] }
 0x1b9   : > { %8100 = vmatprep.mubr.bf16.mxu0 %v18885_v32  ;;  %v20419_v32 = vld [vmem:[%s19590_s24 + $0x1b0] sm:$0xe]  ;;  %v15947_v36 = vcombine.low %v2221_v59, %v2225_v60  ;;  %v2229_v59 = vsel %vm20120_vm5, %v15901_v13, %v2228_v22  ;;  %v2233_v60 = vsel %vm20120_vm5, %v15902_v24, %v2232_v56  ;;  %v20516_v22 = vld [vmem:[%s19590_s24 + $0x20c] sm:$0x1]  ;;  %v20534_v13 = vld [vmem:[%s19590_s24 + $0x234] sm:$0x1] }
 0x1ba   : > { %v20519_v24 = vld [vmem:[%s19590_s24 + $0x210] sm:$0xe]  ;;  %v15948_v56 = vcombine.low %v2229_v59, %v2233_v60  ;;  %v2241_v59 = vsel %vm20120_vm5, %v15904_v50, %v2240_v54  ;;  %v20555_v60 = vld [vmem:[%s19590_s24 + $0x240] sm:$0xe] }
 0x1bb   : > { %26392 = vst [vmem:[#allocation5_spill] sm:$0xff] %v20555_v60  ;;  %v20580_v50 = vld [vmem:[%s19590_s24 + $0x250] sm:$0xe]  ;;  %v15949_v54 = vcombine.low %v2237_v17, %v2241_v59  ;;  %v2245_v17 = vsel %vm20120_vm5, %v15905_v28, %v2244_v51  ;;  %v2249_v59 = vsel %vm20120_vm5, %v15906_v33, %v2248_v58  ;;  %v2938_v28 = vshrl.u32 %v16061_v63, 16  ;;  %v20634_v33 = vld [vmem:[%s19590_s24 + $0xc] sm:$0x1] }
 0x1bc   : > { %26393 = vst [vmem:[#allocation6_spill] sm:$0xff] %v20580_v50  ;;  %v15950_v15 = vcombine.low %v2245_v17, %v2249_v59  ;;  %26402 = vst [vmem:[#allocation15_spill] sm:$0xff] %v20634_v33  ;;  %v20637_v58 = vld [vmem:[%s19590_s24 + $0x10] sm:$0xe]  ;;  %v2952_v51 = vshrl.u32 %v16063_v47, 16  ;;  %v26405_v17 = vrot.slane %v20375_v48, 9 }
 0x1bd   : > { %26403 = vst [vmem:[#allocation16_spill] sm:$0xff] %v20637_v58  ;;  %v2940_v63 = vrot.slane %v2938_v28, 4  ;;  %v20667_v58 = vld [vmem:[%s19590_s24 + $0x1c] sm:$0x1] }
 0x1be   : > { %v2954_v1 = vrot.slane %v2952_v51, 4  ;;  %v20673_v51 = vld [vmem:[%s19590_s24 + $0x24] sm:$0x1] }
 0x1c0   : > { %8101 = vmatmul.mubr.bf16.gmra.mrb[56].mxu0 %v15945_v31  ;;  %v20457_v31 = vld [vmem:[%s19590_s24 + $0x1cc] sm:$0x1] }
 0x1c1   : > { %8108 = vmatprep.mubr.bf16.mxu0 %v18887_v26  ;;  %v18890_v26 = vld [vmem:[%s19590_s24 + $0x158] ss:$8 sps:$4 sm:$0xff]  }
 0x1c8   : > { %8109 = vmatmul.mubr.bf16.gmra.mrb[60].mxu0 %v15946_v4  ;;  %v20469_v4 = vld [vmem:[%s19590_s24 + $0x1ec] sm:$0x1] }
 0x1c9   : > { %8116 = vmatprep.mubr.bf16.mxu0 %v18888_v0  ;;  %v20466_v0 = vld [vmem:[%s19590_s24 + $0x1e8] sm:$0xe] }
 0x1d0   : > { %8117 = vmatmul.mubr.bf16.gmra.mrb[64].mxu0 %v15947_v36  ;;  %v20528_v36 = vld [vmem:[%s19590_s24 + $0x21c] sm:$0x1] }
 0x1d1   : > { %8124 = vmatprep.mubr.bf16.mxu0 %v18890_v26  ;;  %v20537_v26 = vld [vmem:[%s19590_s24 + $0x238] sm:$0xe] }
 0x1d8   : > { %8125 = vmatmul.mubr.bf16.gmra.mrb[68].mxu0 %v15948_v56  ;;  %v20589_v56 = vld [vmem:[%s19590_s24 + $0x25c] sm:$0x1] }
 0x1d9   : > { %8132 = vmatprep.mubr.bf16.mxu0 %v18891_v20  ;;  %26396 = vst [vmem:[#allocation9_spill] sm:$0xff] %v20589_v56  ;;  %v16059_v20 = vld [vmem:[%s19590_s24 + $0x8] sm:$0xf]  ;;  %v2971_v56 = vrot.slane %v2969_v62, 5 }
 0x1da   : > { %v2924_v25 = vshrl.u32 %v16059_v20, 16  ;;  %v2927_v60 = vshll.u32 %v16059_v20, 16  ;;  %v2966_v20 = vshrl.u32 %v16065_v46, 16  ;;  %v20653_v46 = vld [vmem:[%s19590_s24 + $0x14] sm:$0x1] }
 0x1db   : > { %26408 = vst [vmem:[#allocation17_spill] sm:$0xff] %v20653_v46  ;;  %v26412_v46 = vrot.slane %v20413_v5, 9  ;;  %v20716_v5 = vld [vmem:[%s19590_s24 + $0x2c] sm:$0x1] }
 0x1dc   : > { %v2929_v50 = vrot.slane %v2927_v60, 5  ;;  %v26404_v60 = vrot.slane %v20378_v49, 5  ;;  %v16062_v49 = vld [vmem:[%s19590_s24 + $0x14] sm:$0x1]  ;;  %26418 = vst [vmem:[#allocation23_spill] sm:$0xff] %v20716_v5 }
 0x1dd   : > { %v2947_v33 = vshll.u32 %v16062_v49, 16  ;;  %v26410_v49 = vrot.slane %v20406_v9, 9 }
 0x1de   : > { %v2253_v59 = vsel %vm20120_vm5, %v26405_v17, %v26404_v60  ;;  %v16064_v17 = vld [vmem:[%s19590_s24 + $0x1c] sm:$0x1] }
 0x1e0   : > { %8133 = vmatmul.mubr.bf16.gmra.mrb[72].mxu0 %v15949_v54  ;;  %v2955_v54 = vshll.u32 %v16063_v47, 16  ;;  %v2257_v47 = vsel %vm20120_vm5, %v26407_v16, %v26406_v43  ;;  %v16066_v16 = vld [vmem:[%s19590_s24 + $0x24] sm:$0x1]  ;;  %v2968_v43 = vrot.slane %v2966_v20, 4 }
 0x1e1   : > { %8140 = vmatprep.mubr.bf16.mxu0 %v18893_v57  ;;  %v2926_v57 = vrot.slane %v2924_v25, 4  ;;  %v2943_v25 = vrot.slane %v2941_v45, 5  ;;  %v18896_v45 = vld [vmem:[%s19590_s24 + $0x1a8] ss:$8 sps:$4 sm:$0xff]   ;;  %v15951_v48 = vcombine.low %v2253_v59, %v2257_v47  ;;  %v2975_v20 = vshll.u32 %v16066_v16, 16 }
 0x1e2   : > { %v2957_v28 = vrot.slane %v2955_v54, 5  ;;  %v2961_v54 = vshll.u32 %v16064_v17, 16  ;;  %v26411_v47 = vrot.slane %v20416_v27, 5  ;;  %v16073_v27 = vld [vmem:[%s19590_s24 + $0x40] sm:$0xf] }
 0x1e3   : > { %v2930_v60 = vor.u32 %v2929_v50, %v2926_v57  ;;  %v2944_v29 = vor.u32 %v2943_v25, %v2940_v63  ;;  %v20677_v57 = vrot.slane %v2933_v3, 5  ;;  %v16067_v63 = vld [vmem:[%s19590_s24 + $0x28] sm:$0xf]  ;;  %v26409_v25 = vrot.slane %v20409_v55, 5 }
 0x1e4   : > { %v2958_v50 = vor.u32 %v2957_v28, %v2954_v1  ;;  %v2265_v1 = vsel %vm20120_vm5, %v26412_v46, %v26411_v47  ;;  %v20694_v3 = vrot.slane %v2947_v33, 5  ;;  %v20703_v33 = vrot.slane %v2961_v54, 5  ;;  %v20712_v47 = vld [vmem:[%s19590_s24 + $0x28] sm:$0xe]  ;;  %v16068_v54 = vld [vmem:[%s19590_s24 + $0x2c] sm:$0x1] }
 0x1e5   : > { %v20675_v62 = vrot.slane %v2930_v60, 4  ;;  %v2261_v59 = vsel %vm20120_vm5, %v26410_v49, %v26409_v25  ;;  %v20692_v28 = vrot.slane %v2944_v29, 4  ;;  %v20705_v46 = vrot.slane %v2975_v20, 5  ;;  %v16071_v25 = vld [vmem:[%s19590_s24 + $0x38] sm:$0xf]  ;;  %26417 = vst [vmem:[#allocation22_spill] sm:$0xff] %v20712_v47 }
 0x1e6   : > { %v20701_v29 = vrot.slane %v2958_v50, 4  ;;  %26414 = vst [vmem:[#allocation19_spill] sm:$0xff] %v20703_v33  ;;  %v2983_v17 = vshll.u32 %v16067_v63, 16  ;;  %v18897_v49 = vld [vmem:[%s19590_s24 + $0x1b8] ss:$8 sps:$4 sm:$0xff]   ;;  %v3008_v20 = vshrl.u32 %v16071_v25, 16 }
 0x1e7   : > { %26415 = vst [vmem:[#allocation20_spill] sm:$0xff] %v20705_v46  ;;  %v20719_v50 = vld [vmem:[%s19590_s24 + $0x30] sm:$0xe]  ;;  %v3011_v9 = vshll.u32 %v16071_v25, 16  ;;  %v26422_v33 = vrot.slane %v20428_v7, 5  ;;  %v26423_v25 = vrot.slane %v20425_v10, 9 }
 0x1e8   : > { %8141 = vmatmul.mubr.bf16.gmra.mrb[76].mxu0 %v15950_v15  ;;  %v2972_v15 = vor.u32 %v2971_v56, %v2968_v43  ;;  %v16069_v56 = vld [vmem:[%s19590_s24 + $0x30] sm:$0xf]  ;;  %26413 = vst [vmem:[#allocation18_spill] sm:$0xff] %v20701_v29  ;;  %26419 = vst [vmem:[#allocation24_spill] sm:$0xff] %v20719_v50  ;;  %v2985_v55 = vrot.slane %v2983_v17, 5  ;;  %v26420_v29 = vrot.slane %v20422_v6, 5 }
 0x1e9   : > { %8148 = vmatprep.mubr.bf16.mxu0 %v18894_v44  ;;  %v20664_v44 = vld [vmem:[%s19590_s24 + $0x18] sm:$0xe]  ;;  %v2994_v16 = vshrl.u32 %v16069_v56, 16  ;;  %v2997_v43 = vshll.u32 %v16069_v56, 16  ;;  %v16070_v6 = vld [vmem:[%s19590_s24 + $0x34] sm:$0x1] }
 0x1ea   : > { %v20707_v60 = vrot.slane %v2972_v15, 4  ;;  %v2989_v7 = vshll.u32 %v16068_v54, 16  ;;  %v3010_v10 = vrot.slane %v3008_v20, 4  ;;  %v18899_v17 = vld [vmem:[%s19590_s24 + $0x1c8] ss:$8 sps:$4 sm:$0xff]   ;;  %v3003_v5 = vshll.u32 %v16070_v6, 16 }
 0x1eb   : > { %v2996_v56 = vrot.slane %v2994_v16, 4  ;;  %v2999_v46 = vrot.slane %v2997_v43, 5  ;;  %v20749_v50 = vld [vmem:[%s19590_s24 + $0x3c] sm:$0x1]  ;;  %v20752_v54 = vld [vmem:[%s19590_s24 + $0x40] sm:$0xe] }
 0x1ec   : > { %26416 = vst [vmem:[#allocation21_spill] sm:$0xff] %v20707_v60  ;;  %v3025_v60 = vshll.u32 %v16073_v27, 16  ;;  %v26426_v6 = vrot.slane %v20435_v61, 9 }
 0x1ed   : > { %v3000_v47 = vor.u32 %v2999_v46, %v2996_v56  ;;  %v16075_v46 = vld [vmem:[%s19590_s24 + $0x58] sm:$0xf]  ;;  %v26425_v56 = vrot.slane %v20438_v14, 5 }
 0x1f0   : > { %8149 = vmatmul.mubr.bf16.gmra.mrb[80].mxu0 %v15951_v48  ;;  %v2980_v48 = vshrl.u32 %v16067_v63, 16  ;;  %v3022_v63 = vshrl.u32 %v16073_v27, 16  ;;  %v2273_v27 = vsel %vm20120_vm5, %v26423_v25, %v26422_v33  ;;  %v16074_v33 = vld [vmem:[%s19590_s24 + $0x44] sm:$0x1]  ;;  %v3027_v25 = vrot.slane %v3025_v60, 5 }
 0x1f1   : > { %8156 = vmatprep.mubr.bf16.mxu0 %v18896_v45  ;;  %v15952_v45 = vcombine.low %v2261_v59, %v2265_v1  ;;  %v26421_v59 = vrot.slane %v20419_v32, 9 }
 0x1f2   : > { %v2982_v15 = vrot.slane %v2980_v48, 4  ;;  %v20735_v48 = vld [vmem:[%s19590_s24 + $0x34] sm:$0x1] }
 0x1f3   : > { %v2269_v1 = vsel %vm20120_vm5, %v26421_v59, %v26420_v29  ;;  %26424 = vst [vmem:[#allocation25_spill] sm:$0xff] %v20735_v48  ;;  %v3013_v29 = vrot.slane %v3011_v9, 5  ;;  %v3024_v59 = vrot.slane %v3022_v63, 4  ;;  %v20755_v9 = vld [vmem:[%s19590_s24 + $0x44] sm:$0x1]  ;;  %v20759_v63 = vrot.slane %v2989_v7, 5 }
 0x1f4   : > { %v2986_v43 = vor.u32 %v2985_v55, %v2982_v15  ;;  %v15953_v32 = vcombine.low %v2269_v1, %v2273_v27  ;;  %v3031_v15 = vshll.u32 %v16074_v33, 16  ;;  %v2277_v1 = vsel %vm20120_vm5, %v26426_v6, %v26425_v56  ;;  %v16079_v56 = vld [vmem:[%s19590_s24 + $0x68] sm:$0xf] }
 0x1f5   : > { %v3014_v55 = vor.u32 %v3013_v29, %v3010_v10  ;;  %v3028_v16 = vor.u32 %v3027_v25, %v3024_v59  ;;  %v26427_v27 = vrot.slane %v20457_v31, 5  ;;  %v26428_v48 = vrot.slane %v20454_v40, 9  ;;  %v18900_v6 = vld [vmem:[%s19590_s24 + $0x1e8] ss:$8 sps:$4 sm:$0xff]   ;;  %v20798_v40 = vld [vmem:[%s19590_s24 + $0x5c] sm:$0x1] }
 0x1f6   : > { %v20757_v60 = vrot.slane %v2986_v43, 4  ;;  %v20774_v29 = vrot.slane %v3000_v47, 4  ;;  %v20776_v7 = vrot.slane %v3003_v5, 5  ;;  %v16077_v43 = vld [vmem:[%s19590_s24 + $0x60] sm:$0xf]  ;;  %v3039_v33 = vshll.u32 %v16075_v46, 16 }
 0x1f7   : > { %v2281_v10 = vsel %vm20120_vm5, %v26428_v48, %v26427_v27  ;;  %v20783_v5 = vrot.slane %v3014_v55, 4  ;;  %v20787_v48 = vrot.slane %v3031_v15, 5  ;;  %v3050_v59 = vshrl.u32 %v16077_v43, 16  ;;  %v20794_v27 = vld [vmem:[%s19590_s24 + $0x58] sm:$0xe]  ;;  %26434 = vst [vmem:[#allocation31_spill] sm:$0xff] %v20798_v40 }
 0x1f8   : > { %8157 = vmatmul.mubr.bf16.gmra.mrb[84].mxu0 %v15952_v45  ;;  %v16072_v45 = vld [vmem:[%s19590_s24 + $0x3c] sm:$0x1]  ;;  %v3053_v25 = vshll.u32 %v16077_v43, 16  ;;  %26433 = vst [vmem:[#allocation30_spill] sm:$0xff] %v20794_v27  ;;  %v16081_v31 = vld [vmem:[%s19590_s24 + $0x70] sm:$0xf] }
 0x1f9   : > { %8164 = vmatprep.mubr.bf16.mxu0 %v18897_v49  ;;  %v20746_v49 = vld [vmem:[%s19590_s24 + $0x38] sm:$0xe]  ;;  %v3017_v20 = vshll.u32 %v16072_v45, 16  ;;  %26429 = vst [vmem:[#allocation26_spill] sm:$0xff] %v20783_v5  ;;  %26431 = vst [vmem:[#allocation28_spill] sm:$0xff] %v20787_v48  ;;  %v20789_v45 = vrot.slane %v3028_v16, 4 }
 0x1fa   : > { %v20801_v55 = vld [vmem:[%s19590_s24 + $0x60] sm:$0xe]  ;;  %v3064_v15 = vshrl.u32 %v16079_v56, 16  ;;  %v3067_v61 = vshll.u32 %v16079_v56, 16  ;;  %v3041_v14 = vrot.slane %v3039_v33, 5  ;;  %v3052_v43 = vrot.slane %v3050_v59, 4 }
 0x1fb   : > { %v20785_v47 = vrot.slane %v3017_v20, 5  ;;  %26432 = vst [vmem:[#allocation29_spill] sm:$0xff] %v20789_v45  ;;  %26435 = vst [vmem:[#allocation32_spill] sm:$0xff] %v20801_v55  ;;  %v16076_v20 = vld [vmem:[%s19590_s24 + $0x5c] sm:$0x1]  ;;  %v3081_v45 = vshll.u32 %v16081_v31, 16 }
 0x1fc   : > { %v3055_v48 = vrot.slane %v3053_v25, 5  ;;  %v26436_v5 = vrot.slane %v20463_v52, 5  ;;  %v26439_v56 = vrot.slane %v20466_v0, 9  ;;  %v16078_v52 = vld [vmem:[%s19590_s24 + $0x64] sm:$0x1]  ;;  %v3066_v0 = vrot.slane %v3064_v15, 4 }
 0x1fd   : > { %26430 = vst [vmem:[#allocation27_spill] sm:$0xff] %v20785_v47  ;;  %v26438_v47 = vrot.slane %v20469_v4, 5  ;;  %v3045_v4 = vshll.u32 %v16076_v20, 16  ;;  %v18902_v33 = vld [vmem:[%s19590_s24 + $0x1f8] ss:$8 sps:$4 sm:$0xff]   ;;  %v3059_v40 = vshll.u32 %v16078_v52, 16 }
 0x1fe   : > { %v3056_v27 = vor.u32 %v3055_v48, %v3052_v43  ;;  %v20831_v55 = vld [vmem:[%s19590_s24 + $0x6c] sm:$0x1]  ;;  %v20834_v20 = vld [vmem:[%s19590_s24 + $0x70] sm:$0xe]  ;;  %v16083_v48 = vld [vmem:[%s19590_s24 + $0x78] sm:$0xf] }
 0x1ff   : > { %v26441_v43 = vrot.slane %v20475_v39, 5  ;;  %v26442_v52 = vrot.slane %v20472_v2, 9 }
 0x200   : > { %8165 = vmatmul.mubr.bf16.gmra.mrb[88].mxu0 %v15953_v32  ;;  %v3036_v32 = vshrl.u32 %v16075_v46, 16  ;;  %v3078_v46 = vshrl.u32 %v16081_v31, 16  ;;  %v2289_v31 = vsel %vm20120_vm5, %v26439_v56, %v26438_v47  ;;  %v16082_v47 = vld [vmem:[%s19590_s24 + $0x74] sm:$0x1]  ;;  %v3083_v56 = vrot.slane %v3081_v45, 5 }
 0x201   : > { %8172 = vmatprep.mubr.bf16.mxu0 %v18899_v17  ;;  %v15954_v17 = vcombine.low %v2277_v1, %v2281_v10  ;;  %v26437_v1 = vrot.slane %v20460_v38, 9 }
 0x202   : > { %v3038_v16 = vrot.slane %v3036_v32, 4  ;;  %v20817_v32 = vld [vmem:[%s19590_s24 + $0x64] sm:$0x1] }
 0x203   : > { %v2285_v10 = vsel %vm20120_vm5, %v26437_v1, %v26436_v5  ;;  %26440 = vst [vmem:[#allocation33_spill] sm:$0xff] %v20817_v32  ;;  %v3069_v5 = vrot.slane %v3067_v61, 5  ;;  %v3080_v1 = vrot.slane %v3078_v46, 4  ;;  %v20837_v61 = vld [vmem:[%s19590_s24 + $0x74] sm:$0x1]  ;;  %v20841_v46 = vrot.slane %v3045_v4, 5 }
 0x204   : > { %v3042_v25 = vor.u32 %v3041_v14, %v3038_v16  ;;  %v15955_v38 = vcombine.low %v2285_v10, %v2289_v31  ;;  %v3087_v16 = vshll.u32 %v16082_v47, 16  ;;  %v2293_v10 = vsel %vm20120_vm5, %v26442_v52, %v26441_v43  ;;  %v16087_v43 = vld [vmem:[%s19590_s24 + $0x88] sm:$0xf] }
 0x205   : > { %v3070_v14 = vor.u32 %v3069_v5, %v3066_v0  ;;  %v3084_v59 = vor.u32 %v3083_v56, %v3080_v1  ;;  %v26443_v31 = vrot.slane %v20481_v12, 5  ;;  %v26444_v32 = vrot.slane %v20478_v23, 9  ;;  %v18903_v52 = vld [vmem:[%s19590_s24 + $0x208] ss:$8 sps:$4 sm:$0xff]   ;;  %v20880_v23 = vld [vmem:[%s19590_s24 + $0x7c] sm:$0x1] }
 0x206   : > { %v20839_v45 = vrot.slane %v3042_v25, 4  ;;  %v20856_v5 = vrot.slane %v3056_v27, 4  ;;  %v20858_v4 = vrot.slane %v3059_v40, 5  ;;  %v16085_v25 = vld [vmem:[%s19590_s24 + $0x80] sm:$0xf]  ;;  %v3095_v47 = vshll.u32 %v16083_v48, 16 }
 0x207   : > { %v2297_v0 = vsel %vm20120_vm5, %v26444_v32, %v26443_v31  ;;  %v20865_v40 = vrot.slane %v3070_v14, 4  ;;  %v20869_v32 = vrot.slane %v3087_v16, 5  ;;  %v3106_v1 = vshrl.u32 %v16085_v25, 16  ;;  %v20876_v31 = vld [vmem:[%s19590_s24 + $0x78] sm:$0xe]  ;;  %26450 = vst [vmem:[#allocation39_spill] sm:$0xff] %v20880_v23 }
 0x208   : > { %8173 = vmatmul.mubr.bf16.gmra.mrb[92].mxu0 %v15954_v17  ;;  %v16080_v17 = vld [vmem:[%s19590_s24 + $0x6c] sm:$0x1]  ;;  %v3109_v56 = vshll.u32 %v16085_v25, 16  ;;  %26449 = vst [vmem:[#allocation38_spill] sm:$0xff] %v20876_v31  ;;  %v16089_v12 = vld [vmem:[%s19590_s24 + $0x90] sm:$0xf] }
 0x209   : > { %8180 = vmatprep.mubr.bf16.mxu0 %v18900_v6  ;;  %v20828_v6 = vld [vmem:[%s19590_s24 + $0x68] sm:$0xe]  ;;  %v3073_v15 = vshll.u32 %v16080_v17, 16  ;;  %26445 = vst [vmem:[#allocation34_spill] sm:$0xff] %v20865_v40  ;;  %26447 = vst [vmem:[#allocation36_spill] sm:$0xff] %v20869_v32  ;;  %v20871_v17 = vrot.slane %v3084_v59, 4 }
 0x20a   : > { %v20883_v14 = vld [vmem:[%s19590_s24 + $0x80] sm:$0xe]  ;;  %v3120_v16 = vshrl.u32 %v16087_v43, 16  ;;  %v3123_v2 = vshll.u32 %v16087_v43, 16  ;;  %v3097_v39 = vrot.slane %v3095_v47, 5  ;;  %v3108_v25 = vrot.slane %v3106_v1, 4 }
 0x20b   : > { %v20867_v27 = vrot.slane %v3073_v15, 5  ;;  %26448 = vst [vmem:[#allocation37_spill] sm:$0xff] %v20871_v17  ;;  %26451 = vst [vmem:[#allocation40_spill] sm:$0xff] %v20883_v14  ;;  %v16084_v15 = vld [vmem:[%s19590_s24 + $0x7c] sm:$0x1]  ;;  %v3137_v17 = vshll.u32 %v16089_v12, 16 }
 0x20c   : > { %v3111_v32 = vrot.slane %v3109_v56, 5  ;;  %v26452_v40 = vrot.slane %v20497_v35, 5  ;;  %v26455_v43 = vrot.slane %v20513_v8, 9  ;;  %v16086_v35 = vld [vmem:[%s19590_s24 + $0x84] sm:$0x1]  ;;  %v3122_v8 = vrot.slane %v3120_v16, 4 }
 0x20d   : > { %26446 = vst [vmem:[#allocation35_spill] sm:$0xff] %v20867_v27  ;;  %v26454_v27 = vrot.slane %v20516_v22, 5  ;;  %v3101_v22 = vshll.u32 %v16084_v15, 16  ;;  %v18905_v47 = vld [vmem:[%s19590_s24 + $0x218] ss:$8 sps:$4 sm:$0xff]   ;;  %v3115_v23 = vshll.u32 %v16086_v35, 16 }
 0x20e   : > { %v3112_v31 = vor.u32 %v3111_v32, %v3108_v25  ;;  %v20913_v14 = vld [vmem:[%s19590_s24 + $0x8c] sm:$0x1]  ;;  %v20916_v15 = vld [vmem:[%s19590_s24 + $0x90] sm:$0xe]  ;;  %v16091_v32 = vld [vmem:[%s19590_s24 + $0xa8] sm:$0xf] }
 0x20f   : > { %26458 = vst [vmem:[#allocation43_spill] sm:$0xff] %v20913_v14  ;;  %26459 = vst [vmem:[#allocation44_spill] sm:$0xff] %v20916_v15  ;;  %v26461_v25 = vrot.slane %v20522_v19, 5  ;;  %v26462_v35 = vrot.slane %v20519_v24, 9  ;;  %v26487_v15 = vrot.slane %v20574_v41, 9 }
 0x210   : > { %8181 = vmatmul.mubr.bf16.gmra.mrb[96].mxu0 %v15955_v38  ;;  %v3092_v38 = vshrl.u32 %v16083_v48, 16  ;;  %v3134_v48 = vshrl.u32 %v16089_v12, 16  ;;  %v2305_v12 = vsel %vm20120_vm5, %v26455_v43, %v26454_v27  ;;  %v16090_v27 = vld [vmem:[%s19590_s24 + $0x94] sm:$0x1]  ;;  %v3139_v43 = vrot.slane %v3137_v17, 5 }
 0x211   : > { %8188 = vmatprep.mubr.bf16.mxu0 %v18902_v33  ;;  %v15956_v33 = vcombine.low %v2293_v10, %v2297_v0  ;;  %v26453_v10 = vrot.slane %v20484_v37, 9  ;;  %v16109_v14 = vld [vmem:[%s19590_s24 + $0x100] sm:$0xf] }
 0x212   : > { %v3094_v59 = vrot.slane %v3092_v38, 4  ;;  %v20899_v38 = vld [vmem:[%s19590_s24 + $0x84] sm:$0x1] }
 0x213   : > { %v2301_v0 = vsel %vm20120_vm5, %v26453_v10, %v26452_v40  ;;  %26456 = vst [vmem:[#allocation41_spill] sm:$0xff] %v20899_v38  ;;  %v3125_v40 = vrot.slane %v3123_v2, 5  ;;  %v3136_v10 = vrot.slane %v3134_v48, 4  ;;  %v20919_v2 = vld [vmem:[%s19590_s24 + $0x94] sm:$0x1]  ;;  %v20923_v48 = vrot.slane %v3101_v22, 5 }
 0x214   : > { %v3098_v56 = vor.u32 %v3097_v39, %v3094_v59  ;;  %v15957_v37 = vcombine.low %v2301_v0, %v2305_v12  ;;  %26460 = vst [vmem:[#allocation45_spill] sm:$0xff] %v20919_v2  ;;  %v3143_v59 = vshll.u32 %v16090_v27, 16  ;;  %v2309_v0 = vsel %vm20120_vm5, %v26462_v35, %v26461_v25  ;;  %v16095_v25 = vld [vmem:[%s19590_s24 + $0xb8] sm:$0xf] }
 0x215   : > { %v3126_v39 = vor.u32 %v3125_v40, %v3122_v8  ;;  %v3140_v1 = vor.u32 %v3139_v43, %v3136_v10  ;;  %v26463_v12 = vrot.slane %v20528_v36, 5  ;;  %v26464_v38 = vrot.slane %v20525_v30, 9  ;;  %v18906_v35 = vld [vmem:[%s19590_s24 + $0x238] ss:$8 sps:$4 sm:$0xff]   ;;  %v20962_v30 = vld [vmem:[%s19590_s24 + $0xac] sm:$0x1] }
 0x216   : > { %v20921_v17 = vrot.slane %v3098_v56, 4  ;;  %v20938_v40 = vrot.slane %v3112_v31, 4  ;;  %v20940_v22 = vrot.slane %v3115_v23, 5  ;;  %v16093_v56 = vld [vmem:[%s19590_s24 + $0xb0] sm:$0xf]  ;;  %v3151_v27 = vshll.u32 %v16091_v32, 16 }
 0x217   : > { %v2313_v8 = vsel %vm20120_vm5, %v26464_v38, %v26463_v12  ;;  %v20947_v23 = vrot.slane %v3126_v39, 4  ;;  %v20951_v38 = vrot.slane %v3143_v59, 5  ;;  %v3162_v10 = vshrl.u32 %v16093_v56, 16  ;;  %v20958_v12 = vld [vmem:[%s19590_s24 + $0xa8] sm:$0xe]  ;;  %26470 = vst [vmem:[#allocation51_spill] sm:$0xff] %v20962_v30 }
 0x218   : > { %8189 = vmatmul.mubr.bf16.gmra.mrb[100].mxu0 %v15956_v33  ;;  %v16088_v33 = vld [vmem:[%s19590_s24 + $0x8c] sm:$0x1]  ;;  %v3165_v43 = vshll.u32 %v16093_v56, 16  ;;  %26469 = vst [vmem:[#allocation50_spill] sm:$0xff] %v20958_v12  ;;  %v16097_v36 = vld [vmem:[%s19590_s24 + $0xc0] sm:$0xf] }
 0x219   : > { %8196 = vmatprep.mubr.bf16.mxu0 %v18903_v52  ;;  %v20910_v52 = vld [vmem:[%s19590_s24 + $0x88] sm:$0xe]  ;;  %v3129_v16 = vshll.u32 %v16088_v33, 16  ;;  %26465 = vst [vmem:[#allocation46_spill] sm:$0xff] %v20947_v23  ;;  %26467 = vst [vmem:[#allocation48_spill] sm:$0xff] %v20951_v38  ;;  %v20953_v33 = vrot.slane %v3140_v1, 4 }
 0x21a   : > { %26457 = vst [vmem:[#allocation42_spill] sm:$0xff] %v20910_v52  ;;  %v20965_v39 = vld [vmem:[%s19590_s24 + $0xb0] sm:$0xe]  ;;  %v3176_v59 = vshrl.u32 %v16095_v25, 16  ;;  %v3179_v19 = vshll.u32 %v16095_v25, 16  ;;  %v3153_v24 = vrot.slane %v3151_v27, 5 }
 0x21b   : > { %v20949_v31 = vrot.slane %v3129_v16, 5  ;;  %26468 = vst [vmem:[#allocation49_spill] sm:$0xff] %v20953_v33  ;;  %26471 = vst [vmem:[#allocation52_spill] sm:$0xff] %v20965_v39  ;;  %v16092_v16 = vld [vmem:[%s19590_s24 + $0xac] sm:$0x1]  ;;  %v3193_v33 = vshll.u32 %v16097_v36, 16 }
 0x21c   : > { %v3164_v56 = vrot.slane %v3162_v10, 4  ;;  %v3167_v38 = vrot.slane %v3165_v43, 5  ;;  %v26472_v23 = vrot.slane %v20534_v13, 5  ;;  %v26475_v25 = vrot.slane %v20537_v26, 9  ;;  %v16094_v13 = vld [vmem:[%s19590_s24 + $0xb4] sm:$0x1] }
 0x21d   : > { %26466 = vst [vmem:[#allocation47_spill] sm:$0xff] %v20949_v31  ;;  %v26474_v31 = vrot.slane %v20540_v34, 5  ;;  %v3157_v34 = vshll.u32 %v16092_v16, 16  ;;  %v3178_v26 = vrot.slane %v3176_v59, 4  ;;  %v18908_v27 = vld [vmem:[%s19590_s24 + $0x248] ss:$8 sps:$4 sm:$0xff]  }
 0x21e   : > { %v3168_v12 = vor.u32 %v3167_v38, %v3164_v56  ;;  %v3171_v30 = vshll.u32 %v16094_v13, 16  ;;  %v20995_v39 = vld [vmem:[%s19590_s24 + $0xbc] sm:$0x1]  ;;  %v20998_v16 = vld [vmem:[%s19590_s24 + $0xc0] sm:$0xe]  ;;  %v26483_v56 = vrot.slane %v20558_v21, 5 }
 0x21f   : > { %26478 = vst [vmem:[#allocation55_spill] sm:$0xff] %v20995_v39  ;;  %26479 = vst [vmem:[#allocation56_spill] sm:$0xff] %v20998_v16  ;;  %v16099_v38 = vld [vmem:[%s19590_s24 + $0xc8] sm:$0xf] }
 0x220   : > { %8197 = vmatmul.mubr.bf16.gmra.mrb[104].mxu0 %v15957_v37  ;;  %v3148_v37 = vshrl.u32 %v16091_v32, 16  ;;  %v3190_v32 = vshrl.u32 %v16097_v36, 16  ;;  %v2321_v36 = vsel %vm20120_vm5, %v26475_v25, %v26474_v31  ;;  %v16098_v31 = vld [vmem:[%s19590_s24 + $0xc4] sm:$0x1]  ;;  %v3195_v25 = vrot.slane %v3193_v33, 5  ;;  %v26484_v13 = vld [vmem:[#allocation5_spill] sm:$0xff] }
 0x221   : > { %8204 = vmatprep.mubr.bf16.mxu0 %v18905_v47  ;;  %v15958_v47 = vcombine.low %v2309_v0, %v2313_v8  ;;  %v26473_v0 = vrot.slane %v20531_v18, 9  ;;  %v26521_v52 = vld [vmem:[#allocation16_spill] sm:$0xff] }
 0x222   : > { %v3150_v1 = vrot.slane %v3148_v37, 4  ;;  %v20981_v37 = vld [vmem:[%s19590_s24 + $0xb4] sm:$0x1] }
 0x223   : > { %v2317_v8 = vsel %vm20120_vm5, %v26473_v0, %v26472_v23  ;;  %26476 = vst [vmem:[#allocation53_spill] sm:$0xff] %v20981_v37  ;;  %v3181_v23 = vrot.slane %v3179_v19, 5  ;;  %v3192_v0 = vrot.slane %v3190_v32, 4  ;;  %v21001_v19 = vld [vmem:[%s19590_s24 + $0xc4] sm:$0x1]  ;;  %v21005_v32 = vrot.slane %v3157_v34, 5 }
 0x224   : > { %v3154_v43 = vor.u32 %v3153_v24, %v3150_v1  ;;  %v15959_v18 = vcombine.low %v2317_v8, %v2321_v36  ;;  %26480 = vst [vmem:[#allocation57_spill] sm:$0xff] %v21001_v19  ;;  %v3199_v1 = vshll.u32 %v16098_v31, 16  ;;  %v26485_v37 = vrot.slane %v26484_v13, 9  ;;  %v18909_v13 = vld [vmem:[%s19590_s24 + $0x258] ss:$8 sps:$4 sm:$0xff]  }
 0x225   : > { %v3182_v24 = vor.u32 %v3181_v23, %v3178_v26  ;;  %26482 = vst [vmem:[#allocation59_spill] sm:$0xff] %v21005_v32  ;;  %v3196_v10 = vor.u32 %v3195_v25, %v3192_v0  ;;  %v26486_v36 = vrot.slane %v20577_v53, 5  ;;  %v21020_v23 = vrot.slane %v3168_v12, 4  ;;  %v16102_v53 = vld [vmem:[%s19590_s24 + $0xd4] sm:$0x1]  ;;  %v26519_v32 = vld [vmem:[#allocation17_spill] sm:$0xff] }
 0x226   : > { %v21003_v33 = vrot.slane %v3154_v43, 4  ;;  %v2325_v8 = vsel %vm20120_vm5, %v26485_v37, %v26483_v56  ;;  %v21022_v34 = vrot.slane %v3171_v30, 5  ;;  %v16101_v43 = vld [vmem:[%s19590_s24 + $0xd0] sm:$0xf]  ;;  %v21033_v12 = vrot.slane %v3199_v1, 5 }
 0x227   : > { %v2329_v26 = vsel %vm20120_vm5, %v26487_v15, %v26486_v36  ;;  %26488 = vst [vmem:[#allocation5_spill] sm:$0xff] %v21020_v23  ;;  %v21029_v15 = vrot.slane %v3182_v24, 4  ;;  %v3207_v31 = vshll.u32 %v16099_v38, 16  ;;  %v3218_v0 = vshrl.u32 %v16101_v43, 16  ;;  %v16103_v56 = vld [vmem:[%s19590_s24 + $0xd8] sm:$0xf] }
 0x228   : > { %8205 = vmatmul.mubr.bf16.gmra.mrb[108].mxu0 %v15958_v47  ;;  %v16096_v47 = vld [vmem:[%s19590_s24 + $0xbc] sm:$0x1]  ;;  %26481 = vst [vmem:[#allocation58_spill] sm:$0xff] %v21003_v33  ;;  %26489 = vst [vmem:[#allocation60_spill] sm:$0xff] %v21022_v34  ;;  %v3221_v25 = vshll.u32 %v16101_v43, 16  ;;  %v15960_v41 = vcombine.low %v2325_v8, %v2329_v26  ;;  %v3232_v21 = vshrl.u32 %v16103_v56, 16 }
 0x229   : > { %8212 = vmatprep.mubr.bf16.mxu0 %v18906_v35  ;;  %v20992_v35 = vld [vmem:[%s19590_s24 + $0xb8] sm:$0xe]  ;;  %v3185_v59 = vshll.u32 %v16096_v47, 16  ;;  %26490 = vst [vmem:[#allocation61_spill] sm:$0xff] %v21029_v15  ;;  %26492 = vst [vmem:[#allocation63_spill] sm:$0xff] %v21033_v12  ;;  %v21035_v47 = vrot.slane %v3196_v10, 4 }
 0x22a   : > { %26477 = vst [vmem:[#allocation54_spill] sm:$0xff] %v20992_v35  ;;  %v21040_v36 = vld [vmem:[%s19590_s24 + $0xc8] sm:$0xe]  ;;  %v21046_v24 = vld [vmem:[%s19590_s24 + $0xd0] sm:$0xe]  ;;  %v3235_v10 = vshll.u32 %v16103_v56, 16 }
 0x22b   : > { %v21031_v30 = vrot.slane %v3185_v59, 5  ;;  %26493 = vst [vmem:[#allocation64_spill] sm:$0xff] %v21035_v47  ;;  %26494 = vst [vmem:[#allocation65_spill] sm:$0xff] %v21040_v36  ;;  %v21049_v59 = vld [vmem:[%s19590_s24 + $0xd4] sm:$0x1]  ;;  %v3220_v43 = vrot.slane %v3218_v0, 4 }
 0x22c   : > { %26496 = vst [vmem:[#allocation67_spill] sm:$0xff] %v21046_v24  ;;  %26497 = vst [vmem:[#allocation68_spill] sm:$0xff] %v21049_v59  ;;  %v16100_v1 = vld [vmem:[%s19590_s24 + $0xcc] sm:$0x1]  ;;  %v3223_v47 = vrot.slane %v3221_v25, 5  ;;  %v26498_v12 = vld [vmem:[#allocation7_spill] sm:$0xff] }
 0x22d   : > { %26491 = vst [vmem:[#allocation62_spill] sm:$0xff] %v21031_v30  ;;  %v26499_v15 = vrot.slane %v26498_v12, 5  ;;  %v26500_v30 = vld [vmem:[#allocation6_spill] sm:$0xff]  ;;  %v26502_v8 = vld [vmem:[#allocation9_spill] sm:$0xff]  ;;  %v26504_v35 = vld [vmem:[#allocation8_spill] sm:$0xff]  ;;  %v3237_v0 = vrot.slane %v3235_v10, 5 }
 0x22e   : > { %v26501_v16 = vrot.slane %v26500_v30, 9  ;;  %v26503_v26 = vrot.slane %v26502_v8, 5  ;;  %v26505_v39 = vrot.slane %v26504_v35, 9  ;;  %v3227_v35 = vshll.u32 %v16102_v53, 16  ;;  %v21071_v25 = vld [vmem:[%s19590_s24 + $0xd8] sm:$0xe] }
 0x22f   : > { %v3224_v36 = vor.u32 %v3223_v47, %v3220_v43  ;;  %v21076_v30 = vld [vmem:[%s19590_s24 + $0xdc] sm:$0x1]  ;;  %v26508_v59 = vld [vmem:[#allocation10_spill] sm:$0xff]  ;;  %v21086_v10 = vld [vmem:[%s19590_s24 + $0xe0] sm:$0xe]  ;;  %v26520_v2 = vrot.slane %v26519_v32, 5 }
 0x230   : > { %8213 = vmatmul.mubr.bf16.gmra.mrb[112].mxu0 %v15959_v18  ;;  %v3204_v18 = vshrl.u32 %v16099_v38, 16  ;;  %v3209_v38 = vrot.slane %v3207_v31, 5  ;;  %v2333_v19 = vsel %vm20120_vm5, %v26501_v16, %v26499_v15  ;;  %v2337_v56 = vsel %vm20120_vm5, %v26505_v39, %v26503_v26  ;;  %v18911_v31 = vld [vmem:[%s19590_s24 + $0x268] ss:$8 sps:$4 sm:$0xff]   ;;  %v16107_v16 = vld [vmem:[%s19590_s24 + $0xf8] sm:$0xf] }
 0x231   : > { %8220 = vmatprep.mubr.bf16.mxu0 %v18908_v27  ;;  %v21043_v27 = vld [vmem:[%s19590_s24 + $0xcc] sm:$0x1]  ;;  %v3213_v15 = vshll.u32 %v16100_v1, 16  ;;  %v3234_v39 = vrot.slane %v3232_v21, 4  ;;  %v26506_v24 = vld [vmem:[#allocation11_spill] sm:$0xff]  ;;  %v26509_v53 = vrot.slane %v26508_v59, 9 }
 0x232   : > { %26495 = vst [vmem:[#allocation66_spill] sm:$0xff] %v21043_v27  ;;  %v3206_v37 = vrot.slane %v3204_v18, 4  ;;  %v16105_v18 = vld [vmem:[%s19590_s24 + $0xe0] sm:$0xf]  ;;  %v26507_v1 = vrot.slane %v26506_v24, 5  ;;  %26510 = vst [vmem:[#allocation7_spill] sm:$0xff] %v21086_v10 }
 0x233   : > { %v3246_v8 = vshrl.u32 %v16105_v18, 16  ;;  %v3249_v26 = vshll.u32 %v16105_v18, 16  ;;  %v21089_v27 = vld [vmem:[%s19590_s24 + $0xe4] sm:$0x1]  ;;  %v26511_v23 = vld [vmem:[#allocation13_spill] sm:$0xff]  ;;  %v3238_v24 = vor.u32 %v3237_v0, %v3234_v39  ;;  %v26515_v59 = vld [vmem:[#allocation15_spill] sm:$0xff] }
 0x234   : > { %v3210_v12 = vor.u32 %v3209_v38, %v3206_v37  ;;  %v2341_v21 = vsel %vm20120_vm5, %v26509_v53, %v26507_v1  ;;  %v16106_v18 = vld [vmem:[%s19590_s24 + $0xe4] sm:$0x1]  ;;  %v26512_v34 = vrot.slane %v26511_v23, 5  ;;  %v26517_v33 = vld [vmem:[#allocation14_spill] sm:$0xff]  ;;  %v26522_v23 = vrot.slane %v26521_v52, 9 }
 0x235   : > { %v26513_v37 = vld [vmem:[#allocation12_spill] sm:$0xff]  ;;  %v26518_v1 = vrot.slane %v26517_v33, 9  ;;  %v21115_v0 = vrot.slane %v3224_v36, 4  ;;  %v3248_v32 = vrot.slane %v3246_v8, 4  ;;  %v21129_v33 = vld [vmem:[%s19590_s24 + $0xf8] sm:$0xe] }
 0x236   : > { %v26514_v47 = vrot.slane %v26513_v37, 9  ;;  %v4242_v37 = vsel %vm20120_vm5, %v26522_v23, %v26520_v2  ;;  %v21113_v39 = vrot.slane %v3210_v12, 4  ;;  %v21123_v12 = vrot.slane %v3238_v24, 4  ;;  %26525 = vst [vmem:[#allocation8_spill] sm:$0xff] %v21129_v33  ;;  %v16110_v8 = vld [vmem:[%s19590_s24 + $0x104] sm:$0x1] }
 0x237   : > { %v3277_v23 = vshll.u32 %v16109_v14, 16  ;;  %v21134_v52 = vld [vmem:[%s19590_s24 + $0xfc] sm:$0x1]  ;;  %v21137_v36 = vld [vmem:[%s19590_s24 + $0x100] sm:$0xe] }
 0x238   : > { %8221 = vmatmul.mubr.bf16.gmra.mrb[116].mxu0 %v15960_v41  ;;  %v16104_v41 = vld [vmem:[%s19590_s24 + $0xdc] sm:$0x1]  ;;  %v2345_v38 = vsel %vm20120_vm5, %v26514_v47, %v26512_v34  ;;  %v3260_v34 = vshrl.u32 %v16107_v16, 16  ;;  %v3251_v47 = vrot.slane %v3249_v26, 5  ;;  %26523 = vst [vmem:[#allocation6_spill] sm:$0xff] %v21123_v12  ;;  %26526 = vst [vmem:[#allocation11_spill] sm:$0xff] %v21137_v36 }
 0x239   : > { %8228 = vmatprep.mubr.bf16.mxu0 %v18909_v13  ;;  %v15961_v13 = vcombine.low %v2333_v19, %v2337_v56  ;;  %v21098_v19 = vrot.slane %v3213_v15, 5  ;;  %v3241_v43 = vshll.u32 %v16104_v41, 16  ;;  %v26516_v56 = vrot.slane %v26515_v59, 5  ;;  %v16111_v26 = vld [vmem:[%s19590_s24 + $0x108] sm:$0xf]  ;;  %v26545_v36 = vld [vmem:[#allocation22_spill] sm:$0xff] }
 0x23a   : > { %v3263_v15 = vshll.u32 %v16107_v16, 16  ;;  %v21117_v41 = vrot.slane %v3227_v35, 5  ;;  %v3255_v16 = vshll.u32 %v16106_v18, 16  ;;  %v3274_v35 = vshrl.u32 %v16109_v14, 16  ;;  %v21140_v24 = vld [vmem:[%s19590_s24 + $0x104] sm:$0x1] }
 0x23b   : > { %v4238_v53 = vsel %vm20120_vm5, %v26518_v1, %v26516_v56  ;;  %v21125_v59 = vrot.slane %v3241_v43, 5  ;;  %v3262_v56 = vrot.slane %v3260_v34, 4  ;;  %v15962_v2 = vcombine.low %v2341_v21, %v2345_v38  ;;  %26527 = vst [vmem:[#allocation10_spill] sm:$0xff] %v21140_v24  ;;  %v26549_v24 = vld [vmem:[#allocation24_spill] sm:$0xff] }
 0x23c   : > { %v3265_v1 = vrot.slane %v3263_v15, 5  ;;  %v16411_v18 = vcombine.low %v4238_v53, %v4242_v37  ;;  %v3276_v12 = vrot.slane %v3274_v35, 4  ;;  %v3279_v34 = vrot.slane %v3277_v23, 5 }
 0x23d   : > { %26524 = vst [vmem:[#allocation9_spill] sm:$0xff] %v21125_v59  ;;  %v3283_v15 = vshll.u32 %v16110_v8, 16  ;;  %v3288_v14 = vshrl.u32 %v16111_v26, 16  ;;  %v2936_v21 = vsel %vm19609_vm2, %v20675_v62, %v20677_v57  ;;  %v2950_v38 = vsel %vm19609_vm2, %v20692_v28, %v20694_v3  ;;  %v16113_v57 = vld [vmem:[%s19590_s24 + $0x110] sm:$0xf] }
 0x23e   : > { %v3266_v59 = vor.u32 %v3265_v1, %v3262_v56  ;;  %v26530_v53 = vrot.slane %v20664_v44, 9  ;;  %v26532_v35 = vrot.slane %v20670_v42, 9  ;;  %v21165_v28 = vrot.slane %v3255_v16, 5  ;;  %v21178_v1 = vld [vmem:[%s19590_s24 + $0x108] sm:$0xe]  ;;  %v26540_v3 = vld [vmem:[#allocation18_spill] sm:$0xff] }
 0x23f   : > { %v3291_v44 = vshll.u32 %v16111_v26, 16  ;;  %v21175_v16 = vrot.slane %v3283_v15, 5  ;;  %26536 = vst [vmem:[#allocation14_spill] sm:$0xff] %v21178_v1  ;;  %v3290_v23 = vrot.slane %v3288_v14, 4  ;;  %v3302_v8 = vshrl.u32 %v16113_v57, 16  ;;  %v18912_v26 = vld [vmem:[%s26250_s2 + $0x180] sm:$0xff]  }
 0x240   : > { %8229 = vmatmul.mubr.bf16.gmra.mrb[120].mxu0 %v15961_v13  ;;  %v16108_v13 = vld [vmem:[%s19590_s24 + $0xfc] sm:$0x1]  ;;  %v16112_v42 = vld [vmem:[%s19590_s24 + $0x10c] sm:$0x1]  ;;  %v26550_v33 = vrot.slane %v26549_v24, 9 }
 0x241   : > { %8236 = vmatprep.mubr.bf16.mxu0 %v18911_v31  ;;  %v3252_v31 = vor.u32 %v3251_v47, %v3248_v32  ;;  %v3269_v43 = vshll.u32 %v16108_v13, 16  ;;  %v26529_v32 = vrot.slane %v20667_v58, 5  ;;  %v26531_v47 = vrot.slane %v20673_v51, 5  ;;  %26535 = vst [vmem:[#allocation15_spill] sm:$0xff] %v21175_v16  ;;  %v26539_v14 = vld [vmem:[#allocation19_spill] sm:$0xff]  ;;  %v26541_v51 = vld [vmem:[#allocation20_spill] sm:$0xff] }
 0x242   : > { %v3293_v15 = vrot.slane %v3291_v44, 5  ;;  %v2964_v58 = vsel %vm19609_vm2, %v26540_v3, %v26539_v14  ;;  %v26546_v44 = vrot.slane %v26545_v36, 9 }
 0x243   : > { %v4246_v37 = vsel %vm20120_vm5, %v26530_v53, %v26529_v32  ;;  %v4250_v62 = vsel %vm20120_vm5, %v26532_v35, %v26531_v47  ;;  %v21163_v13 = vrot.slane %v3252_v31, 4  ;;  %v21171_v56 = vrot.slane %v3269_v43, 5  ;;  %v16115_v32 = vld [vmem:[%s19590_s24 + $0x118] sm:$0xf]  ;;  %v21188_v53 = vld [vmem:[%s19590_s24 + $0x110] sm:$0xe] }
 0x244   : > { %v3280_v31 = vor.u32 %v3279_v34, %v3276_v12  ;;  %v16187_v43 = vcombine.low %v2936_v21, %v2950_v38  ;;  %26537 = vst [vmem:[#allocation17_spill] sm:$0xff] %v21188_v53  ;;  %v3305_v47 = vshll.u32 %v16113_v57, 16  ;;  %v16412_v35 = vcombine.low %v4246_v37, %v4250_v62  ;;  %v26542_v12 = vld [vmem:[#allocation21_spill] sm:$0xff]  ;;  %v16114_v21 = vld [vmem:[%s19590_s24 + $0x114] sm:$0x1] }
 0x245   : > { %26533 = vst [vmem:[#allocation13_spill] sm:$0xff] %v21171_v56  ;;  %v2978_v34 = vsel %vm19609_vm2, %v26542_v12, %v26541_v51  ;;  %v3316_v38 = vshrl.u32 %v16115_v32, 16  ;;  %v3319_v16 = vshll.u32 %v16115_v32, 16  ;;  %v26547_v62 = vld [vmem:[#allocation25_spill] sm:$0xff]  ;;  %v16117_v32 = vld [vmem:[%s19590_s24 + $0x120] sm:$0xf] }
 0x246   : > { %v26548_v57 = vrot.slane %v26547_v62, 5  ;;  %v21215_v14 = vrot.slane %v3280_v31, 4  ;;  %v3304_v12 = vrot.slane %v3302_v8, 4  ;;  %v3294_v31 = vor.u32 %v3293_v15, %v3290_v23  ;;  %v16116_v8 = vld [vmem:[%s19590_s24 + $0x11c] sm:$0x1] }
 0x247   : > { %v26551_v62 = vmov 0   ;;  %v3330_v36 = vshrl.u32 %v16117_v32, 16  ;;  %v21231_v51 = vld [vmem:[%s19590_s24 + $0x118] sm:$0xe]  ;;  %v16188_v24 = vcombine.low %v2964_v58, %v2978_v34  ;;  %v21235_v23 = vld [vmem:[%s19590_s24 + $0x11c] sm:$0x1]  ;;  %v2992_v34 = vsel %vm19609_vm2, %v20757_v60, %v20759_v63 }
 0x248   : > { %8237 = vmatmul.mubr.bf16.gmra.mrb[124].mxu0 %v15962_v2  ;;  %v21173_v2 = vrot.slane %v3266_v59, 4  ;;  %v21191_v59 = vld [vmem:[%s19590_s24 + $0x114] sm:$0x1]  ;;  %v4258_v3 = vsel %vm20120_vm5, %v26550_v33, %v26548_v57  ;;  %v18913_v33 = vld [vmem:[%s26250_s2 + $0x188] sm:$0xff]   ;;  %v3318_v57 = vrot.slane %v3316_v38, 4  ;;  %26552 = vst [vmem:[#allocation4_spill] sm:$0xff] %v21231_v51 }
 0x249   : > { %8277 = vmatprep.mubr.bf16.mxu0 %v16411_v18  ;;  %v21184_v18 = vld [vmem:[%s19590_s24 + $0x10c] sm:$0x1]  ;;  %26538 = vst [vmem:[#allocation16_spill] sm:$0xff] %v21191_v59  ;;  %v21241_v15 = vld [vmem:[%s19590_s24 + $0x124] sm:$0x1]  ;;  %v3325_v38 = vshll.u32 %v16116_v8, 16 }
 0x24a   : > { %26534 = vst [vmem:[#allocation12_spill] sm:$0xff] %v21173_v2  ;;  %v26543_v2 = vld [vmem:[#allocation23_spill] sm:$0xff]  ;;  %26554 = vst [vmem:[#allocation18_spill] sm:$0xff] %v21241_v15  ;;  %v3332_v59 = vrot.slane %v3330_v36, 4  ;;  %v26557_v36 = vrot.slane %v20755_v9, 5 }
 0x24b   : > { %v26544_v56 = vrot.slane %v26543_v2, 5  ;;  %v16118_v2 = vld [vmem:[%s19590_s24 + $0x124] sm:$0x1]  ;;  %v16119_v60 = vld [vmem:[%s19590_s24 + $0x128] sm:$0xf] }
 0x24c   : > { %v3339_v58 = vshll.u32 %v16118_v2, 16  ;;  %v26558_v2 = vrot.slane %v20752_v54, 9  ;;  %v18915_v54 = vld [vmem:[%s26250_s2 + $0x198] sm:$0xff]   ;;  %v3344_v8 = vshrl.u32 %v16119_v60, 16 }
 0x24d   : > { %v4254_v37 = vsel %vm20120_vm5, %v26546_v44, %v26544_v56  ;;  %v3307_v56 = vrot.slane %v3305_v47, 5  ;;  %v3311_v44 = vshll.u32 %v16114_v21, 16  ;;  %v3321_v47 = vrot.slane %v3319_v16, 5 }
 0x24e   : > { %v16413_v21 = vcombine.low %v4254_v37, %v4258_v3  ;;  %v21243_v16 = vrot.slane %v3294_v31, 4  ;;  %v3006_v37 = vsel %vm19609_vm2, %v20774_v29, %v20776_v7  ;;  %v26555_v3 = vrot.slane %v20749_v50, 5  ;;  %v26564_v7 = vld [vmem:[#allocation26_spill] sm:$0xff]  ;;  %v26567_v50 = vld [vmem:[#allocation31_spill] sm:$0xff] }
 0x24f   : > { %v3308_v53 = vor.u32 %v3307_v56, %v3304_v12  ;;  %v26556_v12 = vrot.slane %v20746_v49, 9  ;;  %v21271_v29 = vrot.slane %v3311_v44, 5  ;;  %v16121_v49 = vld [vmem:[%s19590_s24 + $0x130] sm:$0xf]  ;;  %v21286_v44 = vrot.slane %v3339_v58, 5 }
 0x250   : > { %8278 = vmatmul.mubr.bf16.vlgmr.msra.gmra.mrb[0].mxu0 %v16187_v43  ;;  %v3297_v43 = vshll.u32 %v16112_v42, 16  ;;  %v21238_v42 = vld [vmem:[%s19590_s24 + $0x120] sm:$0xe]  ;;  %v16123_v58 = vld [vmem:[%s19590_s24 + $0x148] sm:$0xf]  ;;  %v26568_v9 = vrot.slane %v26567_v50, 5 }
 0x251   : > { %8535 = vmatpush1.bf16.msra.mxu0 %v18912_v26  ;;  %8285 = vmatprep.mubr.bf16.mxu0 %v16412_v35  ;;  %v3333_v26 = vshll.u32 %v16117_v32, 16  ;;  %v18914_v35 = vld [vmem:[%s26250_s2 + $0x190] sm:$0xff]   ;;  %26553 = vst [vmem:[#allocation19_spill] sm:$0xff] %v21238_v42  ;;  %v3322_v32 = vor.u32 %v3321_v47, %v3318_v57  ;;  %v4262_v56 = vsel %vm20120_vm5, %v26556_v12, %v26555_v3  ;;  %v21269_v31 = vrot.slane %v3308_v53, 4  ;;  %v18916_v47 = vld [vmem:[%s26250_s2 + $0x1a0] sm:$0xff]  }
 0x252   : > { %8536 = vmatprep.subr.bf16.mxu0 %v26551_v62  ;;  %v21267_v63 = vrot.slane %v3297_v43, 5  ;;  %26561 = vst [vmem:[#allocation23_spill] sm:$0xff] %v21286_v44  ;;  %v3347_v57 = vshll.u32 %v16119_v60, 16  ;;  %v16189_v3 = vcombine.low %v2992_v34, %v3006_v37  ;;  %v21295_v12 = vld [vmem:[%s19590_s24 + $0x12c] sm:$0x1]  ;;  %v26563_v60 = vld [vmem:[#allocation27_spill] sm:$0xff] }
 0x253   : > { %v3335_v1 = vrot.slane %v3333_v26, 5  ;;  %v21284_v43 = vrot.slane %v3322_v32, 4  ;;  %v21298_v32 = vld [vmem:[%s19590_s24 + $0x130] sm:$0xe]  ;;  %v26566_v53 = vld [vmem:[#allocation29_spill] sm:$0xff] }
 0x254   : > { %26562 = vst [vmem:[#allocation22_spill] sm:$0xff] %v21298_v32  ;;  %v16120_v34 = vld [vmem:[%s19590_s24 + $0x12c] sm:$0x1]  ;;  %v16122_v37 = vld [vmem:[%s19590_s24 + $0x134] sm:$0x1]  ;;  %v3349_v51 = vrot.slane %v3347_v57, 5 }
 0x255   : > { %8537 = vmatpush1.bf16.msra.mxu0 %v18913_v33  ;;  %v4266_v33 = vsel %vm20120_vm5, %v26558_v2, %v26557_v36  ;;  %26560 = vst [vmem:[#allocation21_spill] sm:$0xff] %v21284_v43  ;;  %v3336_v26 = vor.u32 %v3335_v1, %v3332_v59  ;;  %v21302_v2 = vld [vmem:[%s19590_s24 + $0x134] sm:$0x1]  ;;  %v3020_v1 = vsel %vm19609_vm2, %v26564_v7, %v26563_v60  ;;  %v26565_v59 = vld [vmem:[#allocation28_spill] sm:$0xff]  ;;  %v26571_v44 = vld [vmem:[#allocation33_spill] sm:$0xff]  ;;  %v3375_v57 = vshll.u32 %v16123_v58, 16 }
 0x256   : > { %8538 = vmatprep.subr.bf16.mxu0 %v26551_v62  ;;  %v16414_v36 = vcombine.low %v4262_v56, %v4266_v33  ;;  %v26569_v56 = vld [vmem:[#allocation30_spill] sm:$0xff]  ;;  %v26572_v43 = vrot.slane %v26571_v44, 5 }
 0x257   : > { %v26570_v33 = vrot.slane %v26569_v56, 9  ;;  %v21327_v42 = vrot.slane %v3336_v26, 4  ;;  %v3346_v56 = vrot.slane %v3344_v8, 4  ;;  %v3367_v8 = vshll.u32 %v16122_v37, 16  ;;  %v21353_v32 = vld [vmem:[%s19590_s24 + $0x154] sm:$0x1] }
 0x258   : > { %8286 = vmatmul.mubr.bf16.gmra.mrb[4].mxu0 %v16188_v24  ;;  %v21281_v24 = vrot.slane %v3325_v38, 5  ;;  %v3361_v38 = vshll.u32 %v16121_v49, 16  ;;  %26578 = vst [vmem:[#allocation26_spill] sm:$0xff] %v21353_v32 }
 0x259   : > { %8293 = vmatprep.mubr.bf16.mxu0 %v16413_v21  ;;  %8539 = vmatpush1.bf16.msra.mxu0 %v18914_v35  ;;  %v21292_v35 = vld [vmem:[%s19590_s24 + $0x128] sm:$0xe]  ;;  %v3358_v21 = vshrl.u32 %v16121_v49, 16  ;;  %v3034_v49 = vsel %vm19609_vm2, %v26566_v53, %v26565_v59  ;;  %v16125_v53 = vld [vmem:[%s19590_s24 + $0x150] sm:$0xf]  ;;  %v3372_v59 = vshrl.u32 %v16123_v58, 16  ;;  %v3350_v15 = vor.u32 %v3349_v51, %v3346_v56 }
 0x25a   : > { %26559 = vst [vmem:[#allocation20_spill] sm:$0xff] %v21281_v24  ;;  %8540 = vmatprep.subr.bf16.mxu0 %v26551_v62  ;;  %v26573_v24 = vld [vmem:[#allocation32_spill] sm:$0xff]  ;;  %v3363_v26 = vrot.slane %v3361_v38, 5  ;;  %v21346_v38 = vld [vmem:[%s19590_s24 + $0x14c] sm:$0x1]  ;;  %v3062_v51 = vsel %vm19609_vm2, %v20856_v5, %v20858_v4 }
 0x25b   : > { %v26574_v7 = vrot.slane %v26573_v24, 9  ;;  %v3360_v44 = vrot.slane %v3358_v21, 4  ;;  %v3389_v24 = vshll.u32 %v16125_v53, 16  ;;  %v21343_v21 = vld [vmem:[%s19590_s24 + $0x148] sm:$0xe]  ;;  %26576 = vst [vmem:[#allocation24_spill] sm:$0xff] %v21346_v38 }
 0x25c   : > { %26575 = vst [vmem:[#allocation25_spill] sm:$0xff] %v21343_v21  ;;  %v21350_v58 = vld [vmem:[%s19590_s24 + $0x150] sm:$0xe]  ;;  %v26594_v21 = vld [vmem:[#allocation40_spill] sm:$0xff] }
 0x25d   : > { %8541 = vmatpush1.bf16.msra.mxu0 %v18915_v54  ;;  %v4270_v54 = vsel %vm20120_vm5, %v26570_v33, %v26568_v9  ;;  %v4274_v60 = vsel %vm20120_vm5, %v26574_v7, %v26572_v43  ;;  %v18917_v9 = vld [vmem:[%s26250_s2 + $0x1a8] sm:$0xff]   ;;  %v3374_v7 = vrot.slane %v3372_v59, 4  ;;  %v16190_v43 = vcombine.low %v3020_v1, %v3034_v49  ;;  %26577 = vst [vmem:[#allocation27_spill] sm:$0xff] %v21350_v58  ;;  %v16126_v1 = vld [vmem:[%s19590_s24 + $0x154] sm:$0x1] }
 0x25e   : > { %8542 = vmatprep.subr.bf16.mxu0 %v26551_v62  ;;  %v16124_v33 = vld [vmem:[%s19590_s24 + $0x14c] sm:$0x1]  ;;  %v16415_v50 = vcombine.low %v4270_v54, %v4274_v60  ;;  %v3364_v37 = vor.u32 %v3363_v26, %v3360_v44  ;;  %v3377_v49 = vrot.slane %v3375_v57, 5  ;;  %v26579_v60 = vrot.slane %v20831_v55, 5 }
 0x25f   : > { %v3381_v54 = vshll.u32 %v16124_v33, 16  ;;  %v26580_v59 = vrot.slane %v20828_v6, 9  ;;  %v21377_v44 = vrot.slane %v3350_v15, 4  ;;  %v3391_v57 = vrot.slane %v3389_v24, 5  ;;  %v16129_v6 = vld [vmem:[%s19590_s24 + $0x160] sm:$0xf] }
 0x260   : > { %8294 = vmatmul.mubr.bf16.gmra.mrb[8].mxu0 %v16189_v3  ;;  %v3353_v3 = vshll.u32 %v16120_v34, 16  ;;  %v16127_v34 = vld [vmem:[%s19590_s24 + $0x158] sm:$0xf]  ;;  %v21387_v33 = vrot.slane %v3367_v8, 5  ;;  %v16128_v24 = vld [vmem:[%s19590_s24 + $0x15c] sm:$0x1] }
 0x261   : > { %8301 = vmatprep.mubr.bf16.mxu0 %v16414_v36  ;;  %8543 = vmatpush1.bf16.msra.mxu0 %v18916_v47  ;;  %v3386_v47 = vshrl.u32 %v16125_v53, 16  ;;  %v18918_v36 = vld [vmem:[%s26250_s2 + $0x1b0] sm:$0xff]   ;;  %v3048_v53 = vsel %vm19609_vm2, %v20839_v45, %v20841_v46  ;;  %v4278_v56 = vsel %vm20120_vm5, %v26580_v59, %v26579_v60  ;;  %v26582_v45 = vrot.slane %v20834_v20, 9  ;;  %v26588_v15 = vld [vmem:[#allocation39_spill] sm:$0xff] }
 0x262   : > { %8544 = vmatprep.subr.bf16.mxu0 %v26551_v62  ;;  %v3400_v5 = vshrl.u32 %v16127_v34, 16  ;;  %v3403_v4 = vshll.u32 %v16127_v34, 16  ;;  %v21379_v26 = vrot.slane %v3353_v3, 5  ;;  %v21385_v20 = vrot.slane %v3364_v37, 4  ;;  %v26592_v58 = vld [vmem:[#allocation41_spill] sm:$0xff] }
 0x263   : > { %v3388_v55 = vrot.slane %v3386_v47, 4  ;;  %v3378_v3 = vor.u32 %v3377_v49, %v3374_v7  ;;  %v3395_v47 = vshll.u32 %v16126_v1, 16  ;;  %v3414_v37 = vshrl.u32 %v16129_v6, 16  ;;  %v21404_v1 = vld [vmem:[%s19590_s24 + $0x15c] sm:$0x1] }
 0x264   : > { %v3402_v8 = vrot.slane %v3400_v5, 4  ;;  %v3405_v34 = vrot.slane %v3403_v4, 5  ;;  %v16191_v60 = vcombine.low %v3048_v53, %v3062_v51  ;;  %v26584_v49 = vld [vmem:[#allocation35_spill] sm:$0xff]  ;;  %v21412_v51 = vld [vmem:[%s19590_s24 + $0x160] sm:$0xe]  ;;  %v26593_v32 = vrot.slane %v26592_v58, 5 }
 0x265   : > { %8545 = vmatpush1.bf16.msra.mxu0 %v18917_v9  ;;  %v26581_v9 = vrot.slane %v20837_v61, 5  ;;  %v18919_v61 = vld [vmem:[%s26250_s2 + $0x1b8] sm:$0xff]   ;;  %v3392_v59 = vor.u32 %v3391_v57, %v3388_v55  ;;  %v21415_v5 = vld [vmem:[%s19590_s24 + $0x164] sm:$0x1]  ;;  %v26587_v55 = vld [vmem:[#allocation37_spill] sm:$0xff]  ;;  %v26595_v38 = vrot.slane %v26594_v21, 9 }
 0x266   : > { %8546 = vmatprep.subr.bf16.mxu0 %v26551_v62  ;;  %v26586_v4 = vld [vmem:[#allocation36_spill] sm:$0xff]  ;;  %v3406_v57 = vor.u32 %v3405_v34, %v3402_v8  ;;  %v21438_v8 = vrot.slane %v3395_v47, 5  ;;  %v16133_v34 = vld [vmem:[%s19590_s24 + $0x170] sm:$0xf]  ;;  %v3416_v58 = vrot.slane %v3414_v37, 4 }
 0x267   : > { %v4282_v46 = vsel %vm20120_vm5, %v26582_v45, %v26581_v9  ;;  %v18920_v9 = vld [vmem:[%s26250_s2 + $0x1c0] sm:$0xff]   ;;  %v21400_v45 = vld [vmem:[%s19590_s24 + $0x158] sm:$0xe] }
 0x268   : > { %8302 = vmatmul.mubr.bf16.gmra.mrb[12].mxu0 %v16190_v43  ;;  %v16416_v7 = vcombine.low %v4278_v56, %v4282_v46  ;;  %v3090_v56 = vsel %vm19609_vm2, %v26587_v55, %v26586_v4  ;;  %v21421_v46 = vrot.slane %v3378_v3, 4  ;;  %v26589_v43 = vrot.slane %v26588_v15, 5  ;;  %v16132_v15 = vld [vmem:[%s19590_s24 + $0x16c] sm:$0x1] }
 0x269   : > { %8309 = vmatprep.mubr.bf16.mxu0 %v16415_v50  ;;  %8547 = vmatpush1.bf16.msra.mxu0 %v18918_v36  ;;  %v21394_v36 = vrot.slane %v3381_v54, 5  ;;  %v3417_v50 = vshll.u32 %v16129_v6, 16  ;;  %v26585_v54 = vld [vmem:[#allocation34_spill] sm:$0xff]  ;;  %v3409_v6 = vshll.u32 %v16128_v24, 16  ;;  %v4290_v4 = vsel %vm20120_vm5, %v26595_v38, %v26593_v32  ;;  %v16130_v24 = vld [vmem:[%s19590_s24 + $0x164] sm:$0x1] }
 0x26a   : > { %8548 = vmatprep.subr.bf16.mxu0 %v26551_v62  ;;  %v3076_v53 = vsel %vm19609_vm2, %v26585_v54, %v26584_v49  ;;  %v26590_v49 = vld [vmem:[#allocation38_spill] sm:$0xff]  ;;  %v21436_v3 = vrot.slane %v3392_v59, 4  ;;  %v18921_v32 = vld [vmem:[%s26250_s2 + $0x1c8] sm:$0xff]   ;;  %v3423_v37 = vshll.u32 %v16130_v24, 16  ;;  %v3442_v55 = vshrl.u32 %v16133_v34, 16 }
 0x26b   : > { %26583 = vst [vmem:[#allocation28_spill] sm:$0xff] %v21394_v36  ;;  %v26591_v54 = vrot.slane %v26590_v49, 9  ;;  %v3419_v21 = vrot.slane %v3417_v50, 5  ;;  %v16192_v50 = vcombine.low %v3076_v53, %v3090_v56  ;;  %v3445_v24 = vshll.u32 %v16133_v34, 16  ;;  %v16134_v53 = vld [vmem:[%s19590_s24 + $0x174] sm:$0x1] }
 0x26c   : > { %v21472_v47 = vrot.slane %v3423_v37, 5  ;;  %v3437_v34 = vshll.u32 %v16132_v15, 16  ;;  %v26615_v15 = vld [vmem:[#allocation48_spill] sm:$0xff] }
 0x26d   : > { %8549 = vmatpush1.bf16.msra.mxu0 %v18919_v61  ;;  %v16131_v61 = vld [vmem:[%s19590_s24 + $0x168] sm:$0xf]  ;;  %v4286_v36 = vsel %vm20120_vm5, %v26591_v54, %v26589_v43  ;;  %v16135_v43 = vld [vmem:[%s19590_s24 + $0x178] sm:$0xf] }
 0x26e   : > { %8550 = vmatprep.subr.bf16.mxu0 %v26551_v62  ;;  %v3431_v59 = vshll.u32 %v16131_v61, 16  ;;  %v16417_v49 = vcombine.low %v4286_v36, %v4290_v4  ;;  %v21455_v54 = vld [vmem:[%s19590_s24 + $0x168] sm:$0xe]  ;;  %v18922_v36 = vld [vmem:[%s26250_s2 + $0x1d0] sm:$0xff]   ;;  %26599 = vst [vmem:[#allocation33_spill] sm:$0xff] %v21472_v47  ;;  %v3447_v47 = vrot.slane %v3445_v24, 5 }
 0x26f   : > { %26598 = vst [vmem:[#allocation30_spill] sm:$0xff] %v21455_v54 }
 0x270   : > { %8310 = vmatmul.mubr.bf16.gmra.mrb[16].mxu0 %v16191_v60  ;;  %v3428_v60 = vshrl.u32 %v16131_v61, 16  ;;  %v3104_v61 = vsel %vm19609_vm2, %v20921_v17, %v20923_v48  ;;  %v3433_v4 = vrot.slane %v3431_v59, 5  ;;  %v3456_v17 = vshrl.u32 %v16135_v43, 16 }
 0x271   : > { %8317 = vmatprep.mubr.bf16.mxu0 %v16416_v7  ;;  %8551 = vmatpush1.bf16.msra.mxu0 %v18920_v9  ;;  %v21450_v9 = vrot.slane %v3406_v57, 4  ;;  %v21452_v7 = vrot.slane %v3409_v6, 5  ;;  %v3118_v57 = vsel %vm19609_vm2, %v20938_v40, %v20940_v22  ;;  %v3420_v6 = vor.u32 %v3419_v21, %v3416_v58  ;;  %v21475_v40 = vld [vmem:[%s19590_s24 + $0x16c] sm:$0x1]  ;;  %v21478_v22 = vld [vmem:[%s19590_s24 + $0x170] sm:$0xe] }
 0x272   : > { %8552 = vmatprep.subr.bf16.mxu0 %v26551_v62  ;;  %v3430_v56 = vrot.slane %v3428_v60, 4  ;;  %v3459_v48 = vshll.u32 %v16135_v43, 16  ;;  %v16193_v38 = vcombine.low %v3104_v61, %v3118_v57  ;;  %26600 = vst [vmem:[#allocation32_spill] sm:$0xff] %v21475_v40  ;;  %26601 = vst [vmem:[#allocation35_spill] sm:$0xff] %v21478_v22  ;;  %v26602_v58 = vld [vmem:[#allocation43_spill] sm:$0xff]  ;;  %v26608_v43 = vld [vmem:[#allocation44_spill] sm:$0xff] }
 0x273   : > { %26596 = vst [vmem:[#allocation29_spill] sm:$0xff] %v21450_v9  ;;  %26597 = vst [vmem:[#allocation31_spill] sm:$0xff] %v21452_v7  ;;  %v26603_v21 = vrot.slane %v26602_v58, 5  ;;  %v26606_v9 = vld [vmem:[#allocation45_spill] sm:$0xff]  ;;  %v21492_v61 = vrot.slane %v3420_v6, 4  ;;  %v3458_v6 = vrot.slane %v3456_v17, 4 }
 0x274   : > { %v26607_v7 = vrot.slane %v26606_v9, 5  ;;  %v21495_v57 = vld [vmem:[%s19590_s24 + $0x174] sm:$0x1]  ;;  %v3434_v58 = vor.u32 %v3433_v4, %v3430_v56  ;;  %v26616_v9 = vld [vmem:[#allocation49_spill] sm:$0xff]  ;;  %v16141_v40 = vld [vmem:[%s19590_s24 + $0x1a0] sm:$0xf] }
 0x275   : > { %8553 = vmatpush1.bf16.msra.mxu0 %v18921_v32  ;;  %v26604_v32 = vld [vmem:[#allocation42_spill] sm:$0xff]  ;;  %26610 = vst [vmem:[#allocation34_spill] sm:$0xff] %v21492_v61  ;;  %26611 = vst [vmem:[#allocation36_spill] sm:$0xff] %v21495_v57  ;;  %v3146_v17 = vsel %vm19609_vm2, %v26616_v9, %v26615_v15  ;;  %v16136_v15 = vld [vmem:[%s19590_s24 + $0x17c] sm:$0x1] }
 0x276   : > { %8554 = vmatprep.subr.bf16.mxu0 %v26551_v62  ;;  %v26605_v60 = vrot.slane %v26604_v32, 9  ;;  %v3444_v32 = vrot.slane %v3442_v55, 4  ;;  %v26614_v56 = vld [vmem:[#allocation46_spill] sm:$0xff]  ;;  %v26627_v22 = vld [vmem:[#allocation53_spill] sm:$0xff] }
 0x278   : > { %8318 = vmatmul.mubr.bf16.gmra.mrb[20].mxu0 %v16192_v50  ;;  %v4294_v59 = vsel %vm20120_vm5, %v26605_v60, %v26603_v21  ;;  %v26609_v50 = vrot.slane %v26608_v43, 9  ;;  %v3451_v21 = vshll.u32 %v16134_v53, 16  ;;  %v3461_v60 = vrot.slane %v3459_v48, 5  ;;  %v26613_v53 = vld [vmem:[#allocation47_spill] sm:$0xff] }
 0x279   : > { %8325 = vmatprep.mubr.bf16.mxu0 %v16417_v49  ;;  %v16137_v49 = vld [vmem:[%s19590_s24 + $0x180] sm:$0xf]  ;;  %8555 = vmatpush1.bf16.msra.mxu0 %v18922_v36  ;;  %v3132_v4 = vsel %vm19609_vm2, %v26614_v56, %v26613_v53  ;;  %v16139_v48 = vld [vmem:[%s19590_s24 + $0x198] sm:$0xf]  ;;  %v21528_v56 = vld [vmem:[%s19590_s24 + $0x184] sm:$0x1] }
 0x27a   : > { %v4298_v37 = vsel %vm20120_vm5, %v26609_v50, %v26607_v7  ;;  %8556 = vmatprep.subr.bf16.mxu0 %v26551_v62  ;;  %v21503_v50 = vrot.slane %v3437_v34, 5  ;;  %v3470_v36 = vshrl.u32 %v16137_v49, 16  ;;  %v3473_v55 = vshll.u32 %v16137_v49, 16  ;;  %26622 = vst [vmem:[#allocation42_spill] sm:$0xff] %v21528_v56 }
 0x27b   : > { %v16418_v24 = vcombine.low %v4294_v59, %v4298_v37  ;;  %v21514_v7 = vrot.slane %v3434_v58, 4  ;;  %v3448_v34 = vor.u32 %v3447_v47, %v3444_v32  ;;  %v21516_v43 = vrot.slane %v3451_v21, 5  ;;  %v21522_v59 = vld [vmem:[%s19590_s24 + $0x17c] sm:$0x1]  ;;  %v21525_v37 = vld [vmem:[%s19590_s24 + $0x180] sm:$0xe] }
 0x27c   : > { %26612 = vst [vmem:[#allocation37_spill] sm:$0xff] %v21503_v50  ;;  %v21519_v50 = vld [vmem:[%s19590_s24 + $0x178] sm:$0xe]  ;;  %26620 = vst [vmem:[#allocation40_spill] sm:$0xff] %v21522_v59  ;;  %v3462_v49 = vor.u32 %v3461_v60, %v3458_v6  ;;  %v16194_v53 = vcombine.low %v3132_v4, %v3146_v17  ;;  %v3484_v9 = vshrl.u32 %v16139_v48, 16  ;;  %v26625_v21 = vld [vmem:[#allocation50_spill] sm:$0xff] }
 0x27d   : > { %26617 = vst [vmem:[#allocation39_spill] sm:$0xff] %v21514_v7  ;;  %26618 = vst [vmem:[#allocation38_spill] sm:$0xff] %v21516_v43  ;;  %v18923_v47 = vld [vmem:[%s26250_s2 + $0x1d8] sm:$0xff]   ;;  %v26626_v43 = vrot.slane %v26625_v21, 9  ;;  %v26628_v6 = vrot.slane %v26627_v22, 5  ;;  %v3472_v57 = vrot.slane %v3470_v36, 4 }
 0x27e   : > { %26619 = vst [vmem:[#allocation41_spill] sm:$0xff] %v21519_v50  ;;  %26621 = vst [vmem:[#allocation43_spill] sm:$0xff] %v21525_v37  ;;  %v26623_v58 = vld [vmem:[#allocation51_spill] sm:$0xff]  ;;  %v16138_v17 = vld [vmem:[%s19590_s24 + $0x184] sm:$0x1]  ;;  %v3475_v54 = vrot.slane %v3473_v55, 5  ;;  %8557 = vmatpush1.bf16.msra.mxu0 %v18923_v47 }
 0x27f   : > { %v26624_v32 = vrot.slane %v26623_v58, 5  ;;  %v3487_v36 = vshll.u32 %v16139_v48, 16  ;;  %8558 = vmatprep.subr.bf16.mxu0 %v26551_v62  ;;  %v3479_v55 = vshll.u32 %v16138_v17, 16  ;;  %v3501_v58 = vshll.u32 %v16141_v40, 16  ;;  %v26633_v21 = vld [vmem:[#allocation59_spill] sm:$0xff]  ;;  %v26634_v47 = vld [vmem:[#allocation58_spill] sm:$0xff] }
 0x280   : > { %8326 = vmatmul.mubr.bf16.gmra.mrb[24].mxu0 %v16193_v38  ;;  %v26629_v38 = vld [vmem:[#allocation52_spill] sm:$0xff]  ;;  %v3160_v22 = vsel %vm19609_vm2, %v26634_v47, %v26633_v21 }
 0x281   : > { %8333 = vmatprep.mubr.bf16.mxu0 %v16418_v24  ;;  %v4302_v7 = vsel %vm20120_vm5, %v26626_v43, %v26624_v32  ;;  %v26630_v60 = vrot.slane %v26629_v38, 9  ;;  %v21548_v24 = vrot.slane %v3448_v34, 4  ;;  %v21554_v32 = vrot.slane %v3462_v49, 4  ;;  %v16140_v34 = vld [vmem:[%s19590_s24 + $0x19c] sm:$0x1]  ;;  %v26635_v37 = vld [vmem:[#allocation60_spill] sm:$0xff] }
 0x282   : > { %v3486_v38 = vrot.slane %v3484_v9, 4  ;;  %v26636_v49 = vld [vmem:[#allocation5_spill] sm:$0xff]  ;;  %v21570_v9 = vld [vmem:[%s19590_s24 + $0x19c] sm:$0x1]  ;;  %v21573_v17 = vld [vmem:[%s19590_s24 + $0x1a0] sm:$0xe] }
 0x283   : > { %v4306_v4 = vsel %vm20120_vm5, %v26630_v60, %v26628_v6  ;;  %26631 = vst [vmem:[#allocation45_spill] sm:$0xff] %v21548_v24  ;;  %26632 = vst [vmem:[#allocation44_spill] sm:$0xff] %v21554_v32  ;;  %v3465_v6 = vshll.u32 %v16136_v15, 16  ;;  %v3498_v60 = vshrl.u32 %v16141_v40, 16  ;;  %v3174_v48 = vsel %vm19609_vm2, %v26636_v49, %v26635_v37  ;;  %v21567_v32 = vld [vmem:[%s19590_s24 + $0x198] sm:$0xe] }
 0x284   : > { %v16419_v43 = vcombine.low %v4302_v7, %v4306_v4  ;;  %v3476_v15 = vor.u32 %v3475_v54, %v3472_v57  ;;  %26637 = vst [vmem:[#allocation47_spill] sm:$0xff] %v21567_v32  ;;  %26638 = vst [vmem:[#allocation46_spill] sm:$0xff] %v21570_v9  ;;  %v3489_v40 = vrot.slane %v3487_v36, 5  ;;  %v3493_v7 = vshll.u32 %v16140_v34, 16  ;;  %v21580_v47 = vld [vmem:[%s19590_s24 + $0x1a4] sm:$0x1] }
 0x285   : > { %26639 = vst [vmem:[#allocation48_spill] sm:$0xff] %v21573_v17  ;;  %v16195_v4 = vcombine.low %v3160_v22, %v3174_v48  ;;  %v21575_v56 = vrot.slane %v3465_v6, 5  ;;  %v21577_v21 = vrot.slane %v3479_v55, 5  ;;  %26642 = vst [vmem:[#allocation50_spill] sm:$0xff] %v21580_v47  ;;  %v16142_v37 = vld [vmem:[%s19590_s24 + $0x1a4] sm:$0x1] }
 0x286   : > { %v26643_v54 = vld [vmem:[#allocation55_spill] sm:$0xff]  ;;  %v26645_v49 = vld [vmem:[#allocation54_spill] sm:$0xff]  ;;  %v26647_v24 = vld [vmem:[#allocation57_spill] sm:$0xff]  ;;  %v21595_v6 = vrot.slane %v3476_v15, 4  ;;  %v3507_v15 = vshll.u32 %v16142_v37, 16 }
 0x287   : > { %26640 = vst [vmem:[#allocation49_spill] sm:$0xff] %v21575_v56  ;;  %26641 = vst [vmem:[#allocation51_spill] sm:$0xff] %v21577_v21  ;;  %v26644_v57 = vrot.slane %v26643_v54, 5  ;;  %v26646_v50 = vrot.slane %v26645_v49, 9  ;;  %v26648_v36 = vrot.slane %v26647_v24, 5  ;;  %v26649_v34 = vld [vmem:[#allocation56_spill] sm:$0xff] }
 0x288   : > { %8334 = vmatmul.mubr.bf16.gmra.mrb[28].mxu0 %v16194_v53  ;;  %v26650_v53 = vrot.slane %v26649_v34, 9  ;;  %26651 = vst [vmem:[#allocation53_spill] sm:$0xff] %v21595_v6  ;;  %v16145_v48 = vld [vmem:[%s19590_s24 + $0x1b0] sm:$0xf]  ;;  %v3490_v34 = vor.u32 %v3489_v40, %v3486_v38  ;;  %v16147_v21 = vld [vmem:[%s19590_s24 + $0x1b8] sm:$0xf] }
 0x289   : > { %8341 = vmatprep.mubr.bf16.mxu0 %v16419_v43  ;;  %v4310_v59 = vsel %vm20120_vm5, %v26646_v50, %v26644_v57  ;;  %v16143_v43 = vld [vmem:[%s19590_s24 + $0x1a8] sm:$0xf]  ;;  %v3500_v50 = vrot.slane %v3498_v60, 4  ;;  %v3503_v57 = vrot.slane %v3501_v58, 5  ;;  %v3526_v32 = vshrl.u32 %v16145_v48, 16  ;;  %v26653_v49 = vld [vmem:[#allocation62_spill] sm:$0xff] }
 0x28a   : > { %v4314_v22 = vsel %vm20120_vm5, %v26650_v53, %v26648_v36  ;;  %v21603_v36 = vrot.slane %v3493_v7, 5  ;;  %v3512_v53 = vshrl.u32 %v16143_v43, 16  ;;  %v3515_v55 = vshll.u32 %v16143_v43, 16  ;;  %v16149_v54 = vld [vmem:[%s19590_s24 + $0x1c0] sm:$0xf]  ;;  %v26654_v60 = vld [vmem:[#allocation61_spill] sm:$0xff] }
 0x28b   : > { %v3529_v6 = vshll.u32 %v16145_v48, 16  ;;  %v16420_v56 = vcombine.low %v4310_v59, %v4314_v22  ;;  %v3188_v58 = vsel %vm19609_vm2, %v26654_v60, %v26653_v49  ;;  %v26655_v24 = vld [vmem:[#allocation63_spill] sm:$0xff]  ;;  %v26656_v17 = vld [vmem:[#allocation64_spill] sm:$0xff]  ;;  %v26657_v40 = vld [vmem:[#allocation66_spill] sm:$0xff]  ;;  %v3504_v59 = vor.u32 %v3503_v57, %v3500_v50 }
 0x28c   : > { %26652 = vst [vmem:[#allocation52_spill] sm:$0xff] %v21603_v36  ;;  %v3202_v38 = vsel %vm19609_vm2, %v26656_v17, %v26655_v24  ;;  %v26658_v7 = vrot.slane %v26657_v40, 5  ;;  %v26659_v37 = vld [vmem:[#allocation65_spill] sm:$0xff]  ;;  %v26663_v47 = vld [vmem:[#allocation68_spill] sm:$0xff]  ;;  %v26665_v49 = vld [vmem:[#allocation67_spill] sm:$0xff]  ;;  %v3216_v17 = vsel %vm19609_vm2, %v21113_v39, %v21098_v19  ;;  %v3540_v40 = vshrl.u32 %v16147_v21, 16 }
 0x28d   : > { %v26660_v43 = vrot.slane %v26659_v37, 9  ;;  %v21622_v22 = vld [vmem:[%s19590_s24 + $0x1a8] sm:$0xe]  ;;  %v21625_v36 = vld [vmem:[%s19590_s24 + $0x1ac] sm:$0x1]  ;;  %v26664_v9 = vrot.slane %v26663_v47, 5  ;;  %v3230_v50 = vsel %vm19609_vm2, %v21115_v0, %v21117_v41 }
 0x28e   : > { %26661 = vst [vmem:[#allocation59_spill] sm:$0xff] %v21622_v22  ;;  %26662 = vst [vmem:[#allocation58_spill] sm:$0xff] %v21625_v36  ;;  %v26666_v60 = vrot.slane %v26665_v49, 9  ;;  %v16144_v24 = vld [vmem:[%s19590_s24 + $0x1ac] sm:$0x1]  ;;  %v21642_v47 = vrot.slane %v3490_v34, 4 }
 0x28f   : > { %v4318_v48 = vsel %vm20120_vm5, %v26660_v43, %v26658_v7  ;;  %v3543_v7 = vshll.u32 %v16147_v21, 16  ;;  %v16146_v57 = vld [vmem:[%s19590_s24 + $0x1b4] sm:$0x1]  ;;  %v3557_v37 = vshll.u32 %v16149_v54, 16  ;;  %v18924_v19 = vld [vmem:[%s26250_s2 + $0x1e0] sm:$0xff]   ;;  %v3514_v39 = vrot.slane %v3512_v53, 4 }
 0x290   : > { %v4322_v61 = vsel %vm20120_vm5, %v26666_v60, %v26664_v9  ;;  %8342 = vmatmul.mubr.bf16.gmra.mrb[32].mxu0 %v16195_v4  ;;  %v3554_v9 = vshrl.u32 %v16149_v54, 16  ;;  %v3517_v21 = vrot.slane %v3515_v55, 5  ;;  %v3528_v4 = vrot.slane %v3526_v32, 4  ;;  %v21655_v54 = vld [vmem:[%s19590_s24 + $0x1b0] sm:$0xe] }
 0x291   : > { %8349 = vmatprep.mubr.bf16.mxu0 %v16420_v56  ;;  %v3531_v43 = vrot.slane %v3529_v6, 5  ;;  %v21648_v49 = vrot.slane %v3504_v59, 4  ;;  %v21650_v0 = vrot.slane %v3507_v15, 5  ;;  %8559 = vmatpush1.bf16.msra.mxu0 %v18924_v19  ;;  %v21658_v56 = vld [vmem:[%s19590_s24 + $0x1b4] sm:$0x1]  ;;  %v3521_v55 = vshll.u32 %v16144_v24, 16 }
 0x292   : > { %v3535_v32 = vshll.u32 %v16146_v57, 16  ;;  %v3542_v53 = vrot.slane %v3540_v40, 4  ;;  %v3545_v6 = vrot.slane %v3543_v7, 5  ;;  %8560 = vmatprep.subr.bf16.mxu0 %v26551_v62  ;;  %v16196_v15 = vcombine.low %v3188_v58, %v3202_v38  ;;  %v16148_v59 = vld [vmem:[%s19590_s24 + $0x1bc] sm:$0x1] }
 0x293   : > { %26667 = vst [vmem:[#allocation60_spill] sm:$0xff] %v21648_v49  ;;  %26668 = vst [vmem:[#allocation5_spill] sm:$0xff] %v21650_v0  ;;  %v16150_v60 = vld [vmem:[%s19590_s24 + $0x1c4] sm:$0x1]  ;;  %v3556_v41 = vrot.slane %v3554_v9, 4  ;;  %v3559_v19 = vrot.slane %v3557_v37, 5  ;;  %v16421_v34 = vcombine.low %v4318_v48, %v4322_v61  ;;  %v3518_v22 = vor.u32 %v3517_v21, %v3514_v39 }
 0x294   : > { %v3532_v36 = vor.u32 %v3531_v43, %v3528_v4  ;;  %v21664_v49 = vld [vmem:[%s19590_s24 + $0x1b8] sm:$0xe]  ;;  %v21667_v0 = vld [vmem:[%s19590_s24 + $0x1bc] sm:$0x1]  ;;  %v16151_v24 = vld [vmem:[%s19590_s24 + $0x1c8] sm:$0xf]  ;;  %v16197_v57 = vcombine.low %v3216_v17, %v3230_v50  ;;  %v3546_v17 = vor.u32 %v3545_v6, %v3542_v53 }
 0x295   : > { %26669 = vst [vmem:[#allocation55_spill] sm:$0xff] %v21664_v49  ;;  %26670 = vst [vmem:[#allocation54_spill] sm:$0xff] %v21667_v0  ;;  %v26671_v40 = vrot.slane %v21076_v30, 5  ;;  %v26672_v7 = vrot.slane %v21071_v25, 9  ;;  %v21677_v38 = vld [vmem:[%s19590_s24 + $0x1c0] sm:$0xe]  ;;  %v3560_v4 = vor.u32 %v3559_v19, %v3556_v41 }
 0x296   : > { %26673 = vst [vmem:[#allocation57_spill] sm:$0xff] %v21677_v38  ;;  %v21680_v9 = vld [vmem:[%s19590_s24 + $0x1c4] sm:$0x1]  ;;  %v26675_v61 = vrot.slane %v21089_v27, 5  ;;  %v26676_v48 = vld [vmem:[#allocation7_spill] sm:$0xff]  ;;  %v3549_v50 = vshll.u32 %v16148_v59, 16 }
 0x297   : > { %v4326_v58 = vsel %vm20120_vm5, %v26672_v7, %v26671_v40  ;;  %26674 = vst [vmem:[#allocation56_spill] sm:$0xff] %v21680_v9  ;;  %v26677_v37 = vrot.slane %v26676_v48, 9  ;;  %v3563_v30 = vshll.u32 %v16150_v60, 16  ;;  %v3568_v43 = vshrl.u32 %v16151_v24, 16  ;;  %v16153_v53 = vld [vmem:[%s19590_s24 + $0x1d0] sm:$0xf] }
 0x298   : > { %8350 = vmatmul.mubr.bf16.gmra.mrb[36].mxu0 %v16196_v15  ;;  %v21690_v40 = vrot.slane %v3518_v22, 4  ;;  %v21692_v27 = vrot.slane %v3521_v55, 5  ;;  %v21694_v7 = vrot.slane %v3532_v36, 4  ;;  %v21696_v48 = vrot.slane %v3535_v32, 5  ;;  %v21712_v60 = vld [vmem:[%s19590_s24 + $0x1c8] sm:$0xe] }
 0x299   : > { %v4330_v39 = vsel %vm20120_vm5, %v26677_v37, %v26675_v61  ;;  %8357 = vmatprep.mubr.bf16.mxu0 %v16421_v34  ;;  %v21703_v34 = vrot.slane %v3546_v17, 4  ;;  %v21705_v36 = vrot.slane %v3549_v50, 5  ;;  %v21707_v55 = vrot.slane %v3563_v30, 5  ;;  %26683 = vst [vmem:[#allocation65_spill] sm:$0xff] %v21712_v60  ;;  %v21715_v6 = vld [vmem:[%s19590_s24 + $0x1cc] sm:$0x1] }
 0x29a   : > { %26678 = vst [vmem:[#allocation62_spill] sm:$0xff] %v21694_v7  ;;  %v3571_v32 = vshll.u32 %v16151_v24, 16  ;;  %v21709_v59 = vrot.slane %v3560_v4, 4  ;;  %v3570_v19 = vrot.slane %v3568_v43, 4  ;;  %v3582_v61 = vshrl.u32 %v16153_v53, 16  ;;  %26684 = vst [vmem:[#allocation68_spill] sm:$0xff] %v21715_v6 }
 0x29b   : > { %26679 = vst [vmem:[#allocation61_spill] sm:$0xff] %v21703_v34  ;;  %26680 = vst [vmem:[#allocation63_spill] sm:$0xff] %v21705_v36  ;;  %v3585_v37 = vshll.u32 %v16153_v53, 16  ;;  %v16422_v41 = vcombine.low %v4326_v58, %v4330_v39  ;;  %v21718_v22 = vld [vmem:[%s19590_s24 + $0x1d0] sm:$0xe]  ;;  %v26687_v50 = vld [vmem:[#allocation9_spill] sm:$0xff]  ;;  %v3258_v43 = vsel %vm19609_vm2, %v21163_v13, %v21165_v28 }
 0x29c   : > { %26681 = vst [vmem:[#allocation64_spill] sm:$0xff] %v21707_v55  ;;  %26682 = vst [vmem:[#allocation66_spill] sm:$0xff] %v21709_v59  ;;  %v21721_v17 = vld [vmem:[%s19590_s24 + $0x1d4] sm:$0x1]  ;;  %v16152_v4 = vld [vmem:[%s19590_s24 + $0x1cc] sm:$0x1] }
 0x29d   : > { %26685 = vst [vmem:[#allocation67_spill] sm:$0xff] %v21718_v22  ;;  %26686 = vst [vmem:[#allocation7_spill] sm:$0xff] %v21721_v17  ;;  %v26688_v30 = vld [vmem:[#allocation6_spill] sm:$0xff]  ;;  %v16155_v15 = vld [vmem:[%s19590_s24 + $0x1e8] sm:$0xf]  ;;  %v26689_v58 = vrot.slane %v21134_v52, 5 }
 0x29e   : > { %v3244_v24 = vsel %vm19609_vm2, %v26688_v30, %v26687_v50  ;;  %v26690_v39 = vld [vmem:[#allocation8_spill] sm:$0xff]  ;;  %v26692_v21 = vld [vmem:[#allocation10_spill] sm:$0xff]  ;;  %v26694_v55 = vld [vmem:[#allocation11_spill] sm:$0xff]  ;;  %v3573_v30 = vrot.slane %v3571_v32, 5  ;;  %v3596_v32 = vshrl.u32 %v16155_v15, 16 }
 0x29f   : > { %v26691_v53 = vrot.slane %v26690_v39, 9  ;;  %v26693_v59 = vrot.slane %v26692_v21, 5  ;;  %v26695_v34 = vrot.slane %v26694_v55, 9  ;;  %v16157_v36 = vld [vmem:[%s19590_s24 + $0x1f0] sm:$0xf]  ;;  %v18925_v13 = vld [vmem:[%s26250_s2 + $0x1e8] sm:$0xff]  }
 0x2a0   : > { %8358 = vmatmul.mubr.bf16.gmra.mrb[40].mxu0 %v16197_v57  ;;  %v16154_v57 = vld [vmem:[%s19590_s24 + $0x1d4] sm:$0x1]  ;;  %v3584_v21 = vrot.slane %v3582_v61, 4  ;;  %v3587_v55 = vrot.slane %v3585_v37, 5  ;;  %v3613_v52 = vshll.u32 %v16157_v36, 16  ;;  %v16198_v61 = vcombine.low %v3244_v24, %v3258_v43  ;;  %v26699_v24 = vld [vmem:[#allocation15_spill] sm:$0xff] }
 0x2a1   : > { %v4334_v25 = vsel %vm20120_vm5, %v26691_v53, %v26689_v58  ;;  %v4338_v50 = vsel %vm20120_vm5, %v26695_v34, %v26693_v59  ;;  %8365 = vmatprep.mubr.bf16.mxu0 %v16422_v41  ;;  %v3599_v59 = vshll.u32 %v16155_v15, 16  ;;  %8561 = vmatpush1.bf16.msra.mxu0 %v18925_v13  ;;  %v3577_v41 = vshll.u32 %v16152_v4, 16  ;;  %v21756_v37 = vld [vmem:[%s19590_s24 + $0x1e8] sm:$0xe]  ;;  %v16156_v58 = vld [vmem:[%s19590_s24 + $0x1ec] sm:$0x1] }
 0x2a2   : > { %v3591_v39 = vshll.u32 %v16154_v57, 16  ;;  %v3610_v53 = vshrl.u32 %v16157_v36, 16  ;;  %8562 = vmatprep.subr.bf16.mxu0 %v26551_v62  ;;  %v3574_v28 = vor.u32 %v3573_v30, %v3570_v19  ;;  %v16159_v22 = vld [vmem:[%s19590_s24 + $0x1f8] sm:$0xf]  ;;  %v16423_v34 = vcombine.low %v4334_v25, %v4338_v50  ;;  %v21761_v60 = vld [vmem:[%s19590_s24 + $0x1ec] sm:$0x1] }
 0x2a3   : > { %v3588_v17 = vor.u32 %v3587_v55, %v3584_v21  ;;  %v21764_v15 = vld [vmem:[%s19590_s24 + $0x1f0] sm:$0xe]  ;;  %v21767_v4 = vld [vmem:[%s19590_s24 + $0x1f4] sm:$0x1]  ;;  %v26697_v57 = vld [vmem:[#allocation13_spill] sm:$0xff]  ;;  %v3286_v19 = vsel %vm19609_vm2, %v21215_v14, %v26699_v24  ;;  %v3598_v25 = vrot.slane %v3596_v32, 4 }
 0x2a4   : > { %26696 = vst [vmem:[#allocation9_spill] sm:$0xff] %v21764_v15  ;;  %v26698_v13 = vld [vmem:[#allocation12_spill] sm:$0xff]  ;;  %v16158_v43 = vld [vmem:[%s19590_s24 + $0x1f4] sm:$0x1]  ;;  %v3601_v50 = vrot.slane %v3599_v59, 5  ;;  %v26700_v30 = vrot.slane %v21184_v18, 5 }
 0x2a5   : > { %v3272_v36 = vsel %vm19609_vm2, %v26698_v13, %v26697_v57  ;;  %v26701_v21 = vld [vmem:[#allocation14_spill] sm:$0xff]  ;;  %v26703_v38 = vld [vmem:[#allocation16_spill] sm:$0xff]  ;;  %v26705_v49 = vld [vmem:[#allocation17_spill] sm:$0xff]  ;;  %v3605_v13 = vshll.u32 %v16156_v58, 16  ;;  %v3624_v7 = vshrl.u32 %v16159_v22, 16  ;;  %v21790_v14 = vrot.slane %v3574_v28, 4 }
 0x2a6   : > { %v26702_v55 = vrot.slane %v26701_v21, 9  ;;  %v26704_v9 = vrot.slane %v26703_v38, 5  ;;  %v26706_v0 = vrot.slane %v26705_v49, 9  ;;  %v3612_v32 = vrot.slane %v3610_v53, 4  ;;  %v16161_v59 = vld [vmem:[%s19590_s24 + $0x200] sm:$0xf] }
 0x2a7   : > { %v3615_v18 = vrot.slane %v3613_v52, 5  ;;  %v3627_v24 = vshll.u32 %v16159_v22, 16  ;;  %v21795_v38 = vrot.slane %v3588_v17, 4  ;;  %v21797_v49 = vrot.slane %v3591_v39, 5  ;;  %v16163_v58 = vld [vmem:[%s19590_s24 + $0x208] sm:$0xf] }
 0x2a8   : > { %v4342_v6 = vsel %vm20120_vm5, %v26702_v55, %v26700_v30  ;;  %v4346_v57 = vsel %vm20120_vm5, %v26706_v0, %v26704_v9  ;;  %8366 = vmatmul.mubr.bf16.gmra.mrb[44].mxu0 %v16198_v61  ;;  %v21793_v30 = vrot.slane %v3577_v41, 5  ;;  %v3602_v22 = vor.u32 %v3601_v50, %v3598_v25  ;;  %v21807_v21 = vld [vmem:[%s19590_s24 + $0x1f8] sm:$0xe]  ;;  %v21810_v55 = vld [vmem:[%s19590_s24 + $0x1fc] sm:$0x1] }
 0x2a9   : > { %8373 = vmatprep.mubr.bf16.mxu0 %v16423_v34  ;;  %v21804_v34 = vrot.slane %v3605_v13, 5  ;;  %v3619_v41 = vshll.u32 %v16158_v43, 16  ;;  %v3626_v53 = vrot.slane %v3624_v7, 4  ;;  %v3638_v17 = vshrl.u32 %v16161_v59, 16  ;;  %26707 = vst [vmem:[#allocation6_spill] sm:$0xff] %v21807_v21  ;;  %26708 = vst [vmem:[#allocation8_spill] sm:$0xff] %v21810_v55 }
 0x2aa   : > { %v16199_v39 = vcombine.low %v3272_v36, %v3286_v19  ;;  %v3616_v61 = vor.u32 %v3615_v18, %v3612_v32  ;;  %v3629_v0 = vrot.slane %v3627_v24, 5  ;;  %v3641_v28 = vshll.u32 %v16161_v59, 16  ;;  %v16165_v9 = vld [vmem:[%s19590_s24 + $0x210] sm:$0xf]  ;;  %v21814_v52 = vld [vmem:[%s19590_s24 + $0x200] sm:$0xe] }
 0x2ab   : > { %v16424_v15 = vcombine.low %v4342_v6, %v4346_v57  ;;  %26709 = vst [vmem:[#allocation10_spill] sm:$0xff] %v21814_v52  ;;  %v3652_v25 = vshrl.u32 %v16163_v58, 16  ;;  %v3655_v50 = vshll.u32 %v16163_v58, 16  ;;  %v3300_v7 = vsel %vm19609_vm2, %v21243_v16, %v21267_v63  ;;  %v26711_v43 = vld [vmem:[#allocation4_spill] sm:$0xff]  ;;  %v16160_v57 = vld [vmem:[%s19590_s24 + $0x1fc] sm:$0x1] }
 0x2ac   : > { %v3314_v36 = vsel %vm19609_vm2, %v21269_v31, %v21271_v29  ;;  %v26710_v19 = vrot.slane %v21235_v23, 5  ;;  %v26712_v13 = vrot.slane %v26711_v43, 9  ;;  %v16162_v32 = vld [vmem:[%s19590_s24 + $0x204] sm:$0x1]  ;;  %v26713_v18 = vld [vmem:[#allocation18_spill] sm:$0xff]  ;;  %v26715_v24 = vld [vmem:[#allocation19_spill] sm:$0xff] }
 0x2ad   : > { %v26714_v59 = vrot.slane %v26713_v18, 5  ;;  %v26716_v16 = vrot.slane %v26715_v24, 9  ;;  %v21840_v58 = vrot.slane %v3602_v22, 4  ;;  %v3666_v31 = vshrl.u32 %v16165_v9, 16  ;;  %v18927_v29 = vld [vmem:[%s26250_s2 + $0x200] sm:$0xff]  }
 0x2ae   : > { %v21830_v6 = vsel %vm20120_vm5, %v26712_v13, %v26710_v19  ;;  %v3669_v23 = vshll.u32 %v16165_v9, 16  ;;  %v21845_v19 = vrot.slane %v3616_v61, 4  ;;  %v21847_v43 = vrot.slane %v3619_v41, 5  ;;  %v18928_v9 = vld [vmem:[%s26250_s2 + $0x208] sm:$0xff]   ;;  %v21856_v22 = vld [vmem:[%s19590_s24 + $0x204] sm:$0x1]  ;;  %18257 = vmatprep.subr.bf16.mxu1 %v18927_v29 }
 0x2af   : > { %v4354_v63 = vsel %vm20120_vm5, %v26716_v16, %v26714_v59  ;;  %26717 = vst [vmem:[#allocation11_spill] sm:$0xff] %v21840_v58  ;;  %v3640_v13 = vrot.slane %v3638_v17, 4  ;;  %v3643_v18 = vrot.slane %v3641_v28, 5  ;;  %v18926_v59 = vld [vmem:[%s26250_s2 + $0x1f0] sm:$0xff]   ;;  %v3654_v17 = vrot.slane %v3652_v25, 4  ;;  %18258 = vmatpush3.bf16.msra.mxu1 %v18927_v29 }
 0x2b0   : > { %8374 = vmatmul.mubr.bf16.gmra.mrb[48].mxu0 %v16199_v39  ;;  %26718 = vst [vmem:[#allocation13_spill] sm:$0xff] %v21845_v19  ;;  %26719 = vst [vmem:[#allocation12_spill] sm:$0xff] %v21847_v43  ;;  %v3657_v28 = vrot.slane %v3655_v50, 5  ;;  %v3630_v24 = vor.u32 %v3629_v0, %v3626_v53  ;;  %v3633_v16 = vshll.u32 %v16160_v57, 16  ;;  %v3647_v19 = vshll.u32 %v16162_v32, 16  ;;  %18259 = vmatprep.subr.bf16.mxu1 %v18928_v9  ;;  %v26720_v53 = vld [vmem:[#allocation20_spill] sm:$0xff] }
 0x2b1   : > { %8381 = vmatprep.mubr.bf16.mxu0 %v16424_v15  ;;  %v16164_v43 = vld [vmem:[%s19590_s24 + $0x20c] sm:$0x1]  ;;  %8563 = vmatpush1.bf16.msra.mxu0 %v18926_v59  ;;  %v21863_v15 = vld [vmem:[%s19590_s24 + $0x208] sm:$0xe]  ;;  %v16166_v39 = vld [vmem:[%s19590_s24 + $0x214] sm:$0x1]  ;;  %v16200_v25 = vcombine.low %v3300_v7, %v3314_v36  ;;  %v16425_v0 = vcombine.low %v21830_v6, %v4354_v63  ;;  %v3644_v32 = vor.u32 %v3643_v18, %v3640_v13 }
 0x2b2   : > { %v3668_v21 = vrot.slane %v3666_v31, 4  ;;  %v3671_v58 = vrot.slane %v3669_v23, 5  ;;  %v16167_v41 = vld [vmem:[%s19590_s24 + $0x218] sm:$0xf]  ;;  %8564 = vmatprep.subr.bf16.mxu0 %v26551_v62  ;;  %v26721_v50 = vld [vmem:[#allocation21_spill] sm:$0xff]  ;;  %v3658_v6 = vor.u32 %v3657_v28, %v3654_v17  ;;  %v3661_v63 = vshll.u32 %v16164_v43, 16 }
 0x2b3   : > { %v3328_v57 = vsel %vm19609_vm2, %v26721_v50, %v26720_v53  ;;  %v21874_v59 = vld [vmem:[%s19590_s24 + $0x20c] sm:$0x1]  ;;  %v21877_v29 = vld [vmem:[%s19590_s24 + $0x210] sm:$0xe]  ;;  %v21880_v31 = vld [vmem:[%s19590_s24 + $0x214] sm:$0x1]  ;;  %18260 = vmatpush3.bf16.msra.mxu1 %v18928_v9 }
 0x2b4   : > { %v26722_v23 = vld [vmem:[#allocation23_spill] sm:$0xff]  ;;  %v21887_v61 = vrot.slane %v3630_v24, 4  ;;  %v3675_v53 = vshll.u32 %v16166_v39, 16  ;;  %v3680_v13 = vshrl.u32 %v16167_v41, 16  ;;  %v3683_v18 = vshll.u32 %v16167_v41, 16 }
 0x2b5   : > { %v3342_v7 = vsel %vm19609_vm2, %v21327_v42, %v26722_v23  ;;  %v26723_v50 = vrot.slane %v21295_v12, 5  ;;  %v26724_v62 = vrot.slane %v21292_v35, 9  ;;  %v26725_v55 = vrot.slane %v21302_v2, 5  ;;  %v26726_v42 = vld [vmem:[#allocation22_spill] sm:$0xff]  ;;  %v16169_v28 = vld [vmem:[%s19590_s24 + $0x220] sm:$0xf] }
 0x2b6   : > { %v26727_v23 = vrot.slane %v26726_v42, 9  ;;  %v21901_v17 = vrot.slane %v3633_v16, 5  ;;  %v3672_v39 = vor.u32 %v3671_v58, %v3668_v21  ;;  %v18929_v12 = vld [vmem:[%s26250_s2 + $0x210] sm:$0xff]   ;;  %v21907_v35 = vrot.slane %v3644_v32, 4  ;;  %v18930_v21 = vld [vmem:[%s26250_s2 + $0x218] sm:$0xff]  }
 0x2b7   : > { %v4358_v52 = vsel %vm20120_vm5, %v26724_v62, %v26723_v50  ;;  %v21909_v62 = vrot.slane %v3647_v19, 5  ;;  %v21918_v41 = vrot.slane %v3658_v6, 4  ;;  %v21920_v19 = vrot.slane %v3661_v63, 5  ;;  %18261 = vmatprep.subr.bf16.mxu1 %v18929_v12  ;;  %v16171_v50 = vld [vmem:[%s19590_s24 + $0x238] sm:$0xf] }
 0x2b8   : > { %v4362_v43 = vsel %vm20120_vm5, %v26727_v23, %v26725_v55  ;;  %8382 = vmatmul.mubr.bf16.gmra.mrb[52].mxu0 %v16200_v25  ;;  %v21922_v24 = vrot.slane %v3675_v53, 5  ;;  %v3682_v16 = vrot.slane %v3680_v13, 4  ;;  %v3685_v25 = vrot.slane %v3683_v18, 5  ;;  %18262 = vmatpush3.bf16.msra.mxu1 %v18929_v12  ;;  %v21928_v42 = vld [vmem:[%s19590_s24 + $0x218] sm:$0xe]  ;;  %v26737_v12 = vld [vmem:[#allocation25_spill] sm:$0xff] }
 0x2b9   : > { %8389 = vmatprep.mubr.bf16.mxu0 %v16425_v0  ;;  %26728 = vst [vmem:[#allocation15_spill] sm:$0xff] %v21918_v41  ;;  %26729 = vst [vmem:[#allocation14_spill] sm:$0xff] %v21920_v19  ;;  %v3694_v32 = vshrl.u32 %v16169_v28, 16  ;;  %v21925_v0 = vrot.slane %v3672_v39, 4  ;;  %v3697_v23 = vshll.u32 %v16169_v28, 16  ;;  %18263 = vmatprep.subr.bf16.mxu1 %v18930_v21  ;;  %v16201_v6 = vcombine.low %v3328_v57, %v3342_v7  ;;  %v26735_v57 = vld [vmem:[#allocation24_spill] sm:$0xff] }
 0x2ba   : > { %26730 = vst [vmem:[#allocation16_spill] sm:$0xff] %v21922_v24  ;;  %26732 = vst [vmem:[#allocation4_spill] sm:$0xff] %v21928_v42  ;;  %v21931_v55 = vld [vmem:[%s19590_s24 + $0x21c] sm:$0x1]  ;;  %v21934_v63 = vld [vmem:[%s19590_s24 + $0x220] sm:$0xe]  ;;  %v16426_v58 = vcombine.low %v4358_v52, %v4362_v43  ;;  %v3356_v39 = vsel %vm19609_vm2, %v21377_v44, %v21379_v26  ;;  %v3370_v28 = vsel %vm19609_vm2, %v21385_v20, %v21387_v33 }
 0x2bb   : > { %26731 = vst [vmem:[#allocation17_spill] sm:$0xff] %v21925_v0  ;;  %26733 = vst [vmem:[#allocation18_spill] sm:$0xff] %v21931_v55  ;;  %v16168_v53 = vld [vmem:[%s19590_s24 + $0x21c] sm:$0x1]  ;;  %v3708_v13 = vshrl.u32 %v16171_v50, 16  ;;  %v3711_v18 = vshll.u32 %v16171_v50, 16  ;;  %v3686_v9 = vor.u32 %v3685_v25, %v3682_v16 }
 0x2bc   : > { %26734 = vst [vmem:[#allocation19_spill] sm:$0xff] %v21934_v63  ;;  %v26736_v7 = vrot.slane %v26735_v57, 5  ;;  %v26738_v2 = vrot.slane %v26737_v12, 9  ;;  %v21954_v43 = vld [vmem:[%s19590_s24 + $0x224] sm:$0x1]  ;;  %18264 = vmatpush3.bf16.msra.mxu1 %v18930_v21  ;;  %v26740_v44 = vld [vmem:[#allocation26_spill] sm:$0xff] }
 0x2bd   : > { %26739 = vst [vmem:[#allocation20_spill] sm:$0xff] %v21954_v43  ;;  %v16170_v50 = vld [vmem:[%s19590_s24 + $0x224] sm:$0x1]  ;;  %v26741_v26 = vrot.slane %v26740_v44, 5  ;;  %v26742_v36 = vld [vmem:[#allocation27_spill] sm:$0xff]  ;;  %v3689_v33 = vshll.u32 %v16168_v53, 16  ;;  %v16202_v44 = vcombine.low %v3356_v39, %v3370_v28 }
 0x2be   : > { %v21951_v52 = vsel %vm20120_vm5, %v26738_v2, %v26736_v7  ;;  %v26743_v0 = vrot.slane %v26742_v36, 9  ;;  %v3696_v57 = vrot.slane %v3694_v32, 4  ;;  %v3699_v12 = vrot.slane %v3697_v23, 5  ;;  %v18932_v2 = vld [vmem:[%s26250_s2 + $0x220] sm:$0xff]   ;;  %v18931_v36 = vld [vmem:[%s26250_s2 + $0x1f8] sm:$0xff]   ;;  %v18933_v25 = vld [vmem:[%s26250_s2 + $0x228] sm:$0xff]  }
 0x2bf   : > { %v16173_v16 = vld [vmem:[%s19590_s24 + $0x240] sm:$0xf]  ;;  %v16172_v23 = vld [vmem:[%s19590_s24 + $0x23c] sm:$0x1]  ;;  %v3713_v53 = vrot.slane %v3711_v18, 5  ;;  %18265 = vmatprep.subr.bf16.mxu1 %v18932_v2  ;;  %v21979_v7 = vrot.slane %v3686_v9, 4  ;;  %8565 = vmatpush1.bf16.msra.mxu0 %v18931_v36 }
 0x2c0   : > { %v4370_v20 = vsel %vm20120_vm5, %v26743_v0, %v26741_v26  ;;  %8390 = vmatmul.mubr.bf16.gmra.mrb[56].mxu0 %v16201_v6  ;;  %v3710_v6 = vrot.slane %v3708_v13, 4  ;;  %v3703_v21 = vshll.u32 %v16170_v50, 16  ;;  %v16174_v42 = vld [vmem:[%s19590_s24 + $0x244] sm:$0x1]  ;;  %18266 = vmatpush3.bf16.msra.mxu1 %v18932_v2  ;;  %v21987_v13 = vrot.slane %v3689_v33, 5  ;;  %v26757_v63 = vld [vmem:[#allocation33_spill] sm:$0xff] }
 0x2c1   : > { %8397 = vmatprep.mubr.bf16.mxu0 %v16426_v58  ;;  %v16427_v26 = vcombine.low %v21951_v52, %v4370_v20  ;;  %26744 = vst [vmem:[#allocation21_spill] sm:$0xff] %v21979_v7  ;;  %v16175_v58 = vld [vmem:[%s19590_s24 + $0x248] sm:$0xf]  ;;  %v3700_v18 = vor.u32 %v3699_v12, %v3696_v57  ;;  %v21990_v39 = vld [vmem:[%s19590_s24 + $0x238] sm:$0xe]  ;;  %v3722_v9 = vshrl.u32 %v16173_v16, 16  ;;  %18267 = vmatprep.subr.bf16.mxu1 %v18933_v25 }
 0x2c2   : > { %v26745_v32 = vld [vmem:[#allocation28_spill] sm:$0xff]  ;;  %26746 = vst [vmem:[#allocation23_spill] sm:$0xff] %v21987_v13  ;;  %26747 = vst [vmem:[#allocation22_spill] sm:$0xff] %v21990_v39  ;;  %v21993_v28 = vld [vmem:[%s19590_s24 + $0x23c] sm:$0x1]  ;;  %v3398_v52 = vsel %vm19609_vm2, %v21436_v3, %v21438_v8  ;;  %v26749_v50 = vrot.slane %v21404_v1, 5  ;;  %v3714_v1 = vor.u32 %v3713_v53, %v3710_v6 }
 0x2c3   : > { %v3384_v0 = vsel %vm19609_vm2, %v21421_v46, %v26745_v32  ;;  %26748 = vst [vmem:[#allocation24_spill] sm:$0xff] %v21993_v28  ;;  %v26750_v20 = vrot.slane %v21400_v45, 9  ;;  %v22008_v33 = vld [vmem:[%s19590_s24 + $0x240] sm:$0xe]  ;;  %v22011_v57 = vld [vmem:[%s19590_s24 + $0x244] sm:$0x1] }
 0x2c4   : > { %26751 = vst [vmem:[#allocation25_spill] sm:$0xff] %v22008_v33  ;;  %26752 = vst [vmem:[#allocation26_spill] sm:$0xff] %v22011_v57  ;;  %v3717_v12 = vshll.u32 %v16172_v23, 16  ;;  %v3725_v2 = vshll.u32 %v16173_v16, 16  ;;  %v26753_v36 = vrot.slane %v21415_v5, 5  ;;  %v26754_v32 = vrot.slane %v21412_v51, 9  ;;  %18268 = vmatpush3.bf16.msra.mxu1 %v18933_v25 }
 0x2c5   : > { %v22005_v46 = vsel %vm20120_vm5, %v26750_v20, %v26749_v50  ;;  %v3731_v45 = vshll.u32 %v16174_v42, 16  ;;  %v16177_v8 = vld [vmem:[%s19590_s24 + $0x250] sm:$0xf]  ;;  %v3736_v7 = vshrl.u32 %v16175_v58, 16  ;;  %v26755_v50 = vld [vmem:[#allocation31_spill] sm:$0xff]  ;;  %v22030_v16 = vrot.slane %v3703_v21, 5 }
 0x2c6   : > { %v22019_v3 = vsel %vm20120_vm5, %v26754_v32, %v26753_v36  ;;  %v26756_v20 = vld [vmem:[#allocation29_spill] sm:$0xff]  ;;  %v26758_v23 = vld [vmem:[#allocation34_spill] sm:$0xff]  ;;  %v3739_v51 = vshll.u32 %v16175_v58, 16  ;;  %v22032_v36 = vrot.slane %v3700_v18, 4  ;;  %v3724_v21 = vrot.slane %v3722_v9, 4 }
 0x2c7   : > { %v3412_v13 = vsel %vm19609_vm2, %v26756_v20, %v26755_v50  ;;  %v3426_v5 = vsel %vm19609_vm2, %v26758_v23, %v26757_v63  ;;  %26759 = vst [vmem:[#allocation27_spill] sm:$0xff] %v22030_v16  ;;  %v18934_v32 = vld [vmem:[%s26250_s2 + $0x230] sm:$0xff]   ;;  %v3727_v58 = vrot.slane %v3725_v2, 5  ;;  %v3750_v25 = vshrl.u32 %v16177_v8, 16  ;;  %v18935_v18 = vld [vmem:[%s26250_s2 + $0x238] sm:$0xff]  }
 0x2c8   : > { %26760 = vst [vmem:[#allocation28_spill] sm:$0xff] %v22032_v36  ;;  %8398 = vmatmul.mubr.bf16.gmra.mrb[60].mxu0 %v16202_v44  ;;  %v22044_v50 = vrot.slane %v3714_v1, 4  ;;  %v22046_v20 = vrot.slane %v3717_v12, 5  ;;  %v22048_v44 = vrot.slane %v3731_v45, 5  ;;  %v3738_v23 = vrot.slane %v3736_v7, 4  ;;  %18269 = vmatprep.subr.bf16.mxu1 %v18934_v32  ;;  %v26769_v36 = vld [vmem:[#allocation36_spill] sm:$0xff] }
 0x2c9   : > { %8405 = vmatprep.mubr.bf16.mxu0 %v16427_v26  ;;  %v3741_v9 = vrot.slane %v3739_v51, 5  ;;  %v3753_v2 = vshll.u32 %v16177_v8, 16  ;;  %18270 = vmatpush3.bf16.msra.mxu1 %v18934_v32  ;;  %v16699_v53 = vld [vmem:[%s19590_s24 + $0x10] sm:$0xe]  ;;  %v16700_v63 = vld [vmem:[%s19590_s24 + $0x14] sm:$0x1]  ;;  %v16203_v42 = vcombine.low %v3384_v0, %v3398_v52  ;;  %v16428_v26 = vcombine.low %v22005_v46, %v22019_v3 }
 0x2ca   : > { %26761 = vst [vmem:[#allocation31_spill] sm:$0xff] %v22044_v50  ;;  %26762 = vst [vmem:[#allocation29_spill] sm:$0xff] %v22046_v20  ;;  %v22054_v1 = vcombine.low %v3412_v13, %v3426_v5  ;;  %v16176_v12 = vld [vmem:[%s19590_s24 + $0x24c] sm:$0x1]  ;;  %v16178_v45 = vld [vmem:[%s19590_s24 + $0x254] sm:$0x1]  ;;  %18271 = vmatprep.subr.bf16.mxu1 %v18935_v18  ;;  %v3728_v20 = vor.u32 %v3727_v58, %v3724_v21 }
 0x2cb   : > { %26763 = vst [vmem:[#allocation33_spill] sm:$0xff] %v22048_v44  ;;  %v16701_v7 = vld [vmem:[%s19590_s24 + $0x18] sm:$0xe]  ;;  %v16702_v6 = vld [vmem:[%s19590_s24 + $0x1c] sm:$0x1]  ;;  %v3752_v8 = vrot.slane %v3750_v25, 4 }
 0x2cc   : > { %v22061_v51 = vld [vmem:[%s19590_s24 + $0x248] sm:$0xe]  ;;  %v16827_v32 = vrot.slane %v16699_v53, 9  ;;  %v6382_v44 = vrot.slane %v16700_v63, 5  ;;  %v16828_v0 = vrot.slane %v16701_v7, 9  ;;  %v26765_v46 = vld [vmem:[#allocation32_spill] sm:$0xff] }
 0x2cd   : > { %26764 = vst [vmem:[#allocation34_spill] sm:$0xff] %v22061_v51  ;;  %v16703_v52 = vld [vmem:[%s19590_s24 + $0x20] sm:$0xe]  ;;  %v26766_v13 = vrot.slane %v26765_v46, 5  ;;  %v26767_v3 = vld [vmem:[#allocation30_spill] sm:$0xff]  ;;  %v6386_v33 = vrot.slane %v16702_v6, 5  ;;  %18272 = vmatpush3.bf16.msra.mxu1 %v18935_v18 }
 0x2ce   : > { %v26768_v5 = vrot.slane %v26767_v3, 9  ;;  %v16704_v57 = vld [vmem:[%s19590_s24 + $0x24] sm:$0x1]  ;;  %v16705_v39 = vld [vmem:[%s19590_s24 + $0x28] sm:$0xe]  ;;  %v16829_v28 = vrot.slane %v16703_v52, 9  ;;  %v6383_v46 = vsel %vm20120_vm5, %v16827_v32, %v6382_v44 }
 0x2cf   : > { %v26770_v25 = vrot.slane %v26769_v36, 5  ;;  %v26771_v53 = vld [vmem:[#allocation35_spill] sm:$0xff]  ;;  %v22079_v16 = vld [vmem:[%s19590_s24 + $0x24c] sm:$0x1]  ;;  %v6390_v21 = vrot.slane %v16704_v57, 5  ;;  %v16830_v6 = vrot.slane %v16705_v39, 9  ;;  %v3742_v36 = vor.u32 %v3741_v9, %v3738_v23 }
 0x2d0   : > { %v4382_v50 = vsel %vm20120_vm5, %v26768_v5, %v26766_v13  ;;  %v26772_v63 = vrot.slane %v26771_v53, 9  ;;  %26773 = vst [vmem:[#allocation32_spill] sm:$0xff] %v22079_v16  ;;  %v16706_v13 = vld [vmem:[%s19590_s24 + $0x2c] sm:$0x1]  ;;  %v22085_v58 = vld [vmem:[%s19590_s24 + $0x250] sm:$0xe]  ;;  %v6387_v5 = vsel %vm20120_vm5, %v16828_v0, %v6386_v33  ;;  %8406 = vmatmul.mubr.bf16.gmra.mrb[64].mxu0 %v16203_v42 }
 0x2d1   : > { %26774 = vst [vmem:[#allocation30_spill] sm:$0xff] %v22085_v58  ;;  %v22088_v52 = vld [vmem:[%s19590_s24 + $0x254] sm:$0x1]  ;;  %v3755_v3 = vrot.slane %v3753_v2, 5  ;;  %v3745_v53 = vshll.u32 %v16176_v12, 16  ;;  %v3759_v18 = vshll.u32 %v16178_v45, 16  ;;  %v16891_v43 = vcombine.low %v6383_v46, %v6387_v5  ;;  %8413 = vmatprep.mubr.bf16.mxu0 %v16428_v26 }
 0x2d2   : > { %v4386_v7 = vsel %vm20120_vm5, %v26772_v63, %v26770_v25  ;;  %26775 = vst [vmem:[#allocation36_spill] sm:$0xff] %v22088_v52  ;;  %v6394_v25 = vrot.slane %v16706_v13, 5  ;;  %v16179_v63 = vld [vmem:[%s19590_s24 + $0x258] sm:$0xf]  ;;  %v6391_v57 = vsel %vm20120_vm5, %v16829_v28, %v6390_v21  ;;  %v22095_v39 = vrot.slane %v3728_v20, 4  ;;  %v26777_v2 = vld [vmem:[#allocation37_spill] sm:$0xff] }
 0x2d3   : > { %v16429_v9 = vcombine.low %v4382_v50, %v4386_v7  ;;  %v26778_v42 = vld [vmem:[#allocation39_spill] sm:$0xff]  ;;  %v26779_v45 = vld [vmem:[#allocation38_spill] sm:$0xff]  ;;  %v26780_v32 = vld [vmem:[#allocation45_spill] sm:$0xff]  ;;  %18273 = vmatprep.mubr.bf16.mxu1 %v16891_v43  ;;  %v3756_v7 = vor.u32 %v3755_v3, %v3752_v8  ;;  %v3764_v46 = vshrl.u32 %v16179_v63, 16  ;;  %v22112_v13 = vrot.slane %v3742_v36, 4 }
 0x2d4   : > { %26776 = vst [vmem:[#allocation35_spill] sm:$0xff] %v22095_v39  ;;  %v6395_v33 = vsel %vm20120_vm5, %v16830_v6, %v6394_v25  ;;  %v3440_v12 = vsel %vm19609_vm2, %v26778_v42, %v26777_v2  ;;  %v3454_v28 = vsel %vm19609_vm2, %v26780_v32, %v26779_v45  ;;  %v16181_v20 = vld [vmem:[%s19590_s24 + $0x260] sm:$0xf]  ;;  %v22114_v21 = vrot.slane %v3745_v53, 5  ;;  %v26788_v42 = vld [vmem:[#allocation42_spill] sm:$0xff]  ;;  %v26800_v23 = vld [vmem:[#allocation53_spill] sm:$0xff] }
 0x2d5   : > { %v16892_v26 = vcombine.low %v6391_v57, %v6395_v33  ;;  %26781 = vst [vmem:[#allocation37_spill] sm:$0xff] %v22112_v13  ;;  %v22116_v6 = vrot.slane %v3759_v18, 5  ;;  %v3767_v5 = vshll.u32 %v16179_v63, 16  ;;  %v26784_v43 = vld [vmem:[#allocation40_spill] sm:$0xff]  ;;  %v26786_v57 = vld [vmem:[#allocation41_spill] sm:$0xff]  ;;  %v26789_v8 = vrot.slane %v26788_v42, 5 }
 0x2d6   : > { %26782 = vst [vmem:[#allocation39_spill] sm:$0xff] %v22114_v21  ;;  %v26785_v25 = vrot.slane %v26784_v43, 5  ;;  %v26787_v33 = vrot.slane %v26786_v57, 9  ;;  %v26790_v3 = vld [vmem:[#allocation43_spill] sm:$0xff]  ;;  %v3778_v18 = vshrl.u32 %v16181_v20, 16  ;;  %v3781_v63 = vshll.u32 %v16181_v20, 16 }
 0x2d7   : > { %26783 = vst [vmem:[#allocation38_spill] sm:$0xff] %v22116_v6  ;;  %18274 = vmatmul.mubr.bf16.vlgmr.msra.gmra.mrb[0].mxu1 %v16892_v26  ;;  %v26791_v45 = vrot.slane %v26790_v3, 9  ;;  %v22131_v53 = vld [vmem:[%s19590_s24 + $0x258] sm:$0xe]  ;;  %v22134_v32 = vld [vmem:[%s19590_s24 + $0x25c] sm:$0x1]  ;;  %v16205_v42 = vcombine.low %v3440_v12, %v3454_v28 }
 0x2d8   : > { %v4390_v2 = vsel %vm20120_vm5, %v26787_v33, %v26785_v25  ;;  %26792 = vst [vmem:[#allocation45_spill] sm:$0xff] %v22131_v53  ;;  %26793 = vst [vmem:[#allocation40_spill] sm:$0xff] %v22134_v32  ;;  %v22137_v26 = vld [vmem:[%s19590_s24 + $0x260] sm:$0xe]  ;;  %v22139_v43 = vrot.slane %v3756_v7, 4  ;;  %v3766_v33 = vrot.slane %v3764_v46, 4  ;;  %8414 = vmatmul.mubr.bf16.gmra.mrb[68].mxu0 %v22054_v1 }
 0x2d9   : > { %v4394_v36 = vsel %vm20120_vm5, %v26791_v45, %v26789_v8  ;;  %26794 = vst [vmem:[#allocation41_spill] sm:$0xff] %v22137_v26  ;;  %v16180_v57 = vld [vmem:[%s19590_s24 + $0x25c] sm:$0x1]  ;;  %v16182_v25 = vld [vmem:[%s19590_s24 + $0x264] sm:$0x1]  ;;  %v26796_v8 = vld [vmem:[#allocation49_spill] sm:$0xff]  ;;  %8421 = vmatprep.mubr.bf16.mxu0 %v16429_v9 }
 0x2da   : > { %26795 = vst [vmem:[#allocation42_spill] sm:$0xff] %v22139_v43  ;;  %v16430_v3 = vcombine.low %v4390_v2, %v4394_v36  ;;  %v26797_v45 = vld [vmem:[#allocation44_spill] sm:$0xff]  ;;  %v3769_v1 = vrot.slane %v3767_v5, 5  ;;  %v3773_v28 = vshll.u32 %v16180_v57, 16  ;;  %v3780_v2 = vrot.slane %v3778_v18, 4  ;;  %v26799_v44 = vld [vmem:[#allocation51_spill] sm:$0xff] }
 0x2db   : > { %v3468_v20 = vsel %vm19609_vm2, %v26797_v45, %v26796_v8  ;;  %v22149_v0 = vld [vmem:[%s19590_s24 + $0x268] sm:$0xf]  ;;  %v22155_v12 = vld [vmem:[%s19590_s24 + $0x264] sm:$0x1]  ;;  %v3783_v36 = vrot.slane %v3781_v63, 5  ;;  %v3787_v8 = vshll.u32 %v16182_v25, 16  ;;  %v3482_v9 = vsel %vm19609_vm2, %v26800_v23, %v26799_v44 }
 0x2dc   : > { %26798 = vst [vmem:[#allocation43_spill] sm:$0xff] %v22155_v12  ;;  %v16707_v45 = vld [vmem:[%s19590_s24 + $0x30] sm:$0xe]  ;;  %v26803_v53 = vld [vmem:[#allocation47_spill] sm:$0xff]  ;;  %v3792_v18 = vshrl.u32 %v22149_v0, 16  ;;  %v26807_v43 = vld [vmem:[#allocation48_spill] sm:$0xff] }
 0x2dd   : > { %v26801_v7 = vld [vmem:[#allocation46_spill] sm:$0xff]  ;;  %v26804_v46 = vrot.slane %v26803_v53, 9  ;;  %v16709_v57 = vld [vmem:[%s19590_s24 + $0x38] sm:$0xe]  ;;  %v16831_v25 = vrot.slane %v16707_v45, 9  ;;  %v26808_v6 = vrot.slane %v26807_v43, 9  ;;  %v3770_v43 = vor.u32 %v3769_v1, %v3766_v33 }
 0x2de   : > { %v26802_v50 = vrot.slane %v26801_v7, 5  ;;  %v16708_v63 = vld [vmem:[%s19590_s24 + $0x34] sm:$0x1]  ;;  %v26809_v23 = vld [vmem:[#allocation52_spill] sm:$0xff]  ;;  %v16710_v53 = vld [vmem:[%s19590_s24 + $0x3c] sm:$0x1] }
 0x2df   : > { %v26805_v26 = vld [vmem:[#allocation50_spill] sm:$0xff]  ;;  %v6398_v7 = vrot.slane %v16708_v63, 5  ;;  %v16711_v13 = vld [vmem:[%s19590_s24 + $0x40] sm:$0xe]  ;;  %v26810_v21 = vld [vmem:[#allocation5_spill] sm:$0xff]  ;;  %v6402_v58 = vrot.slane %v16710_v53, 5 }
 0x2e0   : > { %v22168_v5 = vsel %vm20120_vm5, %v26804_v46, %v26802_v50  ;;  %v26806_v32 = vrot.slane %v26805_v26, 5  ;;  %v3496_v50 = vsel %vm19609_vm2, %v21642_v47, %v26809_v23  ;;  %v16832_v46 = vrot.slane %v16709_v57, 9  ;;  %v26811_v45 = vld [vmem:[#allocation60_spill] sm:$0xff]  ;;  %v16713_v51 = vld [vmem:[%s19590_s24 + $0x48] sm:$0xe]  ;;  %8422 = vmatmul.mubr.bf16.gmra.mrb[72].mxu0 %v16205_v42  ;;  %v26842_v57 = vld [vmem:[#allocation7_spill] sm:$0xff] }
 0x2e1   : > { %v3510_v26 = vsel %vm19609_vm2, %v26811_v45, %v26810_v21  ;;  %v16712_v52 = vld [vmem:[%s19590_s24 + $0x44] sm:$0x1]  ;;  %v16185_v16 = vld [vmem:[%s19590_s24 + $0x270] sm:$0xf]  ;;  %v6399_v39 = vsel %vm20120_vm5, %v16831_v25, %v6398_v7  ;;  %v16714_v47 = vld [vmem:[%s19590_s24 + $0x4c] sm:$0x1]  ;;  %8429 = vmatprep.mubr.bf16.mxu0 %v16430_v3  ;;  %v16206_v25 = vcombine.low %v3468_v20, %v3482_v9 }
 0x2e2   : > { %v22179_v44 = vsel %vm20120_vm5, %v26808_v6, %v26806_v32  ;;  %v16833_v6 = vrot.slane %v16711_v13, 9  ;;  %v3784_v32 = vor.u32 %v3783_v36, %v3780_v2  ;;  %v6406_v23 = vrot.slane %v16712_v52, 5  ;;  %v22217_v53 = vld [vmem:[%s19590_s24 + $0x268] sm:$0xe]  ;;  %v22220_v3 = vld [vmem:[%s19590_s24 + $0x26c] sm:$0x1] }
 0x2e3   : > { %v16834_v63 = vrot.slane %v16713_v51, 9  ;;  %v22198_v55 = vrot.slane %v3773_v28, 5  ;;  %v6403_v21 = vsel %vm20120_vm5, %v16832_v46, %v6402_v58  ;;  %v6410_v33 = vrot.slane %v16714_v47, 5  ;;  %26816 = vst [vmem:[#allocation46_spill] sm:$0xff] %v22217_v53  ;;  %26817 = vst [vmem:[#allocation47_spill] sm:$0xff] %v22220_v3  ;;  %v26819_v45 = vld [vmem:[#allocation58_spill] sm:$0xff] }
 0x2e4   : > { %v22202_v13 = vrot.slane %v3787_v8, 5  ;;  %v3795_v1 = vshll.u32 %v22149_v0, 16  ;;  %v16893_v2 = vcombine.low %v6399_v39, %v6403_v21  ;;  %v6407_v51 = vsel %vm20120_vm5, %v16833_v6, %v6406_v23  ;;  %v16539_v0 = vld [vmem:[%s19590_s24 + $0x10] sm:$0xf]  ;;  %v26821_v6 = vld [vmem:[#allocation59_spill] sm:$0xff] }
 0x2e5   : > { %26812 = vst [vmem:[#allocation49_spill] sm:$0xff] %v22198_v55  ;;  %v22207_v52 = vrot.slane %v3770_v43, 4  ;;  %v22209_v28 = vrot.slane %v3792_v18, 4  ;;  %v3806_v58 = vshrl.u32 %v16185_v16, 16  ;;  %v6411_v42 = vsel %vm20120_vm5, %v16834_v63, %v6410_v33  ;;  %v22223_v18 = vld [vmem:[%s19590_s24 + $0x270] sm:$0xe] }
 0x2e6   : > { %26813 = vst [vmem:[#allocation44_spill] sm:$0xff] %v22202_v13  ;;  %v22213_v36 = vrot.slane %v3784_v32, 4  ;;  %v3809_v8 = vshll.u32 %v16185_v16, 16  ;;  %18277 = vmatprep.mubr.bf16.mxu1 %v16893_v2  ;;  %v16894_v39 = vcombine.low %v6407_v51, %v6411_v42  ;;  %26818 = vst [vmem:[#allocation50_spill] sm:$0xff] %v22223_v18  ;;  %v16431_v7 = vcombine.low %v22168_v5, %v22179_v44  ;;  %v22246_v23 = vld [vmem:[%s19590_s24 + $0x26c] sm:$0x1] }
 0x2e7   : > { %26814 = vst [vmem:[#allocation51_spill] sm:$0xff] %v22207_v52  ;;  %v22227_v46 = vcombine.low %v3496_v50, %v3510_v26  ;;  %v26820_v43 = vrot.slane %v26819_v45, 5  ;;  %v26822_v16 = vrot.slane %v26821_v6, 9  ;;  %v26823_v20 = vrot.slane %v21658_v56, 5  ;;  %v16541_v5 = vld [vmem:[%s19590_s24 + $0x18] sm:$0xf] }
 0x2e8   : > { %26815 = vst [vmem:[#allocation53_spill] sm:$0xff] %v22213_v36  ;;  %v26824_v9 = vrot.slane %v21655_v54, 9  ;;  %18278 = vmatmul.mubr.bf16.gmra.mrb[4].mxu1 %v16894_v39  ;;  %v3524_v44 = vsel %vm19609_vm2, %v21690_v40, %v21692_v27  ;;  %v26825_v50 = vld [vmem:[#allocation62_spill] sm:$0xff]  ;;  %v22257_v26 = vrot.slane %v3795_v1, 5  ;;  %v5069_v54 = vshrl.u32 %v16539_v0, 16  ;;  %v26828_v33 = vld [vmem:[#allocation55_spill] sm:$0xff]  ;;  %8430 = vmatmul.mubr.bf16.gmra.mrb[76].mxu0 %v16206_v25 }
 0x2e9   : > { %v22235_v32 = vsel %vm20120_vm5, %v26822_v16, %v26820_v43  ;;  %v3538_v56 = vsel %vm19609_vm2, %v26825_v50, %v21696_v48  ;;  %v26826_v63 = vld [vmem:[#allocation54_spill] sm:$0xff]  ;;  %v26829_v2 = vrot.slane %v26828_v33, 9  ;;  %v26830_v42 = vld [vmem:[#allocation56_spill] sm:$0xff]  ;;  %v26832_v45 = vld [vmem:[#allocation57_spill] sm:$0xff]  ;;  %v5072_v43 = vshll.u32 %v16539_v0, 16  ;;  %8437 = vmatprep.mubr.bf16.mxu0 %v16431_v7 }
 0x2ea   : > { %v22243_v47 = vsel %vm20120_vm5, %v26824_v9, %v26823_v20  ;;  %v26827_v21 = vrot.slane %v26826_v63, 5  ;;  %v26831_v39 = vrot.slane %v26830_v42, 5  ;;  %v26833_v40 = vrot.slane %v26832_v45, 9  ;;  %v22277_v1 = vld [vmem:[%s19590_s24 + $0x274] sm:$0x1]  ;;  %v26844_v0 = vld [vmem:[#allocation67_spill] sm:$0xff] }
 0x2eb   : > { %v3801_v20 = vshll.u32 %v22246_v23, 16  ;;  %v5083_v9 = vshrl.u32 %v16541_v5, 16  ;;  %v16432_v50 = vcombine.low %v22235_v32, %v22243_v47  ;;  %v22284_v63 = vcombine.low %v3524_v44, %v3538_v56  ;;  %v26835_v23 = vld [vmem:[#allocation61_spill] sm:$0xff]  ;;  %v26836_v44 = vld [vmem:[#allocation64_spill] sm:$0xff]  ;;  %v16540_v16 = vld [vmem:[%s19590_s24 + $0x14] sm:$0x1] }
 0x2ec   : > { %v22265_v51 = vsel %vm20120_vm5, %v26829_v2, %v26827_v21  ;;  %v22273_v27 = vsel %vm20120_vm5, %v26833_v40, %v26831_v39  ;;  %v22286_v21 = vrot.slane %v3806_v58, 4  ;;  %v22288_v33 = vrot.slane %v3809_v8, 5  ;;  %v26834_v2 = vld [vmem:[#allocation63_spill] sm:$0xff]  ;;  %v26837_v8 = vld [vmem:[#allocation66_spill] sm:$0xff]  ;;  %v26838_v56 = vld [vmem:[#allocation68_spill] sm:$0xff] }
 0x2ed   : > { %v3815_v32 = vshll.u32 %v22277_v1, 16  ;;  %v22297_v47 = vrot.slane %v5069_v54, 4  ;;  %v16543_v58 = vld [vmem:[%s19590_s24 + $0x20] sm:$0xf]  ;;  %v26839_v42 = vrot.slane %v26838_v56, 5  ;;  %v26840_v39 = vld [vmem:[#allocation65_spill] sm:$0xff] }
 0x2ee   : > { %v26841_v45 = vrot.slane %v26840_v39, 9  ;;  %v22313_v1 = vrot.slane %v5072_v43, 5  ;;  %v5086_v54 = vshll.u32 %v16541_v5, 16  ;;  %v16715_v48 = vld [vmem:[%s19590_s24 + $0x60] sm:$0xe]  ;;  %v26843_v25 = vrot.slane %v26842_v57, 5 }
 0x2ef   : > { %v16716_v6 = vld [vmem:[%s19590_s24 + $0x64] sm:$0x1]  ;;  %v26845_v7 = vrot.slane %v26844_v0, 9  ;;  %v5085_v43 = vrot.slane %v5083_v9, 4  ;;  %v16717_v5 = vld [vmem:[%s19590_s24 + $0x68] sm:$0xe]  ;;  %v3798_v9 = vor.u32 %v22257_v26, %v22209_v28  ;;  %v3812_v24 = vor.u32 %v22288_v33, %v22286_v21 }
 0x2f0   : > { %v22310_v40 = vsel %vm20120_vm5, %v26841_v45, %v26839_v42  ;;  %v16718_v39 = vld [vmem:[%s19590_s24 + $0x6c] sm:$0x1]  ;;  %v16835_v45 = vrot.slane %v16715_v48, 9  ;;  %v22332_v18 = vld [vmem:[%s19590_s24 + $0x274] sm:$0x1]  ;;  %v5097_v57 = vshrl.u32 %v16543_v58, 16  ;;  %8438 = vmatmul.mubr.bf16.gmra.mrb[80].mxu0 %v22227_v46  ;;  %v5075_v46 = vor.u32 %v22313_v1, %v22297_v47 }
 0x2f1   : > { %v22323_v56 = vsel %vm20120_vm5, %v26845_v7, %v26843_v25  ;;  %v5100_v0 = vshll.u32 %v16543_v58, 16  ;;  %v6414_v53 = vrot.slane %v16716_v6, 5  ;;  %v16836_v3 = vrot.slane %v16717_v5, 9  ;;  %v16719_v25 = vld [vmem:[%s19590_s24 + $0x70] sm:$0xe]  ;;  %8445 = vmatprep.mubr.bf16.mxu0 %v16432_v50 }
 0x2f2   : > { %v16542_v42 = vld [vmem:[%s19590_s24 + $0x1c] sm:$0x1]  ;;  %v6418_v48 = vrot.slane %v16718_v39, 5  ;;  %v16720_v36 = vld [vmem:[%s19590_s24 + $0x74] sm:$0x1]  ;;  %v16837_v52 = vrot.slane %v16719_v25, 9 }
 0x2f3   : > { %v16721_v13 = vld [vmem:[%s19590_s24 + $0x78] sm:$0xe]  ;;  %v5088_v58 = vrot.slane %v5086_v54, 5  ;;  %v6415_v6 = vsel %vm20120_vm5, %v16835_v45, %v6414_v53  ;;  %v16722_v5 = vld [vmem:[%s19590_s24 + $0x7c] sm:$0x1]  ;;  %v6422_v55 = vrot.slane %v16720_v36, 5 }
 0x2f4   : > { %v16838_v12 = vrot.slane %v16721_v13, 9  ;;  %v5078_v7 = vshll.u32 %v16540_v16, 16  ;;  %v16544_v41 = vld [vmem:[%s19590_s24 + $0x24] sm:$0x1]  ;;  %v16545_v19 = vld [vmem:[%s19590_s24 + $0x28] sm:$0xf]  ;;  %v6419_v28 = vsel %vm20120_vm5, %v16836_v3, %v6418_v48 }
 0x2f5   : > { %v6426_v26 = vrot.slane %v16722_v5, 5  ;;  %v16546_v54 = vld [vmem:[%s19590_s24 + $0x2c] sm:$0x1]  ;;  %v5099_v39 = vrot.slane %v5097_v57, 4  ;;  %v5102_v25 = vrot.slane %v5100_v0, 5  ;;  %v16895_v53 = vcombine.low %v6415_v6, %v6419_v28 }
 0x2f6   : > { %v6423_v13 = vsel %vm20120_vm5, %v16837_v52, %v6422_v55  ;;  %v22358_v16 = vrot.slane %v3798_v9, 4  ;;  %v22360_v21 = vrot.slane %v3801_v20, 5  ;;  %v5089_v33 = vor.u32 %v5088_v58, %v5085_v43  ;;  %v16547_v57 = vld [vmem:[%s19590_s24 + $0x30] sm:$0xf]  ;;  %v16549_v6 = vld [vmem:[%s19590_s24 + $0x38] sm:$0xf] }
 0x2f7   : > { %v6427_v3 = vsel %vm20120_vm5, %v16838_v12, %v6426_v26  ;;  %v5092_v45 = vshll.u32 %v16542_v42, 16  ;;  %18281 = vmatprep.mubr.bf16.mxu1 %v16895_v53  ;;  %v5106_v55 = vshll.u32 %v16544_v41, 16  ;;  %v5111_v52 = vshrl.u32 %v16545_v19, 16  ;;  %v26849_v42 = vld [vmem:[#allocation9_spill] sm:$0xff]  ;;  %v16729_v36 = vld [vmem:[%s19590_s24 + $0x98] sm:$0xe] }
 0x2f8   : > { %v16896_v0 = vcombine.low %v6423_v13, %v6427_v3  ;;  %v5114_v50 = vshll.u32 %v16545_v19, 16  ;;  %v5120_v48 = vshll.u32 %v16546_v54, 16  ;;  %v22368_v9 = vrot.slane %v3812_v24, 4  ;;  %8446 = vmatmul.mubr.bf16.gmra.mrb[84].mxu0 %v22284_v63 }
 0x2f9   : > { %v22370_v20 = vrot.slane %v3815_v32, 5  ;;  %v22372_v5 = vrot.slane %v5078_v7, 5  ;;  %v5103_v12 = vor.u32 %v5102_v25, %v5099_v39  ;;  %v26846_v47 = vrot.slane %v21761_v60, 5  ;;  %v16551_v25 = vld [vmem:[%s19590_s24 + $0x40] sm:$0xf] }
 0x2fa   : > { %18282 = vmatmul.mubr.bf16.gmra.mrb[8].mxu1 %v16896_v0  ;;  %v26847_v1 = vrot.slane %v21756_v37, 9  ;;  %v26848_v19 = vrot.slane %v21767_v4, 5  ;;  %v26850_v24 = vrot.slane %v26849_v42, 9  ;;  %v5125_v43 = vshrl.u32 %v16547_v57, 16  ;;  %v16723_v0 = vld [vmem:[%s19590_s24 + $0x80] sm:$0xe] }
 0x2fb   : > { %v5128_v7 = vshll.u32 %v16547_v57, 16  ;;  %v22390_v58 = vrot.slane %v5075_v46, 4  ;;  %v22392_v28 = vrot.slane %v5089_v33, 4  ;;  %v22394_v60 = vrot.slane %v5092_v45, 5 }
 0x2fc   : > { %v22380_v41 = vsel %vm20120_vm5, %v26847_v1, %v26846_v47  ;;  %v22388_v32 = vsel %vm20120_vm5, %v26850_v24, %v26848_v19  ;;  %v5139_v37 = vshrl.u32 %v16549_v6, 16  ;;  %v22396_v26 = vrot.slane %v5106_v55, 5  ;;  %v16724_v55 = vld [vmem:[%s19590_s24 + $0x84] sm:$0x1]  ;;  %v16548_v47 = vld [vmem:[%s19590_s24 + $0x34] sm:$0x1] }
 0x2fd   : > { %v5113_v54 = vrot.slane %v5111_v52, 4  ;;  %v5116_v4 = vrot.slane %v5114_v50, 5  ;;  %v22398_v39 = vrot.slane %v5120_v48, 5  ;;  %v22402_v53 = vrot.slane %v5103_v12, 4  ;;  %v26857_v52 = vld [vmem:[#allocation11_spill] sm:$0xff]  ;;  %v26859_v50 = vld [vmem:[#allocation13_spill] sm:$0xff] }
 0x2fe   : > { %v5142_v13 = vshll.u32 %v16549_v6, 16  ;;  %v26852_v3 = vcombine.low %v22265_v51, %v22273_v27  ;;  %v26853_v46 = vsel %vm19609_vm2, %v26837_v8, %v26836_v44  ;;  %v26854_v33 = vsel %vm19609_vm2, %v26835_v23, %v26834_v2  ;;  %v16553_v27 = vld [vmem:[%s19590_s24 + $0x48] sm:$0xf]  ;;  %v16726_v6 = vld [vmem:[%s19590_s24 + $0x8c] sm:$0x1] }
 0x2ff   : > { %26851 = vst [vmem:[#allocation48_spill] sm:$0xff] %v22398_v39  ;;  %v16209_v63 = vcombine.low %v26854_v33, %v26853_v46  ;;  %v16434_v45 = vcombine.low %v22310_v40, %v22323_v56  ;;  %v5127_v57 = vrot.slane %v5125_v43, 4  ;;  %v5130_v51 = vrot.slane %v5128_v7, 5  ;;  %v16725_v48 = vld [vmem:[%s19590_s24 + $0x88] sm:$0xe]  ;;  %v26862_v46 = vld [vmem:[#allocation6_spill] sm:$0xff] }
 0x300   : > { %8453 = vmatprep.mubr.bf16.mxu0 %v26852_v3  ;;  %v26855_v44 = vsel %vm19609_vm2, %v21795_v38, %v21797_v49  ;;  %v26856_v2 = vsel %vm19609_vm2, %v21790_v14, %v21793_v30  ;;  %v22434_v40 = vrot.slane %v5139_v37, 4  ;;  %v5153_v56 = vshrl.u32 %v16551_v25, 16  ;;  %v26858_v49 = vld [vmem:[#allocation12_spill] sm:$0xff]  ;;  %v16550_v1 = vld [vmem:[%s19590_s24 + $0x3c] sm:$0x1] }
 0x301   : > { %v22430_v23 = vcombine.low %v26856_v2, %v26855_v44  ;;  %v5156_v30 = vshll.u32 %v16551_v25, 16  ;;  %v16839_v12 = vrot.slane %v16723_v0, 9  ;;  %v5144_v19 = vrot.slane %v5142_v13, 5  ;;  %v16727_v7 = vld [vmem:[%s19590_s24 + $0x90] sm:$0xe]  ;;  %v26860_v37 = vld [vmem:[#allocation8_spill] sm:$0xff]  ;;  %8454 = vmatmul.mubr.bf16.gmra.mrb[88].mxu0 %v16209_v63 }
 0x302   : > { %v5167_v42 = vshrl.u32 %v16553_v27, 16  ;;  %v6430_v24 = vrot.slane %v16724_v55, 5  ;;  %v16840_v43 = vrot.slane %v16725_v48, 9  ;;  %v26861_v3 = vrot.slane %v26860_v37, 5  ;;  %v16728_v0 = vld [vmem:[%s19590_s24 + $0x94] sm:$0x1]  ;;  %8461 = vmatprep.mubr.bf16.mxu0 %v16434_v45 }
 0x303   : > { %v26863_v33 = vrot.slane %v26862_v46, 9  ;;  %v5117_v25 = vor.u32 %v5116_v4, %v5113_v54  ;;  %v6434_v2 = vrot.slane %v16726_v6, 5  ;;  %v16841_v13 = vrot.slane %v16727_v7, 9  ;;  %v16730_v48 = vld [vmem:[%s19590_s24 + $0x9c] sm:$0x1] }
 0x304   : > { %v5170_v38 = vshll.u32 %v16553_v27, 16  ;;  %v6431_v55 = vsel %vm20120_vm5, %v16839_v12, %v6430_v24  ;;  %v6438_v14 = vrot.slane %v16728_v0, 5  ;;  %v16842_v37 = vrot.slane %v16729_v36, 9  ;;  %v16552_v8 = vld [vmem:[%s19590_s24 + $0x44] sm:$0x1] }
 0x305   : > { %v22457_v44 = vsel %vm20120_vm5, %v26863_v33, %v26861_v3  ;;  %v5155_v46 = vrot.slane %v5153_v56, 4  ;;  %v5158_v39 = vrot.slane %v5156_v30, 5  ;;  %v6435_v54 = vsel %vm20120_vm5, %v16840_v43, %v6434_v2  ;;  %v26865_v3 = vld [vmem:[#allocation10_spill] sm:$0xff]  ;;  %v16554_v24 = vld [vmem:[%s19590_s24 + $0x4c] sm:$0x1] }
 0x306   : > { %v6442_v4 = vrot.slane %v16730_v48, 5  ;;  %v26864_v6 = vrot.slane %v21856_v22, 5  ;;  %v26866_v7 = vrot.slane %v26865_v3, 9  ;;  %v5131_v12 = vor.u32 %v5130_v51, %v5127_v57  ;;  %v16555_v36 = vld [vmem:[%s19590_s24 + $0x60] sm:$0xf] }
 0x307   : > { %v16897_v33 = vcombine.low %v6431_v55, %v6435_v54  ;;  %v6439_v56 = vsel %vm20120_vm5, %v16841_v13, %v6438_v14  ;;  %v22479_v30 = vrot.slane %v5117_v25, 4  ;;  %v5134_v43 = vshll.u32 %v16548_v47, 16  ;;  %v16557_v2 = vld [vmem:[%s19590_s24 + $0x68] sm:$0xf] }
 0x308   : > { %v22473_v27 = vsel %vm20120_vm5, %v26866_v7, %v26864_v6  ;;  %v5148_v63 = vshll.u32 %v16550_v1, 16  ;;  %v6443_v22 = vsel %vm20120_vm5, %v16842_v37, %v6442_v4  ;;  %v5145_v0 = vor.u32 %v5144_v19, %v22434_v40 }
 0x309   : > { %v5169_v48 = vrot.slane %v5167_v42, 4  ;;  %v5172_v6 = vrot.slane %v5170_v38, 5  ;;  %18285 = vmatprep.mubr.bf16.mxu1 %v16897_v33  ;;  %v16898_v57 = vcombine.low %v6439_v56, %v6443_v22  ;;  %v5159_v51 = vor.u32 %v5158_v39, %v5155_v46  ;;  %8462 = vmatmul.mubr.bf16.gmra.mrb[92].mxu0 %v22430_v23  ;;  %v16558_v56 = vld [vmem:[%s19590_s24 + $0x6c] sm:$0x1]  ;;  %v16732_v22 = vld [vmem:[%s19590_s24 + $0xb4] sm:$0x1] }
 0x30a   : > { %v5162_v55 = vshll.u32 %v16552_v8, 16  ;;  %v5176_v54 = vshll.u32 %v16554_v24, 16  ;;  %v5181_v14 = vshrl.u32 %v16555_v36, 16  ;;  %v22485_v45 = vrot.slane %v5131_v12, 4 }
 0x30b   : > { %v5184_v25 = vshll.u32 %v16555_v36, 16  ;;  %v5195_v47 = vshrl.u32 %v16557_v2, 16  ;;  %v5198_v1 = vshll.u32 %v16557_v2, 16  ;;  %18286 = vmatmul.mubr.bf16.gmra.mrb[12].mxu1 %v16898_v57  ;;  %v3636_v40 = vsel %vm19609_vm2, %v21887_v61, %v21901_v17  ;;  %v16559_v17 = vld [vmem:[%s19590_s24 + $0x70] sm:$0xf] }
 0x30c   : > { %v3650_v39 = vsel %vm19609_vm2, %v21907_v35, %v21909_v62  ;;  %v26867_v8 = vrot.slane %v21874_v59, 5  ;;  %v26868_v38 = vrot.slane %v21863_v15, 9  ;;  %v26869_v42 = vrot.slane %v21880_v31, 5  ;;  %v16561_v2 = vld [vmem:[%s19590_s24 + $0x78] sm:$0xf] }
 0x30d   : > { %v26870_v13 = vrot.slane %v21877_v29, 9  ;;  %v22512_v37 = vrot.slane %v5134_v43, 5  ;;  %v22514_v35 = vrot.slane %v5145_v0, 4  ;;  %v22516_v59 = vrot.slane %v5148_v63, 5  ;;  %v16556_v29 = vld [vmem:[%s19590_s24 + $0x64] sm:$0x1] }
 0x30e   : > { %v22501_v19 = vsel %vm20120_vm5, %v26868_v38, %v26867_v8  ;;  %v5173_v15 = vor.u32 %v5172_v6, %v5169_v48  ;;  %v22518_v62 = vrot.slane %v5159_v51, 4  ;;  %v22520_v46 = vrot.slane %v5162_v55, 5  ;;  %v26876_v0 = vld [vmem:[#allocation14_spill] sm:$0xff]  ;;  %v26878_v48 = vld [vmem:[#allocation16_spill] sm:$0xff]  ;;  %v26879_v6 = vld [vmem:[#allocation17_spill] sm:$0xff] }
 0x30f   : > { %v22509_v61 = vsel %vm20120_vm5, %v26870_v13, %v26869_v42  ;;  %v22522_v31 = vrot.slane %v5176_v54, 5  ;;  %v5183_v4 = vrot.slane %v5181_v14, 4  ;;  %v5186_v3 = vrot.slane %v5184_v25, 5  ;;  %v16733_v55 = vld [vmem:[%s19590_s24 + $0xb8] sm:$0xe] }
 0x310   : > { %v5209_v7 = vshrl.u32 %v16559_v17, 16  ;;  %v26872_v12 = vcombine.low %v22380_v41, %v22388_v32  ;;  %v26873_v24 = vsel %vm19609_vm2, %v26859_v50, %v26858_v49  ;;  %v26874_v36 = vsel %vm19609_vm2, %v26857_v52, %v21804_v34  ;;  %v16560_v50 = vld [vmem:[%s19590_s24 + $0x74] sm:$0x1]  ;;  %v16731_v52 = vld [vmem:[%s19590_s24 + $0xb0] sm:$0xe] }
 0x311   : > { %26871 = vst [vmem:[#allocation52_spill] sm:$0xff] %v22522_v31  ;;  %v16211_v33 = vcombine.low %v26874_v36, %v26873_v24  ;;  %v16436_v23 = vcombine.low %v22457_v44, %v22473_v27  ;;  %v5197_v43 = vrot.slane %v5195_v47, 4  ;;  %v5200_v41 = vrot.slane %v5198_v1, 5  ;;  %v26877_v44 = vld [vmem:[#allocation15_spill] sm:$0xff]  ;;  %v16736_v13 = vld [vmem:[%s19590_s24 + $0xc4] sm:$0x1] }
 0x312   : > { %8469 = vmatprep.mubr.bf16.mxu0 %v26872_v12  ;;  %v22542_v32 = vcombine.low %v3636_v40, %v3650_v39  ;;  %v16437_v63 = vcombine.low %v22501_v19, %v22509_v61  ;;  %v22546_v49 = vrot.slane %v5173_v15, 4  ;;  %v5212_v34 = vshll.u32 %v16559_v17, 16  ;;  %v16734_v54 = vld [vmem:[%s19590_s24 + $0xbc] sm:$0x1]  ;;  %v16735_v39 = vld [vmem:[%s19590_s24 + $0xc0] sm:$0xe] }
 0x313   : > { %v3664_v27 = vsel %vm19609_vm2, %v26877_v44, %v26876_v0  ;;  %v3678_v57 = vsel %vm19609_vm2, %v26879_v6, %v26878_v48  ;;  %v5190_v51 = vshll.u32 %v16556_v29, 16  ;;  %v16843_v14 = vrot.slane %v16731_v52, 9  ;;  %v16737_v17 = vld [vmem:[%s19590_s24 + $0xc8] sm:$0xe]  ;;  %v16738_v24 = vld [vmem:[%s19590_s24 + $0xcc] sm:$0x1]  ;;  %8470 = vmatmul.mubr.bf16.gmra.mrb[96].mxu0 %v16211_v33 }
 0x314   : > { %26875 = vst [vmem:[#allocation5_spill] sm:$0xff] %v22546_v49  ;;  %v5204_v25 = vshll.u32 %v16558_v56, 16  ;;  %v5211_v47 = vrot.slane %v5209_v7, 4  ;;  %v6446_v1 = vrot.slane %v16732_v22, 5  ;;  %v16844_v40 = vrot.slane %v16733_v55, 9  ;;  %v26882_v0 = vld [vmem:[#allocation4_spill] sm:$0xff]  ;;  %8477 = vmatprep.mubr.bf16.mxu0 %v16436_v23 }
 0x315   : > { %v5187_v8 = vor.u32 %v5186_v3, %v5183_v4  ;;  %v5201_v38 = vor.u32 %v5200_v41, %v5197_v43  ;;  %v6450_v42 = vrot.slane %v16734_v54, 5  ;;  %v16845_v15 = vrot.slane %v16735_v39, 9  ;;  %v16562_v52 = vld [vmem:[%s19590_s24 + $0x7c] sm:$0x1]  ;;  %v26880_v43 = vld [vmem:[#allocation18_spill] sm:$0xff]  ;;  %v26884_v48 = vld [vmem:[#allocation20_spill] sm:$0xff] }
 0x316   : > { %v5214_v12 = vrot.slane %v5212_v34, 5  ;;  %v6447_v29 = vsel %vm20120_vm5, %v16843_v14, %v6446_v1  ;;  %v6454_v36 = vrot.slane %v16736_v13, 5  ;;  %v16846_v56 = vrot.slane %v16737_v17, 9  ;;  %v26886_v55 = vld [vmem:[#allocation19_spill] sm:$0xff]  ;;  %v16565_v1 = vld [vmem:[%s19590_s24 + $0x88] sm:$0xf] }
 0x317   : > { %v5218_v7 = vshll.u32 %v16560_v50, 16  ;;  %v5223_v22 = vshrl.u32 %v16561_v2, 16  ;;  %v6451_v4 = vsel %vm20120_vm5, %v16844_v40, %v6450_v42  ;;  %v6458_v3 = vrot.slane %v16738_v24, 5  ;;  %v16563_v14 = vld [vmem:[%s19590_s24 + $0x80] sm:$0xf] }
 0x318   : > { %v26881_v41 = vrot.slane %v26880_v43, 5  ;;  %v26883_v44 = vrot.slane %v26882_v0, 9  ;;  %v26885_v6 = vrot.slane %v26884_v48, 5  ;;  %v26887_v54 = vrot.slane %v26886_v55, 9  ;;  %v26901_v55 = vld [vmem:[#allocation26_spill] sm:$0xff] }
 0x319   : > { %v16899_v40 = vcombine.low %v6447_v29, %v6451_v4  ;;  %v6455_v33 = vsel %vm20120_vm5, %v16845_v15, %v6454_v36  ;;  %v22591_v39 = vrot.slane %v5187_v8, 4  ;;  %v22593_v42 = vrot.slane %v5190_v51, 5  ;;  %v26892_v8 = vld [vmem:[#allocation23_spill] sm:$0xff]  ;;  %v26893_v51 = vld [vmem:[#allocation21_spill] sm:$0xff] }
 0x31a   : > { %v22577_v34 = vsel %vm20120_vm5, %v26883_v44, %v26881_v41  ;;  %v22585_v50 = vsel %vm20120_vm5, %v26887_v54, %v26885_v6  ;;  %v5226_v13 = vshll.u32 %v16561_v2, 16  ;;  %v6459_v17 = vsel %vm20120_vm5, %v16846_v56, %v6458_v3  ;;  %v26894_v36 = vld [vmem:[#allocation27_spill] sm:$0xff]  ;;  %v26895_v44 = vld [vmem:[#allocation28_spill] sm:$0xff]  ;;  %v26899_v3 = vld [vmem:[#allocation22_spill] sm:$0xff] }
 0x31b   : > { %26888 = vst [vmem:[#allocation60_spill] sm:$0xff] %v22591_v39  ;;  %26889 = vst [vmem:[#allocation58_spill] sm:$0xff] %v22593_v42  ;;  %v22597_v24 = vrot.slane %v5204_v25, 5  ;;  %v5215_v43 = vor.u32 %v5214_v12, %v5211_v47  ;;  %v5232_v41 = vshll.u32 %v16562_v52, 16  ;;  %18289 = vmatprep.mubr.bf16.mxu1 %v16899_v40  ;;  %v16900_v0 = vcombine.low %v6455_v33, %v6459_v17  ;;  %v26897_v56 = vld [vmem:[#allocation24_spill] sm:$0xff] }
 0x31c   : > { %v22599_v29 = vrot.slane %v5201_v38, 4  ;;  %v5237_v4 = vshrl.u32 %v16563_v14, 16  ;;  %v5240_v15 = vshll.u32 %v16563_v14, 16  ;;  %v5251_v23 = vshrl.u32 %v16565_v1, 16  ;;  %v22614_v38 = vld [vmem:[%s19590_s24 + $0x84] sm:$0x1]  ;;  %8478 = vmatmul.mubr.bf16.gmra.mrb[100].mxu0 %v22542_v32 }
 0x31d   : > { %26890 = vst [vmem:[#allocation59_spill] sm:$0xff] %v22597_v24  ;;  %v3692_v2 = vsel %vm19609_vm2, %v26893_v51, %v26892_v8  ;;  %v3706_v25 = vsel %vm19609_vm2, %v26895_v44, %v26894_v36  ;;  %v22609_v47 = vrot.slane %v5218_v7, 5  ;;  %v22611_v12 = vrot.slane %v5223_v22, 4  ;;  %18290 = vmatmul.mubr.bf16.gmra.mrb[16].mxu1 %v16900_v0  ;;  %v26903_v14 = vld [vmem:[#allocation25_spill] sm:$0xff]  ;;  %8485 = vmatprep.mubr.bf16.mxu0 %v16437_v63 }
 0x31e   : > { %26891 = vst [vmem:[#allocation62_spill] sm:$0xff] %v22599_v29  ;;  %v26898_v52 = vrot.slane %v26897_v56, 5  ;;  %v26900_v48 = vrot.slane %v26899_v3, 9  ;;  %v26902_v54 = vrot.slane %v26901_v55, 5  ;;  %v26904_v40 = vrot.slane %v26903_v14, 9  ;;  %v26910_v3 = vld [vmem:[#allocation35_spill] sm:$0xff] }
 0x31f   : > { %26896 = vst [vmem:[#allocation54_spill] sm:$0xff] %v22609_v47  ;;  %v22632_v22 = vrot.slane %v5226_v13, 5  ;;  %v5254_v33 = vshll.u32 %v16565_v1, 16  ;;  %v16213_v17 = vcombine.low %v3664_v27, %v3678_v57  ;;  %v22636_v8 = vrot.slane %v5215_v43, 4  ;;  %v16567_v36 = vld [vmem:[%s19590_s24 + $0x90] sm:$0xf] }
 0x320   : > { %v22622_v6 = vsel %vm20120_vm5, %v26900_v48, %v26898_v52  ;;  %v22630_v7 = vsel %vm20120_vm5, %v26904_v40, %v26902_v54  ;;  %v22638_v51 = vrot.slane %v5232_v41, 5  ;;  %v22641_v44 = vrot.slane %v5237_v4, 4  ;;  %v16569_v1 = vld [vmem:[%s19590_s24 + $0x98] sm:$0xf]  ;;  %v26907_v43 = vld [vmem:[#allocation29_spill] sm:$0xff]  ;;  %v26911_v55 = vld [vmem:[#allocation32_spill] sm:$0xff] }
 0x321   : > { %26905 = vst [vmem:[#allocation55_spill] sm:$0xff] %v22636_v8  ;;  %v22643_v56 = vrot.slane %v5240_v15, 5  ;;  %v22646_v13 = vrot.slane %v5251_v23, 4  ;;  %v22650_v27 = vcombine.low %v3692_v2, %v3706_v25  ;;  %v26908_v41 = vld [vmem:[#allocation31_spill] sm:$0xff]  ;;  %v26909_v15 = vld [vmem:[#allocation33_spill] sm:$0xff]  ;;  %v22666_v32 = vrot.slane %v5254_v33, 5 }
 0x322   : > { %26906 = vst [vmem:[#allocation56_spill] sm:$0xff] %v22638_v51  ;;  %v16571_v48 = vld [vmem:[%s19590_s24 + $0xb0] sm:$0xf]  ;;  %v5265_v2 = vshrl.u32 %v16567_v36, 16  ;;  %v5268_v25 = vshll.u32 %v16567_v36, 16  ;;  %v26912_v54 = vrot.slane %v26911_v55, 5 }
 0x323   : > { %v26913_v14 = vld [vmem:[#allocation34_spill] sm:$0xff]  ;;  %v26915_v57 = vld [vmem:[#allocation36_spill] sm:$0xff]  ;;  %v5279_v61 = vshrl.u32 %v16569_v1, 16  ;;  %v5282_v63 = vshll.u32 %v16569_v1, 16  ;;  %v5293_v55 = vshrl.u32 %v16571_v48, 16  ;;  %v5243_v29 = vor.u32 %v22643_v56, %v22641_v44 }
 0x324   : > { %v26914_v40 = vrot.slane %v26913_v14, 9  ;;  %v26916_v23 = vrot.slane %v26915_v57, 5  ;;  %v26917_v52 = vld [vmem:[#allocation30_spill] sm:$0xff]  ;;  %v16742_v14 = vld [vmem:[%s19590_s24 + $0xdc] sm:$0x1]  ;;  %v5270_v31 = vrot.slane %v5268_v25, 5  ;;  %8486 = vmatmul.mubr.bf16.gmra.mrb[104].mxu0 %v16213_v17 }
 0x325   : > { %v26918_v0 = vrot.slane %v26917_v52, 9  ;;  %v16739_v33 = vld [vmem:[%s19590_s24 + $0xd0] sm:$0xe]  ;;  %v16740_v36 = vld [vmem:[%s19590_s24 + $0xd4] sm:$0x1]  ;;  %v9118_v52 = vlaneseq }
 0x326   : > { %v22675_v4 = vsel %vm20120_vm5, %v26914_v40, %v26912_v54  ;;  %v16741_v54 = vld [vmem:[%s19590_s24 + $0xd8] sm:$0xe]  ;;  %v16847_v40 = vrot.slane %v16739_v33, 9  ;;  %v19502_v57 = vmov 1966171168   ;;  %v6462_v8 = vrot.slane %v16740_v36, 5 }
 0x327   : > { %v22683_v19 = vsel %vm20120_vm5, %v26918_v0, %v26916_v23  ;;  %v9116_v51 = vunpack.c.l.s4 %v19502_v57  ;;  %v5229_v0 = vor.u32 %v22632_v22, %v22611_v12  ;;  %v5296_v23 = vshll.u32 %v16571_v48, 16  ;;  %v16743_v1 = vld [vmem:[%s19590_s24 + $0xe0] sm:$0xe]  ;;  %v16744_v57 = vld [vmem:[%s19590_s24 + $0xe4] sm:$0x1] }
 0x328   : > { %v16848_v47 = vrot.slane %v16741_v54, 9  ;;  %v6466_v33 = vrot.slane %v16742_v14, 5  ;;  %v16745_v24 = vld [vmem:[%s19590_s24 + $0xe8] sm:$0xe]  ;;  %v16849_v39 = vrot.slane %v16743_v1, 9  ;;  %v5267_v12 = vrot.slane %v5265_v2, 4 }
 0x329   : > { %v9117_v42 = vunpack.c.0.s8 %v9116_v51  ;;  %v6463_v22 = vsel %vm20120_vm5, %v16847_v40, %v6462_v8  ;;  %v16746_v48 = vld [vmem:[%s19590_s24 + $0xec] sm:$0x1]  ;;  %v6470_v36 = vrot.slane %v16744_v57, 5  ;;  %v16850_v54 = vrot.slane %v16745_v24, 9  ;;  %v16568_v24 = vld [vmem:[%s19590_s24 + $0x94] sm:$0x1] }
 0x32a   : > { %v16566_v49 = vld [vmem:[%s19590_s24 + $0x8c] sm:$0x1]  ;;  %v6467_v44 = vsel %vm20120_vm5, %v16848_v47, %v6466_v33  ;;  %v6474_v56 = vrot.slane %v16746_v48, 5  ;;  %v22715_v8 = vshrl.u32 %v9118_v52, 7  ;;  %v5281_v51 = vrot.slane %v5279_v61, 4 }
 0x32b   : > { %v5284_v2 = vrot.slane %v5282_v63, 5  ;;  %v16901_v14 = vcombine.low %v6463_v22, %v6467_v44  ;;  %v6471_v25 = vsel %vm20120_vm5, %v16849_v39, %v6470_v36  ;;  %v22721_v40 = vld.sshfl [vmem:[%s22713_s10] sm:$0xff pattern:$0x75316420]  ;;  %v26920_v47 = vcombine.low %v22577_v34, %v22585_v50  ;;  %v16570_v1 = vld [vmem:[%s19590_s24 + $0x9c] sm:$0x1] }
 0x32c   : > { %26919 = vst [vmem:[#allocation57_spill] sm:$0xff] %v22715_v8  ;;  %v16573_v33 = vld [vmem:[%s19590_s24 + $0xb8] sm:$0xf]  ;;  %v5295_v57 = vrot.slane %v5293_v55, 4  ;;  %v5298_v48 = vrot.slane %v5296_v23, 5  ;;  %v6475_v17 = vsel %vm20120_vm5, %v16850_v54, %v6474_v56  ;;  %v22731_v61 = vsub.s32 %v9117_v42, %v22715_v8  ;;  %v26925_v56 = vld [vmem:[#allocation37_spill] sm:$0xff] }
 0x32d   : > { %8493 = vmatprep.mubr.bf16.mxu0 %v26920_v47  ;;  %v22733_v63 = vrot.slane %v5229_v0, 4  ;;  %v22735_v52 = vrot.slane %v5243_v29, 4  ;;  %v5260_v39 = vshll.u32 %v16566_v49, 16  ;;  %18293 = vmatprep.mubr.bf16.mxu1 %v16901_v14  ;;  %v16902_v22 = vcombine.low %v6471_v25, %v6475_v17  ;;  %v26930_v14 = vld [vmem:[#allocation45_spill] sm:$0xff] }
 0x32e   : > { %v5257_v34 = vor.u32 %v22666_v32, %v22646_v13  ;;  %v5274_v50 = vshll.u32 %v16568_v24, 16  ;;  %v22740_v55 = vsub.s32 0, %v22715_v8  ;;  %v5271_v23 = vor.u32 %v5270_v31, %v5267_v12  ;;  %v26924_v32 = vld [vmem:[#allocation39_spill] sm:$0xff]  ;;  %v26926_v31 = vld [vmem:[#allocation38_spill] sm:$0xff]  ;;  %8494 = vmatmul.mubr.bf16.gmra.mrb[108].mxu0 %v22650_v27 }
 0x32f   : > { %26921 = vst [vmem:[#allocation63_spill] sm:$0xff] %v22735_v52  ;;  %v5285_v36 = vor.u32 %v5284_v2, %v5281_v51  ;;  %v5288_v42 = vshll.u32 %v16570_v1, 16  ;;  %v5307_v54 = vshrl.u32 %v16573_v33, 16  ;;  %18294 = vmatmul.mubr.bf16.gmra.mrb[20].mxu1 %v16902_v22  ;;  %v26922_v29 = vshll.u32 %v22614_v38, 16  ;;  %v26927_v12 = vld [vmem:[#allocation42_spill] sm:$0xff]  ;;  %v26928_v2 = vld [vmem:[#allocation40_spill] sm:$0xff] }
 0x330   : > { %v5299_v49 = vor.u32 %v5298_v48, %v5295_v57  ;;  %v5310_v44 = vshll.u32 %v16573_v33, 16  ;;  %v22748_v13 = vrot.slane %v22721_v40, %v22731_v61  ;;  %v3748_v24 = vsel %vm19609_vm2, %v26925_v56, %v26924_v32  ;;  %v26932_v1 = vld [vmem:[#allocation43_spill] sm:$0xff]  ;;  %v26934_v57 = vld [vmem:[#allocation41_spill] sm:$0xff]  ;;  %v22775_v22 = vld [vmem:[%s19590_s24 + $0xb4] sm:$0x1] }
 0x331   : > { %v22744_v0 = vrot.slane %v26922_v29, 5  ;;  %v3762_v51 = vsel %vm19609_vm2, %v26927_v12, %v26926_v31  ;;  %v26929_v38 = vrot.slane %v26928_v2, 5  ;;  %v26931_v25 = vrot.slane %v26930_v14, 9  ;;  %v22778_v29 = vld [vmem:[%s19590_s24 + $0xbc] sm:$0x1] }
 0x332   : > { %v26933_v33 = vrot.slane %v26932_v1, 5  ;;  %v26935_v48 = vrot.slane %v26934_v57, 9  ;;  %v22780_v32 = vrot.slane %v5257_v34, 4  ;;  %v22782_v56 = vrot.slane %v5260_v39, 5  ;;  %v22806_v1 = vld [vmem:[%s19590_s24 + $0xc4] sm:$0x1] }
 0x333   : > { %26923 = vst [vmem:[#allocation61_spill] sm:$0xff] %v22744_v0  ;;  %v22764_v47 = vsel %vm20120_vm5, %v26931_v25, %v26929_v38  ;;  %v22784_v31 = vrot.slane %v5274_v50, 5  ;;  %v9174_v12 = vrot.slane %v22748_v13, %v22740_v55  ;;  %v22789_v2 = vrot.slane %v5271_v23, 4  ;;  %v16749_v57 = vld [vmem:[%s19590_s24 + $0x108] sm:$0xe] }
 0x334   : > { %v22772_v17 = vsel %vm20120_vm5, %v26935_v48, %v26933_v33  ;;  %26936 = vst [vmem:[#allocation64_spill] sm:$0xff] %v22780_v32  ;;  %26937 = vst [vmem:[#allocation66_spill] sm:$0xff] %v22782_v56  ;;  %v22791_v38 = vrot.slane %v5285_v36, 4  ;;  %v22793_v34 = vrot.slane %v5288_v42, 5  ;;  %v5309_v14 = vrot.slane %v5307_v54, 4 }
 0x335   : > { %26938 = vst [vmem:[#allocation68_spill] sm:$0xff] %v22784_v31  ;;  %26939 = vst [vmem:[#allocation65_spill] sm:$0xff] %v22789_v2  ;;  %v26942_v39 = vcombine.low %v22622_v6, %v22630_v7  ;;  %v22798_v50 = vrot.slane %v5299_v49, 4  ;;  %v5302_v25 = vshll.u32 %v22775_v22, 16  ;;  %v5312_v27 = vrot.slane %v5310_v44, 5  ;;  %9204 = vperm.xlu0 %18798, %v9174_v12   ;;  %v26947_v12 = vld [vmem:[#allocation51_spill] sm:$0xff] }
 0x336   : > { %26940 = vst [vmem:[#allocation7_spill] sm:$0xff] %v22791_v38  ;;  %26941 = vst [vmem:[#allocation67_spill] sm:$0xff] %v22793_v34  ;;  %v5316_v23 = vshll.u32 %v22778_v29, 16  ;;  %v22803_v36 = vld [vmem:[%s19590_s24 + $0xc0] sm:$0xf]  ;;  %v26944_v6 = vsel %vm19609_vm2, %v26910_v3, %v26909_v15  ;;  %v26945_v7 = vsel %vm19609_vm2, %v26908_v41, %v26907_v43  ;;  %v16440_v49 = vcombine.low %v22675_v4, %v22683_v19  ;;  %v26946_v41 = vld [vmem:[#allocation49_spill] sm:$0xff] }
 0x337   : > { %8501 = vmatprep.mubr.bf16.mxu0 %v26942_v39  ;;  %26943 = vst [vmem:[#allocation9_spill] sm:$0xff] %v22798_v50  ;;  %v16747_v42 = vld [vmem:[%s19590_s24 + $0x100] sm:$0xe]  ;;  %v16215_v54 = vcombine.low %v26945_v7, %v26944_v6  ;;  %v16577_v44 = vld [vmem:[%s19590_s24 + $0xc8] sm:$0xf]  ;;  %v22824_v48 = vcombine.low %v3748_v24, %v3762_v51  ;;  %v5321_v24 = vshrl.u32 %v22803_v36, 16 }
 0x338   : > { %v16748_v33 = vld [vmem:[%s19590_s24 + $0x104] sm:$0x1]  ;;  %v16750_v3 = vld [vmem:[%s19590_s24 + $0x10c] sm:$0x1]  ;;  %v16851_v22 = vrot.slane %v16747_v42, 9  ;;  %v16852_v51 = vrot.slane %v16749_v57, 9  ;;  %v5313_v57 = vor.u32 %v5312_v27, %v5309_v14 }
 0x339   : > { %v6478_v29 = vrot.slane %v16748_v33, 5  ;;  %v16751_v43 = vld [vmem:[%s19590_s24 + $0x110] sm:$0xe]  ;;  %v26948_v4 = vld [vmem:[#allocation44_spill] sm:$0xff]  ;;  %v26949_v19 = vld [vmem:[#allocation53_spill] sm:$0xff]  ;;  %v5324_v42 = vshll.u32 %v22803_v36, 16  ;;  %8502 = vmatmul.mubr.bf16.gmra.mrb[112].mxu0 %v16215_v54 }
 0x33a   : > { %v16752_v7 = vld [vmem:[%s19590_s24 + $0x114] sm:$0x1]  ;;  %v16753_v15 = vld [vmem:[%s19590_s24 + $0x118] sm:$0xe]  ;;  %v6482_v8 = vrot.slane %v16750_v3, 5  ;;  %v16853_v39 = vrot.slane %v16751_v43, 9  ;;  %8509 = vmatprep.mubr.bf16.mxu0 %v16440_v49 }
 0x33b   : > { %v6479_v33 = vsel %vm20120_vm5, %v16851_v22, %v6478_v29  ;;  %v16754_v50 = vld [vmem:[%s19590_s24 + $0x11c] sm:$0x1]  ;;  %v16578_v38 = vld [vmem:[%s19590_s24 + $0xcc] sm:$0x1]  ;;  %v5330_v34 = vshll.u32 %v22806_v1, 16  ;;  %v6486_v6 = vrot.slane %v16752_v7, 5 }
 0x33c   : > { %v16854_v2 = vrot.slane %v16753_v15, 9  ;;  %v6490_v31 = vrot.slane %v16754_v50, 5  ;;  %v5335_v32 = vshrl.u32 %v16577_v44, 16  ;;  %v5338_v56 = vshll.u32 %v16577_v44, 16  ;;  %v16579_v52 = vld [vmem:[%s19590_s24 + $0xd0] sm:$0xf] }
 0x33d   : > { %v16581_v36 = vld [vmem:[%s19590_s24 + $0xd8] sm:$0xf]  ;;  %v6483_v22 = vsel %vm20120_vm5, %v16852_v51, %v6482_v8  ;;  %v16583_v50 = vld [vmem:[%s19590_s24 + $0xe0] sm:$0xf]  ;;  %v6487_v14 = vsel %vm20120_vm5, %v16853_v39, %v6486_v6  ;;  %v26954_v8 = vrot.slane %v22332_v18, 5  ;;  %v3818_v39 = vsel %vm19609_vm2, %v22368_v9, %v22370_v20 }
 0x33e   : > { %v26950_v3 = vld [vmem:[#allocation47_spill] sm:$0xff]  ;;  %v26952_v43 = vld [vmem:[#allocation46_spill] sm:$0xff]  ;;  %v16903_v54 = vcombine.low %v6479_v33, %v6483_v22  ;;  %v6491_v27 = vsel %vm20120_vm5, %v16854_v2, %v6490_v31  ;;  %v22881_v6 = vld [vmem:[%s19590_s24 + $0xe8] sm:$0xf]  ;;  %v5344_v18 = vshll.u32 %v16578_v38, 16  ;;  %v5349_v2 = vshrl.u32 %v16579_v52, 16 }
 0x33f   : > { %v26951_v29 = vrot.slane %v26950_v3, 5  ;;  %v26953_v0 = vrot.slane %v26952_v43, 9  ;;  %v26955_v49 = vld [vmem:[#allocation50_spill] sm:$0xff]  ;;  %v16904_v31 = vcombine.low %v6487_v14, %v6491_v27  ;;  %v5352_v51 = vshll.u32 %v16579_v52, 16  ;;  %v16589_v14 = vld [vmem:[%s19590_s24 + $0x108] sm:$0xf] }
 0x340   : > { %v26956_v44 = vrot.slane %v26955_v49, 9  ;;  %v5363_v7 = vshrl.u32 %v16581_v36, 16  ;;  %18297 = vmatprep.mubr.bf16.mxu1 %v16903_v54  ;;  %v22883_v33 = vrot.slane %v5302_v25, 5  ;;  %v22885_v22 = vrot.slane %v5313_v57, 4 }
 0x341   : > { %v22857_v1 = vsel %vm20120_vm5, %v26953_v0, %v26951_v29  ;;  %v3804_v0 = vsel %vm19609_vm2, %v22358_v16, %v22360_v21  ;;  %v22887_v3 = vrot.slane %v5316_v23, 5  ;;  %v22890_v16 = vld [vmem:[%s19590_s24 + $0xd4] sm:$0x1]  ;;  %v5366_v21 = vshll.u32 %v16581_v36, 16  ;;  %18298 = vmatmul.mubr.bf16.gmra.mrb[24].mxu1 %v16904_v31  ;;  %8510 = vmatmul.mubr.bf16.gmra.mrb[116].mxu0 %v22824_v48  ;;  %v16756_v31 = vld [vmem:[%s19590_s24 + $0x124] sm:$0x1] }
 0x342   : > { %v22870_v15 = vsel %vm20120_vm5, %v26956_v44, %v26954_v8  ;;  %v22892_v9 = vrot.slane %v5321_v24, 4  ;;  %v5377_v20 = vshrl.u32 %v16583_v50, 16  ;;  %v5380_v29 = vshll.u32 %v16583_v50, 16  ;;  %v16587_v50 = vld [vmem:[%s19590_s24 + $0x100] sm:$0xf] }
 0x343   : > { %v5391_v52 = vshrl.u32 %v22881_v6, 16  ;;  %v22895_v38 = vrot.slane %v5324_v42, 5  ;;  %v22897_v25 = vrot.slane %v5330_v34, 5  ;;  %v22899_v57 = vrot.slane %v5335_v32, 4  ;;  %v16755_v44 = vld [vmem:[%s19590_s24 + $0x120] sm:$0xe] }
 0x344   : > { %v22901_v23 = vrot.slane %v5338_v56, 5  ;;  %v22903_v43 = vrot.slane %v5344_v18, 5  ;;  %v22905_v54 = vrot.slane %v5349_v2, 4  ;;  %v22907_v36 = vrot.slane %v5352_v51, 5  ;;  %v16758_v2 = vld [vmem:[%s19590_s24 + $0x12c] sm:$0x1] }
 0x345   : > { %v22909_v24 = vrot.slane %v5363_v7, 4  ;;  %v5081_v32 = vsel %vm19609_vm2, %v22390_v58, %v22372_v5  ;;  %v5095_v56 = vsel %vm19609_vm2, %v22392_v28, %v22394_v60  ;;  %v5358_v34 = vshll.u32 %v22890_v16, 16 }
 0x346   : > { %v22922_v42 = vrot.slane %v5366_v21, 5  ;;  %v26957_v48 = vcombine.low %v22764_v47, %v22772_v17  ;;  %v22928_v27 = vrot.slane %v5377_v20, 4  ;;  %v22930_v8 = vrot.slane %v5380_v29, 5  ;;  %v16759_v20 = vld [vmem:[%s19590_s24 + $0x130] sm:$0xe] }
 0x347   : > { %v22932_v5 = vrot.slane %v5391_v52, 4  ;;  %v5394_v58 = vshll.u32 %v22881_v6, 16  ;;  %v26958_v28 = vsel %vm19609_vm2, %v26949_v19, %v26948_v4  ;;  %v26959_v60 = vsel %vm19609_vm2, %v26947_v12, %v26946_v41  ;;  %v16757_v19 = vld [vmem:[%s19590_s24 + $0x128] sm:$0xe]  ;;  %v16760_v29 = vld [vmem:[%s19590_s24 + $0x134] sm:$0x1] }
 0x348   : > { %8517 = vmatprep.mubr.bf16.mxu0 %v26957_v48  ;;  %v16217_v47 = vcombine.low %v26959_v60, %v26958_v28  ;;  %v5405_v17 = vshrl.u32 %v16587_v50, 16  ;;  %v5408_v49 = vshll.u32 %v16587_v50, 16  ;;  %v16442_v6 = vcombine.low %v22857_v1, %v22870_v15  ;;  %v16761_v50 = vld [vmem:[%s19590_s24 + $0x138] sm:$0xe] }
 0x349   : > { %v22949_v18 = vcombine.low %v3804_v0, %v3818_v39  ;;  %v5419_v4 = vshrl.u32 %v16589_v14, 16  ;;  %v16855_v41 = vrot.slane %v16755_v44, 9  ;;  %v22953_v12 = vcombine.low %v5081_v32, %v5095_v56  ;;  %v16582_v0 = vld [vmem:[%s19590_s24 + $0xdc] sm:$0x1]  ;;  %v16584_v56 = vld [vmem:[%s19590_s24 + $0xe4] sm:$0x1] }
 0x34a   : > { %v9129_v51 = vcombine.high %v22721_v40, %v22721_v40  ;;  %v6494_v7 = vrot.slane %v16756_v31, 5  ;;  %v16856_v21 = vrot.slane %v16757_v19, 9  ;;  %v5327_v1 = vor.u32 %v22895_v38, %v22892_v9  ;;  %v16762_v32 = vld [vmem:[%s19590_s24 + $0x13c] sm:$0x1]  ;;  %v16586_v44 = vld [vmem:[%s19590_s24 + $0xec] sm:$0x1]  ;;  %8518 = vmatmul.mubr.bf16.gmra.mrb[120].mxu0 %v16217_v47 }
 0x34b   : > { %v5341_v15 = vor.u32 %v22901_v23, %v22899_v57  ;;  %v5422_v39 = vshll.u32 %v16589_v14, 16  ;;  %v6498_v52 = vrot.slane %v16758_v2, 5  ;;  %v16857_v48 = vrot.slane %v16759_v20, 9  ;;  %8525 = vmatprep.mubr.bf16.mxu0 %v16442_v6 }
 0x34c   : > { %v6495_v40 = vsel %vm20120_vm5, %v16855_v41, %v6494_v7  ;;  %v6502_v28 = vrot.slane %v16760_v29, 5  ;;  %v16858_v60 = vrot.slane %v16761_v50, 9  ;;  %v5396_v31 = vrot.slane %v5394_v58, 5  ;;  %v16588_v7 = vld [vmem:[%s19590_s24 + $0x104] sm:$0x1] }
 0x34d   : > { %v5407_v9 = vrot.slane %v5405_v17, 4  ;;  %v6499_v38 = vsel %vm20120_vm5, %v16856_v21, %v6498_v52  ;;  %v6506_v57 = vrot.slane %v16762_v32, 5  ;;  %v5410_v23 = vrot.slane %v5408_v49, 5  ;;  %v16590_v58 = vld [vmem:[%s19590_s24 + $0x10c] sm:$0x1] }
 0x34e   : > { %v16905_v14 = vcombine.low %v6495_v40, %v6499_v38  ;;  %v6503_v19 = vsel %vm20120_vm5, %v16857_v48, %v6502_v28  ;;  %v22975_v2 = vrot.slane %v9129_v51, %v22731_v61  ;;  %v5355_v41 = vor.u32 %v22907_v36, %v22905_v54  ;;  %v16595_v38 = vld [vmem:[%s19590_s24 + $0x120] sm:$0xf] }
 0x34f   : > { %v5421_v17 = vrot.slane %v5419_v4, 4  ;;  %v5424_v20 = vrot.slane %v5422_v39, 5  ;;  %v6507_v47 = vsel %vm20120_vm5, %v16858_v60, %v6506_v57  ;;  %v5369_v49 = vor.u32 %v22922_v42, %v22909_v24  ;;  %v16591_v24 = vld [vmem:[%s19590_s24 + $0x110] sm:$0xf] }
 0x350   : > { %v5372_v21 = vshll.u32 %v16582_v0, 16  ;;  %18301 = vmatprep.mubr.bf16.mxu1 %v16905_v14  ;;  %v16906_v29 = vcombine.low %v6503_v19, %v6507_v47  ;;  %v9178_v6 = vrot.slane %v22975_v2, %v22740_v55  ;;  %v22987_v51 = vrot.slane %v5327_v1, 4  ;;  %v18936_v57 = vld [vmem:[%s19590_s24 + $0x10] ss:$8 sps:$4 sm:$0xff]  }
 0x351   : > { %v5383_v54 = vor.u32 %v22930_v8, %v22928_v27  ;;  %v5386_v36 = vshll.u32 %v16584_v56, 16  ;;  %v5400_v4 = vshll.u32 %v16586_v44, 16  ;;  %v5397_v39 = vor.u32 %v5396_v31, %v22932_v5 }
 0x352   : > { %v5411_v52 = vor.u32 %v5410_v23, %v5407_v9  ;;  %v5414_v50 = vshll.u32 %v16588_v7, 16  ;;  %v5428_v32 = vshll.u32 %v16590_v58, 16  ;;  %18302 = vmatmul.mubr.bf16.gmra.mrb[28].mxu1 %v16906_v29  ;;  %9208 = vperm.xlu0 %18798, %v9178_v6   ;;  %v22993_v42 = vrot.slane %v5341_v15, 4  ;;  %v16593_v15 = vld [vmem:[%s19590_s24 + $0x118] sm:$0xf]  ;;  %v26960_v23 = vld [vmem:[#allocation48_spill] sm:$0xff] }
 0x353   : > { %v22995_v0 = vrot.slane %v5355_v41, 4  ;;  %v22999_v1 = vrot.slane %v5358_v34, 5  ;;  %v5425_v27 = vor.u32 %v5424_v20, %v5421_v17  ;;  %v23001_v8 = vrot.slane %v5369_v49, 4  ;;  %8526 = vmatmul.mubr.bf16.gmra.mrb[124].mxu0 %v22949_v18  ;;  %v16763_v41 = vld [vmem:[%s19590_s24 + $0x150] sm:$0xe] }
 0x354   : > { %v23003_v5 = vrot.slane %v5372_v21, 5  ;;  %v23005_v56 = vrot.slane %v5383_v54, 4  ;;  %v23007_v40 = vrot.slane %v5386_v36, 5  ;;  %v23009_v48 = vrot.slane %v5400_v4, 5  ;;  %8566 = vmatprep.mubr.bf16.mxu0 %v22953_v12  ;;  %v16764_v7 = vld [vmem:[%s19590_s24 + $0x154] sm:$0x1] }
 0x355   : > { %v5433_v28 = vshrl.u32 %v16591_v24, 16  ;;  %v23013_v16 = vrot.slane %v5397_v39, 4  ;;  %v23015_v34 = vrot.slane %v5411_v52, 4  ;;  %v23017_v60 = vrot.slane %v5414_v50, 5  ;;  %v16765_v17 = vld [vmem:[%s19590_s24 + $0x158] sm:$0xe] }
 0x356   : > { %v23019_v44 = vrot.slane %v5428_v32, 5  ;;  %v23022_v31 = vrot.slane %v5425_v27, 4  ;;  %v5436_v9 = vshll.u32 %v16591_v24, 16  ;;  %v5109_v18 = vsel %vm19609_vm2, %v22402_v53, %v22396_v26  ;;  %v16766_v20 = vld [vmem:[%s19590_s24 + $0x15c] sm:$0x1] }
 0x357   : > { %v5123_v14 = vsel %vm19609_vm2, %v22479_v30, %v26960_v23  ;;  %v5447_v19 = vshrl.u32 %v16593_v15, 16  ;;  %v5450_v12 = vshll.u32 %v16593_v15, 16  ;;  %v5435_v58 = vrot.slane %v5433_v28, 4  ;;  %v16767_v29 = vld [vmem:[%s19590_s24 + $0x160] sm:$0xe] }
 0x358   : > { %v16859_v47 = vrot.slane %v16763_v41, 9  ;;  %v5461_v49 = vshrl.u32 %v16595_v38, 16  ;;  %v5464_v26 = vshll.u32 %v16595_v38, 16  ;;  %v6510_v53 = vrot.slane %v16764_v7, 5  ;;  %v16592_v54 = vld [vmem:[%s19590_s24 + $0x114] sm:$0x1] }
 0x359   : > { %v16860_v21 = vrot.slane %v16765_v17, 9  ;;  %v16668_v6 = vcombine.low %v5109_v18, %v5123_v14  ;;  %v6514_v30 = vrot.slane %v16766_v20, 5  ;;  %v16768_v36 = vld [vmem:[%s19590_s24 + $0x164] sm:$0x1]  ;;  %v16769_v4 = vld [vmem:[%s19590_s24 + $0x168] sm:$0xe] }
 0x35a   : > { %v16861_v39 = vrot.slane %v16767_v29, 9  ;;  %v5438_v52 = vrot.slane %v5436_v9, 5  ;;  %v6511_v50 = vsel %vm20120_vm5, %v16859_v47, %v6510_v53  ;;  %v16770_v32 = vld [vmem:[%s19590_s24 + $0x16c] sm:$0x1]  ;;  %v6518_v24 = vrot.slane %v16768_v36, 5 }
 0x35b   : > { %v16862_v27 = vrot.slane %v16769_v4, 9  ;;  %v16594_v15 = vld [vmem:[%s19590_s24 + $0x11c] sm:$0x1]  ;;  %v5449_v28 = vrot.slane %v5447_v19, 4  ;;  %v5452_v38 = vrot.slane %v5450_v12, 5  ;;  %v6515_v18 = vsel %vm20120_vm5, %v16860_v21, %v6514_v30  ;;  %8567 = vmatmul.mubr.bf16.vlgmr.msra.gmra.mrb[0].mxu0 %v18936_v57 }
 0x35c   : > { %v6522_v23 = vrot.slane %v16770_v32, 5  ;;  %v5137_v9 = vsel %vm19609_vm2, %v22485_v45, %v22512_v37  ;;  %v16596_v14 = vld [vmem:[%s19590_s24 + $0x124] sm:$0x1]  ;;  %v16597_v41 = vld [vmem:[%s19590_s24 + $0x128] sm:$0xf]  ;;  %v16907_v7 = vcombine.low %v6511_v50, %v6515_v18  ;;  %v6519_v17 = vsel %vm20120_vm5, %v16861_v39, %v6518_v24  ;;  %8574 = vmatprep.mubr.bf16.mxu0 %v16668_v6 }
 0x35d   : > { %v5151_v19 = vsel %vm19609_vm2, %v22514_v35, %v22516_v59  ;;  %v16598_v12 = vld [vmem:[%s19590_s24 + $0x12c] sm:$0x1]  ;;  %v5463_v57 = vrot.slane %v5461_v49, 4  ;;  %v5466_v20 = vrot.slane %v5464_v26, 5  ;;  %v16599_v47 = vld [vmem:[%s19590_s24 + $0x130] sm:$0xf]  ;;  %v5439_v37 = vor.u32 %v5438_v52, %v5435_v58 }
 0x35e   : > { %v6523_v45 = vsel %vm20120_vm5, %v16862_v27, %v6522_v23  ;;  %v5442_v53 = vshll.u32 %v16592_v54, 16  ;;  %v5456_v21 = vshll.u32 %v16594_v15, 16  ;;  %18305 = vmatprep.mubr.bf16.mxu1 %v16907_v7  ;;  %v18937_v6 = vld [vmem:[%s19590_s24 + $0x20] ss:$8 sps:$4 sm:$0xff]   ;;  %v5453_v30 = vor.u32 %v5452_v38, %v5449_v28  ;;  %v16601_v59 = vld [vmem:[%s19590_s24 + $0x138] sm:$0xf] }
 0x35f   : > { %v16908_v29 = vcombine.low %v6519_v17, %v6523_v45  ;;  %v5470_v36 = vshll.u32 %v16596_v14, 16  ;;  %v5475_v4 = vshrl.u32 %v16597_v41, 16  ;;  %v5478_v39 = vshll.u32 %v16597_v41, 16  ;;  %v16603_v32 = vld [vmem:[%s19590_s24 + $0x150] sm:$0xf]  ;;  %v26961_v23 = vld [vmem:[#allocation52_spill] sm:$0xff] }
 0x360   : > { %v5484_v35 = vshll.u32 %v16598_v12, 16  ;;  %v5489_v50 = vshrl.u32 %v16599_v47, 16  ;;  %v16669_v49 = vcombine.low %v5137_v9, %v5151_v19  ;;  %v5467_v26 = vor.u32 %v5466_v20, %v5463_v57  ;;  %v26962_v9 = vld [vmem:[#allocation5_spill] sm:$0xff] }
 0x361   : > { %18306 = vmatmul.mubr.bf16.gmra.mrb[32].mxu1 %v16908_v29  ;;  %v23067_v24 = vrot.slane %v5439_v37, 4  ;;  %v23069_v58 = vrot.slane %v5442_v53, 5  ;;  %v23071_v54 = vrot.slane %v5456_v21, 5  ;;  %v5492_v52 = vshll.u32 %v16599_v47, 16  ;;  %v18938_v20 = vld [vmem:[%s19590_s24 + $0x30] ss:$8 sps:$4 sm:$0xff]  }
 0x362   : > { %v23073_v27 = vrot.slane %v5453_v30, 4  ;;  %v23075_v15 = vrot.slane %v5475_v4, 4  ;;  %v23077_v28 = vrot.slane %v5478_v39, 5  ;;  %v5503_v38 = vshrl.u32 %v16601_v59, 16  ;;  %v16771_v37 = vld [vmem:[%s19590_s24 + $0x170] sm:$0xe] }
 0x363   : > { %8575 = vmatmul.mubr.bf16.gmra.mrb[4].mxu0 %v18937_v6  ;;  %v5165_v18 = vsel %vm19609_vm2, %v22518_v62, %v22520_v46  ;;  %v5179_v14 = vsel %vm19609_vm2, %v26962_v9, %v26961_v23  ;;  %v5506_v41 = vshll.u32 %v16601_v59, 16  ;;  %v5517_v7 = vshrl.u32 %v16603_v32, 16  ;;  %v16600_v62 = vld [vmem:[%s19590_s24 + $0x134] sm:$0x1]  ;;  %v16602_v46 = vld [vmem:[%s19590_s24 + $0x13c] sm:$0x1] }
 0x364   : > { %8582 = vmatprep.mubr.bf16.mxu0 %v16669_v49  ;;  %v23087_v17 = vrot.slane %v5467_v26, 4  ;;  %v23089_v19 = vrot.slane %v5470_v36, 5  ;;  %v23091_v12 = vrot.slane %v5484_v35, 5  ;;  %v5491_v57 = vrot.slane %v5489_v50, 4  ;;  %v16772_v53 = vld [vmem:[%s19590_s24 + $0x174] sm:$0x1] }
 0x365   : > { %v5494_v47 = vrot.slane %v5492_v52, 5  ;;  %v5520_v45 = vshll.u32 %v16603_v32, 16  ;;  %v16670_v21 = vcombine.low %v5165_v18, %v5179_v14  ;;  %v26966_v29 = vld [vmem:[#allocation58_spill] sm:$0xff]  ;;  %v26967_v6 = vld [vmem:[#allocation60_spill] sm:$0xff]  ;;  %v5505_v36 = vrot.slane %v5503_v38, 4  ;;  %v26968_v23 = vld [vmem:[#allocation59_spill] sm:$0xff] }
 0x366   : > { %26963 = vst [vmem:[#allocation11_spill] sm:$0xff] %v23087_v17  ;;  %26964 = vst [vmem:[#allocation12_spill] sm:$0xff] %v23089_v19  ;;  %v5193_v30 = vsel %vm19609_vm2, %v26967_v6, %v26966_v29  ;;  %v16773_v4 = vld [vmem:[%s19590_s24 + $0x178] sm:$0xe]  ;;  %v16774_v39 = vld [vmem:[%s19590_s24 + $0x17c] sm:$0x1]  ;;  %v5481_v14 = vor.u32 %v23077_v28, %v23075_v15 }
 0x367   : > { %26965 = vst [vmem:[#allocation13_spill] sm:$0xff] %v23091_v12  ;;  %v16863_v35 = vrot.slane %v16771_v37, 9  ;;  %v5508_v59 = vrot.slane %v5506_v41, 5  ;;  %v16605_v50 = vld [vmem:[%s19590_s24 + $0x158] sm:$0xf]  ;;  %v5519_v49 = vrot.slane %v5517_v7, 4  ;;  %v5495_v15 = vor.u32 %v5494_v47, %v5491_v57 }
 0x368   : > { %v6526_v26 = vrot.slane %v16772_v53, 5  ;;  %v16864_v32 = vrot.slane %v16773_v4, 9  ;;  %v16775_v52 = vld [vmem:[%s19590_s24 + $0x180] sm:$0xe]  ;;  %v26969_v9 = vld [vmem:[#allocation62_spill] sm:$0xff]  ;;  %v6530_v38 = vrot.slane %v16774_v39, 5 }
 0x369   : > { %v5207_v18 = vsel %vm19609_vm2, %v26969_v9, %v26968_v23  ;;  %v16776_v29 = vld [vmem:[%s19590_s24 + $0x184] sm:$0x1]  ;;  %v16777_v6 = vld [vmem:[%s19590_s24 + $0x188] sm:$0xe]  ;;  %v16865_v12 = vrot.slane %v16775_v52, 9  ;;  %v5522_v37 = vrot.slane %v5520_v45, 5 }
 0x36a   : > { %v6527_v41 = vsel %vm20120_vm5, %v16863_v35, %v6526_v26  ;;  %v16778_v7 = vld [vmem:[%s19590_s24 + $0x18c] sm:$0x1]  ;;  %v6534_v53 = vrot.slane %v16776_v29, 5  ;;  %v16866_v4 = vrot.slane %v16777_v6, 9  ;;  %v5498_v17 = vshll.u32 %v16600_v62, 16 }
 0x36b   : > { %v5512_v19 = vshll.u32 %v16602_v46, 16  ;;  %v6531_v23 = vsel %vm20120_vm5, %v16864_v32, %v6530_v38  ;;  %v6538_v9 = vrot.slane %v16778_v7, 5  ;;  %8583 = vmatmul.mubr.bf16.gmra.mrb[8].mxu0 %v18938_v20  ;;  %v16607_v28 = vld [vmem:[%s19590_s24 + $0x160] sm:$0xf]  ;;  %v9159_v35 = vcombine.high %v22748_v13, %v22748_v13  ;;  %v16609_v57 = vld [vmem:[%s19590_s24 + $0x168] sm:$0xf] }
 0x36c   : > { %v16909_v39 = vcombine.low %v6527_v41, %v6531_v23  ;;  %v6535_v45 = vsel %vm20120_vm5, %v16865_v12, %v6534_v53  ;;  %8590 = vmatprep.mubr.bf16.mxu0 %v16670_v21  ;;  %v5509_v62 = vor.u32 %v5508_v59, %v5505_v36  ;;  %v5531_v46 = vshrl.u32 %v16605_v50, 16  ;;  %v23129_v29 = vld [vmem:[%s19590_s24 + $0x154] sm:$0x1]  ;;  %v23132_v12 = vld [vmem:[%s19590_s24 + $0x15c] sm:$0x1] }
 0x36d   : > { %v5534_v26 = vshll.u32 %v16605_v50, 16  ;;  %v6539_v32 = vsel %vm20120_vm5, %v16866_v4, %v6538_v9  ;;  %v5523_v20 = vor.u32 %v5522_v37, %v5519_v49  ;;  %v9182_v52 = vrot.slane %v9159_v35, %v22740_v55  ;;  %v18939_v21 = vld [vmem:[%s19590_s24 + $0x40] ss:$8 sps:$4 sm:$0xff]   ;;  %v16610_v4 = vld [vmem:[%s19590_s24 + $0x16c] sm:$0x1] }
 0x36e   : > { %18309 = vmatprep.mubr.bf16.mxu1 %v16909_v39  ;;  %v16910_v47 = vcombine.low %v6535_v45, %v6539_v32  ;;  %v16671_v38 = vcombine.low %v5193_v30, %v5207_v18  ;;  %v5545_v13 = vshrl.u32 %v16607_v28, 16  ;;  %v5548_v6 = vshll.u32 %v16607_v28, 16  ;;  %v26976_v28 = vld [vmem:[#allocation55_spill] sm:$0xff]  ;;  %v26977_v45 = vld [vmem:[#allocation56_spill] sm:$0xff] }
 0x36f   : > { %v23135_v36 = vrot.slane %v5481_v14, 4  ;;  %v23137_v59 = vrot.slane %v5495_v15, 4  ;;  %v23139_v50 = vrot.slane %v5498_v17, 5  ;;  %v23141_v49 = vrot.slane %v5512_v19, 5  ;;  %9212 = vperm.xlu1 %18799, %v9182_v52   ;;  %v16608_v19 = vld [vmem:[%s19590_s24 + $0x164] sm:$0x1] }
 0x370   : > { %18310 = vmatmul.mubr.bf16.gmra.mrb[36].mxu1 %v16910_v47  ;;  %v23143_v30 = vrot.slane %v5509_v62, 4  ;;  %v5533_v18 = vrot.slane %v5531_v46, 4  ;;  %v5559_v37 = vshrl.u32 %v16609_v57, 16  ;;  %v5562_v41 = vshll.u32 %v16609_v57, 16  ;;  %v26975_v15 = vld [vmem:[#allocation54_spill] sm:$0xff] }
 0x371   : > { %26970 = vst [vmem:[#allocation8_spill] sm:$0xff] %v23137_v59  ;;  %26971 = vst [vmem:[#allocation6_spill] sm:$0xff] %v23139_v50  ;;  %v23145_v7 = vrot.slane %v5523_v20, 4  ;;  %v5526_v14 = vshll.u32 %v23129_v29, 16  ;;  %v5536_v53 = vrot.slane %v5534_v26, 5  ;;  %v5540_v17 = vshll.u32 %v23132_v12, 16 }
 0x372   : > { %26972 = vst [vmem:[#allocation10_spill] sm:$0xff] %v23141_v49  ;;  %26973 = vst [vmem:[#allocation14_spill] sm:$0xff] %v23143_v30  ;;  %v5547_v23 = vrot.slane %v5545_v13, 4  ;;  %v5550_v9 = vrot.slane %v5548_v6, 5  ;;  %v5221_v39 = vsel %vm19609_vm2, %v26976_v28, %v26975_v15  ;;  %v5235_v35 = vsel %vm19609_vm2, %v22733_v63, %v26977_v45  ;;  %v16611_v62 = vld [vmem:[%s19590_s24 + $0x170] sm:$0xf] }
 0x373   : > { %26974 = vst [vmem:[#allocation15_spill] sm:$0xff] %v23145_v7  ;;  %8591 = vmatmul.mubr.bf16.gmra.mrb[12].mxu0 %v18939_v21  ;;  %v5561_v46 = vrot.slane %v5559_v37, 4  ;;  %v5564_v26 = vrot.slane %v5562_v41, 5  ;;  %v16613_v32 = vld [vmem:[%s19590_s24 + $0x178] sm:$0xf]  ;;  %v5554_v57 = vshll.u32 %v16608_v19, 16  ;;  %v16672_v12 = vcombine.low %v5221_v39, %v5235_v35 }
 0x374   : > { %8598 = vmatprep.mubr.bf16.mxu0 %v16671_v38  ;;  %v18940_v20 = vld [vmem:[%s19590_s24 + $0x60] ss:$8 sps:$4 sm:$0xff]   ;;  %v5568_v47 = vshll.u32 %v16610_v4, 16  ;;  %v16780_v29 = vld [vmem:[%s19590_s24 + $0x1a4] sm:$0x1]  ;;  %v5537_v13 = vor.u32 %v5536_v53, %v5533_v18  ;;  %v5573_v6 = vshrl.u32 %v16611_v62, 16  ;;  %v5551_v7 = vor.u32 %v5550_v9, %v5547_v23 }
 0x375   : > { %v16779_v52 = vld [vmem:[%s19590_s24 + $0x1a0] sm:$0xe]  ;;  %v5576_v21 = vshll.u32 %v16611_v62, 16  ;;  %v16781_v63 = vld [vmem:[%s19590_s24 + $0x1a8] sm:$0xe]  ;;  %v5587_v28 = vshrl.u32 %v16613_v32, 16  ;;  %v5565_v30 = vor.u32 %v5564_v26, %v5561_v46 }
 0x376   : > { %v16782_v15 = vld [vmem:[%s19590_s24 + $0x1ac] sm:$0x1]  ;;  %v16867_v38 = vrot.slane %v16779_v52, 9  ;;  %v6542_v37 = vrot.slane %v16780_v29, 5  ;;  %v16868_v41 = vrot.slane %v16781_v63, 9  ;;  %v5590_v39 = vshll.u32 %v16613_v32, 16 }
 0x377   : > { %v16783_v45 = vld [vmem:[%s19590_s24 + $0x1b0] sm:$0xe]  ;;  %v6546_v19 = vrot.slane %v16782_v15, 5  ;;  %v16784_v4 = vld [vmem:[%s19590_s24 + $0x1b4] sm:$0x1]  ;;  %v5575_v52 = vrot.slane %v5573_v6, 4 }
 0x378   : > { %v16785_v49 = vld [vmem:[%s19590_s24 + $0x1b8] sm:$0xe]  ;;  %v16869_v59 = vrot.slane %v16783_v45, 9  ;;  %v6543_v18 = vsel %vm20120_vm5, %v16867_v38, %v6542_v37  ;;  %v16786_v53 = vld [vmem:[%s19590_s24 + $0x1bc] sm:$0x1]  ;;  %v6550_v35 = vrot.slane %v16784_v4, 5 }
 0x379   : > { %v16870_v62 = vrot.slane %v16785_v49, 9  ;;  %v5578_v29 = vrot.slane %v5576_v21, 5  ;;  %v6547_v23 = vsel %vm20120_vm5, %v16868_v41, %v6546_v19  ;;  %v6554_v9 = vrot.slane %v16786_v53, 5  ;;  %v26978_v46 = vld [vmem:[#allocation61_spill] sm:$0xff]  ;;  %v26979_v26 = vld [vmem:[#allocation63_spill] sm:$0xff]  ;;  %v26980_v63 = vld [vmem:[#allocation66_spill] sm:$0xff] }
 0x37a   : > { %v5249_v32 = vsel %vm19609_vm2, %v26979_v26, %v26978_v46  ;;  %v26981_v15 = vld [vmem:[#allocation64_spill] sm:$0xff]  ;;  %v16612_v49 = vld [vmem:[%s19590_s24 + $0x174] sm:$0x1]  ;;  %v16911_v6 = vcombine.low %v6543_v18, %v6547_v23  ;;  %v6551_v21 = vsel %vm20120_vm5, %v16869_v59, %v6550_v35  ;;  %v23186_v41 = vrot.slane %v5526_v14, 5  ;;  %v18941_v53 = vld [vmem:[%s19590_s24 + $0x70] ss:$8 sps:$4 sm:$0xff]  }
 0x37b   : > { %8599 = vmatmul.mubr.bf16.gmra.mrb[16].mxu0 %v18940_v20  ;;  %v5263_v38 = vsel %vm19609_vm2, %v26981_v15, %v26980_v63  ;;  %v16615_v37 = vld [vmem:[%s19590_s24 + $0x180] sm:$0xf]  ;;  %v23188_v20 = vrot.slane %v5537_v13, 4  ;;  %v23190_v45 = vrot.slane %v5540_v17, 5  ;;  %v16617_v19 = vld [vmem:[%s19590_s24 + $0x188] sm:$0xf]  ;;  %v6555_v4 = vsel %vm20120_vm5, %v16870_v62, %v6554_v9 }
 0x37c   : > { %8606 = vmatprep.mubr.bf16.mxu0 %v16672_v12  ;;  %26982 = vst [vmem:[#allocation16_spill] sm:$0xff] %v23186_v41  ;;  %v23196_v46 = vrot.slane %v5551_v7, 4  ;;  %v23198_v26 = vrot.slane %v5554_v57, 5  ;;  %v23200_v18 = vrot.slane %v5568_v47, 5  ;;  %18313 = vmatprep.mubr.bf16.mxu1 %v16911_v6  ;;  %v16912_v59 = vcombine.low %v6551_v21, %v6555_v4  ;;  %v23205_v17 = vld [vmem:[%s19590_s24 + $0x17c] sm:$0x1] }
 0x37d   : > { %26983 = vst [vmem:[#allocation17_spill] sm:$0xff] %v23188_v20  ;;  %26984 = vst [vmem:[#allocation18_spill] sm:$0xff] %v23190_v45  ;;  %v23202_v14 = vrot.slane %v5565_v30, 4  ;;  %v5579_v12 = vor.u32 %v5578_v29, %v5575_v52  ;;  %v5582_v13 = vshll.u32 %v16612_v49, 16  ;;  %v5601_v35 = vshrl.u32 %v16615_v37, 16  ;;  %v26992_v49 = vld [vmem:[#allocation65_spill] sm:$0xff] }
 0x37e   : > { %26985 = vst [vmem:[#allocation4_spill] sm:$0xff] %v23196_v46  ;;  %26986 = vst [vmem:[#allocation20_spill] sm:$0xff] %v23198_v26  ;;  %v5589_v62 = vrot.slane %v5587_v28, 4  ;;  %v5592_v7 = vrot.slane %v5590_v39, 5  ;;  %v5604_v23 = vshll.u32 %v16615_v37, 16  ;;  %v5615_v9 = vshrl.u32 %v16617_v19, 16  ;;  %18314 = vmatmul.mubr.bf16.gmra.mrb[40].mxu1 %v16912_v59 }
 0x37f   : > { %26987 = vst [vmem:[#allocation19_spill] sm:$0xff] %v23200_v18  ;;  %26988 = vst [vmem:[#allocation23_spill] sm:$0xff] %v23202_v14  ;;  %v16673_v57 = vcombine.low %v5249_v32, %v5263_v38  ;;  %v16619_v63 = vld [vmem:[%s19590_s24 + $0x1a0] sm:$0xf]  ;;  %v16616_v47 = vld [vmem:[%s19590_s24 + $0x184] sm:$0x1] }
 0x380   : > { %v23210_v15 = vld [vmem:[%s19590_s24 + $0x18c] sm:$0x1]  ;;  %v23212_v6 = vrot.slane %v5579_v12, 4  ;;  %v23214_v30 = vrot.slane %v5582_v13, 5  ;;  %v5596_v52 = vshll.u32 %v23205_v17, 16  ;;  %v23217_v29 = vrot.slane %v5601_v35, 4 }
 0x381   : > { %v16621_v28 = vld [vmem:[%s19590_s24 + $0x1a8] sm:$0xf]  ;;  %v26993_v38 = vld [vmem:[#allocation67_spill] sm:$0xff]  ;;  %v5618_v4 = vshll.u32 %v16617_v19, 16  ;;  %v5629_v59 = vshrl.u32 %v16619_v63, 16  ;;  %v5606_v17 = vrot.slane %v5604_v23, 5  ;;  %v5593_v26 = vor.u32 %v5592_v7, %v5589_v62 }
 0x382   : > { %26989 = vst [vmem:[#allocation21_spill] sm:$0xff] %v23212_v6  ;;  %26990 = vst [vmem:[#allocation27_spill] sm:$0xff] %v23214_v30  ;;  %v26991_v39 = vld [vmem:[#allocation68_spill] sm:$0xff]  ;;  %v26994_v37 = vld [vmem:[#allocation7_spill] sm:$0xff]  ;;  %v5610_v12 = vshll.u32 %v16616_v47, 16  ;;  %v23228_v13 = vrot.slane %v5615_v9, 4 }
 0x383   : > { %8607 = vmatmul.mubr.bf16.gmra.mrb[20].mxu0 %v18941_v53  ;;  %v5277_v32 = vsel %vm19609_vm2, %v26992_v49, %v26991_v39  ;;  %v5291_v21 = vsel %vm19609_vm2, %v26994_v37, %v26993_v38  ;;  %v5624_v53 = vshll.u32 %v23210_v15, 16  ;;  %v18942_v35 = vld [vmem:[%s19590_s24 + $0x80] ss:$8 sps:$4 sm:$0xff]   ;;  %v5632_v6 = vshll.u32 %v16619_v63, 16  ;;  %v16788_v30 = vld [vmem:[%s19590_s24 + $0x1c4] sm:$0x1] }
 0x384   : > { %8614 = vmatprep.mubr.bf16.mxu0 %v16673_v57  ;;  %v5643_v39 = vshrl.u32 %v16621_v28, 16  ;;  %v16787_v49 = vld [vmem:[%s19590_s24 + $0x1c0] sm:$0xe]  ;;  %v16674_v14 = vcombine.low %v5277_v32, %v5291_v21  ;;  %v5646_v38 = vshll.u32 %v16621_v28, 16  ;;  %v16789_v37 = vld [vmem:[%s19590_s24 + $0x1c8] sm:$0xe]  ;;  %v5607_v62 = vor.u32 %v5606_v17, %v23217_v29 }
 0x385   : > { %v16790_v19 = vld [vmem:[%s19590_s24 + $0x1cc] sm:$0x1]  ;;  %v16871_v57 = vrot.slane %v16787_v49, 9  ;;  %v5620_v23 = vrot.slane %v5618_v4, 5  ;;  %v5631_v47 = vrot.slane %v5629_v59, 4  ;;  %v6558_v9 = vrot.slane %v16788_v30, 5 }
 0x386   : > { %v16872_v18 = vrot.slane %v16789_v37, 9  ;;  %v16791_v46 = vld [vmem:[%s19590_s24 + $0x1d0] sm:$0xe]  ;;  %v26995_v15 = vld [vmem:[#allocation9_spill] sm:$0xff]  ;;  %v6562_v20 = vrot.slane %v16790_v19, 5  ;;  %v5634_v21 = vrot.slane %v5632_v6, 5 }
 0x387   : > { %v5305_v63 = vsel %vm19609_vm2, %v26995_v15, %v22883_v33  ;;  %v16792_v45 = vld [vmem:[%s19590_s24 + $0x1d4] sm:$0x1]  ;;  %v16793_v32 = vld [vmem:[%s19590_s24 + $0x1d8] sm:$0xe]  ;;  %v16873_v28 = vrot.slane %v16791_v46, 9  ;;  %v6559_v49 = vsel %vm20120_vm5, %v16871_v57, %v6558_v9  ;;  %v5645_v37 = vrot.slane %v5643_v39, 4 }
 0x388   : > { %v16794_v4 = vld [vmem:[%s19590_s24 + $0x1dc] sm:$0x1]  ;;  %v6566_v59 = vrot.slane %v16792_v45, 5  ;;  %v16874_v30 = vrot.slane %v16793_v32, 9  ;;  %v5648_v41 = vrot.slane %v5646_v38, 5  ;;  %v6563_v50 = vsel %vm20120_vm5, %v16872_v18, %v6562_v20 }
 0x389   : > { %v6570_v33 = vrot.slane %v16794_v4, 5  ;;  %v16620_v7 = vld [vmem:[%s19590_s24 + $0x1a4] sm:$0x1]  ;;  %v16913_v46 = vcombine.low %v6559_v49, %v6563_v50  ;;  %v9161_v45 = vcombine.high %v22975_v2, %v22975_v2  ;;  %v23254_v39 = vrot.slane %v5593_v26, 4  ;;  %v16623_v18 = vld [vmem:[%s19590_s24 + $0x1b0] sm:$0xf] }
 0x38a   : > { %v6567_v6 = vsel %vm20120_vm5, %v16873_v28, %v6566_v59  ;;  %v23256_v38 = vrot.slane %v5596_v52, 5  ;;  %v23258_v20 = vrot.slane %v5610_v12, 5  ;;  %v5319_v50 = vsel %vm19609_vm2, %v22885_v22, %v22887_v3  ;;  %v18943_v17 = vld [vmem:[%s19590_s24 + $0x90] ss:$8 sps:$4 sm:$0xff]   ;;  %v23276_v15 = vld [vmem:[%s19590_s24 + $0x1ac] sm:$0x1] }
 0x38b   : > { %8615 = vmatmul.mubr.bf16.gmra.mrb[24].mxu0 %v18942_v35  ;;  %v6571_v29 = vsel %vm20120_vm5, %v16874_v30, %v6570_v33  ;;  %v5621_v2 = vor.u32 %v5620_v23, %v23228_v13  ;;  %18317 = vmatprep.mubr.bf16.mxu1 %v16913_v46  ;;  %v9186_v52 = vrot.slane %v9161_v45, %v22740_v55  ;;  %v23271_v12 = vrot.slane %v5624_v53, 5  ;;  %v23279_v22 = vld [vmem:[%s19590_s24 + $0x1b4] sm:$0x1]  ;;  %v16627_v28 = vld [vmem:[%s19590_s24 + $0x1c0] sm:$0xf] }
 0x38c   : > { %8622 = vmatprep.mubr.bf16.mxu0 %v16674_v14  ;;  %v16625_v14 = vld [vmem:[%s19590_s24 + $0x1b8] sm:$0xf]  ;;  %v16914_v26 = vcombine.low %v6567_v6, %v6571_v29  ;;  %v5635_v35 = vor.u32 %v5634_v21, %v5631_v47  ;;  %v5638_v19 = vshll.u32 %v16620_v7, 16  ;;  %v5649_v57 = vor.u32 %v5648_v41, %v5645_v37  ;;  %v16626_v53 = vld [vmem:[%s19590_s24 + $0x1bc] sm:$0x1] }
 0x38d   : > { %v23273_v9 = vrot.slane %v5607_v62, 4  ;;  %v5657_v3 = vshrl.u32 %v16623_v18, 16  ;;  %9216 = vperm.xlu1 %18799, %v9186_v52   ;;  %v16675_v13 = vcombine.low %v5305_v63, %v5319_v50  ;;  %v5660_v23 = vshll.u32 %v16623_v18, 16  ;;  %v16629_v30 = vld [vmem:[%s19590_s24 + $0x1c8] sm:$0xf] }
 0x38e   : > { %18318 = vmatmul.mubr.bf16.gmra.mrb[44].mxu1 %v16914_v26  ;;  %v5671_v32 = vshrl.u32 %v16625_v14, 16  ;;  %v23282_v49 = vrot.slane %v5621_v2, 4  ;;  %v5674_v47 = vshll.u32 %v16625_v14, 16  ;;  %v23285_v41 = vrot.slane %v5635_v35, 4  ;;  %v18944_v6 = vld [vmem:[%s19590_s24 + $0xb0] ss:$8 sps:$4 sm:$0xff]  }
 0x38f   : > { %v23287_v21 = vrot.slane %v5638_v19, 5  ;;  %v23289_v4 = vrot.slane %v5649_v57, 4  ;;  %v5652_v59 = vshll.u32 %v23276_v15, 16  ;;  %v5666_v63 = vshll.u32 %v23279_v22, 16  ;;  %v16795_v2 = vld [vmem:[%s19590_s24 + $0x1f0] sm:$0xe] }
 0x390   : > { %v5685_v37 = vshrl.u32 %v16627_v28, 16  ;;  %v5659_v33 = vrot.slane %v5657_v3, 4  ;;  %v5662_v62 = vrot.slane %v5660_v23, 5  ;;  %v5673_v7 = vrot.slane %v5671_v32, 4  ;;  %v16796_v14 = vld [vmem:[%s19590_s24 + $0x1f4] sm:$0x1] }
 0x391   : > { %v5680_v46 = vshll.u32 %v16626_v53, 16  ;;  %v5333_v45 = vsel %vm19609_vm2, %v22987_v51, %v22897_v25  ;;  %v5347_v18 = vsel %vm19609_vm2, %v22993_v42, %v22903_v43  ;;  %v5676_v29 = vrot.slane %v5674_v47, 5  ;;  %v16798_v35 = vld [vmem:[%s19590_s24 + $0x1fc] sm:$0x1]  ;;  %v16799_v15 = vld [vmem:[%s19590_s24 + $0x200] sm:$0xe] }
 0x392   : > { %v5688_v50 = vshll.u32 %v16627_v28, 16  ;;  %v5699_v26 = vshrl.u32 %v16629_v30, 16  ;;  %v5702_v52 = vshll.u32 %v16629_v30, 16  ;;  %v5687_v19 = vrot.slane %v5685_v37, 4  ;;  %v16800_v42 = vld [vmem:[%s19590_s24 + $0x204] sm:$0x1] }
 0x393   : > { %8623 = vmatmul.mubr.bf16.gmra.mrb[28].mxu0 %v18943_v17  ;;  %v16797_v17 = vld [vmem:[%s19590_s24 + $0x1f8] sm:$0xe]  ;;  %v16875_v57 = vrot.slane %v16795_v2, 9  ;;  %v6574_v25 = vrot.slane %v16796_v14, 5  ;;  %v16676_v22 = vcombine.low %v5333_v45, %v5347_v18  ;;  %v5663_v3 = vor.u32 %v5662_v62, %v5659_v33  ;;  %v16802_v53 = vld [vmem:[%s19590_s24 + $0x20c] sm:$0x1] }
 0x394   : > { %8630 = vmatprep.mubr.bf16.mxu0 %v16675_v13  ;;  %v16876_v51 = vrot.slane %v16797_v17, 9  ;;  %v6578_v43 = vrot.slane %v16798_v35, 5  ;;  %v16801_v13 = vld [vmem:[%s19590_s24 + $0x208] sm:$0xe]  ;;  %v16877_v23 = vrot.slane %v16799_v15, 9  ;;  %v5690_v32 = vrot.slane %v5688_v50, 5 }
 0x395   : > { %v6575_v28 = vsel %vm20120_vm5, %v16875_v57, %v6574_v25  ;;  %v6582_v47 = vrot.slane %v16800_v42, 5  ;;  %v16878_v30 = vrot.slane %v16801_v13, 9  ;;  %v16628_v37 = vld [vmem:[%s19590_s24 + $0x1c4] sm:$0x1]  ;;  %v5701_v2 = vrot.slane %v5699_v26, 4 }
 0x396   : > { %v5704_v14 = vrot.slane %v5702_v52, 5  ;;  %v6579_v33 = vsel %vm20120_vm5, %v16876_v51, %v6578_v43  ;;  %v6586_v62 = vrot.slane %v16802_v53, 5  ;;  %v5361_v45 = vsel %vm19609_vm2, %v22995_v0, %v22999_v1  ;;  %v16630_v50 = vld [vmem:[%s19590_s24 + $0x1cc] sm:$0x1]  ;;  %v16631_v17 = vld [vmem:[%s19590_s24 + $0x1d0] sm:$0xf] }
 0x397   : > { %v5677_v18 = vor.u32 %v5676_v29, %v5673_v7  ;;  %v16915_v35 = vcombine.low %v6575_v28, %v6579_v33  ;;  %v6583_v26 = vsel %vm20120_vm5, %v16877_v23, %v6582_v47  ;;  %v5375_v52 = vsel %vm19609_vm2, %v23001_v8, %v23003_v5  ;;  %v16632_v25 = vld [vmem:[%s19590_s24 + $0x1d4] sm:$0x1]  ;;  %v16633_v0 = vld [vmem:[%s19590_s24 + $0x1d8] sm:$0xf]  ;;  %v16635_v28 = vld [vmem:[%s19590_s24 + $0x1f0] sm:$0xf] }
 0x398   : > { %v23330_v57 = vrot.slane %v5666_v63, 5  ;;  %v6587_v1 = vsel %vm20120_vm5, %v16878_v30, %v6586_v62  ;;  %v23336_v7 = vrot.slane %v5680_v46, 5  ;;  %v5691_v29 = vor.u32 %v5690_v32, %v5687_v19  ;;  %v16634_v53 = vld [vmem:[%s19590_s24 + $0x1dc] sm:$0x1] }
 0x399   : > { %v5694_v51 = vshll.u32 %v16628_v37, 16  ;;  %18321 = vmatprep.mubr.bf16.mxu1 %v16915_v35  ;;  %v16916_v15 = vcombine.low %v6583_v26, %v6587_v1  ;;  %v23339_v43 = vrot.slane %v5663_v3, 4  ;;  %v5705_v8 = vor.u32 %v5704_v14, %v5701_v2  ;;  %v16637_v26 = vld [vmem:[%s19590_s24 + $0x1f8] sm:$0xf] }
 0x39a   : > { %v5708_v5 = vshll.u32 %v16630_v50, 16  ;;  %v23341_v63 = vrot.slane %v5677_v18, 4  ;;  %v5716_v42 = vshll.u32 %v16631_v17, 16  ;;  %v5722_v13 = vshll.u32 %v16632_v25, 16  ;;  %v18946_v50 = vld [vmem:[%s19590_s24 + $0xd0] ss:$8 sps:$4 sm:$0xff]  }
 0x39b   : > { %8631 = vmatmul.mubr.bf16.gmra.mrb[32].mxu0 %v18944_v6  ;;  %v23328_v6 = vrot.slane %v5652_v59, 5  ;;  %v5713_v59 = vshrl.u32 %v16631_v17, 16  ;;  %v5727_v23 = vshrl.u32 %v16633_v0, 16  ;;  %18322 = vmatmul.mubr.bf16.gmra.mrb[48].mxu1 %v16916_v15  ;;  %v16677_v46 = vcombine.low %v5361_v45, %v5375_v52  ;;  %v16803_v52 = vld [vmem:[%s19590_s24 + $0x210] sm:$0xe] }
 0x39c   : > { %8638 = vmatprep.mubr.bf16.mxu0 %v16676_v22  ;;  %v18945_v22 = vld [vmem:[%s19590_s24 + $0xc0] ss:$8 sps:$4 sm:$0xff]   ;;  %v23344_v19 = vrot.slane %v5691_v29, 4  ;;  %v23346_v32 = vrot.slane %v5694_v51, 5  ;;  %v23349_v3 = vrot.slane %v5705_v8, 4  ;;  %v23351_v47 = vrot.slane %v5708_v5, 5 }
 0x39d   : > { %v5715_v30 = vrot.slane %v5713_v59, 4  ;;  %v5730_v37 = vshll.u32 %v16633_v0, 16  ;;  %v5741_v2 = vshrl.u32 %v16635_v28, 16  ;;  %v5744_v14 = vshll.u32 %v16635_v28, 16  ;;  %v16804_v25 = vld [vmem:[%s19590_s24 + $0x214] sm:$0x1] }
 0x39e   : > { %v5718_v33 = vrot.slane %v5716_v42, 5  ;;  %v23353_v62 = vrot.slane %v5722_v13, 5  ;;  %v5729_v45 = vrot.slane %v5727_v23, 4  ;;  %v5736_v18 = vshll.u32 %v16634_v53, 16  ;;  %v19481_v0 = vld [vmem:[%s22713_s10] sm:$0xff] }
 0x39f   : > { %v5389_v17 = vsel %vm19609_vm2, %v23005_v56, %v23007_v40  ;;  %v5403_v35 = vsel %vm19609_vm2, %v23013_v16, %v23009_v48  ;;  %v9114_v1 = vcombine.high %v19481_v0, %v19481_v0  ;;  %v5732_v29 = vrot.slane %v5730_v37, 5  ;;  %v16805_v51 = vld [vmem:[%s19590_s24 + $0x218] sm:$0xe]  ;;  %v16806_v15 = vld [vmem:[%s19590_s24 + $0x21c] sm:$0x1] }
 0x3a0   : > { %v5743_v8 = vrot.slane %v5741_v2, 4  ;;  %v5746_v5 = vrot.slane %v5744_v14, 5  ;;  %v6590_v56 = vrot.slane %v16804_v25, 5  ;;  %v16880_v40 = vrot.slane %v16805_v51, 9  ;;  %v16807_v59 = vld [vmem:[%s19590_s24 + $0x220] sm:$0xe] }
 0x3a1   : > { %v16678_v42 = vcombine.low %v5389_v17, %v5403_v35  ;;  %v6594_v13 = vrot.slane %v16806_v15, 5  ;;  %v16808_v48 = vld [vmem:[%s19590_s24 + $0x224] sm:$0x1]  ;;  %v16809_v16 = vld [vmem:[%s19590_s24 + $0x228] sm:$0xe]  ;;  %v16881_v23 = vrot.slane %v16807_v59, 9  ;;  %v5733_v35 = vor.u32 %v5732_v29, %v5729_v45 }
 0x3a2   : > { %v16810_v53 = vld [vmem:[%s19590_s24 + $0x22c] sm:$0x1]  ;;  %v6598_v37 = vrot.slane %v16808_v48, 5  ;;  %v16882_v0 = vrot.slane %v16809_v16, 9  ;;  %v5758_v2 = vshll.u32 %v16637_v26, 16  ;;  %v5747_v51 = vor.u32 %v5746_v5, %v5743_v8 }
 0x3a3   : > { %8639 = vmatmul.mubr.bf16.gmra.mrb[36].mxu0 %v18945_v22  ;;  %v16879_v22 = vrot.slane %v16803_v52, 9  ;;  %v5755_v52 = vshrl.u32 %v16637_v26, 16  ;;  %v6595_v14 = vsel %vm20120_vm5, %v16880_v40, %v6594_v13  ;;  %v6602_v17 = vrot.slane %v16810_v53, 5  ;;  %v23392_v45 = vld [vmem:[%s19590_s24 + $0x1f4] sm:$0x1] }
 0x3a4   : > { %8646 = vmatprep.mubr.bf16.mxu0 %v16677_v46  ;;  %v5719_v46 = vor.u32 %v5718_v33, %v5715_v30  ;;  %v6599_v30 = vsel %vm20120_vm5, %v16881_v23, %v6598_v37  ;;  %v23381_v33 = vrot.slane %v9114_v1, %v22731_v61  ;;  %v5417_v26 = vsel %vm19609_vm2, %v23015_v34, %v23017_v60  ;;  %v23395_v29 = vld [vmem:[%s19590_s24 + $0x1fc] sm:$0x1]  ;;  %v18948_v15 = vld [vmem:[%s19590_s24 + $0xe0] ss:$8 sps:$4 sm:$0xff]   ;;  %v16643_v13 = vld [vmem:[%s19590_s24 + $0x210] sm:$0xf] }
 0x3a5   : > { %v6591_v28 = vsel %vm20120_vm5, %v16879_v22, %v6590_v56  ;;  %v6603_v1 = vsel %vm20120_vm5, %v16882_v0, %v6602_v17  ;;  %v16639_v22 = vld [vmem:[%s19590_s24 + $0x200] sm:$0xf]  ;;  %v23411_v40 = vrot.slane %v5758_v2, 5  ;;  %v16641_v8 = vld [vmem:[%s19590_s24 + $0x208] sm:$0xf]  ;;  %v23414_v59 = vrot.slane %v5733_v35, 4 }
 0x3a6   : > { %v16917_v25 = vcombine.low %v6591_v28, %v6595_v14  ;;  %v16918_v56 = vcombine.low %v6599_v30, %v6603_v1  ;;  %v23403_v34 = vrot.slane %v23381_v33, %v22731_v61  ;;  %v23405_v60 = vrot.slane %v5719_v46, 4  ;;  %v16645_v37 = vld [vmem:[%s19590_s24 + $0x218] sm:$0xf]  ;;  %v16811_v2 = vld [vmem:[%s19590_s24 + $0x240] sm:$0xe] }
 0x3a7   : > { %26996 = vst [vmem:[#allocation28_spill] sm:$0xff] %v23414_v59  ;;  %v5769_v23 = vshrl.u32 %v16639_v22, 16  ;;  %v5772_v46 = vshll.u32 %v16639_v22, 16  ;;  %v5783_v28 = vshrl.u32 %v16641_v8, 16  ;;  %v5786_v53 = vshll.u32 %v16641_v8, 16 }
 0x3a8   : > { %18325 = vmatprep.mubr.bf16.mxu1 %v16917_v25  ;;  %v9190_v48 = vrot.slane %v23403_v34, %v22740_v55  ;;  %v5797_v0 = vshrl.u32 %v16643_v13, 16  ;;  %v16812_v14 = vld [vmem:[%s19590_s24 + $0x244] sm:$0x1]  ;;  %v5445_v17 = vsel %vm19609_vm2, %v23067_v24, %v23069_v58  ;;  %v5459_v35 = vsel %vm19609_vm2, %v23073_v27, %v23071_v54 }
 0x3a9   : > { %18326 = vmatmul.mubr.bf16.gmra.mrb[52].mxu1 %v16918_v56  ;;  %v16640_v25 = vld [vmem:[%s19590_s24 + $0x204] sm:$0x1]  ;;  %v5800_v30 = vshll.u32 %v16643_v13, 16  ;;  %v5771_v1 = vrot.slane %v5769_v23, 4  ;;  %v16883_v24 = vrot.slane %v16811_v2, 9  ;;  %v6606_v58 = vrot.slane %v16812_v14, 5 }
 0x3aa   : > { %9220 = vperm.xlu0 %18798, %v9190_v48   ;;  %v18949_v56 = vld [vmem:[%s19590_s24 + $0x100] ss:$8 sps:$4 sm:$0xff]   ;;  %v5785_v8 = vrot.slane %v5783_v28, 4  ;;  %v5811_v54 = vshrl.u32 %v16645_v37, 16  ;;  %v5788_v16 = vrot.slane %v5786_v53, 5  ;;  %v5799_v14 = vrot.slane %v5797_v0, 4 }
 0x3ab   : > { %8647 = vmatmul.mubr.bf16.gmra.mrb[40].mxu0 %v18946_v50  ;;  %v5431_v50 = vsel %vm19609_vm2, %v23022_v31, %v23019_v44  ;;  %v23407_v44 = vrot.slane %v5736_v18, 5  ;;  %v23409_v31 = vrot.slane %v5755_v52, 4  ;;  %v23420_v18 = vrot.slane %v5747_v51, 4  ;;  %v23424_v52 = vpop.f32.mrb[0].mxu1  ;;  %v16642_v51 = vld [vmem:[%s19590_s24 + $0x20c] sm:$0x1] }
 0x3ac   : > { %8654 = vmatprep.mubr.bf16.mxu0 %v16678_v42  ;;  %v16679_v5 = vcombine.low %v5417_v26, %v5431_v50  ;;  %v5750_v42 = vshll.u32 %v23392_v45, 16  ;;  %26998 = vst [vmem:[#allocation22_spill] sm:$0xff] %v23424_v52  ;;  %v23437_v26 = vpop.f32.mrb[1].mxu1  ;;  %v16813_v50 = vld [vmem:[%s19590_s24 + $0x248] sm:$0xe]  ;;  %v5814_v52 = vshll.u32 %v16645_v37, 16  ;;  %v6607_v23 = vsel %vm20120_vm5, %v16883_v24, %v6606_v58 }
 0x3ad   : > { %26997 = vst [vmem:[#allocation24_spill] sm:$0xff] %v23420_v18  ;;  %26999 = vst [vmem:[#allocation26_spill] sm:$0xff] %v23437_v26  ;;  %v16814_v45 = vld [vmem:[%s19590_s24 + $0x24c] sm:$0x1]  ;;  %v23442_v22 = vpop.f32.mrb[2].mxu1  ;;  %v16884_v13 = vrot.slane %v16813_v50, 9  ;;  %v5761_v2 = vor.u32 %v23411_v40, %v23409_v31 }
 0x3ae   : > { %27000 = vst [vmem:[#allocation25_spill] sm:$0xff] %v23442_v22  ;;  %v23445_v27 = vpop.f32.mrb[3].mxu1  ;;  %v6610_v48 = vrot.slane %v16814_v45, 5  ;;  %v16816_v22 = vld [vmem:[%s19590_s24 + $0x254] sm:$0x1]  ;;  %v5802_v28 = vrot.slane %v5800_v30, 5 }
 0x3af   : > { %27001 = vst [vmem:[#allocation29_spill] sm:$0xff] %v23445_v27  ;;  %v16817_v27 = vld [vmem:[%s19590_s24 + $0x258] sm:$0xe]  ;;  %v16818_v18 = vld [vmem:[%s19590_s24 + $0x25c] sm:$0x1]  ;;  %v5778_v50 = vshll.u32 %v16640_v25, 16 }
 0x3b0   : > { %v6611_v26 = vsel %vm20120_vm5, %v16884_v13, %v6610_v48  ;;  %v16644_v45 = vld [vmem:[%s19590_s24 + $0x214] sm:$0x1]  ;;  %v5792_v58 = vshll.u32 %v16642_v51, 16  ;;  %v5813_v59 = vrot.slane %v5811_v54, 4  ;;  %v5816_v31 = vrot.slane %v5814_v52, 5  ;;  %v27004_v54 = vld [vmem:[#allocation12_spill] sm:$0xff] }
 0x3b1   : > { %v16919_v53 = vcombine.low %v6607_v23, %v6611_v26  ;;  %v16886_v0 = vrot.slane %v16817_v27, 9  ;;  %v6618_v30 = vrot.slane %v16818_v18, 5  ;;  %v23462_v25 = vrot.slane %v5761_v2, 4  ;;  %v16649_v27 = vld [vmem:[%s19590_s24 + $0x228] sm:$0xf] }
 0x3b2   : > { %v5789_v26 = vor.u32 %v5788_v16, %v5785_v8  ;;  %v5806_v13 = vshll.u32 %v16644_v45, 16  ;;  %v27002_v51 = vshll.u32 %v23395_v29, 16  ;;  %v23469_v52 = vrot.slane %v5778_v50, 5  ;;  %v27006_v8 = vld [vmem:[#allocation13_spill] sm:$0xff] }
 0x3b3   : > { %8655 = vmatmul.mubr.bf16.gmra.mrb[44].mxu0 %v18948_v15  ;;  %v5774_v15 = vrot.slane %v5772_v46, 5  ;;  %v16815_v46 = vld [vmem:[%s19590_s24 + $0x250] sm:$0xe]  ;;  %18329 = vmatprep.mubr.bf16.mxu1 %v16919_v53  ;;  %v6619_v18 = vsel %vm20120_vm5, %v16886_v0, %v6618_v30  ;;  %v5487_v29 = vsel %vm19609_vm2, %v23135_v36, %v27006_v8  ;;  %v5817_v2 = vor.u32 %v5816_v31, %v5813_v59  ;;  %v27013_v30 = vld [vmem:[#allocation8_spill] sm:$0xff]  ;;  %v16650_v59 = vld [vmem:[%s19590_s24 + $0x22c] sm:$0x1] }
 0x3b4   : > { %8662 = vmatprep.mubr.bf16.mxu0 %v16679_v5  ;;  %v16680_v5 = vcombine.low %v5445_v17, %v5459_v35  ;;  %v16885_v37 = vrot.slane %v16815_v46, 9  ;;  %v6614_v17 = vrot.slane %v16816_v22, 5  ;;  %v23458_v35 = vrot.slane %v5750_v42, 5  ;;  %v16646_v22 = vld [vmem:[%s19590_s24 + $0x21c] sm:$0x1]  ;;  %27003 = vst [vmem:[#allocation31_spill] sm:$0xff] %v23469_v52 }
 0x3b5   : > { %v5775_v24 = vor.u32 %v5774_v15, %v5771_v1  ;;  %v5803_v42 = vor.u32 %v5802_v28, %v5799_v14  ;;  %v23467_v1 = vrot.slane %v27002_v51, 5  ;;  %v16647_v15 = vld [vmem:[%s19590_s24 + $0x220] sm:$0xf]  ;;  %v23486_v46 = vrot.slane %v5792_v58, 5  ;;  %v16653_v31 = vld [vmem:[%s19590_s24 + $0x248] sm:$0xf] }
 0x3b6   : > { %v6615_v40 = vsel %vm20120_vm5, %v16885_v37, %v6614_v17  ;;  %v5820_v14 = vshll.u32 %v16646_v22, 16  ;;  %v23488_v28 = vrot.slane %v5789_v26, 4  ;;  %v23492_v45 = vrot.slane %v5806_v13, 5  ;;  %v16651_v37 = vld [vmem:[%s19590_s24 + $0x240] sm:$0xf] }
 0x3b7   : > { %v16920_v48 = vcombine.low %v6615_v40, %v6619_v18  ;;  %v23484_v23 = vrot.slane %v5775_v24, 4  ;;  %27008 = vst [vmem:[#allocation35_spill] sm:$0xff] %v23486_v46  ;;  %v23490_v50 = vrot.slane %v5803_v42, 4  ;;  %v5825_v53 = vshrl.u32 %v16647_v15, 16  ;;  %v16648_v17 = vld [vmem:[%s19590_s24 + $0x224] sm:$0x1] }
 0x3b8   : > { %27009 = vst [vmem:[#allocation32_spill] sm:$0xff] %v23488_v28  ;;  %27011 = vst [vmem:[#allocation36_spill] sm:$0xff] %v23492_v45  ;;  %v5828_v40 = vshll.u32 %v16647_v15, 16  ;;  %v5839_v0 = vshrl.u32 %v16649_v27, 16  ;;  %v27012_v24 = vld [vmem:[#allocation6_spill] sm:$0xff]  ;;  %v23502_v26 = vrot.slane %v5817_v2, 4 }
 0x3b9   : > { %27007 = vst [vmem:[#allocation33_spill] sm:$0xff] %v23484_v23  ;;  %27010 = vst [vmem:[#allocation34_spill] sm:$0xff] %v23490_v50  ;;  %18330 = vmatmul.mubr.bf16.gmra.mrb[56].mxu1 %v16920_v48  ;;  %v5501_v58 = vsel %vm19609_vm2, %v27013_v30, %v27012_v24  ;;  %v23504_v22 = vrot.slane %v5820_v14, 5  ;;  %v5842_v42 = vshll.u32 %v16649_v27, 16  ;;  %v5853_v13 = vshrl.u32 %v16651_v37, 16  ;;  %v27017_v15 = vld [vmem:[#allocation10_spill] sm:$0xff] }
 0x3ba   : > { %27014 = vst [vmem:[#allocation30_spill] sm:$0xff] %v23502_v26  ;;  %v27018_v18 = vld [vmem:[#allocation14_spill] sm:$0xff]  ;;  %v5856_v8 = vshll.u32 %v16651_v37, 16  ;;  %v5830_v27 = vrot.slane %v5828_v40, 5  ;;  %v5841_v48 = vrot.slane %v5839_v0, 4  ;;  %v5848_v2 = vshll.u32 %v16650_v59, 16 }
 0x3bb   : > { %8663 = vmatmul.mubr.bf16.gmra.mrb[48].mxu0 %v18949_v56  ;;  %v27005_v56 = vld [vmem:[#allocation11_spill] sm:$0xff]  ;;  %27015 = vst [vmem:[#allocation39_spill] sm:$0xff] %v23504_v22  ;;  %v23506_v51 = vpop.f32.mrb[4].mxu1  ;;  %v5867_v14 = vshrl.u32 %v16653_v31, 16  ;;  %v5870_v30 = vshll.u32 %v16653_v31, 16  ;;  %v27022_v26 = vld [vmem:[#allocation16_spill] sm:$0xff] }
 0x3bc   : > { %8670 = vmatprep.mubr.bf16.mxu0 %v16680_v5  ;;  %v5473_v16 = vsel %vm19609_vm2, %v27005_v56, %v27004_v54  ;;  %v18950_v5 = vld [vmem:[%s19590_s24 + $0x110] ss:$8 sps:$4 sm:$0xff]   ;;  %27016 = vst [vmem:[#allocation37_spill] sm:$0xff] %v23506_v51  ;;  %v5515_v54 = vsel %vm19609_vm2, %v27018_v18, %v27017_v15  ;;  %v5827_v56 = vrot.slane %v5825_v53, 4  ;;  %v18951_v24 = vld [vmem:[%s19590_s24 + $0x120] ss:$8 sps:$4 sm:$0xff]  }
 0x3bd   : > { %v16681_v36 = vcombine.low %v5473_v16, %v5487_v29  ;;  %v5834_v16 = vshll.u32 %v16648_v17, 16  ;;  %v23512_v29 = vpop.f32.mrb[5].mxu1  ;;  %v16819_v53 = vld [vmem:[%s19590_s24 + $0x260] sm:$0xe]  ;;  %v16820_v37 = vld [vmem:[%s19590_s24 + $0x264] sm:$0x1]  ;;  %v16682_v17 = vcombine.low %v5501_v58, %v5515_v54 }
 0x3be   : > { %27019 = vst [vmem:[#allocation38_spill] sm:$0xff] %v23512_v29  ;;  %v5844_v15 = vrot.slane %v5842_v42, 5  ;;  %v5855_v18 = vrot.slane %v5853_v13, 4  ;;  %v16821_v29 = vld [vmem:[%s19590_s24 + $0x268] sm:$0xe]  ;;  %v5858_v40 = vrot.slane %v5856_v8, 5 }
 0x3bf   : > { %v16887_v0 = vrot.slane %v16819_v53, 9  ;;  %v6622_v59 = vrot.slane %v16820_v37, 5  ;;  %v16823_v31 = vld [vmem:[%s19590_s24 + $0x270] sm:$0xe]  ;;  %v27023_v22 = vld [vmem:[#allocation15_spill] sm:$0xff]  ;;  %v27025_v58 = vld [vmem:[#allocation17_spill] sm:$0xff]  ;;  %v5831_v53 = vor.u32 %v5830_v27, %v5827_v56 }
 0x3c0   : > { %v27024_v50 = vld [vmem:[#allocation18_spill] sm:$0xff]  ;;  %v16652_v13 = vld [vmem:[%s19590_s24 + $0x244] sm:$0x1]  ;;  %v16889_v45 = vrot.slane %v16823_v31, 9  ;;  %v5869_v37 = vrot.slane %v5867_v14, 4  ;;  %v5872_v28 = vrot.slane %v5870_v30, 5  ;;  %v5845_v52 = vor.u32 %v5844_v15, %v5841_v48 }
 0x3c1   : > { %v5543_v42 = vsel %vm19609_vm2, %v27025_v58, %v27024_v50  ;;  %v16824_v8 = vld [vmem:[%s19590_s24 + $0x274] sm:$0x1]  ;;  %v16825_v46 = vld [vmem:[%s19590_s24 + $0x278] sm:$0xe]  ;;  %v16826_v23 = vld [vmem:[%s19590_s24 + $0x27c] sm:$0x1]  ;;  %v5859_v56 = vor.u32 %v5858_v40, %v5855_v18 }
 0x3c2   : > { %v6630_v58 = vrot.slane %v16824_v8, 5  ;;  %v5862_v27 = vshll.u32 %v16652_v13, 16  ;;  %v6634_v30 = vrot.slane %v16826_v23, 5  ;;  %v16656_v48 = vld [vmem:[%s19590_s24 + $0x254] sm:$0x1] }
 0x3c3   : > { %8671 = vmatmul.mubr.bf16.gmra.mrb[52].mxu0 %v18950_v5  ;;  %v23514_v5 = vpop.f32.mrb[6].mxu1  ;;  %v18952_v31 = vld [vmem:[%s19590_s24 + $0x130] ss:$8 sps:$4 sm:$0xff]   ;;  %v23562_v13 = vrot.slane %v5859_v56, 4  ;;  %v27027_v56 = vld [vmem:[#allocation4_spill] sm:$0xff] }
 0x3c4   : > { %8678 = vmatprep.mubr.bf16.mxu0 %v16681_v36  ;;  %27020 = vst [vmem:[#allocation42_spill] sm:$0xff] %v23514_v5  ;;  %v23517_v51 = vpop.f32.mrb[7].mxu1  ;;  %v16822_v36 = vld [vmem:[%s19590_s24 + $0x26c] sm:$0x1]  ;;  %v16888_v5 = vrot.slane %v16821_v29, 9  ;;  %v6623_v29 = vsel %vm20120_vm5, %v16887_v0, %v6622_v59  ;;  %v23542_v0 = vrot.slane %v5834_v16, 5  ;;  %v6631_v15 = vsel %vm20120_vm5, %v16889_v45, %v6630_v58 }
 0x3c5   : > { %27021 = vst [vmem:[#allocation40_spill] sm:$0xff] %v23517_v51  ;;  %v5529_v51 = vsel %vm19609_vm2, %v27023_v22, %v27022_v26  ;;  %v6626_v54 = vrot.slane %v16822_v36, 5  ;;  %v16654_v26 = vld [vmem:[%s19590_s24 + $0x24c] sm:$0x1]  ;;  %v16655_v22 = vld [vmem:[%s19590_s24 + $0x250] sm:$0xf] }
 0x3c6   : > { %v16890_v36 = vrot.slane %v16825_v46, 9  ;;  %v23544_v59 = vrot.slane %v5848_v2, 5  ;;  %v5876_v46 = vshll.u32 %v16654_v26, 16  ;;  %v5881_v18 = vshrl.u32 %v16655_v22, 16  ;;  %v18953_v58 = vld [vmem:[%s19590_s24 + $0x150] ss:$8 sps:$4 sm:$0xff]  }
 0x3c7   : > { %v6627_v50 = vsel %vm20120_vm5, %v16888_v5, %v6626_v54  ;;  %v9130_v5 = vcombine.high %v23381_v33, %v23381_v33  ;;  %v5873_v54 = vor.u32 %v5872_v28, %v5869_v37  ;;  %v23555_v16 = vrot.slane %v5831_v53, 4 }
 0x3c8   : > { %v16921_v14 = vcombine.low %v6623_v29, %v6627_v50  ;;  %v6635_v23 = vsel %vm20120_vm5, %v16890_v36, %v6634_v30  ;;  %v5884_v2 = vshll.u32 %v16655_v22, 16  ;;  %v23560_v45 = vrot.slane %v5845_v52, 4  ;;  %v27026_v36 = vld [vmem:[#allocation20_spill] sm:$0xff]  ;;  %v27029_v30 = vld [vmem:[#allocation23_spill] sm:$0xff] }
 0x3c9   : > { %v23558_v40 = vrot.slane %v9130_v5, %v22731_v61  ;;  %v23564_v33 = vrot.slane %v5862_v27, 5  ;;  %v5890_v28 = vshll.u32 %v16656_v48, 16  ;;  %v16683_v8 = vcombine.low %v5529_v51, %v5543_v42 }
 0x3ca   : > { %18333 = vmatprep.mubr.bf16.mxu1 %v16921_v14  ;;  %v23568_v53 = vrot.slane %v5873_v54, 4  ;;  %v23570_v37 = vrot.slane %v5876_v46, 5  ;;  %v5883_v29 = vrot.slane %v5881_v18, 4  ;;  %v5886_v26 = vrot.slane %v5884_v2, 5  ;;  %v27028_v14 = vld [vmem:[#allocation19_spill] sm:$0xff] }
 0x3cb   : > { %8679 = vmatmul.mubr.bf16.gmra.mrb[56].mxu0 %v18951_v24  ;;  %v16657_v24 = vld [vmem:[%s19590_s24 + $0x258] sm:$0xf]  ;;  %v9194_v11 = vrot.slane %v23558_v40, %v22740_v55  ;;  %v23576_v42 = vrot.slane %v5890_v28, 5  ;;  %v5557_v27 = vsel %vm19609_vm2, %v27027_v56, %v27026_v36  ;;  %v5571_v48 = vsel %vm19609_vm2, %v27029_v30, %v27028_v14  ;;  %v18954_v54 = vld [vmem:[%s19590_s24 + $0x160] ss:$8 sps:$4 sm:$0xff]  }
 0x3cc   : > { %8686 = vmatprep.mubr.bf16.mxu0 %v16682_v17  ;;  %v16922_v17 = vcombine.low %v6631_v15, %v6635_v23  ;;  %v5895_v61 = vshrl.u32 %v16657_v24, 16  ;;  %v5898_v22 = vshll.u32 %v16657_v24, 16  ;;  %v27030_v46 = vld [vmem:[#allocation27_spill] sm:$0xff]  ;;  %v27031_v24 = vld [vmem:[#allocation21_spill] sm:$0xff]  ;;  %v5599_v23 = vsel %vm19609_vm2, %v23254_v39, %v23256_v38 }
 0x3cd   : > { %v23572_v52 = vpop.f32.mrb[8].mxu1  ;;  %9224 = vperm.xlu1 %18799, %v9194_v11   ;;  %v5585_v18 = vsel %vm19609_vm2, %v27031_v24, %v27030_v46  ;;  %v16658_v2 = vld [vmem:[%s19590_s24 + $0x25c] sm:$0x1]  ;;  %v5613_v39 = vsel %vm19609_vm2, %v23273_v9, %v23258_v20  ;;  %v5627_v38 = vsel %vm19609_vm2, %v23282_v49, %v23271_v12  ;;  %v5655_v20 = vsel %vm19609_vm2, %v23289_v4, %v23328_v6  ;;  %v16661_v9 = vld [vmem:[%s19590_s24 + $0x268] sm:$0xf] }
 0x3ce   : > { %18334 = vmatmul.mubr.bf16.gmra.mrb[60].mxu1 %v16922_v17  ;;  %v23574_v51 = vpop.f32.mrb[9].mxu1  ;;  %v5897_v15 = vrot.slane %v5895_v61, 4  ;;  %v16659_v17 = vld [vmem:[%s19590_s24 + $0x260] sm:$0xf]  ;;  %v16685_v28 = vcombine.low %v5585_v18, %v5599_v23  ;;  %v5900_v61 = vrot.slane %v5898_v22, 5  ;;  %v16686_v30 = vcombine.low %v5613_v39, %v5627_v38 }
 0x3cf   : > { %v23578_v50 = vpop.f32.mrb[10].mxu1  ;;  %v5909_v36 = vshrl.u32 %v16659_v17, 16  ;;  %v5912_v14 = vshll.u32 %v16659_v17, 16  ;;  %v9160_v12 = vcombine.high %v23403_v34, %v23403_v34  ;;  %v5887_v46 = vor.u32 %v5886_v26, %v5883_v29  ;;  %v18957_v34 = vld [vmem:[%s19590_s24 + $0x1a0] ss:$8 sps:$4 sm:$0xff]  }
 0x3d0   : > { %v23589_v5 = vpop.f32.mrb[11].mxu1  ;;  %v5926_v4 = vshll.u32 %v16661_v9, 16  ;;  %v5669_v29 = vsel %vm19609_vm2, %v23339_v43, %v23330_v57  ;;  %v5683_v26 = vsel %vm19609_vm2, %v23341_v63, %v23336_v7  ;;  %v5711_v57 = vsel %vm19609_vm2, %v23349_v3, %v23351_v47  ;;  %v16660_v63 = vld [vmem:[%s19590_s24 + $0x264] sm:$0x1]  ;;  %v18959_v3 = vld [vmem:[%s19590_s24 + $0x1c0] ss:$8 sps:$4 sm:$0xff]  }
 0x3d1   : > { %v9198_v49 = vrot.slane %v9160_v12, %v22740_v55  ;;  %v23649_v23 = vrot.slane %v5887_v46, 4  ;;  %v16688_v17 = vcombine.low %v5669_v29, %v5683_v26  ;;  %v5901_v7 = vor.u32 %v5900_v61, %v5897_v15  ;;  %v27032_v15 = vld [vmem:[#allocation28_spill] sm:$0xff]  ;;  %v27034_v26 = vld [vmem:[#allocation31_spill] sm:$0xff] }
 0x3d2   : > { %v5725_v47 = vsel %vm19609_vm2, %v23405_v60, %v23353_v62  ;;  %v5739_v61 = vsel %vm19609_vm2, %v27032_v15, %v23407_v44  ;;  %v27033_v12 = vld [vmem:[#allocation24_spill] sm:$0xff]  ;;  %v5767_v60 = vsel %vm19609_vm2, %v23462_v25, %v23467_v1  ;;  %v16662_v44 = vld [vmem:[%s19590_s24 + $0x26c] sm:$0x1]  ;;  %v27036_v1 = vld [vmem:[#allocation35_spill] sm:$0xff] }
 0x3d3   : > { %8687 = vmatmul.mubr.bf16.gmra.mrb[60].mxu0 %v18952_v31  ;;  %v16684_v31 = vcombine.low %v5557_v27, %v5571_v48  ;;  %v18955_v27 = vld [vmem:[%s19590_s24 + $0x170] ss:$8 sps:$4 sm:$0xff]   ;;  %v18956_v48 = vld [vmem:[%s19590_s24 + $0x180] ss:$8 sps:$4 sm:$0xff]   ;;  %9228 = vperm.xlu0 %18798, %v9198_v49   ;;  %v23665_v38 = vrot.slane %v5901_v7, 4  ;;  %v5753_v62 = vsel %vm19609_vm2, %v27033_v12, %v23458_v35 }
 0x3d4   : > { %8694 = vmatprep.mubr.bf16.mxu0 %v16683_v8  ;;  %v5904_v8 = vshll.u32 %v16658_v2, 16  ;;  %v18961_v35 = vld [vmem:[%s19590_s24 + $0x1f0] ss:$8 sps:$4 sm:$0xff]   ;;  %v18962_v7 = vld [vmem:[%s19590_s24 + $0x200] ss:$8 sps:$4 sm:$0xff]  }
 0x3d6   : > { %v23632_v24 = vrot.slane %v5904_v8, 5  ;;  %v5697_v8 = vsel %vm19609_vm2, %v23344_v19, %v23346_v32  ;;  %v9162_v19 = vcombine.high %v23558_v40, %v23558_v40  ;;  %v5914_v32 = vrot.slane %v5912_v14, 5 }
 0x3d7   : > { %v16689_v43 = vcombine.low %v5697_v8, %v5711_v57  ;;  %v16690_v14 = vcombine.low %v5725_v47, %v5739_v61  ;;  %v27041_v47 = vld [vmem:[#allocation30_spill] sm:$0xff] }
 0x3d8   : > { %v9202_v40 = vrot.slane %v9162_v19, %v22740_v55 }
 0x3da   : > { %9232 = vperm.xlu1 %18799, %v9202_v40  }
 0x3db   : > { %8695 = vmatmul.mubr.bf16.gmra.mrb[64].mxu0 %v18953_v58 }
 0x3dc   : > { %8702 = vmatprep.mubr.bf16.mxu0 %v16684_v31  ;;  %v5641_v31 = vsel %vm19609_vm2, %v23285_v41, %v23287_v21  ;;  %v5923_v41 = vshrl.u32 %v16661_v9, 16  ;;  %v16691_v9 = vcombine.low %v5753_v62, %v5767_v60 }
 0x3de   : > { %v23602_v11 = vpop.f32.mrb[12].mxu1  ;;  %v5925_v49 = vrot.slane %v5923_v41, 4  ;;  %v27037_v41 = vld [vmem:[#allocation32_spill] sm:$0xff] }
 0x3df   : > { %v23604_v58 = vpop.f32.mrb[13].mxu1 }
 0x3e0   : > { %v23606_v56 = vpop.f32.mrb[14].mxu1 }
 0x3e1   : > { %v23617_v22 = vpop.f32.mrb[15].mxu1 }
 0x3e3   : > { %8703 = vmatmul.mubr.bf16.gmra.mrb[68].mxu0 %v18954_v54  ;;  %v16687_v54 = vcombine.low %v5641_v31, %v5655_v20  ;;  %v18960_v20 = vld [vmem:[%s19590_s24 + $0x1d0] ss:$8 sps:$4 sm:$0xff]  }
 0x3e4   : > { %8710 = vmatprep.mubr.bf16.mxu0 %v16685_v28  ;;  %v18958_v28 = vld [vmem:[%s19590_s24 + $0x1b0] ss:$8 sps:$4 sm:$0xff]  }
 0x3eb   : > { %8711 = vmatmul.mubr.bf16.gmra.mrb[72].mxu0 %v18955_v27  ;;  %v5911_v27 = vrot.slane %v5909_v36, 4  ;;  %v5918_v36 = vshll.u32 %v16660_v63, 16  ;;  %v27039_v63 = vld [vmem:[#allocation34_spill] sm:$0xff] }
 0x3ec   : > { %8718 = vmatprep.mubr.bf16.mxu0 %v16686_v30 }
 0x3ed   : > { %v23710_v8 = vrot.slane %v5918_v36, 5  ;;  %v5915_v61 = vor.u32 %v5914_v32, %v5911_v27  ;;  %v18963_v27 = vld [vmem:[%s19590_s24 + $0x210] ss:$8 sps:$4 sm:$0xff]   ;;  %v5837_v32 = vsel %vm19609_vm2, %v23555_v16, %v23542_v0  ;;  %v16664_v0 = vld [vmem:[%s19590_s24 + $0x274] sm:$0x1] }
 0x3ee   : > { %v16665_v16 = vld [vmem:[%s19590_s24 + $0x278] sm:$0xf] }
 0x3ef   : > { %v23728_v62 = vrot.slane %v5915_v61, 4 }
 0x3f0   : > { %v23634_v18 = vpop.f32.mrb[16].mxu1 }
 0x3f1   : > { %v23636_v21 = vpop.f32.mrb[17].mxu1 }
 0x3f2   : > { %v23638_v6 = vpop.f32.mrb[18].mxu1 }
 0x3f3   : > { %8719 = vmatmul.mubr.bf16.gmra.mrb[76].mxu0 %v18956_v48  ;;  %v23651_v2 = vpop.f32.mrb[19].mxu1 }
 0x3f4   : > { %8726 = vmatprep.mubr.bf16.mxu0 %v16687_v54  ;;  %v5928_v54 = vrot.slane %v5926_v4, 5 }
 0x3f6   : > { %v5929_v40 = vor.u32 %v5928_v54, %v5925_v49  ;;  %v5851_v49 = vsel %vm19609_vm2, %v23560_v45, %v23544_v59  ;;  %v23764_v59 = vld [vmem:[%s26252_s4 + $0x8] sm:$0xff] }
 0x3f7   : > { %v18964_v45 = vld [vmem:[%s19590_s24 + $0x220] ss:$8 sps:$4 sm:$0xff]  }
 0x3fb   : > { %8727 = vmatmul.mubr.bf16.gmra.mrb[80].mxu0 %v18957_v34  ;;  %v5932_v34 = vshll.u32 %v16662_v44, 16  ;;  %v23732_v44 = vrot.slane %v5929_v40, 4  ;;  %v5954_v40 = vshll.u32 %v16665_v16, 16 }
 0x3fc   : > { %8734 = vmatprep.mubr.bf16.mxu0 %v16688_v17  ;;  %v27035_v17 = vld [vmem:[#allocation33_spill] sm:$0xff] }
 0x3fd   : > { %v5781_v25 = vsel %vm19609_vm2, %v27035_v17, %v27034_v26  ;;  %v23750_v26 = vld [vmem:[%s26251_s3] ss:$0 sm:$0xff] }
 0x3fe   : > { %v23755_v17 = vld [vmem:[%s26252_s4] sm:$0xff] }
 0x402   : > { %v23663_v39 = vpop.f32.mrb[20].mxu1 }
 0x403   : > { %8735 = vmatmul.mubr.bf16.gmra.mrb[84].mxu0 %v18958_v28  ;;  %v23667_v30 = vpop.f32.mrb[21].mxu1  ;;  %v5795_v28 = vsel %vm19609_vm2, %v27037_v41, %v27036_v1  ;;  %v5865_v1 = vsel %vm19609_vm2, %v23562_v13, %v23564_v33  ;;  %v5879_v41 = vsel %vm19609_vm2, %v23568_v53, %v23570_v37  ;;  %v27043_v13 = vld [vmem:[#allocation26_spill] sm:$0xff] }
 0x404   : > { %8742 = vmatprep.mubr.bf16.mxu0 %v16689_v43  ;;  %v23671_v48 = vpop.f32.mrb[22].mxu1  ;;  %v16692_v57 = vcombine.low %v5781_v25, %v5795_v28  ;;  %v27038_v43 = vld [vmem:[#allocation36_spill] sm:$0xff]  ;;  %v23759_v25 = vpop.permute.xlu0 %9204  ;;  %v23785_v37 = vld [vmem:[%s26252_s4 + $0x10] sm:$0xff] }
 0x405   : > { %v23682_v31 = vpop.f32.mrb[23].mxu1  ;;  %v5809_v19 = vsel %vm19609_vm2, %v27039_v63, %v27038_v43  ;;  %v9235_v63 = vmul.f32 %v23759_v25, %v23755_v17  ;;  %v9236_v53 = vmul.f32 %v23759_v25, %v23764_v59 }
 0x40b   : > { %8743 = vmatmul.mubr.bf16.gmra.mrb[88].mxu0 %v18959_v3  ;;  %v27040_v3 = vld [vmem:[#allocation39_spill] sm:$0xff] }
 0x40c   : > { %8750 = vmatprep.mubr.bf16.mxu0 %v16690_v14  ;;  %v5823_v15 = vsel %vm19609_vm2, %v27041_v47, %v27040_v3  ;;  %v16663_v14 = vld [vmem:[%s19590_s24 + $0x270] sm:$0xf]  ;;  %v16695_v47 = vcombine.low %v5865_v1, %v5879_v41 }
 0x40d   : > { %v16693_v36 = vcombine.low %v5809_v19, %v5823_v15  ;;  %v5937_v54 = vshrl.u32 %v16663_v14, 16  ;;  %v5946_v19 = vshll.u32 %v16664_v0, 16  ;;  %v5951_v15 = vshrl.u32 %v16665_v16, 16  ;;  %v23795_v0 = vld [vmem:[%s26252_s4 + $0x18] sm:$0xff] }
 0x40e   : > { %v16666_v16 = vld [vmem:[%s19590_s24 + $0x27c] sm:$0x1] }
 0x413   : > { %8751 = vmatmul.mubr.bf16.gmra.mrb[92].mxu0 %v18960_v20  ;;  %v23724_v20 = vrot.slane %v5932_v34, 5 }
 0x414   : > { %v23695_v55 = vpop.f32.mrb[24].mxu1  ;;  %8758 = vmatprep.mubr.bf16.mxu0 %v16691_v9 }
 0x415   : > { %v23697_v46 = vpop.f32.mrb[25].mxu1 }
 0x416   : > { %v23699_v29 = vpop.f32.mrb[26].mxu1 }
 0x417   : > { %v23712_v4 = vpop.f32.mrb[27].mxu1 }
 0x41b   : > { %8759 = vmatmul.mubr.bf16.gmra.mrb[96].mxu0 %v18961_v35  ;;  %v16694_v35 = vcombine.low %v5837_v32, %v5851_v49  ;;  %v27045_v49 = vld [vmem:[#allocation29_spill] sm:$0xff] }
 0x41c   : > { %8766 = vmatprep.mubr.bf16.mxu0 %v16692_v57  ;;  %v5940_v57 = vshll.u32 %v16663_v14, 16  ;;  %v23787_v14 = vrot.slane %v5937_v54, 4  ;;  %v5893_v54 = vsel %vm19609_vm2, %v23649_v23, %v23576_v42  ;;  %v9237_v42 = vmul.f32 %v23759_v25, %v23785_v37 }
 0x41d   : > { %v5953_v23 = vrot.slane %v5951_v15, 4 }
 0x41e   : > { %v23797_v1 = vrot.slane %v5940_v57, 5  ;;  %v5907_v57 = vsel %vm19609_vm2, %v23665_v38, %v23632_v24 }
 0x41f   : > { %v16696_v15 = vcombine.low %v5893_v54, %v5907_v57 }
 0x423   : > { %8767 = vmatmul.mubr.bf16.gmra.mrb[100].mxu0 %v18962_v7 }
 0x424   : > { %8774 = vmatprep.mubr.bf16.mxu0 %v16693_v36 }
 0x425   : > { %v23726_v12 = vpop.f32.mrb[28].mxu1 }
 0x426   : > { %v23730_v60 = vpop.f32.mrb[29].mxu1 }
 0x427   : > { %v23734_v9 = vpop.f32.mrb[30].mxu1 }
 0x428   : > { %27042 = vst [vmem:[#allocation45_spill] sm:$0xff] %v23734_v9  ;;  %v23745_v34 = vpop.f32.mrb[31].mxu1 }
 0x42b   : > { %8775 = vmatmul.mubr.bf16.gmra.mrb[104].mxu0 %v18963_v27 }
 0x42c   : > { %8782 = vmatprep.mubr.bf16.mxu0 %v16694_v35 }
 0x42e   : > { %v8568_v28 = vpop.f32.mrb[0].mxu0 }
 0x42f   : > { %v18337_v7 = vadd.f32 %v23750_v26, %v8568_v28  ;;  %v8570_v43 = vpop.f32.mrb[1].mxu0  ;;  %v23806_v28 = vrot.slane %v5946_v19, 5  ;;  %v18969_v19 = vld [vmem:[%s26253_s5 + $0x40] sm:$0xff]  }
 0x430   : > { %v8571_v3 = vpop.f32.mrb[2].mxu0  ;;  %17553 = vmatprep.subr.bf16.mxu1 %v18969_v19 }
 0x431   : > { %v18338_v61 = vadd.f32 %v23750_v26, %v8571_v3  ;;  %v8858_v33 = vadd.f32 %v18337_v7, %v27043_v13  ;;  %v8573_v36 = vpop.f32.mrb[3].mxu0 }
 0x433   : > { %v9299_v32 = vadd.f32 %v9235_v63, %v8858_v33  ;;  %v8861_v35 = vadd.f32 %v18338_v61, %v27045_v49  ;;  %8783 = vmatmul.mubr.bf16.gmra.mrb[108].mxu0 %v18964_v45  ;;  %v18965_v63 = vld [vmem:[%s19590_s24 + $0x240] ss:$8 sps:$4 sm:$0xff]   ;;  %v9238_v49 = vmul.f32 %v23759_v25, %v23795_v0 }
 0x434   : > { %v23789_v27 = vpop.f32.mrb[32].mxu1  ;;  %8790 = vmatprep.mubr.bf16.mxu0 %v16695_v47  ;;  %v18970_v61 = vld [vmem:[%s26253_s5] sm:$0xff]  }
 0x435   : > { %27044 = vst [vmem:[#allocation43_spill] sm:$0xff] %v23789_v27  ;;  %v23799_v41 = vpop.f32.mrb[33].mxu1  ;;  %vm9363_vm6 = vcmp.ge.f32.partialorder %v9299_v32, 0.0  ;;  %v9427_v45 = vmul.f32 0.2, %v9299_v32  ;;  %v9300_v43 = vadd.f32 %v9236_v53, %v8861_v35  ;;  %v5956_v35 = vrot.slane %v5954_v40, 5  ;;  %17554 = vmatpush3.bf16.msra.mxu1 %v18970_v61 }
 0x436   : > { %27046 = vst [vmem:[#allocation41_spill] sm:$0xff] %v23799_v41  ;;  %v23808_v7 = vpop.f32.mrb[34].mxu1  ;;  %v8576_v47 = vpop.f32.mrb[4].mxu0  ;;  %v27049_v27 = vld [vmem:[#allocation22_spill] sm:$0xff] }
 0x437   : > { %27047 = vst [vmem:[#allocation49_spill] sm:$0xff] %v23808_v7  ;;  %v23815_v3 = vpop.f32.mrb[35].mxu1  ;;  %v9491_v13 = vsel %vm9363_vm6, %v9299_v32, %v9427_v45  ;;  %vm9364_vm7 = vcmp.ge.f32.partialorder %v9300_v43, 0.0  ;;  %v9428_v33 = vmul.f32 0.2, %v9300_v43  ;;  %v18339_v24 = vadd.f32 %v23750_v26, %v8576_v47  ;;  %v8578_v38 = vpop.f32.mrb[5].mxu0 }
 0x438   : > { %27048 = vst [vmem:[#allocation51_spill] sm:$0xff] %v23815_v3  ;;  %v9555_v36 = vmul.f32 1.4142135, %v9491_v13  ;;  %v8579_v53 = vpop.f32.mrb[6].mxu0  ;;  %v23833_v32 = vld [vmem:[%s26252_s4 + $0x20] sm:$0xff]  ;;  %v5960_v45 = vshll.u32 %v16666_v16, 16  ;;  %v5943_v16 = vor.u32 %v23797_v1, %v23787_v14  ;;  %v5957_v57 = vor.u32 %v5956_v35, %v5953_v23 }
 0x439   : > { %v9492_v7 = vsel %vm9364_vm7, %v9300_v43, %v9428_v33  ;;  %v8866_v3 = vadd.f32 %v18339_v24, %v27049_v27  ;;  %v18340_v41 = vadd.f32 %v23750_v26, %v8579_v53  ;;  %v8581_v9 = vpop.f32.mrb[7].mxu0  ;;  %v27050_v38 = vld [vmem:[#allocation25_spill] sm:$0xff]  ;;  %v5935_v27 = vsel %vm19609_vm2, %v23732_v44, %v23724_v20  ;;  %v27051_v53 = vld [vmem:[#allocation38_spill] sm:$0xff] }
 0x43a   : > { %v9556_v47 = vmul.f32 1.4142135, %v9492_v7  ;;  %v5921_v9 = vsel %vm19609_vm2, %v23728_v62, %v23710_v8  ;;  %v23851_v43 = vld [vmem:[%s26252_s4 + $0x28] sm:$0xff]  ;;  %v9239_v8 = vmul.f32 %v23759_v25, %v23833_v32  ;;  %v5962_v62 = vrot.slane %v5960_v45, 5 }
 0x43b   : > { %v9301_v13 = vadd.f32 %v9237_v42, %v8866_v3  ;;  %v8869_v54 = vadd.f32 %v18340_v41, %v27050_v38  ;;  %8791 = vmatmul.mubr.bf16.gmra.mrb[112].mxu0 %v18965_v63  ;;  %v18966_v63 = vld [vmem:[%s19590_s24 + $0x250] ss:$8 sps:$4 sm:$0xff]   ;;  %v9240_v61 = vmul.f32 %v23759_v25, %v23851_v43  ;;  %v16697_v33 = vcombine.low %v5921_v9, %v5935_v27  ;;  %v27052_v38 = vld [vmem:[#allocation40_spill] sm:$0xff] }
 0x43c   : > { %v23836_v40 = vpack.c.bf16 %v9556_v47, %v9555_v36  ;;  %8798 = vmatprep.mubr.bf16.mxu0 %v16696_v15  ;;  %v5944_v24 = vrot.slane %v5943_v16, 4  ;;  %v5958_v35 = vrot.slane %v5957_v57, 4  ;;  %v23867_v9 = vld [vmem:[%s26252_s4 + $0x30] sm:$0xff] }
 0x43d   : > { %vm9365_vm8 = vcmp.ge.f32.partialorder %v9301_v13, 0.0  ;;  %v9429_v7 = vmul.f32 0.2, %v9301_v13  ;;  %v9302_v41 = vadd.f32 %v9238_v49, %v8869_v54 }
 0x43e   : > { %v8584_v3 = vpop.f32.mrb[8].mxu0 }
 0x43f   : > { %v9493_v42 = vsel %vm9365_vm8, %v9301_v13, %v9429_v7  ;;  %vm9366_vm9 = vcmp.ge.f32.partialorder %v9302_v41, 0.0  ;;  %v9430_v20 = vmul.f32 0.2, %v9302_v41  ;;  %v18341_v44 = vadd.f32 %v23750_v26, %v8584_v3  ;;  %v8586_v14 = vpop.f32.mrb[9].mxu0  ;;  %v23876_v7 = vld [vmem:[%s26252_s4 + $0x38] sm:$0xff] }
 0x440   : > { %v9557_v1 = vmul.f32 1.4142135, %v9493_v42  ;;  %v8587_v19 = vpop.f32.mrb[10].mxu0  ;;  %v5963_v42 = vsel %vm19609_vm2, %v5958_v35, %v5962_v62  ;;  %v9241_v14 = vmul.f32 %v23759_v25, %v23867_v9  ;;  %v9242_v35 = vmul.f32 %v23759_v25, %v23876_v7 }
 0x441   : > { %v9494_v36 = vsel %vm9366_vm9, %v9302_v41, %v9430_v20  ;;  %v18342_v23 = vadd.f32 %v23750_v26, %v8587_v19  ;;  %v8874_v49 = vadd.f32 %v18341_v44, %v27051_v53  ;;  %v8589_v15 = vpop.f32.mrb[11].mxu0  ;;  %v5949_v41 = vsel %vm19609_vm2, %v5944_v24, %v23806_v28  ;;  %v18972_v28 = vld [vmem:[%s26253_s5 + $0x8] sm:$0xff]  }
 0x442   : > { %v9558_v45 = vmul.f32 1.4142135, %v9494_v36  ;;  %v16698_v36 = vcombine.low %v5949_v41, %v5963_v42  ;;  %v27053_v53 = vld [vmem:[#allocation37_spill] sm:$0xff] }
 0x443   : > { %v23861_v47 = vpop.f32.mrb[36].mxu1  ;;  %v9303_v13 = vadd.f32 %v9239_v8, %v8874_v49  ;;  %v8877_v54 = vadd.f32 %v18342_v23, %v27052_v38  ;;  %8799 = vmatmul.mubr.bf16.gmra.mrb[116].mxu0 %v18966_v63  ;;  %v18967_v8 = vld [vmem:[%s19590_s24 + $0x260] ss:$8 sps:$4 sm:$0xff]  }
 0x444   : > { %v23869_v27 = vpop.f32.mrb[37].mxu1  ;;  %v23871_v16 = vpack.c.bf16 %v9558_v45, %v9557_v1  ;;  %8806 = vmatprep.mubr.bf16.mxu0 %v16697_v33  ;;  %v18971_v1 = vld [vmem:[%s26253_s5 + $0x48] sm:$0xff]  }
 0x445   : > { %v23881_v63 = vpop.f32.mrb[38].mxu1  ;;  %vm9367_vm10 = vcmp.ge.f32.partialorder %v9303_v13, 0.0  ;;  %v9431_v57 = vmul.f32 0.2, %v9303_v13  ;;  %v9304_v3 = vadd.f32 %v9240_v61, %v8877_v54  ;;  %17555 = vmatprep.subr.bf16.mxu1 %v18971_v1  ;;  %v27054_v54 = vld [vmem:[#allocation42_spill] sm:$0xff] }
 0x446   : > { %v23886_v20 = vpop.f32.mrb[39].mxu1  ;;  %v8592_v44 = vpop.f32.mrb[12].mxu0  ;;  %17556 = vmatpush3.bf16.msra.mxu1 %v18972_v28  ;;  %v18968_v1 = vld [vmem:[%s19590_s24 + $0x270] ss:$8 sps:$4 sm:$0xff]  }
 0x447   : > { %v9495_v19 = vsel %vm9367_vm10, %v9303_v13, %v9431_v57  ;;  %vm9368_vm11 = vcmp.ge.f32.partialorder %v9304_v3, 0.0  ;;  %v9432_v61 = vmul.f32 0.2, %v9304_v3  ;;  %v18343_v10 = vadd.f32 %v23750_v26, %v8592_v44  ;;  %v8594_v62 = vpop.f32.mrb[13].mxu0  ;;  %v23902_v44 = vpop.permute.xlu0 %9208 }
 0x448   : > { %v9559_v33 = vmul.f32 1.4142135, %v9495_v19  ;;  %v8595_v24 = vpop.f32.mrb[14].mxu0  ;;  %v9243_v25 = vmul.f32 %v23902_v44, %v23755_v17 }
 0x449   : > { %v9496_v23 = vsel %vm9368_vm11, %v9304_v3, %v9432_v61  ;;  %v8882_v49 = vadd.f32 %v18343_v10, %v27053_v53  ;;  %v18344_v15 = vadd.f32 %v23750_v26, %v8595_v24  ;;  %v8597_v45 = vpop.f32.mrb[15].mxu0  ;;  %v9244_v53 = vmul.f32 %v23902_v44, %v23764_v59 }
 0x44a   : > { %v9560_v13 = vmul.f32 1.4142135, %v9496_v23 }
 0x44b   : > { %v9305_v38 = vadd.f32 %v9241_v14, %v8882_v49  ;;  %v8885_v57 = vadd.f32 %v18344_v15, %v27054_v54  ;;  %8807 = vmatmul.mubr.bf16.gmra.mrb[120].mxu0 %v18967_v8 }
 0x44c   : > { %v23904_v41 = vpack.c.bf16 %v9560_v13, %v9559_v33  ;;  %8814 = vmatprep.mubr.bf16.mxu0 %v16698_v36 }
 0x44d   : > { %vm9369_vm12 = vcmp.ge.f32.partialorder %v9305_v38, 0.0  ;;  %v9433_v3 = vmul.f32 0.2, %v9305_v38  ;;  %v9306_v42 = vadd.f32 %v9242_v35, %v8885_v57 }
 0x44e   : > { %v8600_v19 = vpop.f32.mrb[16].mxu0 }
 0x44f   : > { %v9497_v61 = vsel %vm9369_vm12, %v9305_v38, %v9433_v3  ;;  %vm9370_vm13 = vcmp.ge.f32.partialorder %v9306_v42, 0.0  ;;  %v9434_v28 = vmul.f32 0.2, %v9306_v42  ;;  %v18345_v14 = vadd.f32 %v23750_v26, %v8600_v19  ;;  %v8602_v10 = vpop.f32.mrb[17].mxu0 }
 0x450   : > { %v9561_v8 = vmul.f32 1.4142135, %v9497_v61  ;;  %v8603_v62 = vpop.f32.mrb[18].mxu0  ;;  %v9245_v19 = vmul.f32 %v23902_v44, %v23785_v37 }
 0x451   : > { %v9498_v24 = vsel %vm9370_vm13, %v9306_v42, %v9434_v28  ;;  %v18346_v33 = vadd.f32 %v23750_v26, %v8603_v62  ;;  %v8890_v36 = vadd.f32 %v18345_v14, %v23574_v51  ;;  %v8605_v23 = vpop.f32.mrb[19].mxu0  ;;  %v23914_v15 = vpop.f32.mrb[40].mxu1 }
 0x452   : > { %v9562_v49 = vmul.f32 1.4142135, %v9498_v24  ;;  %v23917_v13 = vpop.f32.mrb[41].mxu1 }
 0x453   : > { %v9307_v35 = vadd.f32 %v9243_v25, %v8890_v36  ;;  %v8893_v45 = vadd.f32 %v18346_v33, %v23589_v5  ;;  %8815 = vmatmul.mubr.bf16.gmra.mrb[124].mxu0 %v18968_v1  ;;  %v23921_v54 = vpop.f32.mrb[42].mxu1  ;;  %v18973_v5 = vld [vmem:[%s26253_s5 + $0x50] sm:$0xff]   ;;  %v9246_v36 = vmul.f32 %v23902_v44, %v23795_v0 }
 0x454   : > { %v23919_v38 = vpack.c.bf16 %v9562_v49, %v9561_v8  ;;  %v23923_v3 = vpop.f32.mrb[43].mxu1  ;;  %v18974_v1 = vld [vmem:[%s26253_s5 + $0x10] sm:$0xff]   ;;  %17557 = vmatprep.subr.bf16.mxu1 %v18973_v5 }
 0x455   : > { %vm9371_vm14 = vcmp.ge.f32.partialorder %v9307_v35, 0.0  ;;  %v9435_v57 = vmul.f32 0.2, %v9307_v35  ;;  %v9308_v51 = vadd.f32 %v9244_v53, %v8893_v45  ;;  %17558 = vmatpush3.bf16.msra.mxu1 %v18974_v1 }
 0x456   : > { %v8608_v42 = vpop.f32.mrb[20].mxu0 }
 0x457   : > { %v9499_v25 = vsel %vm9371_vm14, %v9307_v35, %v9435_v57  ;;  %vm9372_vm15 = vcmp.ge.f32.partialorder %v9308_v51, 0.0  ;;  %v9436_v61 = vmul.f32 0.2, %v9308_v51  ;;  %v18347_v28 = vadd.f32 %v23750_v26, %v8608_v42  ;;  %v8610_v14 = vpop.f32.mrb[21].mxu0 }
 0x458   : > { %v9563_v10 = vmul.f32 1.4142135, %v9499_v25  ;;  %v8611_v8 = vpop.f32.mrb[22].mxu0  ;;  %v9655_v57 = vshrl.u32 %v23836_v40, 16 }
 0x459   : > { %v9500_v62 = vsel %vm9372_vm15, %v9308_v51, %v9436_v61  ;;  %v8898_v24 = vadd.f32 %v18347_v28, %v23572_v52  ;;  %v18348_v33 = vadd.f32 %v23750_v26, %v8611_v8  ;;  %v8613_v23 = vpop.f32.mrb[23].mxu0  ;;  %v9247_v61 = vmul.f32 %v23902_v44, %v23833_v32 }
 0x45a   : > { %v9564_v53 = vmul.f32 1.4142135, %v9500_v62 }
 0x45b   : > { %v9309_v49 = vadd.f32 %v9245_v19, %v8898_v24  ;;  %v8901_v35 = vadd.f32 %v18348_v33, %v23578_v50 }
 0x45c   : > { %v9623_v45 = vpack.c.bf16 %v9564_v53, %v9563_v10 }
 0x45d   : > { %vm9373_vm0 = vcmp.ge.f32.partialorder %v9309_v49, 0.0  ;;  %v9437_v42 = vmul.f32 0.2, %v9309_v49  ;;  %v9310_v5 = vadd.f32 %v9246_v36, %v8901_v35  ;;  %v9248_v36 = vmul.f32 %v23902_v44, %v23851_v43 }
 0x45e   : > { %v23941_v51 = vpack.i.b16 %v9623_v45, %v23836_v40  ;;  %v9656_v52 = vshrl.u32 %v9623_v45, 16  ;;  %v8616_v25 = vpop.f32.mrb[24].mxu0 }
 0x45f   : > { %v9501_v28 = vsel %vm9373_vm0, %v9309_v49, %v9437_v42  ;;  %vm9374_vm1 = vcmp.ge.f32.partialorder %v9310_v5, 0.0  ;;  %v9438_v1 = vmul.f32 0.2, %v9310_v5  ;;  %v18349_v19 = vadd.f32 %v23750_v26, %v8616_v25  ;;  %v8618_v50 = vpop.f32.mrb[25].mxu0 }
 0x460   : > { %v9565_v14 = vmul.f32 1.4142135, %v9501_v28  ;;  %v8619_v10 = vpop.f32.mrb[26].mxu0  ;;  %v23946_v8 = vpack.i.b16 %v9656_v52, %v9655_v57  ;;  %v9687_v57 = vshrl.u32 %v23871_v16, 16  ;;  %v18976_v50 = vld [vmem:[%s26253_s5 + $0x18] sm:$0xff]  }
 0x461   : > { %v9502_v62 = vsel %vm9374_vm1, %v9310_v5, %v9438_v1  ;;  %v18350_v24 = vadd.f32 %v23750_v26, %v8619_v10  ;;  %v8906_v40 = vadd.f32 %v18349_v19, %v23604_v58  ;;  %v8621_v33 = vpop.f32.mrb[27].mxu0  ;;  %v23952_v53 = vpop.f32.mrb[44].mxu1 }
 0x462   : > { %v9566_v23 = vmul.f32 1.4142135, %v9502_v62  ;;  %v23955_v45 = vpop.f32.mrb[45].mxu1 }
 0x463   : > { %v9311_v49 = vadd.f32 %v9247_v61, %v8906_v40  ;;  %v8909_v35 = vadd.f32 %v18350_v24, %v23617_v22  ;;  %v23958_v5 = vpop.f32.mrb[46].mxu1  ;;  %v9249_v22 = vmul.f32 %v23902_v44, %v23867_v9  ;;  %v18975_v61 = vld [vmem:[%s26253_s5 + $0x58] sm:$0xff]  }
 0x464   : > { %v9624_v42 = vpack.c.bf16 %v9566_v23, %v9565_v14  ;;  %27055 = vst [vmem:[#allocation44_spill] sm:$0xff] %v23958_v5  ;;  %v23960_v25 = vpop.f32.mrb[47].mxu1  ;;  %17559 = vmatprep.subr.bf16.mxu1 %v18975_v61 }
 0x465   : > { %vm9375_vm2 = vcmp.ge.f32.partialorder %v9311_v49, 0.0  ;;  %v9439_v52 = vmul.f32 0.2, %v9311_v49  ;;  %v9312_v58 = vadd.f32 %v9248_v36, %v8909_v35  ;;  %17560 = vmatpush3.bf16.msra.mxu1 %v18976_v50 }
 0x466   : > { %v23963_v28 = vpack.i.b16 %v9624_v42, %v23871_v16  ;;  %v9688_v1 = vshrl.u32 %v9624_v42, 16  ;;  %v8624_v19 = vpop.f32.mrb[28].mxu0  ;;  %v9250_v42 = vmul.f32 %v23902_v44, %v23876_v7 }
 0x467   : > { %v9503_v14 = vsel %vm9375_vm2, %v9311_v49, %v9439_v52  ;;  %vm9376_vm3 = vcmp.ge.f32.partialorder %v9312_v58, 0.0  ;;  %v9440_v10 = vmul.f32 0.2, %v9312_v58  ;;  %v18351_v62 = vadd.f32 %v23750_v26, %v8624_v19  ;;  %v8626_v16 = vpop.f32.mrb[29].mxu0 }
 0x468   : > { %v9567_v24 = vmul.f32 1.4142135, %v9503_v14  ;;  %v8627_v40 = vpop.f32.mrb[30].mxu0  ;;  %v23974_v33 = vpack.i.b16 %v9688_v1, %v9687_v57  ;;  %v23981_v16 = vpop.permute.xlu1 %9212  ;;  %v9719_v57 = vshrl.u32 %v23904_v41, 16 }
 0x469   : > { %v9504_v36 = vsel %vm9376_vm3, %v9312_v58, %v9440_v10  ;;  %v8914_v23 = vadd.f32 %v18351_v62, %v23602_v11  ;;  %v18352_v35 = vadd.f32 %v23750_v26, %v8627_v40  ;;  %v8629_v5 = vpop.f32.mrb[31].mxu0  ;;  %v9251_v44 = vmul.f32 %v23981_v16, %v23755_v17 }
 0x46a   : > { %v9568_v49 = vmul.f32 1.4142135, %v9504_v36 }
 0x46b   : > { %v9313_v52 = vadd.f32 %v9249_v22, %v8914_v23  ;;  %v8917_v19 = vadd.f32 %v18352_v35, %v23606_v56 }
 0x46c   : > { %v9625_v14 = vpack.c.bf16 %v9568_v49, %v9567_v24 }
 0x46d   : > { %vm9377_vm4 = vcmp.ge.f32.partialorder %v9313_v52, 0.0  ;;  %v9441_v58 = vmul.f32 0.2, %v9313_v52  ;;  %v9314_v1 = vadd.f32 %v9250_v42, %v8917_v19  ;;  %v9252_v42 = vmul.f32 %v23981_v16, %v23764_v59 }
 0x46e   : > { %v23985_v11 = vpack.i.b16 %v9625_v14, %v23904_v41  ;;  %v9720_v61 = vshrl.u32 %v9625_v14, 16  ;;  %v8632_v10 = vpop.f32.mrb[32].mxu0  ;;  %v23996_v49 = vpop.f32.mrb[48].mxu1 }
 0x46f   : > { %v9505_v5 = vsel %vm9377_vm4, %v9313_v52, %v9441_v58  ;;  %vm9378_vm5 = vcmp.ge.f32.partialorder %v9314_v1, 0.0  ;;  %v9442_v22 = vmul.f32 0.2, %v9314_v1  ;;  %v18353_v56 = vadd.f32 %v23750_v26, %v8632_v10  ;;  %v8634_v50 = vpop.f32.mrb[33].mxu0  ;;  %v23999_v14 = vpop.f32.mrb[49].mxu1 }
 0x470   : > { %v9569_v62 = vmul.f32 1.4142135, %v9505_v5  ;;  %v8635_v24 = vpop.f32.mrb[34].mxu0  ;;  %v23990_v40 = vpack.i.b16 %v9720_v61, %v9719_v57  ;;  %v9751_v57 = vshrl.u32 %v23919_v38, 16 }
 0x471   : > { %v9506_v36 = vsel %vm9378_vm5, %v9314_v1, %v9442_v22  ;;  %v18354_v23 = vadd.f32 %v23750_v26, %v8635_v24  ;;  %v8922_v41 = vadd.f32 %v18353_v56, %v23636_v21  ;;  %v8637_v35 = vpop.f32.mrb[35].mxu0  ;;  %v24002_v1 = vpop.f32.mrb[50].mxu1 }
 0x472   : > { %v9570_v17 = vmul.f32 1.4142135, %v9506_v36  ;;  %v24004_v10 = vpop.f32.mrb[51].mxu1 }
 0x473   : > { %v9315_v52 = vadd.f32 %v9251_v44, %v8922_v41  ;;  %v8925_v19 = vadd.f32 %v18354_v23, %v23651_v2  ;;  %v9253_v2 = vmul.f32 %v23981_v16, %v23785_v37 }
 0x474   : > { %v9626_v58 = vpack.c.bf16 %v9570_v17, %v9569_v62 }
 0x475   : > { %vm9379_vm6 = vcmp.ge.f32.partialorder %v9315_v52, 0.0  ;;  %v9443_v61 = vmul.f32 0.2, %v9315_v52  ;;  %v9316_v21 = vadd.f32 %v9252_v42, %v8925_v19  ;;  %v9254_v42 = vmul.f32 %v23981_v16, %v23795_v0  ;;  %v18978_v19 = vld [vmem:[%s26253_s5 + $0x20] sm:$0xff]  }
 0x476   : > { %v24007_v59 = vpack.i.b16 %v9626_v58, %v23919_v38  ;;  %v9752_v5 = vshrl.u32 %v9626_v58, 16  ;;  %v8640_v22 = vpop.f32.mrb[36].mxu0 }
 0x477   : > { %v9507_v44 = vsel %vm9379_vm6, %v9315_v52, %v9443_v61  ;;  %vm9380_vm7 = vcmp.ge.f32.partialorder %v9316_v21, 0.0  ;;  %v9444_v56 = vmul.f32 0.2, %v9316_v21  ;;  %v18355_v50 = vadd.f32 %v23750_v26, %v8640_v22  ;;  %v8642_v62 = vpop.f32.mrb[37].mxu0  ;;  %v18977_v52 = vld [vmem:[%s26253_s5 + $0x60] sm:$0xff]  }
 0x478   : > { %v9571_v24 = vmul.f32 1.4142135, %v9507_v44  ;;  %v8643_v36 = vpop.f32.mrb[38].mxu0  ;;  %v24012_v23 = vpack.i.b16 %v9752_v5, %v9751_v57  ;;  %17561 = vmatprep.subr.bf16.mxu1 %v18977_v52  ;;  %v9255_v5 = vmul.f32 %v23981_v16, %v23833_v32 }
 0x479   : > { %v9508_v41 = vsel %vm9380_vm7, %v9316_v21, %v9444_v56  ;;  %v8930_v35 = vadd.f32 %v18355_v50, %v23634_v18  ;;  %v18356_v38 = vadd.f32 %v23750_v26, %v8643_v36  ;;  %v8645_v17 = vpop.f32.mrb[39].mxu0  ;;  %17562 = vmatpush3.bf16.msra.mxu1 %v18978_v19 }
 0x47a   : > { %v9572_v37 = vmul.f32 1.4142135, %v9508_v41 }
 0x47b   : > { %v9317_v57 = vadd.f32 %v9253_v2, %v8930_v35  ;;  %v8933_v58 = vadd.f32 %v18356_v38, %v23638_v6  ;;  %v9256_v35 = vmul.f32 %v23981_v16, %v23851_v43  ;;  %v9257_v43 = vmul.f32 %v23981_v16, %v23867_v9 }
 0x47c   : > { %v24025_v61 = vpack.c.bf16 %v9572_v37, %v9571_v24 }
 0x47d   : > { %vm9381_vm8 = vcmp.ge.f32.partialorder %v9317_v57, 0.0  ;;  %v9445_v18 = vmul.f32 0.2, %v9317_v57  ;;  %v9318_v21 = vadd.f32 %v9254_v42, %v8933_v58  ;;  %v24034_v42 = vpop.f32.mrb[52].mxu1 }
 0x47e   : > { %v8648_v0 = vpop.f32.mrb[40].mxu0  ;;  %v24037_v37 = vpop.f32.mrb[53].mxu1 }
 0x47f   : > { %v9509_v22 = vsel %vm9381_vm8, %v9317_v57, %v9445_v18  ;;  %vm9382_vm9 = vcmp.ge.f32.partialorder %v9318_v21, 0.0  ;;  %v9446_v44 = vmul.f32 0.2, %v9318_v21  ;;  %v18357_v56 = vadd.f32 %v23750_v26, %v8648_v0  ;;  %v8650_v50 = vpop.f32.mrb[41].mxu0  ;;  %v24041_v19 = vpop.f32.mrb[54].mxu1 }
 0x480   : > { %v9573_v2 = vmul.f32 1.4142135, %v9509_v22  ;;  %v8651_v62 = vpop.f32.mrb[42].mxu0 }
 0x481   : > { %v9510_v6 = vsel %vm9382_vm9, %v9318_v21, %v9446_v44  ;;  %v18358_v24 = vadd.f32 %v23750_v26, %v8651_v62  ;;  %v8938_v36 = vadd.f32 %v18357_v56, %v23667_v30  ;;  %v8653_v41 = vpop.f32.mrb[43].mxu0  ;;  %v24043_v30 = vpop.f32.mrb[55].mxu1  ;;  %v18979_v21 = vld [vmem:[%s26253_s5 + $0x68] sm:$0xff]  }
 0x482   : > { %v9574_v38 = vmul.f32 1.4142135, %v9510_v6  ;;  %17563 = vmatprep.subr.bf16.mxu1 %v18979_v21  ;;  %v24058_v6 = vld [vmem:[%s26251_s3] ss:$0 sm:$0xff] }
 0x483   : > { %v9319_v32 = vadd.f32 %v9255_v5, %v8938_v36  ;;  %v8941_v17 = vadd.f32 %v18358_v24, %v23682_v31  ;;  %v18980_v31 = vld [vmem:[%s26253_s5 + $0x28] sm:$0xff]   ;;  %v9258_v36 = vmul.f32 %v23981_v16, %v23876_v7 }
 0x484   : > { %v24039_v52 = vpack.c.bf16 %v9574_v38, %v9573_v2  ;;  %17564 = vmatpush3.bf16.msra.mxu1 %v18980_v31 }
 0x485   : > { %vm9383_vm10 = vcmp.ge.f32.partialorder %v9319_v32, 0.0  ;;  %v9447_v57 = vmul.f32 0.2, %v9319_v32  ;;  %v9320_v58 = vadd.f32 %v9256_v35, %v8941_v17 }
 0x486   : > { %v8656_v18 = vpop.f32.mrb[44].mxu0 }
 0x487   : > { %v9511_v0 = vsel %vm9383_vm10, %v9319_v32, %v9447_v57  ;;  %vm9384_vm11 = vcmp.ge.f32.partialorder %v9320_v58, 0.0  ;;  %v9448_v5 = vmul.f32 0.2, %v9320_v58  ;;  %v18359_v22 = vadd.f32 %v23750_v26, %v8656_v18  ;;  %v8658_v44 = vpop.f32.mrb[45].mxu0  ;;  %v24064_v32 = vpop.permute.xlu1 %9216  ;;  %v24071_v18 = vld [vmem:[%s26252_s4] sm:$0xff] }
 0x488   : > { %v9575_v56 = vmul.f32 1.4142135, %v9511_v0  ;;  %v8659_v50 = vpop.f32.mrb[46].mxu0  ;;  %v9259_v7 = vmul.f32 %v24071_v18, %v24064_v32 }
 0x489   : > { %v9512_v2 = vsel %vm9384_vm11, %v9320_v58, %v9448_v5  ;;  %v8946_v62 = vadd.f32 %v18359_v22, %v23663_v39  ;;  %v18360_v24 = vadd.f32 %v24058_v6, %v8659_v50  ;;  %v8661_v41 = vpop.f32.mrb[47].mxu0  ;;  %v24081_v50 = vld [vmem:[%s26252_s4 + $0x8] sm:$0xff] }
 0x48a   : > { %v9576_v26 = vmul.f32 1.4142135, %v9512_v2  ;;  %v9260_v2 = vmul.f32 %v24081_v50, %v24064_v32 }
 0x48b   : > { %v9321_v35 = vadd.f32 %v9257_v43, %v8946_v62  ;;  %v8949_v38 = vadd.f32 %v18360_v24, %v23671_v48 }
 0x48c   : > { %v24066_v17 = vpack.c.bf16 %v9576_v26, %v9575_v56  ;;  %v24085_v24 = vpop.f32.mrb[56].mxu1 }
 0x48d   : > { %vm9385_vm12 = vcmp.ge.f32.partialorder %v9321_v35, 0.0  ;;  %v9449_v39 = vmul.f32 0.2, %v9321_v35  ;;  %v9322_v57 = vadd.f32 %v9258_v36, %v8949_v38  ;;  %v24088_v26 = vpop.f32.mrb[57].mxu1 }
 0x48e   : > { %v8664_v58 = vpop.f32.mrb[48].mxu0 }
 0x48f   : > { %v9513_v16 = vsel %vm9385_vm12, %v9321_v35, %v9449_v39  ;;  %vm9386_vm13 = vcmp.ge.f32.partialorder %v9322_v57, 0.0  ;;  %v9450_v43 = vmul.f32 0.2, %v9322_v57  ;;  %v18361_v48 = vadd.f32 %v24058_v6, %v8664_v58  ;;  %v8666_v21 = vpop.f32.mrb[49].mxu0 }
 0x490   : > { %v9577_v31 = vmul.f32 1.4142135, %v9513_v16  ;;  %v8667_v0 = vpop.f32.mrb[50].mxu0  ;;  %v24099_v16 = vld [vmem:[%s26252_s4 + $0x10] sm:$0xff] }
 0x491   : > { %v9514_v5 = vsel %vm9386_vm13, %v9322_v57, %v9450_v43  ;;  %v18362_v22 = vadd.f32 %v24058_v6, %v8667_v0  ;;  %v8954_v44 = vadd.f32 %v18361_v48, %v23697_v46  ;;  %v8669_v56 = vpop.f32.mrb[51].mxu0  ;;  %v24092_v46 = vpop.f32.mrb[58].mxu1  ;;  %v18982_v43 = vld [vmem:[%s26253_s5 + $0x30] sm:$0xff]  }
 0x492   : > { %v9578_v62 = vmul.f32 1.4142135, %v9514_v5  ;;  %v24094_v57 = vpop.f32.mrb[59].mxu1 }
 0x493   : > { %v9323_v36 = vadd.f32 %v9259_v7, %v8954_v44  ;;  %v8957_v41 = vadd.f32 %v18362_v22, %v23712_v4  ;;  %v9261_v4 = vmul.f32 %v24099_v16, %v24064_v32  ;;  %v18981_v7 = vld [vmem:[%s26253_s5 + $0x70] sm:$0xff]  }
 0x494   : > { %v24090_v35 = vpack.c.bf16 %v9578_v62, %v9577_v31  ;;  %17565 = vmatprep.subr.bf16.mxu1 %v18981_v7  ;;  %v24115_v62 = vld [vmem:[%s26252_s4 + $0x18] sm:$0xff] }
 0x495   : > { %vm9387_vm14 = vcmp.ge.f32.partialorder %v9323_v36, 0.0  ;;  %v9451_v38 = vmul.f32 0.2, %v9323_v36  ;;  %v9324_v39 = vadd.f32 %v9260_v2, %v8957_v41  ;;  %17566 = vmatpush3.bf16.msra.mxu1 %v18982_v43 }
 0x496   : > { %v8672_v58 = vpop.f32.mrb[52].mxu0 }
 0x497   : > { %v9515_v48 = vsel %vm9387_vm14, %v9323_v36, %v9451_v38  ;;  %vm9388_vm15 = vcmp.ge.f32.partialorder %v9324_v39, 0.0  ;;  %v9452_v21 = vmul.f32 0.2, %v9324_v39  ;;  %v18363_v31 = vadd.f32 %v24058_v6, %v8672_v58  ;;  %v8674_v0 = vpop.f32.mrb[53].mxu0 }
 0x498   : > { %v9579_v5 = vmul.f32 1.4142135, %v9515_v48  ;;  %v8675_v22 = vpop.f32.mrb[54].mxu0  ;;  %v9262_v36 = vmul.f32 %v24115_v62, %v24064_v32 }
 0x499   : > { %v9516_v44 = vsel %vm9388_vm15, %v9324_v39, %v9452_v21  ;;  %v8962_v56 = vadd.f32 %v18363_v31, %v23695_v55  ;;  %v18364_v2 = vadd.f32 %v24058_v6, %v8675_v22  ;;  %v8677_v41 = vpop.f32.mrb[55].mxu0  ;;  %v9663_v39 = vshrl.u32 %v24025_v61, 16 }
 0x49a   : > { %v9580_v38 = vmul.f32 1.4142135, %v9516_v44  ;;  %v24127_v41 = vld [vmem:[%s26252_s4 + $0x20] sm:$0xff] }
 0x49b   : > { %v9325_v58 = vadd.f32 %v9261_v4, %v8962_v56  ;;  %v8965_v48 = vadd.f32 %v18364_v2, %v23699_v29  ;;  %v9263_v4 = vmul.f32 %v24127_v41, %v24064_v32 }
 0x49c   : > { %v9631_v7 = vpack.c.bf16 %v9580_v38, %v9579_v5 }
 0x49d   : > { %vm9389_vm0 = vcmp.ge.f32.partialorder %v9325_v58, 0.0  ;;  %v9453_v55 = vmul.f32 0.2, %v9325_v58  ;;  %v9326_v21 = vadd.f32 %v9262_v36, %v8965_v48 }
 0x49e   : > { %v24122_v31 = vpack.i.b16 %v9631_v7, %v24025_v61  ;;  %v9664_v0 = vshrl.u32 %v9631_v7, 16  ;;  %v8680_v22 = vpop.f32.mrb[56].mxu0 }
 0x49f   : > { %v9517_v29 = vsel %vm9389_vm0, %v9325_v58, %v9453_v55  ;;  %vm9390_vm1 = vcmp.ge.f32.partialorder %v9326_v21, 0.0  ;;  %v9454_v43 = vmul.f32 0.2, %v9326_v21  ;;  %v18365_v5 = vadd.f32 %v24058_v6, %v8680_v22  ;;  %v8682_v44 = vpop.f32.mrb[57].mxu0 }
 0x4a0   : > { %27056 = vst [vmem:[#allocation53_spill] sm:$0xff] %v24122_v31  ;;  %v9581_v56 = vmul.f32 1.4142135, %v9517_v29  ;;  %v8683_v2 = vpop.f32.mrb[58].mxu0  ;;  %v24132_v61 = vpack.i.b16 %v9664_v0, %v9663_v39  ;;  %v24139_v31 = vld [vmem:[%s26252_s4 + $0x28] sm:$0xff]  ;;  %v18985_v39 = vld [vmem:[%s26253_s5 + $0xec0] sm:$0xff]  }
 0x4a1   : > { %v9518_v36 = vsel %vm9390_vm1, %v9326_v21, %v9454_v43  ;;  %v18366_v38 = vadd.f32 %v24058_v6, %v8683_v2  ;;  %v8970_v48 = vadd.f32 %v18365_v5, %v23730_v60  ;;  %v8685_v7 = vpop.f32.mrb[59].mxu0  ;;  %v9264_v58 = vmul.f32 %v24139_v31, %v24064_v32  ;;  %v24147_v22 = vpop.f32.mrb[60].mxu1  ;;  %v18986_v60 = vld [vmem:[%s26253_s5 + $0xe80] sm:$0xff]   ;;  %v18983_v43 = vld [vmem:[%s26253_s5 + $0x78] sm:$0xff]   ;;  %18191 = vmatprep.subr.bf16.mxu0 %v18985_v39 }
 0x4a2   : > { %27057 = vst [vmem:[#allocation47_spill] sm:$0xff] %v24132_v61  ;;  %v9582_v55 = vmul.f32 1.4142135, %v9518_v36  ;;  %27058 = vst [vmem:[#allocation46_spill] sm:$0xff] %v24147_v22  ;;  %v24155_v5 = vpop.f32.mrb[61].mxu1  ;;  %18192 = vmatpush3.bf16.msra.mxu0 %v18986_v60  ;;  %v9695_v36 = vshrl.u32 %v24039_v52, 16  ;;  %v9265_v7 = vmul.f32 %v24064_v32, %v23867_v9  ;;  %17567 = vmatprep.subr.bf16.mxu1 %v18983_v43 }
 0x4a3   : > { %v9327_v0 = vadd.f32 %v9263_v4, %v8970_v48  ;;  %v8973_v21 = vadd.f32 %v18366_v38, %v23745_v34  ;;  %v18984_v34 = vld [vmem:[%s26253_s5 + $0x38] sm:$0xff]   ;;  %v24160_v4 = vpop.f32.mrb[62].mxu1  ;;  %v18989_v9 = vld [vmem:[%s26253_s5 + $0xc0] sm:$0xff]  }
 0x4a4   : > { %v9632_v29 = vpack.c.bf16 %v9582_v55, %v9581_v56  ;;  %27059 = vst [vmem:[#allocation50_spill] sm:$0xff] %v24160_v4  ;;  %v24168_v55 = vpop.f32.mrb[63].mxu1  ;;  %17568 = vmatpush3.bf16.msra.mxu1 %v18984_v34  ;;  %v24187_v34 = vld [vmem:[%s26252_s4 + $0x38] sm:$0xff] }
 0x4a5   : > { %vm9391_vm2 = vcmp.ge.f32.partialorder %v9327_v0, 0.0  ;;  %v9455_v44 = vmul.f32 0.2, %v9327_v0  ;;  %v9328_v2 = vadd.f32 %v9264_v58, %v8973_v21  ;;  %27061 = vst [vmem:[#allocation52_spill] sm:$0xff] %v24168_v55  ;;  %v18987_v58 = vld [vmem:[%s26253_s5 + $0xec8] sm:$0xff]   ;;  %17575 = vmatprep.subr.bf16.mxu1 %v18989_v9  ;;  %v27066_v55 = vld [vmem:[#allocation51_spill] sm:$0xff] }
 0x4a6   : > { %v24164_v56 = vpack.i.b16 %v9632_v29, %v24039_v52  ;;  %v9696_v38 = vshrl.u32 %v9632_v29, 16  ;;  %v8688_v48 = vpop.f32.mrb[60].mxu0  ;;  %v18988_v52 = vld [vmem:[%s26253_s5 + $0xe88] sm:$0xff]   ;;  %18193 = vmatprep.subr.bf16.mxu0 %v18987_v58 }
 0x4a7   : > { %v9519_v39 = vsel %vm9391_vm2, %v9327_v0, %v9455_v44  ;;  %vm9392_vm3 = vcmp.ge.f32.partialorder %v9328_v2, 0.0  ;;  %v9456_v21 = vmul.f32 0.2, %v9328_v2  ;;  %v18367_v60 = vadd.f32 %v24058_v6, %v8688_v48  ;;  %v8690_v4 = vpop.f32.mrb[61].mxu0  ;;  %18194 = vmatpush3.bf16.msra.mxu0 %v18988_v52 }
 0x4a8   : > { %27060 = vst [vmem:[#allocation48_spill] sm:$0xff] %v24164_v56  ;;  %v8691_v29 = vpop.f32.mrb[62].mxu0  ;;  %v24180_v43 = vpack.i.b16 %v9696_v38, %v9695_v36  ;;  %v9266_v4 = vmul.f32 %v24187_v34, %v24064_v32  ;;  %v9583_v58 = vmul.f32 1.4142135, %v9519_v39  ;;  %v27063_v38 = vld [vmem:[#allocation45_spill] sm:$0xff] }
 0x4a9   : > { %v9520_v56 = vsel %vm9392_vm3, %v9328_v2, %v9456_v21  ;;  %v8978_v0 = vadd.f32 %v18367_v60, %v23726_v12  ;;  %v18368_v44 = vadd.f32 %v24058_v6, %v8691_v29  ;;  %v8693_v48 = vpop.f32.mrb[63].mxu0  ;;  %v24192_v21 = vpop.permute.xlu0 %9220  ;;  %v18991_v12 = vld [vmem:[%s26253_s5 + $0xed0] sm:$0xff]  }
 0x4aa   : > { %27062 = vst [vmem:[#allocation5_spill] sm:$0xff] %v24180_v43  ;;  %v9584_v22 = vmul.f32 1.4142135, %v9520_v56  ;;  %v18992_v29 = vld [vmem:[%s26253_s5 + $0xe90] sm:$0xff]   ;;  %18195 = vmatprep.subr.bf16.mxu0 %v18991_v12  ;;  %v9727_v56 = vshrl.u32 %v24066_v17, 16 }
 0x4ab   : > { %v9329_v36 = vadd.f32 %v9265_v7, %v8978_v0  ;;  %v8981_v2 = vadd.f32 %v18368_v44, %v27063_v38  ;;  %v9267_v0 = vmul.f32 %v24071_v18, %v24192_v21  ;;  %18196 = vmatpush3.bf16.msra.mxu0 %v18992_v29 }
 0x4ac   : > { %v9633_v60 = vpack.c.bf16 %v9584_v22, %v9583_v58 }
 0x4ad   : > { %vm9393_vm4 = vcmp.ge.f32.partialorder %v9329_v36, 0.0  ;;  %v9457_v32 = vmul.f32 0.2, %v9329_v36  ;;  %v9330_v52 = vadd.f32 %v9266_v4, %v8981_v2  ;;  %v18995_v4 = vld [vmem:[%s26253_s5 + $0xed8] sm:$0xff]  }
 0x4ae   : > { %v24202_v7 = vpack.i.b16 %v9633_v60, %v24066_v17  ;;  %v9728_v39 = vshrl.u32 %v9633_v60, 16  ;;  %v8696_v9 = vpop.f32.mrb[64].mxu0  ;;  %v18996_v17 = vld [vmem:[%s26253_s5 + $0xe98] sm:$0xff]   ;;  %18197 = vmatprep.subr.bf16.mxu0 %v18995_v4 }
 0x4af   : > { %v9521_v22 = vsel %vm9393_vm4, %v9329_v36, %v9457_v32  ;;  %vm9394_vm5 = vcmp.ge.f32.partialorder %v9330_v52, 0.0  ;;  %v9458_v44 = vmul.f32 0.2, %v9330_v52  ;;  %v18369_v48 = vadd.f32 %v24058_v6, %v8696_v9  ;;  %v8698_v58 = vpop.f32.mrb[65].mxu0  ;;  %v27065_v36 = vld [vmem:[#allocation41_spill] sm:$0xff]  ;;  %18198 = vmatpush3.bf16.msra.mxu0 %v18996_v17 }
 0x4b0   : > { %27064 = vst [vmem:[#allocation58_spill] sm:$0xff] %v24202_v7  ;;  %v8699_v38 = vpop.f32.mrb[66].mxu0  ;;  %v24213_v2 = vpack.i.b16 %v9728_v39, %v9727_v56  ;;  %v9268_v9 = vmul.f32 %v24081_v50, %v24192_v21  ;;  %v9585_v58 = vmul.f32 1.4142135, %v9521_v22  ;;  %v18999_v56 = vld [vmem:[%s26253_s5 + $0xee0] sm:$0xff]   ;;  %v9759_v22 = vshrl.u32 %v24090_v35, 16 }
 0x4b1   : > { %v9522_v12 = vsel %vm9394_vm5, %v9330_v52, %v9458_v44  ;;  %v18370_v60 = vadd.f32 %v24058_v6, %v8699_v38  ;;  %v8986_v29 = vadd.f32 %v18369_v48, %v27065_v36  ;;  %v8701_v32 = vpop.f32.mrb[67].mxu0  ;;  %v19000_v39 = vld [vmem:[%s26253_s5 + $0xea0] sm:$0xff]   ;;  %18199 = vmatprep.subr.bf16.mxu0 %v18999_v56  ;;  %v9269_v38 = vmul.f32 %v24099_v16, %v24192_v21 }
 0x4b2   : > { %v9586_v43 = vmul.f32 1.4142135, %v9522_v12  ;;  %v9270_v56 = vmul.f32 %v24115_v62, %v24192_v21 }
 0x4b3   : > { %v9331_v7 = vadd.f32 %v9267_v0, %v8986_v29  ;;  %v8989_v61 = vadd.f32 %v18370_v60, %v27066_v55  ;;  %18200 = vmatpush3.bf16.msra.mxu0 %v19000_v39 }
 0x4b4   : > { %v9634_v52 = vpack.c.bf16 %v9586_v43, %v9585_v58 }
 0x4b5   : > { %vm9395_vm6 = vcmp.ge.f32.partialorder %v9331_v7, 0.0  ;;  %v9459_v44 = vmul.f32 0.2, %v9331_v7  ;;  %v9332_v48 = vadd.f32 %v9268_v9, %v8989_v61  ;;  %v19003_v61 = vld [vmem:[%s26253_s5 + $0xee8] sm:$0xff]   ;;  %v27068_v9 = vld [vmem:[#allocation43_spill] sm:$0xff] }
 0x4b6   : > { %v24228_v4 = vpack.i.b16 %v9634_v52, %v24090_v35  ;;  %v9760_v0 = vshrl.u32 %v9634_v52, 16  ;;  %v8704_v55 = vpop.f32.mrb[68].mxu0  ;;  %v19004_v35 = vld [vmem:[%s26253_s5 + $0xea8] sm:$0xff]   ;;  %18201 = vmatprep.subr.bf16.mxu0 %v19003_v61 }
 0x4b7   : > { %v9523_v43 = vsel %vm9395_vm6, %v9331_v7, %v9459_v44  ;;  %vm9396_vm7 = vcmp.ge.f32.partialorder %v9332_v48, 0.0  ;;  %v9460_v17 = vmul.f32 0.2, %v9332_v48  ;;  %v18371_v12 = vadd.f32 %v24058_v6, %v8704_v55  ;;  %v8706_v60 = vpop.f32.mrb[69].mxu0  ;;  %18202 = vmatpush3.bf16.msra.mxu0 %v19004_v35 }
 0x4b8   : > { %27067 = vst [vmem:[#allocation60_spill] sm:$0xff] %v24228_v4  ;;  %v8707_v36 = vpop.f32.mrb[70].mxu0  ;;  %v24239_v29 = vpack.i.b16 %v9760_v0, %v9759_v22  ;;  %v9587_v39 = vmul.f32 1.4142135, %v9523_v43  ;;  %v27069_v60 = vld [vmem:[#allocation49_spill] sm:$0xff] }
 0x4b9   : > { %v9524_v32 = vsel %vm9396_vm7, %v9332_v48, %v9460_v17  ;;  %v8994_v58 = vadd.f32 %v18371_v12, %v27068_v9  ;;  %v18372_v7 = vadd.f32 %v24058_v6, %v8707_v36  ;;  %v8709_v52 = vpop.f32.mrb[71].mxu0  ;;  %v19007_v22 = vld [vmem:[%s26253_s5 + $0xef0] sm:$0xff]   ;;  %v19011_v9 = vld [vmem:[%s26253_s5 + $0xef8] sm:$0xff]  }
 0x4ba   : > { %v9588_v44 = vmul.f32 1.4142135, %v9524_v32  ;;  %v19008_v0 = vld [vmem:[%s26253_s5 + $0xeb0] sm:$0xff]   ;;  %18203 = vmatprep.subr.bf16.mxu0 %v19007_v22 }
 0x4bb   : > { %v9333_v55 = vadd.f32 %v9269_v38, %v8994_v58  ;;  %v8997_v4 = vadd.f32 %v18372_v7, %v27069_v60  ;;  %v9271_v38 = vmul.f32 %v24127_v41, %v24192_v21  ;;  %18204 = vmatpush3.bf16.msra.mxu0 %v19008_v0 }
 0x4bc   : > { %v24249_v48 = vpack.c.bf16 %v9588_v44, %v9587_v39  ;;  %v9272_v44 = vmul.f32 %v24139_v31, %v24192_v21  ;;  %18205 = vmatprep.subr.bf16.mxu0 %v19011_v9 }
 0x4bd   : > { %vm9397_vm8 = vcmp.ge.f32.partialorder %v9333_v55, 0.0  ;;  %v9461_v17 = vmul.f32 0.2, %v9333_v55  ;;  %v9334_v12 = vadd.f32 %v9270_v56, %v8997_v4  ;;  %v19012_v4 = vld [vmem:[%s26253_s5 + $0xeb8] sm:$0xff]  }
 0x4be   : > { %v8712_v43 = vpop.f32.mrb[72].mxu0 }
 0x4bf   : > { %v9525_v61 = vsel %vm9397_vm8, %v9333_v55, %v9461_v17  ;;  %vm9398_vm9 = vcmp.ge.f32.partialorder %v9334_v12, 0.0  ;;  %v9462_v36 = vmul.f32 0.2, %v9334_v12  ;;  %v18373_v35 = vadd.f32 %v24058_v6, %v8712_v43  ;;  %v8714_v32 = vpop.f32.mrb[73].mxu0  ;;  %18206 = vmatpush3.bf16.msra.mxu0 %v19012_v4  ;;  %v19015_v17 = vld [vmem:[%s26253_s5 + $0xfc0] sm:$0xff]  }
 0x4c0   : > { %v8715_v58 = vpop.f32.mrb[74].mxu0  ;;  %v9589_v55 = vmul.f32 1.4142135, %v9525_v61  ;;  %18235 = vmatprep.subr.bf16.mxu0 %v19015_v17  ;;  %v24276_v61 = vld [vmem:[%s26252_s4 + $0x30] sm:$0xff] }
 0x4c1   : > { %v9526_v7 = vsel %vm9398_vm9, %v9334_v12, %v9462_v36  ;;  %v18374_v56 = vadd.f32 %v24058_v6, %v8715_v58  ;;  %v9002_v52 = vadd.f32 %v18373_v35, %v23869_v27  ;;  %v8717_v39 = vpop.f32.mrb[75].mxu0 }
 0x4c2   : > { %v9590_v60 = vmul.f32 1.4142135, %v9526_v7 }
 0x4c3   : > { %v9335_v22 = vadd.f32 %v9271_v38, %v9002_v52  ;;  %v9005_v0 = vadd.f32 %v18374_v56, %v23886_v20  ;;  %v9273_v38 = vmul.f32 %v24276_v61, %v24192_v21  ;;  %v9274_v52 = vmul.f32 %v24187_v34, %v24192_v21 }
 0x4c4   : > { %v24271_v12 = vpack.c.bf16 %v9590_v60, %v9589_v55 }
 0x4c5   : > { %vm9399_vm10 = vcmp.ge.f32.partialorder %v9335_v22, 0.0  ;;  %v9463_v43 = vmul.f32 0.2, %v9335_v22  ;;  %v9336_v27 = vadd.f32 %v9272_v44, %v9005_v0  ;;  %v24286_v0 = vpop.permute.xlu1 %9224 }
 0x4c6   : > { %v8720_v36 = vpop.f32.mrb[76].mxu0 }
 0x4c7   : > { %v9527_v20 = vsel %vm9399_vm10, %v9335_v22, %v9463_v43  ;;  %vm9400_vm11 = vcmp.ge.f32.partialorder %v9336_v27, 0.0  ;;  %v9464_v35 = vmul.f32 0.2, %v9336_v27  ;;  %v18375_v32 = vadd.f32 %v24058_v6, %v8720_v36  ;;  %v8722_v9 = vpop.f32.mrb[77].mxu0 }
 0x4c8   : > { %v8723_v58 = vpop.f32.mrb[78].mxu0  ;;  %v9591_v44 = vmul.f32 1.4142135, %v9527_v20 }
 0x4c9   : > { %v9528_v4 = vsel %vm9400_vm11, %v9336_v27, %v9464_v35  ;;  %v9010_v7 = vadd.f32 %v18375_v32, %v23861_v47  ;;  %v18376_v56 = vadd.f32 %v24058_v6, %v8723_v58  ;;  %v8725_v39 = vpop.f32.mrb[79].mxu0  ;;  %v9275_v47 = vmul.f32 %v24071_v18, %v24286_v0 }
 0x4ca   : > { %v9592_v55 = vmul.f32 1.4142135, %v9528_v4 }
 0x4cb   : > { %v9337_v60 = vadd.f32 %v9273_v38, %v9010_v7  ;;  %v9013_v22 = vadd.f32 %v18376_v56, %v23881_v63  ;;  %v9276_v7 = vmul.f32 %v24081_v50, %v24286_v0 }
 0x4cc   : > { %v24288_v17 = vpack.c.bf16 %v9592_v55, %v9591_v44 }
 0x4cd   : > { %vm9401_vm12 = vcmp.ge.f32.partialorder %v9337_v60, 0.0  ;;  %v9465_v43 = vmul.f32 0.2, %v9337_v60  ;;  %v9338_v27 = vadd.f32 %v9274_v52, %v9013_v22 }
 0x4ce   : > { %v8728_v36 = vpop.f32.mrb[80].mxu0 }
 0x4cf   : > { %v9529_v35 = vsel %vm9401_vm12, %v9337_v60, %v9465_v43  ;;  %vm9402_vm13 = vcmp.ge.f32.partialorder %v9338_v27, 0.0  ;;  %v9466_v21 = vmul.f32 0.2, %v9338_v27  ;;  %v18377_v20 = vadd.f32 %v24058_v6, %v8728_v36  ;;  %v8730_v32 = vpop.f32.mrb[81].mxu0 }
 0x4d0   : > { %v8731_v38 = vpop.f32.mrb[82].mxu0  ;;  %v9593_v56 = vmul.f32 1.4142135, %v9529_v35 }
 0x4d1   : > { %v9530_v9 = vsel %vm9402_vm13, %v9338_v27, %v9466_v21  ;;  %v18378_v63 = vadd.f32 %v24058_v6, %v8731_v38  ;;  %v9018_v58 = vadd.f32 %v18377_v20, %v23917_v13  ;;  %v8733_v4 = vpop.f32.mrb[83].mxu0  ;;  %v9277_v27 = vmul.f32 %v24099_v16, %v24286_v0 }
 0x4d2   : > { %v9594_v52 = vmul.f32 1.4142135, %v9530_v9  ;;  %v9278_v38 = vmul.f32 %v24115_v62, %v24286_v0 }
 0x4d3   : > { %v9339_v39 = vadd.f32 %v9275_v47, %v9018_v58  ;;  %v9021_v44 = vadd.f32 %v18378_v63, %v23923_v3 }
 0x4d4   : > { %v24298_v55 = vpack.c.bf16 %v9594_v52, %v9593_v56 }
 0x4d5   : > { %vm9403_vm14 = vcmp.ge.f32.partialorder %v9339_v39, 0.0  ;;  %v9467_v60 = vmul.f32 0.2, %v9339_v39  ;;  %v9340_v22 = vadd.f32 %v9276_v7, %v9021_v44  ;;  %v9671_v44 = vshrl.u32 %v24249_v48, 16 }
 0x4d6   : > { %v8736_v43 = vpop.f32.mrb[84].mxu0 }
 0x4d7   : > { %v9531_v36 = vsel %vm9403_vm14, %v9339_v39, %v9467_v60  ;;  %vm9404_vm15 = vcmp.ge.f32.partialorder %v9340_v22, 0.0  ;;  %v9468_v13 = vmul.f32 0.2, %v9340_v22  ;;  %v18379_v21 = vadd.f32 %v24058_v6, %v8736_v43  ;;  %v8738_v20 = vpop.f32.mrb[85].mxu0 }
 0x4d8   : > { %v8739_v35 = vpop.f32.mrb[86].mxu0  ;;  %v9595_v63 = vmul.f32 1.4142135, %v9531_v36  ;;  %v9279_v43 = vmul.f32 %v24127_v41, %v24286_v0 }
 0x4d9   : > { %v9532_v32 = vsel %vm9404_vm15, %v9340_v22, %v9468_v13  ;;  %v9026_v47 = vadd.f32 %v18379_v21, %v23914_v15  ;;  %v18380_v3 = vadd.f32 %v24058_v6, %v8739_v35  ;;  %v8741_v9 = vpop.f32.mrb[87].mxu0 }
 0x4da   : > { %v9596_v58 = vmul.f32 1.4142135, %v9532_v32  ;;  %v9280_v9 = vmul.f32 %v24139_v31, %v24286_v0 }
 0x4db   : > { %v9341_v4 = vadd.f32 %v9277_v27, %v9026_v47  ;;  %v9029_v7 = vadd.f32 %v18380_v3, %v23921_v54 }
 0x4dc   : > { %v9639_v56 = vpack.c.bf16 %v9596_v58, %v9595_v63 }
 0x4dd   : > { %vm9405_vm0 = vcmp.ge.f32.partialorder %v9341_v4, 0.0  ;;  %v9469_v52 = vmul.f32 0.2, %v9341_v4  ;;  %v9342_v39 = vadd.f32 %v9278_v38, %v9029_v7 }
 0x4de   : > { %v24310_v60 = vpack.i.b16 %v9639_v56, %v24249_v48  ;;  %v9672_v15 = vshrl.u32 %v9639_v56, 16  ;;  %v8744_v22 = vpop.f32.mrb[88].mxu0 }
 0x4df   : > { %v9533_v13 = vsel %vm9405_vm0, %v9341_v4, %v9469_v52  ;;  %vm9406_vm1 = vcmp.ge.f32.partialorder %v9342_v39, 0.0  ;;  %v9470_v36 = vmul.f32 0.2, %v9342_v39  ;;  %v18381_v27 = vadd.f32 %v24058_v6, %v8744_v22  ;;  %v8746_v54 = vpop.f32.mrb[89].mxu0 }
 0x4e0   : > { %v9779_v21 = vcombine.low %v23941_v51, %v24310_v60  ;;  %v9780_v20 = vcombine.high %v23941_v51, %v24310_v60  ;;  %v8747_v35 = vpop.f32.mrb[90].mxu0  ;;  %v24319_v48 = vpack.i.b16 %v9672_v15, %v9671_v44  ;;  %v9597_v63 = vmul.f32 1.4142135, %v9533_v13 }
 0x4e1   : > { %v9534_v32 = vsel %vm9406_vm1, %v9342_v39, %v9470_v36  ;;  %v18382_v47 = vadd.f32 %v24058_v6, %v8747_v35  ;;  %v9034_v3 = vadd.f32 %v18381_v27, %v23955_v45  ;;  %v8749_v38 = vpop.f32.mrb[91].mxu0  ;;  %v9703_v45 = vshrl.u32 %v24271_v12, 16 }
 0x4e2   : > { %v9598_v58 = vmul.f32 1.4142135, %v9534_v32  ;;  %v9847_v4 = vcombine.low %v23946_v8, %v24319_v48  ;;  %v9848_v7 = vcombine.high %v23946_v8, %v24319_v48  ;;  %v9281_v27 = vmul.f32 %v24276_v61, %v24286_v0 }
 0x4e3   : > { %v9343_v56 = vadd.f32 %v9279_v43, %v9034_v3  ;;  %v9037_v52 = vadd.f32 %v18382_v47, %v23960_v25 }
 0x4e4   : > { %v9640_v39 = vpack.c.bf16 %v9598_v58, %v9597_v63  ;;  %v9282_v58 = vmul.f32 %v24187_v34, %v24286_v0  ;;  %v9735_v0 = vshrl.u32 %v24288_v17, 16 }
 0x4e5   : > { %vm9407_vm2 = vcmp.ge.f32.partialorder %v9343_v56, 0.0  ;;  %v9471_v44 = vmul.f32 0.2, %v9343_v56  ;;  %v9344_v15 = vadd.f32 %v9280_v9, %v9037_v52 }
 0x4e6   : > { %v24332_v22 = vpack.i.b16 %v9640_v39, %v24271_v12  ;;  %v9704_v13 = vshrl.u32 %v9640_v39, 16  ;;  %v8752_v36 = vpop.f32.mrb[92].mxu0 }
 0x4e7   : > { %v9535_v54 = vsel %vm9407_vm2, %v9343_v56, %v9471_v44  ;;  %vm9408_vm3 = vcmp.ge.f32.partialorder %v9344_v15, 0.0  ;;  %v9472_v35 = vmul.f32 0.2, %v9344_v15  ;;  %v18383_v43 = vadd.f32 %v24058_v6, %v8752_v36  ;;  %v8754_v25 = vpop.f32.mrb[93].mxu0  ;;  %v27070_v36 = vld [vmem:[#allocation44_spill] sm:$0xff] }
 0x4e8   : > { %v8755_v32 = vpop.f32.mrb[94].mxu0  ;;  %v24337_v47 = vpack.i.b16 %v9704_v13, %v9703_v45  ;;  %v9915_v3 = vcombine.low %v23963_v28, %v24332_v22  ;;  %v9916_v12 = vcombine.high %v23963_v28, %v24332_v22  ;;  %v9599_v52 = vmul.f32 1.4142135, %v9535_v54 }
 0x4e9   : > { %v9536_v38 = vsel %vm9408_vm3, %v9344_v15, %v9472_v35  ;;  %v9042_v9 = vadd.f32 %v18383_v43, %v23952_v53  ;;  %v18384_v63 = vadd.f32 %v24058_v6, %v8755_v32  ;;  %v8757_v56 = vpop.f32.mrb[95].mxu0  ;;  %v24352_v15 = vpop.permute.xlu0 %9228 }
 0x4ea   : > { %v9600_v39 = vmul.f32 1.4142135, %v9536_v38  ;;  %v9283_v56 = vmul.f32 %v24071_v18, %v24352_v15  ;;  %v27078_v28 = vcombine.low %v23974_v33, %v24337_v47 }
 0x4eb   : > { %v9345_v13 = vadd.f32 %v9281_v27, %v9042_v9  ;;  %v9045_v25 = vadd.f32 %v18384_v63, %v27070_v36 }
 0x4ec   : > { %v9641_v53 = vpack.c.bf16 %v9600_v39, %v9599_v52 }
 0x4ed   : > { %vm9409_vm4 = vcmp.ge.f32.partialorder %v9345_v13, 0.0  ;;  %v9473_v35 = vmul.f32 0.2, %v9345_v13  ;;  %v9346_v43 = vadd.f32 %v9282_v58, %v9045_v25 }
 0x4ee   : > { %v24356_v54 = vpack.i.b16 %v9641_v53, %v24288_v17  ;;  %v9736_v32 = vshrl.u32 %v9641_v53, 16  ;;  %v8760_v38 = vpop.f32.mrb[96].mxu0 }
 0x4ef   : > { %v9537_v45 = vsel %vm9409_vm4, %v9345_v13, %v9473_v35  ;;  %vm9410_vm5 = vcmp.ge.f32.partialorder %v9346_v43, 0.0  ;;  %v9474_v27 = vmul.f32 0.2, %v9346_v43  ;;  %v18385_v9 = vadd.f32 %v24058_v6, %v8760_v38  ;;  %v8762_v63 = vpop.f32.mrb[97].mxu0 }
 0x4f0   : > { %v8763_v39 = vpop.f32.mrb[98].mxu0  ;;  %v24365_v17 = vpack.i.b16 %v9736_v32, %v9735_v0  ;;  %v9284_v35 = vmul.f32 %v24081_v50, %v24352_v15  ;;  %v9601_v38 = vmul.f32 1.4142135, %v9537_v45 }
 0x4f1   : > { %v9538_v36 = vsel %vm9410_vm5, %v9346_v43, %v9474_v27  ;;  %v18386_v25 = vadd.f32 %v24058_v6, %v8763_v39  ;;  %v9050_v53 = vadd.f32 %v18385_v9, %v23999_v14  ;;  %v8765_v13 = vpop.f32.mrb[99].mxu0  ;;  %v9767_v14 = vshrl.u32 %v24298_v55, 16 }
 0x4f2   : > { %v9602_v63 = vmul.f32 1.4142135, %v9538_v36  ;;  %v9285_v36 = vmul.f32 %v24099_v16, %v24352_v15 }
 0x4f3   : > { %v9347_v44 = vadd.f32 %v9283_v56, %v9050_v53  ;;  %v9053_v0 = vadd.f32 %v18386_v25, %v24004_v10 }
 0x4f4   : > { %v9642_v43 = vpack.c.bf16 %v9602_v63, %v9601_v38 }
 0x4f5   : > { %vm9411_vm6 = vcmp.ge.f32.partialorder %v9347_v44, 0.0  ;;  %v9475_v32 = vmul.f32 0.2, %v9347_v44  ;;  %v9348_v27 = vadd.f32 %v9284_v35, %v9053_v0 }
 0x4f6   : > { %v24378_v9 = vpack.i.b16 %v9642_v43, %v24298_v55  ;;  %v9768_v45 = vshrl.u32 %v9642_v43, 16  ;;  %v8768_v39 = vpop.f32.mrb[100].mxu0 }
 0x4f7   : > { %v9539_v13 = vsel %vm9411_vm6, %v9347_v44, %v9475_v32  ;;  %vm9412_vm7 = vcmp.ge.f32.partialorder %v9348_v27, 0.0  ;;  %v9476_v58 = vmul.f32 0.2, %v9348_v27  ;;  %v18387_v56 = vadd.f32 %v24058_v6, %v8768_v39  ;;  %v8770_v10 = vpop.f32.mrb[101].mxu0 }
 0x4f8   : > { %v10188_v25 = vcombine.high %v24007_v59, %v24378_v9  ;;  %v8771_v53 = vpop.f32.mrb[102].mxu0  ;;  %v24385_v35 = vpack.i.b16 %v9768_v45, %v9767_v14  ;;  %v9286_v44 = vmul.f32 %v24115_v62, %v24352_v15  ;;  %v9603_v32 = vmul.f32 1.4142135, %v9539_v13 }
 0x4f9   : > { %v9540_v38 = vsel %vm9412_vm7, %v9348_v27, %v9476_v58  ;;  %v9058_v63 = vadd.f32 %v18387_v56, %v23996_v49  ;;  %v18388_v0 = vadd.f32 %v24058_v6, %v8771_v53  ;;  %v8773_v43 = vpop.f32.mrb[103].mxu0  ;;  %v9287_v53 = vmul.f32 %v24127_v41, %v24352_v15 }
 0x4fa   : > { %v9604_v39 = vmul.f32 1.4142135, %v9540_v38  ;;  %vm15727_vm7 = vcmask 7168  }
 0x4fb   : > { %v9349_v45 = vadd.f32 %v9285_v36, %v9058_v63  ;;  %v9061_v55 = vadd.f32 %v18388_v0, %v24002_v1 }
 0x4fc   : > { %v24398_v58 = vpack.c.bf16 %v9604_v39, %v9603_v32 }
 0x4fd   : > { %vm9413_vm8 = vcmp.ge.f32.partialorder %v9349_v45, 0.0  ;;  %v9477_v49 = vmul.f32 0.2, %v9349_v45  ;;  %v9350_v27 = vadd.f32 %v9286_v44, %v9061_v55  ;;  %v9288_v55 = vmul.f32 %v24139_v31, %v24352_v15 }
 0x4fe   : > { %v8776_v56 = vpop.f32.mrb[104].mxu0 }
 0x4ff   : > { %v9541_v13 = vsel %vm9413_vm8, %v9349_v45, %v9477_v49  ;;  %vm9414_vm9 = vcmp.ge.f32.partialorder %v9350_v27, 0.0  ;;  %v9478_v38 = vmul.f32 0.2, %v9350_v27  ;;  %v18389_v43 = vadd.f32 %v24058_v6, %v8776_v56  ;;  %v8778_v10 = vpop.f32.mrb[105].mxu0 }
 0x500   : > { %v8779_v52 = vpop.f32.mrb[106].mxu0  ;;  %v9605_v0 = vmul.f32 1.4142135, %v9541_v13 }
 0x501   : > { %v9542_v14 = vsel %vm9414_vm9, %v9350_v27, %v9478_v38  ;;  %v18390_v36 = vadd.f32 %v24058_v6, %v8779_v52  ;;  %v9066_v1 = vadd.f32 %v18389_v43, %v24037_v37  ;;  %v8781_v63 = vpop.f32.mrb[107].mxu0 }
 0x502   : > { %v9606_v44 = vmul.f32 1.4142135, %v9542_v14  ;;  %v9289_v14 = vmul.f32 %v24276_v61, %v24352_v15 }
 0x503   : > { %v9351_v32 = vadd.f32 %v9287_v53, %v9066_v1  ;;  %v9069_v39 = vadd.f32 %v18390_v36, %v24043_v30 }
 0x504   : > { %v24408_v45 = vpack.c.bf16 %v9606_v44, %v9605_v0  ;;  %v9290_v44 = vmul.f32 %v24187_v34, %v24352_v15 }
 0x505   : > { %vm9415_vm10 = vcmp.ge.f32.partialorder %v9351_v32, 0.0  ;;  %v9479_v49 = vmul.f32 0.2, %v9351_v32  ;;  %v9352_v10 = vadd.f32 %v9288_v55, %v9069_v39 }
 0x506   : > { %v8784_v56 = vpop.f32.mrb[108].mxu0 }
 0x507   : > { %v9543_v27 = vsel %vm9415_vm10, %v9351_v32, %v9479_v49  ;;  %vm9416_vm11 = vcmp.ge.f32.partialorder %v9352_v10, 0.0  ;;  %v9480_v52 = vmul.f32 0.2, %v9352_v10  ;;  %v18391_v37 = vadd.f32 %v24058_v6, %v8784_v56  ;;  %v8786_v38 = vpop.f32.mrb[109].mxu0 }
 0x508   : > { %v8787_v43 = vpop.f32.mrb[110].mxu0  ;;  %v9607_v36 = vmul.f32 1.4142135, %v9543_v27 }
 0x509   : > { %v9544_v63 = vsel %vm9416_vm11, %v9352_v10, %v9480_v52  ;;  %v9074_v13 = vadd.f32 %v18391_v37, %v24034_v42  ;;  %v18392_v30 = vadd.f32 %v24058_v6, %v8787_v43  ;;  %v8789_v53 = vpop.f32.mrb[111].mxu0  ;;  %v9233_v42 = vpop.permute.xlu1 %9232 }
 0x50a   : > { %v9608_v1 = vmul.f32 1.4142135, %v9544_v63  ;;  %v9291_v63 = vmul.f32 %v24071_v18, %v9233_v42 }
 0x50b   : > { %v9353_v55 = vadd.f32 %v9289_v14, %v9074_v13  ;;  %v9077_v0 = vadd.f32 %v18392_v30, %v24041_v19  ;;  %v19503_v14 = vmov 1983009808  }
 0x50c   : > { %v24418_v32 = vpack.c.bf16 %v9608_v1, %v9607_v36  ;;  %v9782_v30 = vunpack.c.l.s4 %v19503_v14 }
 0x50d   : > { %vm9417_vm12 = vcmp.ge.f32.partialorder %v9353_v55, 0.0  ;;  %v9481_v39 = vmul.f32 0.2, %v9353_v55  ;;  %v9354_v49 = vadd.f32 %v9290_v44, %v9077_v0  ;;  %v9292_v0 = vmul.f32 %v24081_v50, %v9233_v42 }
 0x50e   : > { %v8792_v10 = vpop.f32.mrb[112].mxu0  ;;  %v19504_v44 = vmov 1934713408   ;;  %v9783_v18 = vunpack.c.0.s8 %v9782_v30 }
 0x50f   : > { %v9545_v56 = vsel %vm9417_vm12, %v9353_v55, %v9481_v39  ;;  %vm9418_vm13 = vcmp.ge.f32.partialorder %v9354_v49, 0.0  ;;  %v9482_v52 = vmul.f32 0.2, %v9354_v49  ;;  %v18393_v37 = vadd.f32 %v24058_v6, %v8792_v10  ;;  %v8794_v27 = vpop.f32.mrb[113].mxu0 }
 0x510   : > { %v8795_v38 = vpop.f32.mrb[114].mxu0  ;;  %v9609_v53 = vmul.f32 1.4142135, %v9545_v56  ;;  %v9814_v39 = vunpack.c.l.s4 %v19504_v44  ;;  %v24431_v56 = vld [vmem:[%s26251_s3] ss:$0 sm:$0xff] }
 0x511   : > { %v9546_v43 = vsel %vm9418_vm13, %v9354_v49, %v9482_v52  ;;  %v9082_v19 = vadd.f32 %v18393_v37, %v24088_v26  ;;  %v18394_v15 = vadd.f32 %v24058_v6, %v8795_v38  ;;  %v8797_v13 = vpop.f32.mrb[115].mxu0 }
 0x512   : > { %v9610_v36 = vmul.f32 1.4142135, %v9546_v43  ;;  %v9815_v27 = vunpack.c.0.s8 %v9814_v39 }
 0x513   : > { %v9355_v1 = vadd.f32 %v9291_v63, %v9082_v19  ;;  %v9085_v55 = vadd.f32 %v18394_v15, %v24094_v57  ;;  %v9293_v63 = vmul.f32 %v24099_v16, %v9233_v42  ;;  %v9296_v16 = vmul.f32 %v24139_v31, %v9233_v42 }
 0x514   : > { %v24426_v10 = vpack.c.bf16 %v9610_v36, %v9609_v53  ;;  %v27071_v53 = vld [vmem:[#allocation57_spill] sm:$0xff] }
 0x515   : > { %vm9419_vm14 = vcmp.ge.f32.partialorder %v9355_v1, 0.0  ;;  %v9483_v26 = vmul.f32 0.2, %v9355_v1  ;;  %v9356_v49 = vadd.f32 %v9292_v0, %v9085_v55  ;;  %v24438_v36 = vsub.s32 %v9783_v18, %v27071_v53 }
 0x516   : > { %v8800_v52 = vpop.f32.mrb[116].mxu0  ;;  %v9294_v0 = vmul.f32 %v24115_v62, %v9233_v42  ;;  %v24443_v44 = vsub.s32 %v9815_v27, %v27071_v53  ;;  %v9679_v18 = vshrl.u32 %v24398_v58, 16  ;;  %v27072_v27 = vld [vmem:[#allocation53_spill] sm:$0xff]  ;;  %v27073_v53 = vld [vmem:[#allocation47_spill] sm:$0xff] }
 0x517   : > { %v9547_v6 = vsel %vm9419_vm14, %v9355_v1, %v9483_v26  ;;  %vm9420_vm15 = vcmp.ge.f32.partialorder %v9356_v49, 0.0  ;;  %v9484_v37 = vmul.f32 0.2, %v9356_v49  ;;  %v18395_v57 = vadd.f32 %v24431_v56, %v8800_v52  ;;  %v8802_v50 = vpop.f32.mrb[117].mxu0 }
 0x518   : > { %v8803_v38 = vpop.f32.mrb[118].mxu0  ;;  %v9611_v14 = vmul.f32 1.4142135, %v9547_v6  ;;  %v24448_v52 = vmul.f32 %v24276_v61, %v9233_v42  ;;  %v9787_v61 = vrot.slane %v9779_v21, %v24438_v36  ;;  %v9991_v22 = vrot.slane %v27078_v28, %v24438_v36 }
 0x519   : > { %v9548_v43 = vsel %vm9420_vm15, %v9356_v49, %v9484_v37  ;;  %v9090_v19 = vadd.f32 %v18395_v57, %v24085_v24  ;;  %v18396_v15 = vadd.f32 %v24431_v56, %v8803_v38  ;;  %v8805_v13 = vpop.f32.mrb[119].mxu0  ;;  %v9295_v24 = vmul.f32 %v24127_v41, %v9233_v42 }
 0x51a   : > { %v9612_v30 = vmul.f32 1.4142135, %v9548_v43  ;;  %v24453_v37 = vmul.f32 %v24187_v34, %v9233_v42 }
 0x51b   : > { %v9357_v1 = vadd.f32 %v9293_v63, %v9090_v19  ;;  %v9093_v55 = vadd.f32 %v18396_v15, %v24092_v46 }
 0x51c   : > { %v9647_v39 = vpack.c.bf16 %v9612_v30, %v9611_v14 }
 0x51d   : > { %vm9421_vm0 = vcmp.ge.f32.partialorder %v9357_v1, 0.0  ;;  %v9485_v26 = vmul.f32 0.2, %v9357_v1  ;;  %v9358_v49 = vadd.f32 %v9294_v0, %v9093_v55  ;;  %v27074_v0 = vld [vmem:[#allocation52_spill] sm:$0xff] }
 0x51e   : > { %v9677_v46 = vpack.i.b16 %v9647_v39, %v24398_v58  ;;  %v9680_v6 = vshrl.u32 %v9647_v39, 16  ;;  %v8808_v62 = vpop.f32.mrb[120].mxu0 }
 0x51f   : > { %v9549_v57 = vsel %vm9421_vm0, %v9357_v1, %v9485_v26  ;;  %vm9422_vm1 = vcmp.ge.f32.partialorder %v9358_v49, 0.0  ;;  %v9486_v41 = vmul.f32 0.2, %v9358_v49  ;;  %v18397_v31 = vadd.f32 %v24431_v56, %v8808_v62  ;;  %v8810_v50 = vpop.f32.mrb[121].mxu0 }
 0x520   : > { %v9795_v38 = vcombine.low %v27072_v27, %v9677_v46  ;;  %v9796_v58 = vcombine.high %v27072_v27, %v9677_v46  ;;  %v8811_v43 = vpop.f32.mrb[122].mxu0  ;;  %v9681_v19 = vpack.i.b16 %v9680_v6, %v9679_v18  ;;  %v9613_v63 = vmul.f32 1.4142135, %v9549_v57 }
 0x521   : > { %v9550_v34 = vsel %vm9422_vm1, %v9358_v49, %v9486_v41  ;;  %v18398_v42 = vadd.f32 %v24431_v56, %v8811_v43  ;;  %v9098_v15 = vadd.f32 %v18397_v31, %v24155_v5  ;;  %v8813_v13 = vpop.f32.mrb[123].mxu0  ;;  %v9855_v26 = vrot.slane %v9847_v4, %v24438_v36  ;;  %v18990_v43 = vld [vmem:[%s26253_s5 + $0x80] sm:$0xff]  }
 0x522   : > { %v9803_v14 = vrot.slane %v9795_v38, %v24438_v36  ;;  %v9614_v30 = vmul.f32 1.4142135, %v9550_v34  ;;  %v9863_v1 = vcombine.low %v27073_v53, %v9681_v19  ;;  %v9864_v21 = vcombine.high %v27073_v53, %v9681_v19 }
 0x523   : > { %v9359_v55 = vadd.f32 %v9295_v24, %v9098_v15  ;;  %v9101_v39 = vadd.f32 %v18398_v42, %v27074_v0  ;;  %v24476_v5 = vrot.slane %v9780_v20, %v24438_v36  ;;  %v24482_v57 = vrot.slane %v9796_v58, %v24438_v36  ;;  %v27075_v42 = vld [vmem:[#allocation46_spill] sm:$0xff] }
 0x524   : > { %v24478_v49 = vpack.c.bf16 %v9614_v30, %v9613_v63  ;;  %v9871_v18 = vrot.slane %v9863_v1, %v24438_v36  ;;  %v9811_v46 = vcombine.low %v9787_v61, %v9803_v14  ;;  %v9812_v6 = vcombine.high %v9787_v61, %v9803_v14  ;;  %v18993_v30 = vld [vmem:[%s26253_s5 + $0xc8] sm:$0xff]   ;;  %v27077_v0 = vld [vmem:[#allocation50_spill] sm:$0xff] }
 0x525   : > { %vm9423_vm2 = vcmp.ge.f32.partialorder %v9359_v55, 0.0  ;;  %v9487_v24 = vmul.f32 0.2, %v9359_v55  ;;  %v9360_v62 = vadd.f32 %v9296_v16, %v9101_v39  ;;  %v9878_v20 = vrot.slane %v9864_v21, %v24438_v36 }
 0x526   : > { %v24486_v4 = vpack.i.b16 %v24478_v49, %v24408_v45  ;;  %v8816_v41 = vpop.f32.mrb[124].mxu0  ;;  %v9879_v51 = vcombine.low %v9855_v26, %v9871_v18  ;;  %v24489_v60 = vrot.slane %v9811_v46, %v24443_v44  ;;  %v9880_v19 = vcombine.high %v9855_v26, %v9871_v18 }
 0x527   : > { %v9551_v31 = vsel %vm9423_vm2, %v9359_v55, %v9487_v24  ;;  %vm9424_vm3 = vcmp.ge.f32.partialorder %v9360_v62, 0.0  ;;  %v9488_v50 = vmul.f32 0.2, %v9360_v62  ;;  %v18399_v61 = vadd.f32 %v24431_v56, %v8816_v41  ;;  %v8818_v16 = vpop.f32.mrb[125].mxu0 }
 0x528   : > { %v9615_v27 = vmul.f32 1.4142135, %v9551_v31  ;;  %v8819_v38 = vpop.f32.mrb[126].mxu0  ;;  %v9887_v58 = vrot.slane %v9879_v51, %v24443_v44  ;;  %v9862_v63 = vrot.slane %v9848_v7, %v24438_v36  ;;  %v24507_v53 = vrot.slane %v9812_v6, %v24443_v44 }
 0x529   : > { %v9552_v34 = vsel %vm9424_vm3, %v9360_v62, %v9488_v50  ;;  %v9106_v15 = vadd.f32 %v18399_v61, %v27075_v42  ;;  %v18400_v13 = vadd.f32 %v24431_v56, %v8819_v38  ;;  %v8821_v14 = vpop.f32.mrb[127].mxu0  ;;  %v27076_v21 = vmov 0   ;;  %v18997_v62 = vld [vmem:[%s26253_s5 + $0xd0] sm:$0xff]  }
 0x52a   : > { %v9616_v1 = vmul.f32 1.4142135, %v9552_v34  ;;  %14458 = vmatprep.mubr.bf16.mxu1 %v9887_v58  ;;  %v9911_v55 = vcombine.high %v9887_v58, %v27076_v21  ;;  %v24511_v8 = vrot.slane %v9880_v19, %v24443_v44  ;;  %v9895_v48 = vcombine.low %v9862_v63, %v9878_v20  ;;  %v27080_v34 = vld [vmem:[#allocation48_spill] sm:$0xff] }
 0x52b   : > { %v9361_v7 = vadd.f32 %v24448_v52, %v9106_v15  ;;  %v9109_v56 = vadd.f32 %v18400_v13, %v27077_v0  ;;  %14459 = vmatmul.mubr.bf16.vlgmr.msra.gmra.mrb[64].mxu1 %v24489_v60  ;;  %v9827_v39 = vcombine.low %v24476_v5, %v24482_v57  ;;  %v9923_v26 = vrot.slane %v9915_v3, %v24438_v36  ;;  %v18994_v52 = vld [vmem:[%s26253_s5 + $0x88] sm:$0xff]   ;;  %v19002_v0 = vld [vmem:[%s26253_s5 + $0x98] sm:$0xff]  }
 0x52c   : > { %v9712_v18 = vshrl.u32 %v24478_v49, 16  ;;  %v9649_v46 = vpack.c.bf16 %v9616_v1, %v9615_v27  ;;  %17576 = vmatpush3.bf16.msra.mxu1 %v18990_v43  ;;  %14498 = vmatprep.mubr.bf16.mxu1 %v9911_v55  ;;  %v24527_v6 = vrot.slane %v9895_v48, %v24443_v44  ;;  %v24533_v24 = vrot.slane %v9916_v12, %v24438_v36  ;;  %v27079_v27 = vld [vmem:[#allocation58_spill] sm:$0xff]  ;;  %v27081_v55 = vld [vmem:[#allocation5_spill] sm:$0xff] }
 0x52d   : > { %vm9425_vm4 = vcmp.ge.f32.partialorder %v9361_v7, 0.0  ;;  %v9489_v3 = vmul.f32 0.2, %v9361_v7  ;;  %v9362_v49 = vadd.f32 %v24453_v37, %v9109_v56  ;;  %17577 = vmatprep.subr.bf16.mxu1 %v18993_v30  ;;  %v24540_v41 = vrot.slane %v9827_v39, %v24443_v44 }
 0x52e   : > { %v24543_v51 = vpack.i.b16 %v9649_v46, %v24418_v32  ;;  %v9744_v31 = vshrl.u32 %v9649_v46, 16  ;;  %v9896_v50 = vcombine.high %v9862_v63, %v9878_v20  ;;  %v9711_v12 = vshrl.u32 %v24408_v45, 16  ;;  %v18998_v20 = vld [vmem:[%s26253_s5 + $0x90] sm:$0xff]  }
 0x52f   : > { %v9553_v37 = vsel %vm9425_vm4, %v9361_v7, %v9489_v3  ;;  %vm9426_vm5 = vcmp.ge.f32.partialorder %v9362_v49, 0.0  ;;  %v9490_v61 = vmul.f32 0.2, %v9362_v49  ;;  %v9743_v16 = vshrl.u32 %v24418_v32, 16  ;;  %v19001_v32 = vld [vmem:[%s26253_s5 + $0xd8] sm:$0xff]  }
 0x530   : > { %v10067_v38 = vcombine.low %v27079_v27, %v24543_v51  ;;  %v10068_v58 = vcombine.high %v27079_v27, %v24543_v51  ;;  %17578 = vmatpush3.bf16.msra.mxu1 %v18994_v52  ;;  %v24559_v43 = vrot.slane %v9896_v50, %v24443_v44  ;;  %v9828_v19 = vcombine.high %v24476_v5, %v24482_v57  ;;  %v19005_v52 = vld [vmem:[%s26253_s5 + $0xe0] sm:$0xff]   ;;  %v19018_v51 = vld [vmem:[%s26253_s5 + $0xb8] sm:$0xff]  }
 0x531   : > { %v9554_v45 = vsel %vm9426_vm5, %v9362_v49, %v9490_v61  ;;  %17579 = vmatprep.subr.bf16.mxu1 %v18997_v62  ;;  %v9713_v63 = vpack.i.b16 %v9712_v18, %v9711_v12  ;;  %v9931_v42 = vcombine.low %v27080_v34, %v24486_v4  ;;  %v9617_v15 = vmul.f32 1.4142135, %v9553_v37 }
 0x532   : > { %v9618_v13 = vmul.f32 1.4142135, %v9554_v45  ;;  %v9932_v14 = vcombine.high %v27080_v34, %v24486_v4  ;;  %v24570_v30 = vpack.i.b16 %v9744_v31, %v9743_v16  ;;  %v24573_v1 = vrot.slane %v9828_v19, %v24443_v44  ;;  %v27083_v16 = vld [vmem:[#allocation60_spill] sm:$0xff] }
 0x533   : > { %v9999_v48 = vcombine.low %v27081_v55, %v9713_v63  ;;  %v9939_v7 = vrot.slane %v9931_v42, %v24438_v36  ;;  %v10000_v5 = vcombine.high %v27081_v55, %v9713_v63  ;;  %v27082_v4 = vcombine.high %v23974_v33, %v24337_v47 }
 0x534   : > { %v9650_v57 = vpack.c.bf16 %v9618_v13, %v9617_v15  ;;  %17580 = vmatpush3.bf16.msra.mxu1 %v18998_v20  ;;  %v9946_v39 = vrot.slane %v9932_v14, %v24438_v36  ;;  %v10135_v18 = vcombine.low %v24213_v2, %v24570_v30  ;;  %v9775_v46 = vshrl.u32 %v24426_v10, 16 }
 0x535   : > { %v9998_v56 = vrot.slane %v27082_v4, %v24438_v36  ;;  %17581 = vmatprep.subr.bf16.mxu1 %v19001_v32  ;;  %v10007_v3 = vrot.slane %v9999_v48, %v24438_v36  ;;  %v9947_v49 = vcombine.low %v9923_v26, %v9939_v7  ;;  %v9948_v62 = vcombine.high %v9923_v26, %v9939_v7 }
 0x536   : > { %v24594_v31 = vpack.i.b16 %v9650_v57, %v24426_v10  ;;  %v9776_v33 = vshrl.u32 %v9650_v57, 16  ;;  %v10014_v47 = vrot.slane %v10000_v5, %v24438_v36  ;;  %v9963_v50 = vcombine.low %v24533_v24, %v9946_v39  ;;  %v19006_v10 = vld [vmem:[%s26253_s5 + $0xa0] sm:$0xff]   ;;  %v19010_v57 = vld [vmem:[%s26253_s5 + $0xa8] sm:$0xff]  }
 0x537   : > { %v10015_v28 = vcombine.low %v9991_v22, %v10007_v3  ;;  %v24599_v12 = vrot.slane %v9947_v49, %v24443_v44  ;;  %v10016_v37 = vcombine.high %v9991_v22, %v10007_v3  ;;  %v24602_v61 = vrot.slane %v9948_v62, %v24443_v44  ;;  %v19009_v22 = vld [vmem:[%s26253_s5 + $0xe8] sm:$0xff]  }
 0x538   : > { %v10204_v20 = vcombine.high %v27083_v16, %v24594_v31  ;;  %17582 = vmatpush3.bf16.msra.mxu1 %v19002_v0  ;;  %v24609_v26 = vpack.i.b16 %v9776_v33, %v9775_v46  ;;  %v10031_v45 = vcombine.low %v9998_v56, %v10014_v47  ;;  %v24612_v32 = vrot.slane %v9963_v50, %v24443_v44  ;;  %v19013_v46 = vld [vmem:[%s26253_s5 + $0xf0] sm:$0xff]  }
 0x539   : > { %17583 = vmatprep.subr.bf16.mxu1 %v19005_v52  ;;  %v24618_v19 = vrot.slane %v10015_v28, %v24443_v44  ;;  %v24621_v63 = vrot.slane %v10016_v37, %v24443_v44  ;;  %v10075_v34 = vrot.slane %v10067_v38, %v24438_v36  ;;  %v10202_v42 = vrot.slane %v10188_v25, %v24438_v36 }
 0x53a   : > { %v10218_v15 = vrot.slane %v10204_v20, %v24438_v36  ;;  %v10272_v13 = vcombine.high %v24239_v29, %v24609_v26  ;;  %v24632_v14 = vrot.slane %v10031_v45, %v24443_v44  ;;  %v10032_v55 = vcombine.high %v9998_v56, %v10014_v47 }
 0x53b   : > { %v9964_v48 = vcombine.high %v24533_v24, %v9946_v39  ;;  %v27084_v38 = vcombine.low %v23990_v40, %v24365_v17  ;;  %v27085_v25 = vcombine.low %v23985_v11, %v24356_v54  ;;  %v27086_v0 = vcombine.high %v24012_v23, %v24385_v35 }
 0x53c   : > { %17584 = vmatpush3.bf16.msra.mxu1 %v19006_v10  ;;  %v10286_v4 = vrot.slane %v10272_v13, %v24438_v36  ;;  %v10235_v56 = vcombine.low %v10202_v42, %v10218_v15  ;;  %v10236_v39 = vcombine.high %v10202_v42, %v10218_v15  ;;  %v24655_v52 = vrot.slane %v10032_v55, %v24443_v44  ;;  %v19014_v10 = vld [vmem:[%s26253_s5 + $0xb0] sm:$0xff]   ;;  %v19017_v15 = vld [vmem:[%s26253_s5 + $0xf8] sm:$0xff]  }
 0x53d   : > { %v10127_v7 = vrot.slane %v27084_v38, %v24438_v36  ;;  %v10059_v5 = vrot.slane %v27085_v25, %v24438_v36  ;;  %v10270_v24 = vrot.slane %v27086_v0, %v24438_v36  ;;  %17585 = vmatprep.subr.bf16.mxu1 %v19009_v22  ;;  %v24658_v3 = vrot.slane %v9964_v48, %v24443_v44 }
 0x53e   : > { %v10143_v49 = vrot.slane %v10135_v18, %v24438_v36  ;;  %v24662_v47 = vrot.slane %v10235_v56, %v24443_v44  ;;  %v24665_v28 = vrot.slane %v10236_v39, %v24443_v44  ;;  %v27087_v22 = vcombine.high %v23985_v11, %v24356_v54  ;;  %v19016_v54 = vld [vmem:[%s26253_s5 + $0xf80] sm:$0xff]   ;;  %v19020_v56 = vld [vmem:[%s26253_s5 + $0xf88] sm:$0xff]  }
 0x53f   : > { %v10083_v62 = vcombine.low %v10059_v5, %v10075_v34  ;;  %v10303_v33 = vcombine.low %v10270_v24, %v10286_v4  ;;  %v10304_v50 = vcombine.high %v10270_v24, %v10286_v4  ;;  %v10084_v48 = vcombine.high %v10059_v5, %v10075_v34  ;;  %v19021_v24 = vld [vmem:[%s26253_s5 + $0x140] sm:$0xff]  }
 0x540   : > { %v10151_v37 = vcombine.low %v10127_v7, %v10143_v49  ;;  %17586 = vmatpush3.bf16.msra.mxu1 %v19010_v57  ;;  %v10066_v42 = vrot.slane %v27087_v22, %v24438_v36  ;;  %v10152_v55 = vcombine.high %v10127_v7, %v10143_v49  ;;  %v27088_v38 = vcombine.high %v23990_v40, %v24365_v17  ;;  %v19019_v17 = vld [vmem:[%s26253_s5 + $0xfc8] sm:$0xff]  }
 0x541   : > { %v24668_v20 = vrot.slane %v10083_v62, %v24443_v44  ;;  %v24674_v18 = vrot.slane %v10303_v33, %v24443_v44  ;;  %v24677_v45 = vrot.slane %v10304_v50, %v24443_v44  ;;  %17587 = vmatprep.subr.bf16.mxu1 %v19013_v46  ;;  %v10253_v11 = vcombine.high %v24662_v47, %v27076_v21  ;;  %v19023_v62 = vld [vmem:[%s26253_s5 + $0xfd0] sm:$0xff]  }
 0x542   : > { %v24687_v13 = vrot.slane %v10151_v37, %v24443_v44  ;;  %v10134_v25 = vrot.slane %v27088_v38, %v24438_v36  ;;  %v10136_v0 = vcombine.high %v24213_v2, %v24570_v30  ;;  %v10082_v34 = vrot.slane %v10068_v58, %v24438_v36  ;;  %v19022_v37 = vld [vmem:[%s26253_s5 + $0x100] sm:$0xff]  }
 0x543   : > { %v10321_v57 = vcombine.high %v24674_v18, %v27076_v21  ;;  %v10322_v40 = vcombine.high %v24677_v45, %v27076_v21  ;;  %v24712_v7 = vrot.slane %v10152_v55, %v24443_v44  ;;  %v24715_v5 = vrot.slane %v10084_v48, %v24443_v44 }
 0x544   : > { %v10271_v2 = vcombine.low %v24239_v29, %v24609_v26  ;;  %17588 = vmatpush3.bf16.msra.mxu1 %v19014_v10  ;;  %v10150_v27 = vrot.slane %v10136_v0, %v24438_v36  ;;  %v10099_v58 = vcombine.low %v10066_v42, %v10082_v34  ;;  %v10100_v30 = vcombine.high %v10066_v42, %v10082_v34  ;;  %v19028_v0 = vld [vmem:[%s26253_s5 + $0xf98] sm:$0xff]   ;;  %v19031_v34 = vld [vmem:[%s26253_s5 + $0xfe0] sm:$0xff]  }
 0x545   : > { %15618 = vmatprep.mubr.bf16.mxu0 %v10321_v57  ;;  %17589 = vmatprep.subr.bf16.mxu1 %v19017_v15  ;;  %v27089_v29 = vcombine.low %v24012_v23, %v24385_v35  ;;  %v10203_v33 = vcombine.low %v27083_v16, %v24594_v31  ;;  %v27090_v42 = vcombine.low %v24007_v59, %v24378_v9  ;;  %v19025_v16 = vld [vmem:[%s26253_s5 + $0x148] sm:$0xff]   ;;  %v19024_v59 = vld [vmem:[%s26253_s5 + $0xf90] sm:$0xff]   ;;  %v19027_v9 = vld [vmem:[%s26253_s5 + $0xfd8] sm:$0xff]  }
 0x546   : > { %15619 = vmatmul.mubr.bf16.vlgmr.msra.gmra.mrb[128].mxu0 %v10253_v11  ;;  %v10279_v4 = vrot.slane %v10271_v2, %v24438_v36  ;;  %v10167_v39 = vcombine.low %v10134_v25, %v10150_v27  ;;  %v24735_v46 = vrot.slane %v10099_v58, %v24443_v44  ;;  %v10168_v49 = vcombine.high %v10134_v25, %v10150_v27  ;;  %v19029_v57 = vld [vmem:[%s26253_s5 + $0x150] sm:$0xff]   ;;  %v19035_v2 = vld [vmem:[%s26253_s5 + $0xfe8] sm:$0xff]   ;;  %v19037_v27 = vld [vmem:[%s26253_s5 + $0x160] sm:$0xff]  }
 0x547   : > { %v10263_v26 = vrot.slane %v27089_v29, %v24438_v36  ;;  %18236 = vmatpush3.bf16.msra.mxu0 %v19016_v54  ;;  %15698 = vmatprep.mubr.bf16.mxu0 %v10322_v40  ;;  %v24741_v23 = vrot.slane %v10100_v30, %v24443_v44  ;;  %v10195_v15 = vrot.slane %v27090_v42, %v24438_v36  ;;  %v19030_v40 = vld [vmem:[%s26253_s5 + $0x110] sm:$0xff]   ;;  %v19036_v58 = vld [vmem:[%s26253_s5 + $0xfa8] sm:$0xff]   ;;  %v19050_v42 = vld [vmem:[%s26253_s5 + $0x180] sm:$0xff]  }
 0x548   : > { %18237 = vmatprep.subr.bf16.mxu0 %v19019_v17  ;;  %17590 = vmatpush3.bf16.msra.mxu1 %v19018_v51  ;;  %v24749_v10 = vrot.slane %v10167_v39, %v24443_v44  ;;  %v24752_v22 = vrot.slane %v10168_v49, %v24443_v44  ;;  %v9843_v31 = vcombine.high %v24489_v60, %v27076_v21  ;;  %v19032_v17 = vld [vmem:[%s26253_s5 + $0xfa0] sm:$0xff]   ;;  %v19034_v51 = vld [vmem:[%s26253_s5 + $0x118] sm:$0xff]   ;;  %v19039_v30 = vld [vmem:[%s26253_s5 + $0xff0] sm:$0xff]  }
 0x549   : > { %v10287_v35 = vcombine.low %v10263_v26, %v10279_v4  ;;  %v10288_v50 = vcombine.high %v10263_v26, %v10279_v4  ;;  %17597 = vmatprep.subr.bf16.mxu1 %v19021_v24  ;;  %v10211_v48 = vrot.slane %v10203_v33, %v24438_v36  ;;  %v19026_v36 = vld [vmem:[%s26253_s5 + $0x108] sm:$0xff]   ;;  %v19038_v24 = vld [vmem:[%s26253_s5 + $0x120] sm:$0xff]   ;;  %v19040_v26 = vld [vmem:[%s26253_s5 + $0xfb0] sm:$0xff]   ;;  %v10254_v33 = vcombine.high %v24665_v28, %v27076_v21 }
 0x54a   : > { %v19041_v29 = vld [vmem:[%s26253_s5 + $0x168] sm:$0xff]   ;;  %v19043_v4 = vld [vmem:[%s26253_s5 + $0xff8] sm:$0xff]   ;;  %v19045_v39 = vld [vmem:[%s26253_s5 + $0x170] sm:$0xff]  }
 0x54b   : > { %v24764_v55 = vrot.slane %v10287_v35, %v24443_v44  ;;  %v24768_v38 = vrot.slane %v10288_v50, %v24443_v44  ;;  %18238 = vmatpush3.bf16.msra.mxu0 %v19020_v56  ;;  %14499 = vmatmul.mubr.bf16.vlgmr.msra.gmra.mrb[68].mxu1 %v9843_v31  ;;  %v10219_v60 = vcombine.low %v10195_v15, %v10211_v48  ;;  %v19042_v56 = vld [vmem:[%s26253_s5 + $0x128] sm:$0xff]   ;;  %v19044_v49 = vld [vmem:[%s26253_s5 + $0xfb8] sm:$0xff]  }
 0x54c   : > { %18239 = vmatprep.subr.bf16.mxu0 %v19023_v62  ;;  %v10220_v25 = vcombine.high %v10195_v15, %v10211_v48  ;;  %17598 = vmatpush3.bf16.msra.mxu1 %v19022_v37  ;;  %v19046_v62 = vld [vmem:[%s26253_s5 + $0x130] sm:$0xff]   ;;  %v19047_v35 = vld [vmem:[%s26253_s5 + $0x178] sm:$0xff]   ;;  %v19049_v37 = vld [vmem:[%s26253_s5 + $0x1c0] sm:$0xff]   ;;  %v9912_v31 = vcombine.high %v24511_v8, %v27076_v21 }
 0x54d   : > { %14538 = vmatprep.mubr.bf16.mxu1 %v24511_v8  ;;  %17599 = vmatprep.subr.bf16.mxu1 %v19025_v16  ;;  %v24784_v11 = vrot.slane %v10219_v60, %v24443_v44  ;;  %v19048_v50 = vld [vmem:[%s26253_s5 + $0x138] sm:$0xff]   ;;  %v19051_v15 = vld [vmem:[%s26253_s5 + $0x1c8] sm:$0xff]   ;;  %v19053_v48 = vld [vmem:[%s26253_s5 + $0x1d0] sm:$0xff]  }
 0x54e   : > { %v24787_v54 = vrot.slane %v10220_v25, %v24443_v44  ;;  %v19033_v44 = vld [vmem:[%s26253_s5 + $0x158] sm:$0xff]   ;;  %v19052_v16 = vld [vmem:[%s26253_s5 + $0x188] sm:$0xff]   ;;  %v19057_v60 = vld [vmem:[%s26253_s5 + $0x1e0] sm:$0xff]  }
 0x54f   : > { %18240 = vmatpush3.bf16.msra.mxu0 %v19024_v59  ;;  %v19054_v59 = vld [vmem:[%s26253_s5 + $0x190] sm:$0xff]   ;;  %v19055_v8 = vld [vmem:[%s26253_s5 + $0x1d8] sm:$0xff]   ;;  %v19058_v25 = vld [vmem:[%s26253_s5 + $0x1a0] sm:$0xff]  }
 0x550   : > { %18241 = vmatprep.subr.bf16.mxu0 %v19027_v9  ;;  %17600 = vmatpush3.bf16.msra.mxu1 %v19026_v36  ;;  %v19056_v9 = vld [vmem:[%s26253_s5 + $0x198] sm:$0xff]   ;;  %v19059_v36 = vld [vmem:[%s26253_s5 + $0x1e8] sm:$0xff]  }
 0x551   : > { %17601 = vmatprep.subr.bf16.mxu1 %v19029_v57  ;;  %v19060_v57 = vld [vmem:[%s26253_s5 + $0x1a8] sm:$0xff]  }
 0x553   : > { %18242 = vmatpush3.bf16.msra.mxu0 %v19028_v0  ;;  %v19061_v0 = vld [vmem:[%s26253_s5 + $0x1f0] sm:$0xff]  }
 0x554   : > { %18243 = vmatprep.subr.bf16.mxu0 %v19031_v34  ;;  %17602 = vmatpush3.bf16.msra.mxu1 %v19030_v40  ;;  %v19062_v34 = vld [vmem:[%s26253_s5 + $0x1b0] sm:$0xff]   ;;  %v19063_v40 = vld [vmem:[%s26253_s5 + $0x1f8] sm:$0xff]  }
 0x555   : > { %17603 = vmatprep.subr.bf16.mxu1 %v19033_v44  ;;  %v19064_v44 = vld [vmem:[%s26253_s5 + $0x1b8] sm:$0xff]  }
 0x557   : > { %18244 = vmatpush3.bf16.msra.mxu0 %v19032_v17  ;;  %v19065_v17 = vld [vmem:[%s26253_s5 + $0x240] sm:$0xff]  }
 0x558   : > { %18245 = vmatprep.subr.bf16.mxu0 %v19035_v2  ;;  %17604 = vmatpush3.bf16.msra.mxu1 %v19034_v51  ;;  %v19066_v2 = vld [vmem:[%s26253_s5 + $0x200] sm:$0xff]   ;;  %v9844_v51 = vcombine.high %v24507_v53, %v27076_v21 }
 0x559   : > { %17605 = vmatprep.subr.bf16.mxu1 %v19037_v27  ;;  %v19067_v27 = vld [vmem:[%s26253_s5 + $0x248] sm:$0xff]  }
 0x55b   : > { %18246 = vmatpush3.bf16.msra.mxu0 %v19036_v58  ;;  %v19068_v58 = vld [vmem:[%s26253_s5 + $0x208] sm:$0xff]  }
 0x55c   : > { %18247 = vmatprep.subr.bf16.mxu0 %v19039_v30  ;;  %17606 = vmatpush3.bf16.msra.mxu1 %v19038_v24  ;;  %v19069_v30 = vld [vmem:[%s26253_s5 + $0x250] sm:$0xff]   ;;  %v19071_v24 = vld [vmem:[%s26253_s5 + $0x258] sm:$0xff]  }
 0x55d   : > { %17607 = vmatprep.subr.bf16.mxu1 %v19041_v29  ;;  %v19072_v29 = vld [vmem:[%s26253_s5 + $0x218] sm:$0xff]  }
 0x55f   : > { %18248 = vmatpush3.bf16.msra.mxu0 %v19040_v26  ;;  %v19073_v26 = vld [vmem:[%s26253_s5 + $0x260] sm:$0xff]  }
 0x560   : > { %18249 = vmatprep.subr.bf16.mxu0 %v19043_v4  ;;  %17608 = vmatpush3.bf16.msra.mxu1 %v19042_v56  ;;  %v19074_v4 = vld [vmem:[%s26253_s5 + $0x220] sm:$0xff]   ;;  %v19075_v56 = vld [vmem:[%s26253_s5 + $0x268] sm:$0xff]  }
 0x561   : > { %17609 = vmatprep.subr.bf16.mxu1 %v19045_v39  ;;  %v19076_v39 = vld [vmem:[%s26253_s5 + $0x228] sm:$0xff]  }
 0x563   : > { %18250 = vmatpush3.bf16.msra.mxu0 %v19044_v49  ;;  %v19077_v49 = vld [vmem:[%s26253_s5 + $0x270] sm:$0xff]  }
 0x564   : > { %17610 = vmatpush3.bf16.msra.mxu1 %v19046_v62  ;;  %v19078_v62 = vld [vmem:[%s26253_s5 + $0x230] sm:$0xff]  }
 0x565   : > { %17611 = vmatprep.subr.bf16.mxu1 %v19047_v35  ;;  %v19079_v35 = vld [vmem:[%s26253_s5 + $0x278] sm:$0xff]  }
 0x566   : > { %15699 = vmatmul.mubr.bf16.vlgmr.msra.gmra.mrb[132].mxu0 %v10254_v33  ;;  %v19080_v33 = vld [vmem:[%s26253_s5 + $0x238] sm:$0xff]  }
 0x568   : > { %17612 = vmatpush3.bf16.msra.mxu1 %v19048_v50  ;;  %v19081_v50 = vld [vmem:[%s26253_s5 + $0x2c0] sm:$0xff]  }
 0x569   : > { %17619 = vmatprep.subr.bf16.mxu1 %v19049_v37  ;;  %v19082_v37 = vld [vmem:[%s26253_s5 + $0x280] sm:$0xff]  }
 0x56b   : > { %14539 = vmatmul.mubr.bf16.vlgmr.msra.gmra.mrb[72].mxu1 %v24507_v53  ;;  %v19070_v53 = vld [vmem:[%s26253_s5 + $0x210] sm:$0xff]  }
 0x56c   : > { %17620 = vmatpush3.bf16.msra.mxu1 %v19050_v42  ;;  %14578 = vmatprep.mubr.bf16.mxu1 %v9912_v31  ;;  %v19083_v42 = vld [vmem:[%s26253_s5 + $0x2c8] sm:$0xff]  }
 0x56d   : > { %17621 = vmatprep.subr.bf16.mxu1 %v19051_v15  ;;  %v9913_v15 = vcombine.high %v24527_v6, %v27076_v21  ;;  %v19084_v31 = vld [vmem:[%s26253_s5 + $0x288] sm:$0xff]  }
 0x570   : > { %17622 = vmatpush3.bf16.msra.mxu1 %v19052_v16  ;;  %v19085_v16 = vld [vmem:[%s26253_s5 + $0x2d0] sm:$0xff]  }
 0x571   : > { %17623 = vmatprep.subr.bf16.mxu1 %v19053_v48  ;;  %v19086_v48 = vld [vmem:[%s26253_s5 + $0x290] sm:$0xff]  }
 0x574   : > { %17624 = vmatpush3.bf16.msra.mxu1 %v19054_v59  ;;  %v19088_v59 = vld [vmem:[%s26253_s5 + $0x298] sm:$0xff]  }
 0x575   : > { %17625 = vmatprep.subr.bf16.mxu1 %v19055_v8  ;;  %v19089_v8 = vld [vmem:[%s26253_s5 + $0x2e0] sm:$0xff]  }
 0x578   : > { %17626 = vmatpush3.bf16.msra.mxu1 %v19056_v9  ;;  %v19090_v9 = vld [vmem:[%s26253_s5 + $0x2a0] sm:$0xff]  }
 0x579   : > { %17627 = vmatprep.subr.bf16.mxu1 %v19057_v60  ;;  %v19091_v60 = vld [vmem:[%s26253_s5 + $0x2e8] sm:$0xff]  }
 0x57c   : > { %17628 = vmatpush3.bf16.msra.mxu1 %v19058_v25  ;;  %v19092_v25 = vld [vmem:[%s26253_s5 + $0x2a8] sm:$0xff]  }
 0x57d   : > { %17629 = vmatprep.subr.bf16.mxu1 %v19059_v36  ;;  %v19093_v36 = vld [vmem:[%s26253_s5 + $0x2f0] sm:$0xff]  }
 0x580   : > { %17630 = vmatpush3.bf16.msra.mxu1 %v19060_v57  ;;  %v19094_v57 = vld [vmem:[%s26253_s5 + $0x2b0] sm:$0xff]  }
 0x581   : > { %17631 = vmatprep.subr.bf16.mxu1 %v19061_v0  ;;  %v19095_v0 = vld [vmem:[%s26253_s5 + $0x2f8] sm:$0xff]  }
 0x584   : > { %17632 = vmatpush3.bf16.msra.mxu1 %v19062_v34  ;;  %v19096_v34 = vld [vmem:[%s26253_s5 + $0x2b8] sm:$0xff]  }
 0x585   : > { %17633 = vmatprep.subr.bf16.mxu1 %v19063_v40  ;;  %v19097_v40 = vld [vmem:[%s26253_s5 + $0x340] sm:$0xff]  }
 0x588   : > { %17634 = vmatpush3.bf16.msra.mxu1 %v19064_v44  ;;  %v19098_v44 = vld [vmem:[%s26253_s5 + $0x300] sm:$0xff]  }
 0x589   : > { %17641 = vmatprep.subr.bf16.mxu1 %v19065_v17  ;;  %v9845_v17 = vcombine.high %v24540_v41, %v27076_v21 }
 0x58b   : > { %14579 = vmatmul.mubr.bf16.vlgmr.msra.gmra.mrb[76].mxu1 %v9844_v51  ;;  %v19100_v51 = vld [vmem:[%s26253_s5 + $0x308] sm:$0xff]  }
 0x58c   : > { %17642 = vmatpush3.bf16.msra.mxu1 %v19066_v2  ;;  %14618 = vmatprep.mubr.bf16.mxu1 %v24527_v6  ;;  %v19087_v6 = vld [vmem:[%s26253_s5 + $0x2d8] sm:$0xff]   ;;  %v19099_v2 = vld [vmem:[%s26253_s5 + $0x348] sm:$0xff]  }
 0x58d   : > { %17643 = vmatprep.subr.bf16.mxu1 %v19067_v27  ;;  %v19101_v27 = vld [vmem:[%s26253_s5 + $0x350] sm:$0xff]  }
 0x590   : > { %17644 = vmatpush3.bf16.msra.mxu1 %v19068_v58  ;;  %v19103_v58 = vld [vmem:[%s26253_s5 + $0x358] sm:$0xff]  }
 0x591   : > { %17645 = vmatprep.subr.bf16.mxu1 %v19069_v30  ;;  %v19104_v30 = vld [vmem:[%s26253_s5 + $0x318] sm:$0xff]  }
 0x594   : > { %17646 = vmatpush3.bf16.msra.mxu1 %v19070_v53  ;;  %v19105_v53 = vld [vmem:[%s26253_s5 + $0x360] sm:$0xff]  }
 0x595   : > { %17647 = vmatprep.subr.bf16.mxu1 %v19071_v24  ;;  %v19106_v24 = vld [vmem:[%s26253_s5 + $0x320] sm:$0xff]  }
 0x598   : > { %17648 = vmatpush3.bf16.msra.mxu1 %v19072_v29  ;;  %v19107_v29 = vld [vmem:[%s26253_s5 + $0x368] sm:$0xff]  }
 0x599   : > { %17649 = vmatprep.subr.bf16.mxu1 %v19073_v26  ;;  %v19108_v26 = vld [vmem:[%s26253_s5 + $0x328] sm:$0xff]  }
 0x59c   : > { %17650 = vmatpush3.bf16.msra.mxu1 %v19074_v4  ;;  %v19109_v4 = vld [vmem:[%s26253_s5 + $0x370] sm:$0xff]  }
 0x59d   : > { %17651 = vmatprep.subr.bf16.mxu1 %v19075_v56  ;;  %v19110_v56 = vld [vmem:[%s26253_s5 + $0x330] sm:$0xff]  }
 0x5a0   : > { %17652 = vmatpush3.bf16.msra.mxu1 %v19076_v39  ;;  %v19111_v39 = vld [vmem:[%s26253_s5 + $0x378] sm:$0xff]  }
 0x5a1   : > { %17653 = vmatprep.subr.bf16.mxu1 %v19077_v49  ;;  %v19112_v49 = vld [vmem:[%s26253_s5 + $0x338] sm:$0xff]  }
 0x5a4   : > { %17654 = vmatpush3.bf16.msra.mxu1 %v19078_v62  ;;  %v19113_v62 = vld [vmem:[%s26253_s5 + $0x3c0] sm:$0xff]  }
 0x5a5   : > { %17655 = vmatprep.subr.bf16.mxu1 %v19079_v35  ;;  %v19114_v35 = vld [vmem:[%s26253_s5 + $0x380] sm:$0xff]  }
 0x5a8   : > { %17656 = vmatpush3.bf16.msra.mxu1 %v19080_v33  ;;  %v19115_v33 = vld [vmem:[%s26253_s5 + $0x3c8] sm:$0xff]  }
 0x5a9   : > { %17663 = vmatprep.subr.bf16.mxu1 %v19081_v50  ;;  %v9914_v50 = vcombine.high %v24559_v43, %v27076_v21 }
 0x5ab   : > { %14619 = vmatmul.mubr.bf16.vlgmr.msra.gmra.mrb[80].mxu1 %v24540_v41  ;;  %v19102_v41 = vld [vmem:[%s26253_s5 + $0x310] sm:$0xff]  }
 0x5ac   : > { %17664 = vmatpush3.bf16.msra.mxu1 %v19082_v37  ;;  %14658 = vmatprep.mubr.bf16.mxu1 %v9913_v15  ;;  %v19116_v37 = vld [vmem:[%s26253_s5 + $0x388] sm:$0xff]   ;;  %v19118_v15 = vld [vmem:[%s26253_s5 + $0x390] sm:$0xff]  }
 0x5ad   : > { %17665 = vmatprep.subr.bf16.mxu1 %v19083_v42  ;;  %v19117_v42 = vld [vmem:[%s26253_s5 + $0x3d0] sm:$0xff]  }
 0x5b0   : > { %17666 = vmatpush3.bf16.msra.mxu1 %v19084_v31  ;;  %v19120_v31 = vld [vmem:[%s26253_s5 + $0x398] sm:$0xff]  }
 0x5b1   : > { %17667 = vmatprep.subr.bf16.mxu1 %v19085_v16  ;;  %v19121_v16 = vld [vmem:[%s26253_s5 + $0x3e0] sm:$0xff]  }
 0x5b4   : > { %17668 = vmatpush3.bf16.msra.mxu1 %v19086_v48  ;;  %v19122_v48 = vld [vmem:[%s26253_s5 + $0x3a0] sm:$0xff]  }
 0x5b5   : > { %17669 = vmatprep.subr.bf16.mxu1 %v19087_v6  ;;  %v19123_v6 = vld [vmem:[%s26253_s5 + $0x3e8] sm:$0xff]  }
 0x5b8   : > { %17670 = vmatpush3.bf16.msra.mxu1 %v19088_v59  ;;  %v19124_v59 = vld [vmem:[%s26253_s5 + $0x3a8] sm:$0xff]  }
 0x5b9   : > { %17671 = vmatprep.subr.bf16.mxu1 %v19089_v8  ;;  %v19125_v8 = vld [vmem:[%s26253_s5 + $0x3f0] sm:$0xff]  }
 0x5bc   : > { %17672 = vmatpush3.bf16.msra.mxu1 %v19090_v9 }
 0x5bd   : > { %17673 = vmatprep.subr.bf16.mxu1 %v19091_v60 }
 0x5c0   : > { %17674 = vmatpush3.bf16.msra.mxu1 %v19092_v25 }
 0x5c1   : > { %17675 = vmatprep.subr.bf16.mxu1 %v19093_v36 }
 0x5c4   : > { %17676 = vmatpush3.bf16.msra.mxu1 %v19094_v57  ;;  %v19126_v57 = vld [vmem:[%s26253_s5 + $0x3b0] sm:$0xff]  }
 0x5c5   : > { %17677 = vmatprep.subr.bf16.mxu1 %v19095_v0 }
 0x5c8   : > { %17678 = vmatpush3.bf16.msra.mxu1 %v19096_v34  ;;  %v19127_v34 = vld [vmem:[%s26253_s5 + $0x3f8] sm:$0xff]  }
 0x5c9   : > { %17685 = vmatprep.subr.bf16.mxu1 %v19097_v40  ;;  %v19128_v40 = vld [vmem:[%s26253_s5 + $0x3b8] sm:$0xff]  }
 0x5cb   : > { %14659 = vmatmul.mubr.bf16.vlgmr.msra.gmra.mrb[84].mxu1 %v9845_v17  ;;  %v19130_v17 = vld [vmem:[%s26253_s5 + $0x400] sm:$0xff]  }
 0x5cc   : > { %17686 = vmatpush3.bf16.msra.mxu1 %v19098_v44  ;;  %14698 = vmatprep.mubr.bf16.mxu1 %v24559_v43  ;;  %v19119_v43 = vld [vmem:[%s26253_s5 + $0x3d8] sm:$0xff]   ;;  %v19129_v44 = vld [vmem:[%s26253_s5 + $0x440] sm:$0xff]  }
 0x5cd   : > { %17687 = vmatprep.subr.bf16.mxu1 %v19099_v2  ;;  %v9846_v2 = vcombine.high %v24573_v1, %v27076_v21 }
 0x5d0   : > { %17688 = vmatpush3.bf16.msra.mxu1 %v19100_v51  ;;  %v19131_v51 = vld [vmem:[%s26253_s5 + $0x448] sm:$0xff]  }
 0x5d1   : > { %17689 = vmatprep.subr.bf16.mxu1 %v19101_v27  ;;  %v19132_v27 = vld [vmem:[%s26253_s5 + $0x408] sm:$0xff]  }
 0x5d4   : > { %17690 = vmatpush3.bf16.msra.mxu1 %v19102_v41  ;;  %v19133_v41 = vld [vmem:[%s26253_s5 + $0x450] sm:$0xff]  }
 0x5d5   : > { %17691 = vmatprep.subr.bf16.mxu1 %v19103_v58  ;;  %v19135_v58 = vld [vmem:[%s26253_s5 + $0x458] sm:$0xff]  }
 0x5d8   : > { %17692 = vmatpush3.bf16.msra.mxu1 %v19104_v30  ;;  %v19136_v30 = vld [vmem:[%s26253_s5 + $0x418] sm:$0xff]  }
 0x5d9   : > { %17693 = vmatprep.subr.bf16.mxu1 %v19105_v53  ;;  %v19137_v53 = vld [vmem:[%s26253_s5 + $0x460] sm:$0xff]  }
 0x5dc   : > { %17694 = vmatpush3.bf16.msra.mxu1 %v19106_v24 }
 0x5dd   : > { %17695 = vmatprep.subr.bf16.mxu1 %v19107_v29  ;;  %v19138_v29 = vld [vmem:[%s26253_s5 + $0x420] sm:$0xff]  }
 0x5e0   : > { %17696 = vmatpush3.bf16.msra.mxu1 %v19108_v26 }
 0x5e1   : > { %17697 = vmatprep.subr.bf16.mxu1 %v19109_v4  ;;  %v19139_v4 = vld [vmem:[%s26253_s5 + $0x468] sm:$0xff]  }
 0x5e4   : > { %17698 = vmatpush3.bf16.msra.mxu1 %v19110_v56 }
 0x5e5   : > { %17699 = vmatprep.subr.bf16.mxu1 %v19111_v39 }
 0x5e8   : > { %17700 = vmatpush3.bf16.msra.mxu1 %v19112_v49 }
 0x5e9   : > { %17707 = vmatprep.subr.bf16.mxu1 %v19113_v62  ;;  %v19140_v62 = vld [vmem:[%s26253_s5 + $0x428] sm:$0xff]  }
 0x5eb   : > { %14699 = vmatmul.mubr.bf16.vlgmr.msra.gmra.mrb[88].mxu1 %v24573_v1  ;;  %v19134_v1 = vld [vmem:[%s26253_s5 + $0x410] sm:$0xff]  }
 0x5ec   : > { %17708 = vmatpush3.bf16.msra.mxu1 %v19114_v35  ;;  %14738 = vmatprep.mubr.bf16.mxu1 %v9914_v50  ;;  %v16996_v35 = vld [vmem:[%s26254_s6] ss:$0 sm:$0xff] }
 0x5ed   : > { %17709 = vmatprep.subr.bf16.mxu1 %v19115_v33  ;;  %v19141_v33 = vld [vmem:[%s26253_s5 + $0x470] sm:$0xff]  }
 0x5f0   : > { %17710 = vmatpush3.bf16.msra.mxu1 %v19116_v37 }
 0x5f1   : > { %17711 = vmatprep.subr.bf16.mxu1 %v19117_v42 }
 0x5f4   : > { %17712 = vmatpush3.bf16.msra.mxu1 %v19118_v15 }
 0x5f5   : > { %17713 = vmatprep.subr.bf16.mxu1 %v19119_v43 }
 0x5f8   : > { %17714 = vmatpush3.bf16.msra.mxu1 %v19120_v31  ;;  %v19142_v31 = vld [vmem:[%s26253_s5 + $0x430] sm:$0xff]  }
 0x5f9   : > { %17715 = vmatprep.subr.bf16.mxu1 %v19121_v16 }
 0x5fc   : > { %17716 = vmatpush3.bf16.msra.mxu1 %v19122_v48  ;;  %v19143_v48 = vld [vmem:[%s26253_s5 + $0x478] sm:$0xff]  }
 0x5fd   : > { %17717 = vmatprep.subr.bf16.mxu1 %v19123_v6 }
 0x5fe   : > { %v17569_v9 = vpop.f32.mrb[64].mxu1 }
 0x5ff   : > { %v17570_v60 = vpop.f32.mrb[65].mxu1 }
 0x600   : > { %v17571_v25 = vadd.f32 %v17570_v60, %v17569_v9  ;;  %17718 = vmatpush3.bf16.msra.mxu1 %v19124_v59  ;;  %v17572_v36 = vpop.f32.mrb[66].mxu1  ;;  %v19144_v59 = vld [vmem:[%s26253_s5 + $0x438] sm:$0xff]   ;;  %v19146_v9 = vld [vmem:[%s26253_s5 + $0x480] sm:$0xff]   ;;  %v19147_v60 = vld [vmem:[%s26253_s5 + $0x4c8] sm:$0xff]  }
 0x601   : > { %v17573_v0 = vpop.f32.mrb[67].mxu1  ;;  %17719 = vmatprep.subr.bf16.mxu1 %v19125_v8  ;;  %v19145_v8 = vld [vmem:[%s26253_s5 + $0x4c0] sm:$0xff]   ;;  %v19148_v36 = vld [vmem:[%s26253_s5 + $0x488] sm:$0xff]  }
 0x602   : > { %v14461_v42 = vadd.f32 %v17571_v25, %v16996_v35  ;;  %v10047_v25 = vcombine.high %v24618_v19, %v27076_v21  ;;  %v19150_v0 = vld [vmem:[%s26253_s5 + $0x490] sm:$0xff]   ;;  %v19160_v35 = vld [vmem:[%s26253_s5 + $0x4b8] sm:$0xff]  }
 0x604   : > { %17720 = vmatpush3.bf16.msra.mxu1 %v19126_v57  ;;  %v19149_v57 = vld [vmem:[%s26253_s5 + $0x4d0] sm:$0xff]  }
 0x605   : > { %17721 = vmatprep.subr.bf16.mxu1 %v19127_v34  ;;  %v19152_v34 = vld [vmem:[%s26253_s5 + $0x498] sm:$0xff]  }
 0x608   : > { %17722 = vmatpush3.bf16.msra.mxu1 %v19128_v40  ;;  %v19153_v40 = vld [vmem:[%s26253_s5 + $0x4e0] sm:$0xff]  }
 0x609   : > { %17729 = vmatprep.subr.bf16.mxu1 %v19129_v44 }
 0x60b   : > { %14739 = vmatmul.mubr.bf16.vlgmr.msra.gmra.mrb[92].mxu1 %v9846_v2 }
 0x60c   : > { %17730 = vmatpush3.bf16.msra.mxu1 %v19130_v17  ;;  %14778 = vmatprep.mubr.bf16.mxu1 %v24618_v19  ;;  %v19151_v19 = vld [vmem:[%s26253_s5 + $0x4d8] sm:$0xff]   ;;  %v19154_v17 = vld [vmem:[%s26253_s5 + $0x4a0] sm:$0xff]  }
 0x60d   : > { %17731 = vmatprep.subr.bf16.mxu1 %v19131_v51  ;;  %v19155_v51 = vld [vmem:[%s26253_s5 + $0x4e8] sm:$0xff]  }
 0x610   : > { %17732 = vmatpush3.bf16.msra.mxu1 %v19132_v27 }
 0x611   : > { %17733 = vmatprep.subr.bf16.mxu1 %v19133_v41 }
 0x614   : > { %17734 = vmatpush3.bf16.msra.mxu1 %v19134_v1 }
 0x615   : > { %17735 = vmatprep.subr.bf16.mxu1 %v19135_v58  ;;  %v19156_v58 = vld [vmem:[%s26253_s5 + $0x4a8] sm:$0xff]  }
 0x618   : > { %17736 = vmatpush3.bf16.msra.mxu1 %v19136_v30  ;;  %v19157_v30 = vld [vmem:[%s26253_s5 + $0x4f0] sm:$0xff]  }
 0x619   : > { %v18207_v24 = vpop.f32.mrb[128].mxu0  ;;  %17737 = vmatprep.subr.bf16.mxu1 %v19137_v53 }
 0x61a   : > { %v18208_v26 = vpop.f32.mrb[129].mxu0 }
 0x61b   : > { %v25142_v56 = vadd.f32 %v18208_v26, %v18207_v24  ;;  %v18210_v39 = vpop.f32.mrb[130].mxu0 }
 0x61c   : > { %v18211_v49 = vpop.f32.mrb[131].mxu0  ;;  %17738 = vmatpush3.bf16.msra.mxu1 %v19138_v29 }
 0x61d   : > { %17739 = vmatprep.subr.bf16.mxu1 %v19139_v4  ;;  %v19158_v4 = vld [vmem:[%s26253_s5 + $0x4b0] sm:$0xff]   ;;  %v19159_v49 = vld [vmem:[%s26253_s5 + $0x4f8] sm:$0xff]  }
 0x61e   : > { %v17591_v50 = vpop.f32.mrb[68].mxu1 }
 0x61f   : > { %v17592_v37 = vpop.f32.mrb[69].mxu1 }
 0x620   : > { %v17593_v15 = vadd.f32 %v17592_v37, %v17591_v50  ;;  %v17594_v43 = vpop.f32.mrb[70].mxu1  ;;  %17740 = vmatpush3.bf16.msra.mxu1 %v19140_v62  ;;  %v19162_v50 = vld [vmem:[%s26253_s5 + $0x500] sm:$0xff]   ;;  %v9979_v37 = vcombine.high %v24599_v12, %v27076_v21 }
 0x621   : > { %v17595_v16 = vpop.f32.mrb[71].mxu1  ;;  %17741 = vmatprep.subr.bf16.mxu1 %v19141_v33  ;;  %v19161_v33 = vld [vmem:[%s26253_s5 + $0x540] sm:$0xff]   ;;  %v19165_v43 = vld [vmem:[%s26253_s5 + $0x550] sm:$0xff]  }
 0x622   : > { %v14501_v6 = vadd.f32 %v17593_v15, %v14461_v42  ;;  %v19163_v42 = vld [vmem:[%s26253_s5 + $0x548] sm:$0xff]   ;;  %v19168_v16 = vld [vmem:[%s26253_s5 + $0x518] sm:$0xff]  }
 0x623   : > { %v19164_v15 = vld [vmem:[%s26253_s5 + $0x508] sm:$0xff]  }
 0x624   : > { %17742 = vmatpush3.bf16.msra.mxu1 %v19142_v31  ;;  %v19167_v31 = vld [vmem:[%s26253_s5 + $0x558] sm:$0xff]  }
 0x625   : > { %17743 = vmatprep.subr.bf16.mxu1 %v19143_v48  ;;  %v19169_v48 = vld [vmem:[%s26253_s5 + $0x560] sm:$0xff]  }
 0x628   : > { %17744 = vmatpush3.bf16.msra.mxu1 %v19144_v59  ;;  %v19171_v59 = vld [vmem:[%s26253_s5 + $0x568] sm:$0xff]  }
 0x629   : > { %17751 = vmatprep.subr.bf16.mxu1 %v19145_v8  ;;  %v19172_v8 = vld [vmem:[%s26253_s5 + $0x528] sm:$0xff]  }
 0x62b   : > { %14779 = vmatmul.mubr.bf16.vlgmr.msra.gmra.mrb[96].mxu1 %v24599_v12  ;;  %v19166_v12 = vld [vmem:[%s26253_s5 + $0x510] sm:$0xff]  }
 0x62c   : > { %17752 = vmatpush3.bf16.msra.mxu1 %v19146_v9  ;;  %14818 = vmatprep.mubr.bf16.mxu1 %v10047_v25  ;;  %v19173_v9 = vld [vmem:[%s26253_s5 + $0x570] sm:$0xff]  }
 0x62d   : > { %17753 = vmatprep.subr.bf16.mxu1 %v19147_v60 }
 0x630   : > { %17754 = vmatpush3.bf16.msra.mxu1 %v19148_v36 }
 0x631   : > { %17755 = vmatprep.subr.bf16.mxu1 %v19149_v57 }
 0x634   : > { %17756 = vmatpush3.bf16.msra.mxu1 %v19150_v0  ;;  %v19174_v0 = vld [vmem:[%s26253_s5 + $0x530] sm:$0xff]  }
 0x635   : > { %17757 = vmatprep.subr.bf16.mxu1 %v19151_v19 }
 0x638   : > { %17758 = vmatpush3.bf16.msra.mxu1 %v19152_v34  ;;  %v19175_v34 = vld [vmem:[%s26253_s5 + $0x578] sm:$0xff]  }
 0x639   : > { %v18251_v44 = vpop.f32.mrb[132].mxu0  ;;  %17759 = vmatprep.subr.bf16.mxu1 %v19153_v40 }
 0x63a   : > { %v18252_v2 = vpop.f32.mrb[133].mxu0 }
 0x63b   : > { %v25198_v27 = vadd.f32 %v18252_v2, %v18251_v44  ;;  %v18254_v41 = vpop.f32.mrb[134].mxu0  ;;  %v19176_v44 = vld [vmem:[%s26253_s5 + $0x538] sm:$0xff]   ;;  %v19178_v2 = vld [vmem:[%s26253_s5 + $0x580] sm:$0xff]  }
 0x63c   : > { %v18255_v1 = vpop.f32.mrb[135].mxu0  ;;  %17760 = vmatpush3.bf16.msra.mxu1 %v19154_v17  ;;  %v19177_v17 = vld [vmem:[%s26253_s5 + $0x5c0] sm:$0xff]   ;;  %v10048_v41 = vcombine.high %v24621_v63, %v27076_v21 }
 0x63d   : > { %17761 = vmatprep.subr.bf16.mxu1 %v19155_v51  ;;  %v19179_v51 = vld [vmem:[%s26253_s5 + $0x5c8] sm:$0xff]  }
 0x63e   : > { %v17613_v53 = vpop.f32.mrb[72].mxu1  ;;  %v19180_v1 = vld [vmem:[%s26253_s5 + $0x588] sm:$0xff]  }
 0x63f   : > { %v17614_v24 = vpop.f32.mrb[73].mxu1 }
 0x640   : > { %v17615_v29 = vadd.f32 %v17614_v24, %v17613_v53  ;;  %v17616_v26 = vpop.f32.mrb[74].mxu1  ;;  %17762 = vmatpush3.bf16.msra.mxu1 %v19156_v58  ;;  %v19181_v58 = vld [vmem:[%s26253_s5 + $0x5d0] sm:$0xff]   ;;  %v19184_v53 = vld [vmem:[%s26253_s5 + $0x598] sm:$0xff]   ;;  %v19185_v24 = vld [vmem:[%s26253_s5 + $0x5e0] sm:$0xff]  }
 0x641   : > { %v17617_v39 = vpop.f32.mrb[75].mxu1  ;;  %17763 = vmatprep.subr.bf16.mxu1 %v19157_v30  ;;  %v19182_v30 = vld [vmem:[%s26253_s5 + $0x590] sm:$0xff]   ;;  %v19187_v26 = vld [vmem:[%s26253_s5 + $0x5e8] sm:$0xff]  }
 0x642   : > { %v14541_v62 = vadd.f32 %v17615_v29, %v14501_v6  ;;  %v19170_v6 = vld [vmem:[%s26253_s5 + $0x520] sm:$0xff]   ;;  %v19189_v39 = vld [vmem:[%s26253_s5 + $0x5f0] sm:$0xff]  }
 0x643   : > { %v19186_v29 = vld [vmem:[%s26253_s5 + $0x5a0] sm:$0xff]  }
 0x644   : > { %17764 = vmatpush3.bf16.msra.mxu1 %v19158_v4  ;;  %v19188_v4 = vld [vmem:[%s26253_s5 + $0x5a8] sm:$0xff]  }
 0x645   : > { %17765 = vmatprep.subr.bf16.mxu1 %v19159_v49 }
 0x648   : > { %17766 = vmatpush3.bf16.msra.mxu1 %v19160_v35 }
 0x649   : > { %17773 = vmatprep.subr.bf16.mxu1 %v19161_v33 }
 0x64b   : > { %14819 = vmatmul.mubr.bf16.vlgmr.msra.gmra.mrb[100].mxu1 %v9979_v37 }
 0x64c   : > { %17774 = vmatpush3.bf16.msra.mxu1 %v19162_v50  ;;  %14858 = vmatprep.mubr.bf16.mxu1 %v24621_v63  ;;  %v19183_v63 = vld [vmem:[%s26253_s5 + $0x5d8] sm:$0xff]   ;;  %v19190_v50 = vld [vmem:[%s26253_s5 + $0x5b0] sm:$0xff]  }
 0x64d   : > { %17775 = vmatprep.subr.bf16.mxu1 %v19163_v42  ;;  %v19191_v42 = vld [vmem:[%s26253_s5 + $0x5f8] sm:$0xff]  }
 0x650   : > { %17776 = vmatpush3.bf16.msra.mxu1 %v19164_v15 }
 0x651   : > { %17777 = vmatprep.subr.bf16.mxu1 %v19165_v43  ;;  %v19192_v43 = vld [vmem:[%s26253_s5 + $0x5b8] sm:$0xff]  }
 0x654   : > { %17778 = vmatpush3.bf16.msra.mxu1 %v19166_v12  ;;  %v19193_v12 = vld [vmem:[%s26253_s5 + $0x640] sm:$0xff]  }
 0x655   : > { %17779 = vmatprep.subr.bf16.mxu1 %v19167_v31  ;;  %v19194_v31 = vld [vmem:[%s26253_s5 + $0x600] sm:$0xff]  }
 0x658   : > { %17780 = vmatpush3.bf16.msra.mxu1 %v19168_v16  ;;  %v9980_v16 = vcombine.high %v24602_v61, %v27076_v21 }
 0x659   : > { %17781 = vmatprep.subr.bf16.mxu1 %v19169_v48  ;;  %v19195_v48 = vld [vmem:[%s26253_s5 + $0x648] sm:$0xff]  }
 0x65c   : > { %17782 = vmatpush3.bf16.msra.mxu1 %v19170_v6  ;;  %v19196_v6 = vld [vmem:[%s26253_s5 + $0x608] sm:$0xff]  }
 0x65d   : > { %17783 = vmatprep.subr.bf16.mxu1 %v19171_v59  ;;  %v19197_v59 = vld [vmem:[%s26253_s5 + $0x650] sm:$0xff]  }
 0x65e   : > { %v17635_v60 = vpop.f32.mrb[76].mxu1 }
 0x65f   : > { %v17636_v25 = vpop.f32.mrb[77].mxu1 }
 0x660   : > { %v17637_v36 = vadd.f32 %v17636_v25, %v17635_v60  ;;  %v17638_v57 = vpop.f32.mrb[78].mxu1  ;;  %17784 = vmatpush3.bf16.msra.mxu1 %v19172_v8  ;;  %v19199_v8 = vld [vmem:[%s26253_s5 + $0x658] sm:$0xff]   ;;  %v19201_v60 = vld [vmem:[%s26253_s5 + $0x660] sm:$0xff]  }
 0x661   : > { %v17639_v19 = vpop.f32.mrb[79].mxu1  ;;  %17785 = vmatprep.subr.bf16.mxu1 %v19173_v9  ;;  %v19200_v9 = vld [vmem:[%s26253_s5 + $0x618] sm:$0xff]   ;;  %v19202_v25 = vld [vmem:[%s26253_s5 + $0x620] sm:$0xff]   ;;  %v19204_v57 = vld [vmem:[%s26253_s5 + $0x628] sm:$0xff]  }
 0x662   : > { %v14581_v40 = vadd.f32 %v17637_v36, %v14541_v62  ;;  %v19203_v36 = vld [vmem:[%s26253_s5 + $0x668] sm:$0xff]  }
 0x664   : > { %17786 = vmatpush3.bf16.msra.mxu1 %v19174_v0  ;;  %v19205_v0 = vld [vmem:[%s26253_s5 + $0x670] sm:$0xff]  }
 0x665   : > { %17787 = vmatprep.subr.bf16.mxu1 %v19175_v34 }
 0x668   : > { %17788 = vmatpush3.bf16.msra.mxu1 %v19176_v44 }
 0x669   : > { %17795 = vmatprep.subr.bf16.mxu1 %v19177_v17  ;;  %v19206_v17 = vld [vmem:[%s26253_s5 + $0x630] sm:$0xff]  }
 0x66b   : > { %14859 = vmatmul.mubr.bf16.vlgmr.msra.gmra.mrb[104].mxu1 %v24602_v61  ;;  %v19198_v61 = vld [vmem:[%s26253_s5 + $0x610] sm:$0xff]  }
 0x66c   : > { %17796 = vmatpush3.bf16.msra.mxu1 %v19178_v2  ;;  %14898 = vmatprep.mubr.bf16.mxu1 %v10048_v41 }
 0x66d   : > { %17797 = vmatprep.subr.bf16.mxu1 %v19179_v51  ;;  %v19207_v51 = vld [vmem:[%s26253_s5 + $0x678] sm:$0xff]  }
 0x670   : > { %17798 = vmatpush3.bf16.msra.mxu1 %v19180_v1  ;;  %v19208_v1 = vld [vmem:[%s26253_s5 + $0x638] sm:$0xff]  }
 0x671   : > { %17799 = vmatprep.subr.bf16.mxu1 %v19181_v58  ;;  %v19209_v58 = vld [vmem:[%s26253_s5 + $0x6c0] sm:$0xff]  }
 0x674   : > { %17800 = vmatpush3.bf16.msra.mxu1 %v19182_v30  ;;  %v19210_v30 = vld [vmem:[%s26253_s5 + $0x680] sm:$0xff]  }
 0x675   : > { %17801 = vmatprep.subr.bf16.mxu1 %v19183_v63  ;;  %v19211_v63 = vld [vmem:[%s26253_s5 + $0x6c8] sm:$0xff]  }
 0x678   : > { %17802 = vmatpush3.bf16.msra.mxu1 %v19184_v53  ;;  %v10049_v53 = vcombine.high %v24632_v14, %v27076_v21 }
 0x679   : > { %17803 = vmatprep.subr.bf16.mxu1 %v19185_v24  ;;  %v19212_v24 = vld [vmem:[%s26253_s5 + $0x688] sm:$0xff]  }
 0x67c   : > { %17804 = vmatpush3.bf16.msra.mxu1 %v19186_v29  ;;  %v19213_v29 = vld [vmem:[%s26253_s5 + $0x6d0] sm:$0xff]  }
 0x67d   : > { %17805 = vmatprep.subr.bf16.mxu1 %v19187_v26  ;;  %v19214_v26 = vld [vmem:[%s26253_s5 + $0x690] sm:$0xff]  }
 0x67e   : > { %v17657_v49 = vpop.f32.mrb[80].mxu1 }
 0x67f   : > { %v17658_v62 = vpop.f32.mrb[81].mxu1 }
 0x680   : > { %v17659_v35 = vadd.f32 %v17658_v62, %v17657_v49  ;;  %v17660_v33 = vpop.f32.mrb[82].mxu1  ;;  %17806 = vmatpush3.bf16.msra.mxu1 %v19188_v4  ;;  %v19216_v4 = vld [vmem:[%s26253_s5 + $0x698] sm:$0xff]   ;;  %v19218_v49 = vld [vmem:[%s26253_s5 + $0x6a0] sm:$0xff]   ;;  %v19219_v62 = vld [vmem:[%s26253_s5 + $0x6e8] sm:$0xff]  }
 0x681   : > { %v17661_v37 = vpop.f32.mrb[83].mxu1  ;;  %17807 = vmatprep.subr.bf16.mxu1 %v19189_v39  ;;  %v19217_v39 = vld [vmem:[%s26253_s5 + $0x6e0] sm:$0xff]   ;;  %v19221_v33 = vld [vmem:[%s26253_s5 + $0x6f0] sm:$0xff]  }
 0x682   : > { %v14621_v15 = vadd.f32 %v17659_v35, %v14581_v40  ;;  %v19220_v35 = vld [vmem:[%s26253_s5 + $0x6a8] sm:$0xff]  }
 0x684   : > { %17808 = vmatpush3.bf16.msra.mxu1 %v19190_v50 }
 0x685   : > { %17809 = vmatprep.subr.bf16.mxu1 %v19191_v42 }
 0x688   : > { %17810 = vmatpush3.bf16.msra.mxu1 %v19192_v43  ;;  %v19222_v43 = vld [vmem:[%s26253_s5 + $0x6b0] sm:$0xff]  }
 0x689   : > { %17817 = vmatprep.subr.bf16.mxu1 %v19193_v12 }
 0x68b   : > { %14899 = vmatmul.mubr.bf16.vlgmr.msra.gmra.mrb[108].mxu1 %v9980_v16 }
 0x68c   : > { %17818 = vmatpush3.bf16.msra.mxu1 %v19194_v31  ;;  %14938 = vmatprep.mubr.bf16.mxu1 %v24632_v14  ;;  %v19215_v14 = vld [vmem:[%s26253_s5 + $0x6d8] sm:$0xff]  }
 0x68d   : > { %17819 = vmatprep.subr.bf16.mxu1 %v19195_v48  ;;  %v19223_v31 = vld [vmem:[%s26253_s5 + $0x6f8] sm:$0xff]  }
 0x68e   : > { %v19224_v48 = vld [vmem:[%s26253_s5 + $0x6b8] sm:$0xff]  }
 0x690   : > { %17820 = vmatpush3.bf16.msra.mxu1 %v19196_v6  ;;  %v19225_v6 = vld [vmem:[%s26253_s5 + $0x740] sm:$0xff]  }
 0x691   : > { %17821 = vmatprep.subr.bf16.mxu1 %v19197_v59  ;;  %v19226_v59 = vld [vmem:[%s26253_s5 + $0x700] sm:$0xff]  }
 0x694   : > { %17822 = vmatpush3.bf16.msra.mxu1 %v19198_v61  ;;  %v9981_v61 = vcombine.high %v24612_v32, %v27076_v21 }
 0x695   : > { %17823 = vmatprep.subr.bf16.mxu1 %v19199_v8  ;;  %v19227_v8 = vld [vmem:[%s26253_s5 + $0x748] sm:$0xff]  }
 0x698   : > { %17824 = vmatpush3.bf16.msra.mxu1 %v19200_v9  ;;  %v19228_v9 = vld [vmem:[%s26253_s5 + $0x708] sm:$0xff]  }
 0x699   : > { %17825 = vmatprep.subr.bf16.mxu1 %v19201_v60  ;;  %v19229_v60 = vld [vmem:[%s26253_s5 + $0x750] sm:$0xff]  }
 0x69c   : > { %17826 = vmatpush3.bf16.msra.mxu1 %v19202_v25  ;;  %v19231_v25 = vld [vmem:[%s26253_s5 + $0x758] sm:$0xff]  }
 0x69d   : > { %17827 = vmatprep.subr.bf16.mxu1 %v19203_v36  ;;  %v19232_v36 = vld [vmem:[%s26253_s5 + $0x718] sm:$0xff]  }
 0x69e   : > { %v17679_v19 = vpop.f32.mrb[84].mxu1 }
 0x69f   : > { %v17680_v34 = vpop.f32.mrb[85].mxu1 }
 0x6a0   : > { %v17681_v40 = vadd.f32 %v17680_v34, %v17679_v19  ;;  %v17682_v44 = vpop.f32.mrb[86].mxu1  ;;  %17828 = vmatpush3.bf16.msra.mxu1 %v19204_v57  ;;  %v19233_v57 = vld [vmem:[%s26253_s5 + $0x760] sm:$0xff]   ;;  %v19235_v19 = vld [vmem:[%s26253_s5 + $0x768] sm:$0xff]  }
 0x6a1   : > { %v17683_v2 = vpop.f32.mrb[87].mxu1  ;;  %17829 = vmatprep.subr.bf16.mxu1 %v19205_v0  ;;  %v19234_v0 = vld [vmem:[%s26253_s5 + $0x720] sm:$0xff]   ;;  %v19236_v34 = vld [vmem:[%s26253_s5 + $0x728] sm:$0xff]  }
 0x6a2   : > { %v14661_v41 = vadd.f32 %v17681_v40, %v14621_v15  ;;  %v19237_v40 = vld [vmem:[%s26253_s5 + $0x770] sm:$0xff]  }
 0x6a4   : > { %17830 = vmatpush3.bf16.msra.mxu1 %v19206_v17 }
 0x6a5   : > { %17831 = vmatprep.subr.bf16.mxu1 %v19207_v51 }
 0x6a8   : > { %17832 = vmatpush3.bf16.msra.mxu1 %v19208_v1 }
 0x6a9   : > { %17839 = vmatprep.subr.bf16.mxu1 %v19209_v58  ;;  %v19239_v58 = vld [vmem:[%s26253_s5 + $0x778] sm:$0xff]  }
 0x6ab   : > { %14939 = vmatmul.mubr.bf16.vlgmr.msra.gmra.mrb[112].mxu1 %v24612_v32  ;;  %v19230_v32 = vld [vmem:[%s26253_s5 + $0x710] sm:$0xff]  }
 0x6ac   : > { %17840 = vmatpush3.bf16.msra.mxu1 %v19210_v30  ;;  %14978 = vmatprep.mubr.bf16.mxu1 %v10049_v53  ;;  %v19241_v53 = vld [vmem:[%s26253_s5 + $0x7c0] sm:$0xff]  }
 0x6ad   : > { %17841 = vmatprep.subr.bf16.mxu1 %v19211_v63  ;;  %v19240_v63 = vld [vmem:[%s26253_s5 + $0x738] sm:$0xff]  }
 0x6b0   : > { %17842 = vmatpush3.bf16.msra.mxu1 %v19212_v24  ;;  %v19242_v24 = vld [vmem:[%s26253_s5 + $0x780] sm:$0xff]  }
 0x6b1   : > { %17843 = vmatprep.subr.bf16.mxu1 %v19213_v29  ;;  %v19243_v29 = vld [vmem:[%s26253_s5 + $0x7c8] sm:$0xff]  }
 0x6b4   : > { %17844 = vmatpush3.bf16.msra.mxu1 %v19214_v26  ;;  %v10050_v26 = vcombine.high %v24655_v52, %v27076_v21 }
 0x6b5   : > { %17845 = vmatprep.subr.bf16.mxu1 %v19215_v14  ;;  %v19244_v14 = vld [vmem:[%s26253_s5 + $0x788] sm:$0xff]  }
 0x6b8   : > { %17846 = vmatpush3.bf16.msra.mxu1 %v19216_v4  ;;  %v19245_v4 = vld [vmem:[%s26253_s5 + $0x7d0] sm:$0xff]  }
 0x6b9   : > { %17847 = vmatprep.subr.bf16.mxu1 %v19217_v39  ;;  %v19246_v39 = vld [vmem:[%s26253_s5 + $0x790] sm:$0xff]  }
 0x6bc   : > { %17848 = vmatpush3.bf16.msra.mxu1 %v19218_v49  ;;  %v19248_v49 = vld [vmem:[%s26253_s5 + $0x798] sm:$0xff]  }
 0x6bd   : > { %17849 = vmatprep.subr.bf16.mxu1 %v19219_v62  ;;  %v19249_v62 = vld [vmem:[%s26253_s5 + $0x7e0] sm:$0xff]  }
 0x6be   : > { %v17701_v50 = vpop.f32.mrb[88].mxu1 }
 0x6bf   : > { %v17702_v37 = vpop.f32.mrb[89].mxu1 }
 0x6c0   : > { %v17703_v42 = vadd.f32 %v17702_v37, %v17701_v50  ;;  %v17704_v15 = vpop.f32.mrb[90].mxu1  ;;  %17850 = vmatpush3.bf16.msra.mxu1 %v19220_v35  ;;  %v19250_v35 = vld [vmem:[%s26253_s5 + $0x7a0] sm:$0xff]   ;;  %v19252_v50 = vld [vmem:[%s26253_s5 + $0x7a8] sm:$0xff]   ;;  %v19253_v37 = vld [vmem:[%s26253_s5 + $0x7f0] sm:$0xff]  }
 0x6c1   : > { %v17705_v12 = vpop.f32.mrb[91].mxu1  ;;  %17851 = vmatprep.subr.bf16.mxu1 %v19221_v33  ;;  %v19251_v33 = vld [vmem:[%s26253_s5 + $0x7e8] sm:$0xff]  }
 0x6c2   : > { %v14701_v16 = vadd.f32 %v17703_v42, %v14661_v41  ;;  %v19238_v41 = vld [vmem:[%s26253_s5 + $0x730] sm:$0xff]  }
 0x6c4   : > { %17852 = vmatpush3.bf16.msra.mxu1 %v19222_v43 }
 0x6c5   : > { %17853 = vmatprep.subr.bf16.mxu1 %v19223_v31  ;;  %v19254_v31 = vld [vmem:[%s26253_s5 + $0x7b0] sm:$0xff]  }
 0x6c8   : > { %17854 = vmatpush3.bf16.msra.mxu1 %v19224_v48  ;;  %v19255_v48 = vld [vmem:[%s26253_s5 + $0x7f8] sm:$0xff]  }
 0x6c9   : > { %17861 = vmatprep.subr.bf16.mxu1 %v19225_v6 }
 0x6cb   : > { %14979 = vmatmul.mubr.bf16.vlgmr.msra.gmra.mrb[116].mxu1 %v9981_v61  ;;  %v19257_v61 = vld [vmem:[%s26253_s5 + $0x840] sm:$0xff]  }
 0x6cc   : > { %17862 = vmatpush3.bf16.msra.mxu1 %v19226_v59  ;;  %15018 = vmatprep.mubr.bf16.mxu1 %v24655_v52  ;;  %v19247_v52 = vld [vmem:[%s26253_s5 + $0x7d8] sm:$0xff]  }
 0x6cd   : > { %17863 = vmatprep.subr.bf16.mxu1 %v19227_v8  ;;  %v19256_v59 = vld [vmem:[%s26253_s5 + $0x7b8] sm:$0xff]   ;;  %v19258_v8 = vld [vmem:[%s26253_s5 + $0x800] sm:$0xff]  }
 0x6d0   : > { %17864 = vmatpush3.bf16.msra.mxu1 %v19228_v9  ;;  %v9982_v9 = vcombine.high %v24658_v3, %v27076_v21 }
 0x6d1   : > { %17865 = vmatprep.subr.bf16.mxu1 %v19229_v60  ;;  %v19259_v60 = vld [vmem:[%s26253_s5 + $0x848] sm:$0xff]  }
 0x6d4   : > { %17866 = vmatpush3.bf16.msra.mxu1 %v19230_v32  ;;  %v19260_v32 = vld [vmem:[%s26253_s5 + $0x808] sm:$0xff]  }
 0x6d5   : > { %17867 = vmatprep.subr.bf16.mxu1 %v19231_v25  ;;  %v19261_v25 = vld [vmem:[%s26253_s5 + $0x850] sm:$0xff]  }
 0x6d8   : > { %17868 = vmatpush3.bf16.msra.mxu1 %v19232_v36  ;;  %v19263_v36 = vld [vmem:[%s26253_s5 + $0x858] sm:$0xff]  }
 0x6d9   : > { %17869 = vmatprep.subr.bf16.mxu1 %v19233_v57  ;;  %v19264_v57 = vld [vmem:[%s26253_s5 + $0x818] sm:$0xff]  }
 0x6dc   : > { %17870 = vmatpush3.bf16.msra.mxu1 %v19234_v0  ;;  %v19265_v0 = vld [vmem:[%s26253_s5 + $0x860] sm:$0xff]  }
 0x6dd   : > { %17871 = vmatprep.subr.bf16.mxu1 %v19235_v19  ;;  %v19266_v19 = vld [vmem:[%s26253_s5 + $0x820] sm:$0xff]  }
 0x6de   : > { %v17723_v44 = vpop.f32.mrb[92].mxu1 }
 0x6df   : > { %v17724_v17 = vpop.f32.mrb[93].mxu1 }
 0x6e0   : > { %v17725_v2 = vadd.f32 %v17724_v17, %v17723_v44  ;;  %v17726_v51 = vpop.f32.mrb[94].mxu1  ;;  %17872 = vmatpush3.bf16.msra.mxu1 %v19236_v34  ;;  %v19267_v34 = vld [vmem:[%s26253_s5 + $0x868] sm:$0xff]   ;;  %v19269_v44 = vld [vmem:[%s26253_s5 + $0x870] sm:$0xff]  }
 0x6e1   : > { %v17727_v1 = vpop.f32.mrb[95].mxu1  ;;  %17873 = vmatprep.subr.bf16.mxu1 %v19237_v40  ;;  %v19268_v40 = vld [vmem:[%s26253_s5 + $0x828] sm:$0xff]  }
 0x6e2   : > { %v14741_v30 = vadd.f32 %v17725_v2, %v14701_v16  ;;  %v19270_v1 = vld [vmem:[%s26253_s5 + $0x830] sm:$0xff]  }
 0x6e4   : > { %17874 = vmatpush3.bf16.msra.mxu1 %v19238_v41 }
 0x6e5   : > { %17875 = vmatprep.subr.bf16.mxu1 %v19239_v58 }
 0x6e8   : > { %17876 = vmatpush3.bf16.msra.mxu1 %v19240_v63 }
 0x6e9   : > { %17883 = vmatprep.subr.bf16.mxu1 %v19241_v53  ;;  %v19272_v53 = vld [vmem:[%s26253_s5 + $0x838] sm:$0xff]  }
 0x6eb   : > { %15019 = vmatmul.mubr.bf16.vlgmr.msra.gmra.mrb[120].mxu1 %v24658_v3  ;;  %v19262_v3 = vld [vmem:[%s26253_s5 + $0x810] sm:$0xff]  }
 0x6ec   : > { %17884 = vmatpush3.bf16.msra.mxu1 %v19242_v24  ;;  %15058 = vmatprep.mubr.bf16.mxu1 %v10050_v26  ;;  %v19273_v24 = vld [vmem:[%s26253_s5 + $0x8c0] sm:$0xff]   ;;  %v19275_v26 = vld [vmem:[%s26253_s5 + $0x8c8] sm:$0xff]  }
 0x6ed   : > { %17885 = vmatprep.subr.bf16.mxu1 %v19243_v29  ;;  %v19274_v29 = vld [vmem:[%s26253_s5 + $0x880] sm:$0xff]  }
 0x6f0   : > { %17886 = vmatpush3.bf16.msra.mxu1 %v19244_v14  ;;  %v10183_v14 = vcombine.high %v24687_v13, %v27076_v21 }
 0x6f1   : > { %17887 = vmatprep.subr.bf16.mxu1 %v19245_v4  ;;  %v19276_v4 = vld [vmem:[%s26253_s5 + $0x888] sm:$0xff]  }
 0x6f4   : > { %17888 = vmatpush3.bf16.msra.mxu1 %v19246_v39  ;;  %v19277_v39 = vld [vmem:[%s26253_s5 + $0x8d0] sm:$0xff]  }
 0x6f5   : > { %17889 = vmatprep.subr.bf16.mxu1 %v19247_v52  ;;  %v19278_v52 = vld [vmem:[%s26253_s5 + $0x890] sm:$0xff]  }
 0x6f8   : > { %17890 = vmatpush3.bf16.msra.mxu1 %v19248_v49  ;;  %v19280_v49 = vld [vmem:[%s26253_s5 + $0x898] sm:$0xff]  }
 0x6f9   : > { %17891 = vmatprep.subr.bf16.mxu1 %v19249_v62  ;;  %v19281_v62 = vld [vmem:[%s26253_s5 + $0x8e0] sm:$0xff]  }
 0x6fc   : > { %17892 = vmatpush3.bf16.msra.mxu1 %v19250_v35  ;;  %v19282_v35 = vld [vmem:[%s26253_s5 + $0x8a0] sm:$0xff]  }
 0x6fd   : > { %17893 = vmatprep.subr.bf16.mxu1 %v19251_v33  ;;  %v19283_v33 = vld [vmem:[%s26253_s5 + $0x8e8] sm:$0xff]  }
 0x6fe   : > { %v17745_v42 = vpop.f32.mrb[96].mxu1 }
 0x6ff   : > { %v17746_v15 = vpop.f32.mrb[97].mxu1 }
 0x700   : > { %v17747_v43 = vadd.f32 %v17746_v15, %v17745_v42  ;;  %v17748_v12 = vpop.f32.mrb[98].mxu1  ;;  %17894 = vmatpush3.bf16.msra.mxu1 %v19252_v50  ;;  %v19284_v50 = vld [vmem:[%s26253_s5 + $0x8a8] sm:$0xff]  }
 0x701   : > { %v17749_v16 = vpop.f32.mrb[99].mxu1  ;;  %17895 = vmatprep.subr.bf16.mxu1 %v19253_v37  ;;  %v19285_v37 = vld [vmem:[%s26253_s5 + $0x8f0] sm:$0xff]  }
 0x702   : > { %v14781_v6 = vadd.f32 %v17747_v43, %v14741_v30  ;;  %v19271_v30 = vld [vmem:[%s26253_s5 + $0x878] sm:$0xff]  }
 0x704   : > { %17896 = vmatpush3.bf16.msra.mxu1 %v19254_v31  ;;  %v19286_v31 = vld [vmem:[%s26253_s5 + $0x8b0] sm:$0xff]  }
 0x705   : > { %17897 = vmatprep.subr.bf16.mxu1 %v19255_v48  ;;  %v19287_v48 = vld [vmem:[%s26253_s5 + $0x8f8] sm:$0xff]  }
 0x708   : > { %17898 = vmatpush3.bf16.msra.mxu1 %v19256_v59  ;;  %v19288_v59 = vld [vmem:[%s26253_s5 + $0x8b8] sm:$0xff]  }
 0x709   : > { %17905 = vmatprep.subr.bf16.mxu1 %v19257_v61  ;;  %v19289_v61 = vld [vmem:[%s26253_s5 + $0x940] sm:$0xff]  }
 0x70b   : > { %15059 = vmatmul.mubr.bf16.vlgmr.msra.gmra.mrb[124].mxu1 %v9982_v9  ;;  %v10115_v9 = vcombine.high %v24668_v20, %v27076_v21 }
 0x70c   : > { %17906 = vmatpush3.bf16.msra.mxu1 %v19258_v8  ;;  %15098 = vmatprep.mubr.bf16.mxu1 %v24687_v13  ;;  %v19279_v13 = vld [vmem:[%s26253_s5 + $0x8d8] sm:$0xff]   ;;  %v19290_v8 = vld [vmem:[%s26253_s5 + $0x900] sm:$0xff]  }
 0x70d   : > { %17907 = vmatprep.subr.bf16.mxu1 %v19259_v60  ;;  %v19291_v60 = vld [vmem:[%s26253_s5 + $0x948] sm:$0xff]  }
 0x710   : > { %17908 = vmatpush3.bf16.msra.mxu1 %v19260_v32  ;;  %v19292_v32 = vld [vmem:[%s26253_s5 + $0x908] sm:$0xff]  }
 0x711   : > { %17909 = vmatprep.subr.bf16.mxu1 %v19261_v25  ;;  %v19293_v25 = vld [vmem:[%s26253_s5 + $0x950] sm:$0xff]  }
 0x714   : > { %17910 = vmatpush3.bf16.msra.mxu1 %v19262_v3  ;;  %v19295_v3 = vld [vmem:[%s26253_s5 + $0x958] sm:$0xff]  }
 0x715   : > { %17911 = vmatprep.subr.bf16.mxu1 %v19263_v36  ;;  %v19296_v36 = vld [vmem:[%s26253_s5 + $0x918] sm:$0xff]  }
 0x718   : > { %17912 = vmatpush3.bf16.msra.mxu1 %v19264_v57  ;;  %v19297_v57 = vld [vmem:[%s26253_s5 + $0x960] sm:$0xff]  }
 0x719   : > { %17913 = vmatprep.subr.bf16.mxu1 %v19265_v0  ;;  %v19298_v0 = vld [vmem:[%s26253_s5 + $0x920] sm:$0xff]  }
 0x71c   : > { %17914 = vmatpush3.bf16.msra.mxu1 %v19266_v19  ;;  %v19299_v19 = vld [vmem:[%s26253_s5 + $0x968] sm:$0xff]  }
 0x71d   : > { %17915 = vmatprep.subr.bf16.mxu1 %v19267_v34  ;;  %v19300_v34 = vld [vmem:[%s26253_s5 + $0x928] sm:$0xff]  }
 0x71e   : > { %v17767_v17 = vpop.f32.mrb[100].mxu1 }
 0x71f   : > { %v17768_v2 = vpop.f32.mrb[101].mxu1 }
 0x720   : > { %v17769_v51 = vadd.f32 %v17768_v2, %v17767_v17  ;;  %v17770_v41 = vpop.f32.mrb[102].mxu1  ;;  %17916 = vmatpush3.bf16.msra.mxu1 %v19268_v40  ;;  %v19301_v40 = vld [vmem:[%s26253_s5 + $0x970] sm:$0xff]  }
 0x721   : > { %v17771_v58 = vpop.f32.mrb[103].mxu1  ;;  %17917 = vmatprep.subr.bf16.mxu1 %v19269_v44  ;;  %v19302_v41 = vld [vmem:[%s26253_s5 + $0x930] sm:$0xff]  }
 0x722   : > { %v14821_v63 = vadd.f32 %v17769_v51, %v14781_v6  ;;  %v19303_v58 = vld [vmem:[%s26253_s5 + $0x978] sm:$0xff]  }
 0x724   : > { %17918 = vmatpush3.bf16.msra.mxu1 %v19270_v1 }
 0x725   : > { %17919 = vmatprep.subr.bf16.mxu1 %v19271_v30 }
 0x728   : > { %17920 = vmatpush3.bf16.msra.mxu1 %v19272_v53  ;;  %v19305_v53 = vld [vmem:[%s26253_s5 + $0x9c0] sm:$0xff]  }
 0x729   : > { %17927 = vmatprep.subr.bf16.mxu1 %v19273_v24  ;;  %v19306_v24 = vld [vmem:[%s26253_s5 + $0x980] sm:$0xff]  }
 0x72b   : > { %15099 = vmatmul.mubr.bf16.vlgmr.msra.gmra.mrb[128].mxu1 %v24668_v20  ;;  %v19294_v20 = vld [vmem:[%s26253_s5 + $0x910] sm:$0xff]  }
 0x72c   : > { %17928 = vmatpush3.bf16.msra.mxu1 %v19274_v29  ;;  %15138 = vmatprep.mubr.bf16.mxu1 %v10183_v14  ;;  %v19307_v29 = vld [vmem:[%s26253_s5 + $0x9c8] sm:$0xff]  }
 0x72d   : > { %17929 = vmatprep.subr.bf16.mxu1 %v19275_v26  ;;  %v10184_v26 = vcombine.high %v24712_v7, %v27076_v21  ;;  %v19308_v14 = vld [vmem:[%s26253_s5 + $0x988] sm:$0xff]  }
 0x730   : > { %17930 = vmatpush3.bf16.msra.mxu1 %v19276_v4  ;;  %v19309_v4 = vld [vmem:[%s26253_s5 + $0x9d0] sm:$0xff]  }
 0x731   : > { %17931 = vmatprep.subr.bf16.mxu1 %v19277_v39  ;;  %v19310_v39 = vld [vmem:[%s26253_s5 + $0x990] sm:$0xff]  }
 0x734   : > { %17932 = vmatpush3.bf16.msra.mxu1 %v19278_v52  ;;  %v19312_v52 = vld [vmem:[%s26253_s5 + $0x998] sm:$0xff]  }
 0x735   : > { %17933 = vmatprep.subr.bf16.mxu1 %v19279_v13  ;;  %v19313_v13 = vld [vmem:[%s26253_s5 + $0x9e0] sm:$0xff]  }
 0x738   : > { %17934 = vmatpush3.bf16.msra.mxu1 %v19280_v49  ;;  %v19314_v49 = vld [vmem:[%s26253_s5 + $0x9a0] sm:$0xff]  }
 0x739   : > { %17935 = vmatprep.subr.bf16.mxu1 %v19281_v62  ;;  %v19315_v62 = vld [vmem:[%s26253_s5 + $0x9e8] sm:$0xff]  }
 0x73c   : > { %17936 = vmatpush3.bf16.msra.mxu1 %v19282_v35  ;;  %v19316_v35 = vld [vmem:[%s26253_s5 + $0x9a8] sm:$0xff]  }
 0x73d   : > { %17937 = vmatprep.subr.bf16.mxu1 %v19283_v33  ;;  %v19317_v33 = vld [vmem:[%s26253_s5 + $0x9f0] sm:$0xff]  }
 0x73e   : > { %v17789_v42 = vpop.f32.mrb[104].mxu1 }
 0x73f   : > { %v17790_v15 = vpop.f32.mrb[105].mxu1 }
 0x740   : > { %v17791_v43 = vadd.f32 %v17790_v15, %v17789_v42  ;;  %v17792_v12 = vpop.f32.mrb[106].mxu1  ;;  %17938 = vmatpush3.bf16.msra.mxu1 %v19284_v50 }
 0x741   : > { %v17793_v16 = vpop.f32.mrb[107].mxu1  ;;  %17939 = vmatprep.subr.bf16.mxu1 %v19285_v37 }
 0x742   : > { %v14861_v6 = vadd.f32 %v17791_v43, %v14821_v63  ;;  %v19304_v63 = vld [vmem:[%s26253_s5 + $0x938] sm:$0xff]   ;;  %v19318_v43 = vld [vmem:[%s26253_s5 + $0x9b0] sm:$0xff]  }
 0x744   : > { %17940 = vmatpush3.bf16.msra.mxu1 %v19286_v31  ;;  %v19319_v31 = vld [vmem:[%s26253_s5 + $0x9f8] sm:$0xff]  }
 0x745   : > { %17941 = vmatprep.subr.bf16.mxu1 %v19287_v48  ;;  %v19320_v48 = vld [vmem:[%s26253_s5 + $0x9b8] sm:$0xff]  }
 0x748   : > { %17942 = vmatpush3.bf16.msra.mxu1 %v19288_v59  ;;  %v19322_v59 = vld [vmem:[%s26253_s5 + $0xa00] sm:$0xff]  }
 0x749   : > { %17949 = vmatprep.subr.bf16.mxu1 %v19289_v61  ;;  %v10116_v61 = vcombine.high %v24715_v5, %v27076_v21 }
 0x74b   : > { %15139 = vmatmul.mubr.bf16.vlgmr.msra.gmra.mrb[132].mxu1 %v10115_v9  ;;  %v19324_v9 = vld [vmem:[%s26253_s5 + $0xa08] sm:$0xff]  }
 0x74c   : > { %17950 = vmatpush3.bf16.msra.mxu1 %v19290_v8  ;;  %15178 = vmatprep.mubr.bf16.mxu1 %v24712_v7  ;;  %v19311_v7 = vld [vmem:[%s26253_s5 + $0x9d8] sm:$0xff]   ;;  %v19323_v8 = vld [vmem:[%s26253_s5 + $0xa48] sm:$0xff]  }
 0x74d   : > { %17951 = vmatprep.subr.bf16.mxu1 %v19291_v60  ;;  %v19325_v60 = vld [vmem:[%s26253_s5 + $0xa50] sm:$0xff]  }
 0x750   : > { %17952 = vmatpush3.bf16.msra.mxu1 %v19292_v32  ;;  %v19327_v32 = vld [vmem:[%s26253_s5 + $0xa58] sm:$0xff]  }
 0x751   : > { %17953 = vmatprep.subr.bf16.mxu1 %v19293_v25  ;;  %v19328_v25 = vld [vmem:[%s26253_s5 + $0xa18] sm:$0xff]  }
 0x754   : > { %17954 = vmatpush3.bf16.msra.mxu1 %v19294_v20  ;;  %v19329_v20 = vld [vmem:[%s26253_s5 + $0xa60] sm:$0xff]  }
 0x755   : > { %17955 = vmatprep.subr.bf16.mxu1 %v19295_v3  ;;  %v19330_v3 = vld [vmem:[%s26253_s5 + $0xa20] sm:$0xff]  }
 0x758   : > { %17956 = vmatpush3.bf16.msra.mxu1 %v19296_v36  ;;  %v19331_v36 = vld [vmem:[%s26253_s5 + $0xa68] sm:$0xff]  }
 0x759   : > { %17957 = vmatprep.subr.bf16.mxu1 %v19297_v57  ;;  %v19332_v57 = vld [vmem:[%s26253_s5 + $0xa28] sm:$0xff]  }
 0x75c   : > { %17958 = vmatpush3.bf16.msra.mxu1 %v19298_v0  ;;  %v19333_v0 = vld [vmem:[%s26253_s5 + $0xa70] sm:$0xff]  }
 0x75d   : > { %17959 = vmatprep.subr.bf16.mxu1 %v19299_v19 }
 0x75e   : > { %v17811_v44 = vpop.f32.mrb[108].mxu1 }
 0x75f   : > { %v17812_v17 = vpop.f32.mrb[109].mxu1 }
 0x760   : > { %v17813_v2 = vadd.f32 %v17812_v17, %v17811_v44  ;;  %v17814_v51 = vpop.f32.mrb[110].mxu1  ;;  %17960 = vmatpush3.bf16.msra.mxu1 %v19300_v34  ;;  %v19334_v17 = vld [vmem:[%s26253_s5 + $0xa30] sm:$0xff]  }
 0x761   : > { %v17815_v1 = vpop.f32.mrb[111].mxu1  ;;  %17961 = vmatprep.subr.bf16.mxu1 %v19301_v40  ;;  %v19335_v51 = vld [vmem:[%s26253_s5 + $0xa78] sm:$0xff]  }
 0x762   : > { %v14901_v30 = vadd.f32 %v17813_v2, %v14861_v6  ;;  %v19321_v6 = vld [vmem:[%s26253_s5 + $0xa40] sm:$0xff]   ;;  %v19336_v1 = vld [vmem:[%s26253_s5 + $0xa38] sm:$0xff]  }
 0x764   : > { %17962 = vmatpush3.bf16.msra.mxu1 %v19302_v41 }
 0x765   : > { %17963 = vmatprep.subr.bf16.mxu1 %v19303_v58  ;;  %v19337_v58 = vld [vmem:[%s26253_s5 + $0xac0] sm:$0xff]  }
 0x768   : > { %17964 = vmatpush3.bf16.msra.mxu1 %v19304_v63  ;;  %v19339_v63 = vld [vmem:[%s26253_s5 + $0xac8] sm:$0xff]  }
 0x769   : > { %17971 = vmatprep.subr.bf16.mxu1 %v19305_v53  ;;  %v10185_v53 = vcombine.high %v24749_v10, %v27076_v21 }
 0x76b   : > { %15179 = vmatmul.mubr.bf16.vlgmr.msra.gmra.mrb[136].mxu1 %v24715_v5  ;;  %v19326_v5 = vld [vmem:[%s26253_s5 + $0xa10] sm:$0xff]  }
 0x76c   : > { %17972 = vmatpush3.bf16.msra.mxu1 %v19306_v24  ;;  %15218 = vmatprep.mubr.bf16.mxu1 %v10184_v26  ;;  %v19340_v24 = vld [vmem:[%s26253_s5 + $0xa88] sm:$0xff]   ;;  %v19342_v26 = vld [vmem:[%s26253_s5 + $0xa90] sm:$0xff]  }
 0x76d   : > { %17973 = vmatprep.subr.bf16.mxu1 %v19307_v29  ;;  %v19341_v29 = vld [vmem:[%s26253_s5 + $0xad0] sm:$0xff]  }
 0x770   : > { %17974 = vmatpush3.bf16.msra.mxu1 %v19308_v14  ;;  %v19344_v14 = vld [vmem:[%s26253_s5 + $0xa98] sm:$0xff]  }
 0x771   : > { %17975 = vmatprep.subr.bf16.mxu1 %v19309_v4  ;;  %v19345_v4 = vld [vmem:[%s26253_s5 + $0xae0] sm:$0xff]  }
 0x774   : > { %17976 = vmatpush3.bf16.msra.mxu1 %v19310_v39  ;;  %v19346_v39 = vld [vmem:[%s26253_s5 + $0xaa0] sm:$0xff]  }
 0x775   : > { %17977 = vmatprep.subr.bf16.mxu1 %v19311_v7  ;;  %v19347_v7 = vld [vmem:[%s26253_s5 + $0xae8] sm:$0xff]  }
 0x778   : > { %17978 = vmatpush3.bf16.msra.mxu1 %v19312_v52  ;;  %v19348_v52 = vld [vmem:[%s26253_s5 + $0xaa8] sm:$0xff]  }
 0x779   : > { %17979 = vmatprep.subr.bf16.mxu1 %v19313_v13  ;;  %v19349_v13 = vld [vmem:[%s26253_s5 + $0xaf0] sm:$0xff]  }
 0x77c   : > { %17980 = vmatpush3.bf16.msra.mxu1 %v19314_v49 }
 0x77d   : > { %17981 = vmatprep.subr.bf16.mxu1 %v19315_v62 }
 0x77e   : > { %v17833_v50 = vpop.f32.mrb[112].mxu1 }
 0x77f   : > { %v17834_v37 = vpop.f32.mrb[113].mxu1 }
 0x780   : > { %v17835_v42 = vadd.f32 %v17834_v37, %v17833_v50  ;;  %v17836_v15 = vpop.f32.mrb[114].mxu1  ;;  %17982 = vmatpush3.bf16.msra.mxu1 %v19316_v35  ;;  %v19350_v50 = vld [vmem:[%s26253_s5 + $0xab0] sm:$0xff]  }
 0x781   : > { %v17837_v12 = vpop.f32.mrb[115].mxu1  ;;  %17983 = vmatprep.subr.bf16.mxu1 %v19317_v33 }
 0x782   : > { %v14941_v16 = vadd.f32 %v17835_v42, %v14901_v30  ;;  %v19338_v30 = vld [vmem:[%s26253_s5 + $0xa80] sm:$0xff]   ;;  %v19351_v42 = vld [vmem:[%s26253_s5 + $0xaf8] sm:$0xff]  }
 0x783   : > { %v19353_v12 = vld [vmem:[%s26253_s5 + $0xb40] sm:$0xff]  }
 0x784   : > { %17984 = vmatpush3.bf16.msra.mxu1 %v19318_v43  ;;  %v19352_v43 = vld [vmem:[%s26253_s5 + $0xab8] sm:$0xff]  }
 0x785   : > { %17985 = vmatprep.subr.bf16.mxu1 %v19319_v31  ;;  %v19354_v31 = vld [vmem:[%s26253_s5 + $0xb00] sm:$0xff]  }
 0x788   : > { %17986 = vmatpush3.bf16.msra.mxu1 %v19320_v48  ;;  %v19355_v48 = vld [vmem:[%s26253_s5 + $0xb48] sm:$0xff]  }
 0x789   : > { %17993 = vmatprep.subr.bf16.mxu1 %v19321_v6  ;;  %v19356_v6 = vld [vmem:[%s26253_s5 + $0xb08] sm:$0xff]  }
 0x78b   : > { %15219 = vmatmul.mubr.bf16.vlgmr.msra.gmra.mrb[140].mxu1 %v10116_v61  ;;  %v19359_v61 = vld [vmem:[%s26253_s5 + $0xb58] sm:$0xff]  }
 0x78c   : > { %17994 = vmatpush3.bf16.msra.mxu1 %v19322_v59  ;;  %15258 = vmatprep.mubr.bf16.mxu1 %v24749_v10  ;;  %v19343_v10 = vld [vmem:[%s26253_s5 + $0xad8] sm:$0xff]   ;;  %v19357_v59 = vld [vmem:[%s26253_s5 + $0xb50] sm:$0xff]  }
 0x78d   : > { %17995 = vmatprep.subr.bf16.mxu1 %v19323_v8  ;;  %v19360_v8 = vld [vmem:[%s26253_s5 + $0xb18] sm:$0xff]  }
 0x790   : > { %17996 = vmatpush3.bf16.msra.mxu1 %v19324_v9  ;;  %v19361_v9 = vld [vmem:[%s26253_s5 + $0xb60] sm:$0xff]  }
 0x791   : > { %17997 = vmatprep.subr.bf16.mxu1 %v19325_v60  ;;  %v19362_v60 = vld [vmem:[%s26253_s5 + $0xb20] sm:$0xff]  }
 0x794   : > { %17998 = vmatpush3.bf16.msra.mxu1 %v19326_v5  ;;  %v19363_v5 = vld [vmem:[%s26253_s5 + $0xb68] sm:$0xff]  }
 0x795   : > { %17999 = vmatprep.subr.bf16.mxu1 %v19327_v32  ;;  %v19364_v32 = vld [vmem:[%s26253_s5 + $0xb28] sm:$0xff]  }
 0x798   : > { %18000 = vmatpush3.bf16.msra.mxu1 %v19328_v25  ;;  %v19365_v25 = vld [vmem:[%s26253_s5 + $0xb70] sm:$0xff]  }
 0x799   : > { %18001 = vmatprep.subr.bf16.mxu1 %v19329_v20 }
 0x79c   : > { %18002 = vmatpush3.bf16.msra.mxu1 %v19330_v3 }
 0x79d   : > { %18003 = vmatprep.subr.bf16.mxu1 %v19331_v36 }
 0x79e   : > { %v17855_v19 = vpop.f32.mrb[116].mxu1 }
 0x79f   : > { %v17856_v34 = vpop.f32.mrb[117].mxu1 }
 0x7a0   : > { %v17857_v40 = vadd.f32 %v17856_v34, %v17855_v19  ;;  %v17858_v44 = vpop.f32.mrb[118].mxu1  ;;  %18004 = vmatpush3.bf16.msra.mxu1 %v19332_v57  ;;  %v19367_v34 = vld [vmem:[%s26253_s5 + $0xb78] sm:$0xff]  }
 0x7a1   : > { %v17859_v2 = vpop.f32.mrb[119].mxu1  ;;  %18005 = vmatprep.subr.bf16.mxu1 %v19333_v0  ;;  %v19366_v0 = vld [vmem:[%s26253_s5 + $0xb30] sm:$0xff]   ;;  %v19368_v44 = vld [vmem:[%s26253_s5 + $0xb38] sm:$0xff]  }
 0x7a2   : > { %v14981_v41 = vadd.f32 %v17857_v40, %v14941_v16  ;;  %v10117_v16 = vcombine.high %v24735_v46, %v27076_v21  ;;  %v19370_v2 = vld [vmem:[%s26253_s5 + $0xb80] sm:$0xff]  }
 0x7a4   : > { %18006 = vmatpush3.bf16.msra.mxu1 %v19334_v17  ;;  %v19369_v17 = vld [vmem:[%s26253_s5 + $0xbc0] sm:$0xff]  }
 0x7a5   : > { %18007 = vmatprep.subr.bf16.mxu1 %v19335_v51  ;;  %v19371_v51 = vld [vmem:[%s26253_s5 + $0xbc8] sm:$0xff]  }
 0x7a8   : > { %18008 = vmatpush3.bf16.msra.mxu1 %v19336_v1  ;;  %v19372_v1 = vld [vmem:[%s26253_s5 + $0xb88] sm:$0xff]  }
 0x7a9   : > { %18015 = vmatprep.subr.bf16.mxu1 %v19337_v58  ;;  %v19373_v58 = vld [vmem:[%s26253_s5 + $0xbd0] sm:$0xff]  }
 0x7ab   : > { %15259 = vmatmul.mubr.bf16.vlgmr.msra.gmra.mrb[144].mxu1 %v24735_v46  ;;  %v19358_v46 = vld [vmem:[%s26253_s5 + $0xb10] sm:$0xff]  }
 0x7ac   : > { %18016 = vmatpush3.bf16.msra.mxu1 %v19338_v30  ;;  %15298 = vmatprep.mubr.bf16.mxu1 %v10185_v53  ;;  %v19374_v30 = vld [vmem:[%s26253_s5 + $0xb90] sm:$0xff]   ;;  %v19377_v53 = vld [vmem:[%s26253_s5 + $0xbe0] sm:$0xff]  }
 0x7ad   : > { %18017 = vmatprep.subr.bf16.mxu1 %v19339_v63  ;;  %v19376_v63 = vld [vmem:[%s26253_s5 + $0xb98] sm:$0xff]  }
 0x7b0   : > { %18018 = vmatpush3.bf16.msra.mxu1 %v19340_v24  ;;  %v19378_v24 = vld [vmem:[%s26253_s5 + $0xba0] sm:$0xff]  }
 0x7b1   : > { %18019 = vmatprep.subr.bf16.mxu1 %v19341_v29  ;;  %v19379_v29 = vld [vmem:[%s26253_s5 + $0xbe8] sm:$0xff]  }
 0x7b4   : > { %18020 = vmatpush3.bf16.msra.mxu1 %v19342_v26  ;;  %v19380_v26 = vld [vmem:[%s26253_s5 + $0xba8] sm:$0xff]  }
 0x7b5   : > { %18021 = vmatprep.subr.bf16.mxu1 %v19343_v10  ;;  %v19381_v10 = vld [vmem:[%s26253_s5 + $0xbf0] sm:$0xff]  }
 0x7b8   : > { %18022 = vmatpush3.bf16.msra.mxu1 %v19344_v14 }
 0x7b9   : > { %18023 = vmatprep.subr.bf16.mxu1 %v19345_v4 }
 0x7bc   : > { %18024 = vmatpush3.bf16.msra.mxu1 %v19346_v39 }
 0x7bd   : > { %18025 = vmatprep.subr.bf16.mxu1 %v19347_v7 }
 0x7be   : > { %v17877_v49 = vpop.f32.mrb[120].mxu1 }
 0x7bf   : > { %v17878_v62 = vpop.f32.mrb[121].mxu1 }
 0x7c0   : > { %v17879_v35 = vadd.f32 %v17878_v62, %v17877_v49  ;;  %v17880_v33 = vpop.f32.mrb[122].mxu1  ;;  %18026 = vmatpush3.bf16.msra.mxu1 %v19348_v52  ;;  %v19382_v52 = vld [vmem:[%s26253_s5 + $0xbb0] sm:$0xff]   ;;  %v19383_v49 = vld [vmem:[%s26253_s5 + $0xbf8] sm:$0xff]  }
 0x7c1   : > { %v17881_v37 = vpop.f32.mrb[123].mxu1  ;;  %18027 = vmatprep.subr.bf16.mxu1 %v19349_v13  ;;  %v19385_v33 = vld [vmem:[%s26253_s5 + $0xc40] sm:$0xff]  }
 0x7c2   : > { %v15021_v15 = vadd.f32 %v17879_v35, %v14981_v41  ;;  %v10186_v41 = vcombine.high %v24752_v22, %v27076_v21  ;;  %v19384_v35 = vld [vmem:[%s26253_s5 + $0xbb8] sm:$0xff]   ;;  %v10118_v37 = vcombine.high %v24741_v23, %v27076_v21 }
 0x7c4   : > { %18028 = vmatpush3.bf16.msra.mxu1 %v19350_v50  ;;  %v19386_v50 = vld [vmem:[%s26253_s5 + $0xc00] sm:$0xff]  }
 0x7c5   : > { %18029 = vmatprep.subr.bf16.mxu1 %v19351_v42  ;;  %v19387_v42 = vld [vmem:[%s26253_s5 + $0xc48] sm:$0xff]  }
 0x7c8   : > { %18030 = vmatpush3.bf16.msra.mxu1 %v19352_v43  ;;  %v19389_v43 = vld [vmem:[%s26253_s5 + $0xc50] sm:$0xff]  }
 0x7c9   : > { %18037 = vmatprep.subr.bf16.mxu1 %v19353_v12  ;;  %v19391_v12 = vld [vmem:[%s26253_s5 + $0xc58] sm:$0xff]  }
 0x7cb   : > { %15299 = vmatmul.mubr.bf16.vlgmr.msra.gmra.mrb[148].mxu1 %v10117_v16  ;;  %v19393_v16 = vld [vmem:[%s26253_s5 + $0xc60] sm:$0xff]  }
 0x7cc   : > { %18038 = vmatpush3.bf16.msra.mxu1 %v19354_v31  ;;  %15338 = vmatprep.mubr.bf16.mxu1 %v24752_v22  ;;  %v19375_v22 = vld [vmem:[%s26253_s5 + $0xbd8] sm:$0xff]  }
 0x7cd   : > { %18039 = vmatprep.subr.bf16.mxu1 %v19355_v48  ;;  %v19392_v31 = vld [vmem:[%s26253_s5 + $0xc18] sm:$0xff]   ;;  %v19394_v48 = vld [vmem:[%s26253_s5 + $0xc20] sm:$0xff]  }
 0x7d0   : > { %18040 = vmatpush3.bf16.msra.mxu1 %v19356_v6  ;;  %v19395_v6 = vld [vmem:[%s26253_s5 + $0xc68] sm:$0xff]  }
 0x7d1   : > { %18041 = vmatprep.subr.bf16.mxu1 %v19357_v59  ;;  %v19396_v59 = vld [vmem:[%s26253_s5 + $0xc28] sm:$0xff]  }
 0x7d4   : > { %18042 = vmatpush3.bf16.msra.mxu1 %v19358_v46  ;;  %v19397_v46 = vld [vmem:[%s26253_s5 + $0xc70] sm:$0xff]  }
 0x7d5   : > { %18043 = vmatprep.subr.bf16.mxu1 %v19359_v61 }
 0x7d8   : > { %18044 = vmatpush3.bf16.msra.mxu1 %v19360_v8 }
 0x7d9   : > { %18045 = vmatprep.subr.bf16.mxu1 %v19361_v9 }
 0x7dc   : > { %18046 = vmatpush3.bf16.msra.mxu1 %v19362_v60 }
 0x7dd   : > { %18047 = vmatprep.subr.bf16.mxu1 %v19363_v5  ;;  %v19398_v5 = vld [vmem:[%s26253_s5 + $0xc30] sm:$0xff]  }
 0x7de   : > { %v17899_v20 = vpop.f32.mrb[124].mxu1 }
 0x7df   : > { %v17900_v3 = vpop.f32.mrb[125].mxu1 }
 0x7e0   : > { %v17901_v36 = vadd.f32 %v17900_v3, %v17899_v20  ;;  %v17902_v57 = vpop.f32.mrb[126].mxu1  ;;  %18048 = vmatpush3.bf16.msra.mxu1 %v19364_v32  ;;  %v19400_v3 = vld [vmem:[%s26253_s5 + $0xc38] sm:$0xff]  }
 0x7e1   : > { %v17903_v19 = vpop.f32.mrb[127].mxu1  ;;  %18049 = vmatprep.subr.bf16.mxu1 %v19365_v25  ;;  %v19399_v25 = vld [vmem:[%s26253_s5 + $0xc78] sm:$0xff]   ;;  %v19402_v57 = vld [vmem:[%s26253_s5 + $0xc80] sm:$0xff]  }
 0x7e2   : > { %v15061_v40 = vadd.f32 %v17901_v36, %v15021_v15  ;;  %v19388_v15 = vld [vmem:[%s26253_s5 + $0xc08] sm:$0xff]   ;;  %v19401_v36 = vld [vmem:[%s26253_s5 + $0xcc0] sm:$0xff]   ;;  %v10319_v19 = vcombine.high %v24764_v55, %v27076_v21 }
 0x7e4   : > { %18050 = vmatpush3.bf16.msra.mxu1 %v19366_v0  ;;  %v19403_v0 = vld [vmem:[%s26253_s5 + $0xcc8] sm:$0xff]  }
 0x7e5   : > { %18051 = vmatprep.subr.bf16.mxu1 %v19367_v34  ;;  %v19404_v34 = vld [vmem:[%s26253_s5 + $0xc88] sm:$0xff]  }
 0x7e8   : > { %18052 = vmatpush3.bf16.msra.mxu1 %v19368_v44  ;;  %v19406_v44 = vld [vmem:[%s26253_s5 + $0xc90] sm:$0xff]  }
 0x7e9   : > { %18059 = vmatprep.subr.bf16.mxu1 %v19369_v17  ;;  %v19408_v17 = vld [vmem:[%s26253_s5 + $0xc98] sm:$0xff]  }
 0x7eb   : > { %15339 = vmatmul.mubr.bf16.vlgmr.msra.gmra.mrb[152].mxu1 %v24741_v23  ;;  %v19390_v23 = vld [vmem:[%s26253_s5 + $0xc10] sm:$0xff]  }
 0x7ec   : > { %18060 = vmatpush3.bf16.msra.mxu1 %v19370_v2  ;;  %15378 = vmatprep.mubr.bf16.mxu1 %v10186_v41  ;;  %v19409_v2 = vld [vmem:[%s26253_s5 + $0xce0] sm:$0xff]   ;;  %v19411_v41 = vld [vmem:[%s26253_s5 + $0xce8] sm:$0xff]  }
 0x7ed   : > { %18061 = vmatprep.subr.bf16.mxu1 %v19371_v51  ;;  %v19410_v51 = vld [vmem:[%s26253_s5 + $0xca0] sm:$0xff]  }
 0x7f0   : > { %18062 = vmatpush3.bf16.msra.mxu1 %v19372_v1  ;;  %v19412_v1 = vld [vmem:[%s26253_s5 + $0xca8] sm:$0xff]  }
 0x7f1   : > { %18063 = vmatprep.subr.bf16.mxu1 %v19373_v58  ;;  %v19413_v58 = vld [vmem:[%s26253_s5 + $0xcf0] sm:$0xff]  }
 0x7f4   : > { %18064 = vmatpush3.bf16.msra.mxu1 %v19374_v30 }
 0x7f5   : > { %18065 = vmatprep.subr.bf16.mxu1 %v19375_v22 }
 0x7f8   : > { %18066 = vmatpush3.bf16.msra.mxu1 %v19376_v63 }
 0x7f9   : > { %18067 = vmatprep.subr.bf16.mxu1 %v19377_v53 }
 0x7fc   : > { %18068 = vmatpush3.bf16.msra.mxu1 %v19378_v24  ;;  %v19414_v24 = vld [vmem:[%s26253_s5 + $0xcb0] sm:$0xff]  }
 0x7fd   : > { %18069 = vmatprep.subr.bf16.mxu1 %v19379_v29 }
 0x7fe   : > { %v17921_v14 = vpop.f32.mrb[128].mxu1 }
 0x7ff   : > { %v17922_v4 = vpop.f32.mrb[129].mxu1 }
 0x800   : > { %v17923_v39 = vadd.f32 %v17922_v4, %v17921_v14  ;;  %v17924_v7 = vpop.f32.mrb[130].mxu1  ;;  %18070 = vmatpush3.bf16.msra.mxu1 %v19380_v26  ;;  %v19415_v26 = vld [vmem:[%s26253_s5 + $0xcf8] sm:$0xff]   ;;  %v19417_v4 = vld [vmem:[%s26253_s5 + $0xd40] sm:$0xff]  }
 0x801   : > { %v17925_v13 = vpop.f32.mrb[131].mxu1  ;;  %18071 = vmatprep.subr.bf16.mxu1 %v19381_v10  ;;  %v19416_v14 = vld [vmem:[%s26253_s5 + $0xcb8] sm:$0xff]   ;;  %v10251_v7 = vcombine.high %v24784_v11, %v27076_v21 }
 0x802   : > { %v15101_v62 = vadd.f32 %v17923_v39, %v15061_v40  ;;  %v19405_v40 = vld [vmem:[%s26253_s5 + $0xcd0] sm:$0xff]   ;;  %v19418_v39 = vld [vmem:[%s26253_s5 + $0xd00] sm:$0xff]   ;;  %v19420_v13 = vld [vmem:[%s26253_s5 + $0xd08] sm:$0xff]  }
 0x804   : > { %18072 = vmatpush3.bf16.msra.mxu1 %v19382_v52  ;;  %v19419_v52 = vld [vmem:[%s26253_s5 + $0xd48] sm:$0xff]  }
 0x805   : > { %18073 = vmatprep.subr.bf16.mxu1 %v19383_v49  ;;  %v19421_v49 = vld [vmem:[%s26253_s5 + $0xd50] sm:$0xff]  }
 0x808   : > { %18074 = vmatpush3.bf16.msra.mxu1 %v19384_v35  ;;  %v19424_v35 = vld [vmem:[%s26253_s5 + $0xd18] sm:$0xff]  }
 0x809   : > { %18081 = vmatprep.subr.bf16.mxu1 %v19385_v33  ;;  %v19425_v33 = vld [vmem:[%s26253_s5 + $0xd60] sm:$0xff]  }
 0x80b   : > { %15379 = vmatmul.mubr.bf16.vlgmr.msra.gmra.mrb[156].mxu1 %v10118_v37  ;;  %v19427_v37 = vld [vmem:[%s26253_s5 + $0xd68] sm:$0xff]  }
 0x80c   : > { %18082 = vmatpush3.bf16.msra.mxu1 %v19386_v50  ;;  %15418 = vmatprep.mubr.bf16.mxu1 %v24764_v55  ;;  %v19407_v55 = vld [vmem:[%s26253_s5 + $0xcd8] sm:$0xff]   ;;  %v19426_v50 = vld [vmem:[%s26253_s5 + $0xd20] sm:$0xff]  }
 0x80d   : > { %18083 = vmatprep.subr.bf16.mxu1 %v19387_v42  ;;  %v19428_v42 = vld [vmem:[%s26253_s5 + $0xd28] sm:$0xff]  }
 0x810   : > { %18084 = vmatpush3.bf16.msra.mxu1 %v19388_v15  ;;  %v19429_v15 = vld [vmem:[%s26253_s5 + $0xd70] sm:$0xff]  }
 0x811   : > { %18085 = vmatprep.subr.bf16.mxu1 %v19389_v43 }
 0x814   : > { %18086 = vmatpush3.bf16.msra.mxu1 %v19390_v23 }
 0x815   : > { %18087 = vmatprep.subr.bf16.mxu1 %v19391_v12 }
 0x818   : > { %18088 = vmatpush3.bf16.msra.mxu1 %v19392_v31 }
 0x819   : > { %18089 = vmatprep.subr.bf16.mxu1 %v19393_v16  ;;  %v19430_v16 = vld [vmem:[%s26253_s5 + $0xd30] sm:$0xff]  }
 0x81c   : > { %18090 = vmatpush3.bf16.msra.mxu1 %v19394_v48 }
 0x81d   : > { %18091 = vmatprep.subr.bf16.mxu1 %v19395_v6  ;;  %v19431_v6 = vld [vmem:[%s26253_s5 + $0xd78] sm:$0xff]  }
 0x81e   : > { %v17943_v61 = vpop.f32.mrb[132].mxu1 }
 0x81f   : > { %v17944_v8 = vpop.f32.mrb[133].mxu1 }
 0x820   : > { %v17945_v9 = vadd.f32 %v17944_v8, %v17943_v61  ;;  %v17946_v60 = vpop.f32.mrb[134].mxu1  ;;  %18092 = vmatpush3.bf16.msra.mxu1 %v19396_v59  ;;  %v19433_v61 = vld [vmem:[%s26253_s5 + $0xdc0] sm:$0xff]  }
 0x821   : > { %v17947_v32 = vpop.f32.mrb[135].mxu1  ;;  %18093 = vmatprep.subr.bf16.mxu1 %v19397_v46  ;;  %v19432_v46 = vld [vmem:[%s26253_s5 + $0xd38] sm:$0xff]   ;;  %v19434_v8 = vld [vmem:[%s26253_s5 + $0xd80] sm:$0xff]   ;;  %v10320_v60 = vcombine.high %v24768_v38, %v27076_v21 }
 0x822   : > { %v15141_v20 = vadd.f32 %v17945_v9, %v15101_v62  ;;  %v19423_v62 = vld [vmem:[%s26253_s5 + $0xd58] sm:$0xff]   ;;  %v19435_v9 = vld [vmem:[%s26253_s5 + $0xdc8] sm:$0xff]   ;;  %v19437_v32 = vld [vmem:[%s26253_s5 + $0xdd0] sm:$0xff]  }
 0x824   : > { %18094 = vmatpush3.bf16.msra.mxu1 %v19398_v5  ;;  %v19436_v5 = vld [vmem:[%s26253_s5 + $0xd88] sm:$0xff]  }
 0x825   : > { %18095 = vmatprep.subr.bf16.mxu1 %v19399_v25  ;;  %v19438_v25 = vld [vmem:[%s26253_s5 + $0xd90] sm:$0xff]  }
 0x828   : > { %18096 = vmatpush3.bf16.msra.mxu1 %v19400_v3  ;;  %v19441_v3 = vld [vmem:[%s26253_s5 + $0xde0] sm:$0xff]  }
 0x829   : > { %18103 = vmatprep.subr.bf16.mxu1 %v19401_v36  ;;  %v19442_v36 = vld [vmem:[%s26253_s5 + $0xda0] sm:$0xff]  }
 0x82b   : > { %15419 = vmatmul.mubr.bf16.vlgmr.msra.gmra.mrb[160].mxu1 %v24784_v11  ;;  %v19422_v11 = vld [vmem:[%s26253_s5 + $0xd10] sm:$0xff]  }
 0x82c   : > { %18104 = vmatpush3.bf16.msra.mxu1 %v19402_v57  ;;  %15458 = vmatprep.mubr.bf16.mxu1 %v10319_v19  ;;  %v19443_v57 = vld [vmem:[%s26253_s5 + $0xde8] sm:$0xff]   ;;  %v19445_v19 = vld [vmem:[%s26253_s5 + $0xdf0] sm:$0xff]  }
 0x82d   : > { %18105 = vmatprep.subr.bf16.mxu1 %v19403_v0  ;;  %v19444_v0 = vld [vmem:[%s26253_s5 + $0xda8] sm:$0xff]  }
 0x830   : > { %18106 = vmatpush3.bf16.msra.mxu1 %v19404_v34 }
 0x831   : > { %18107 = vmatprep.subr.bf16.mxu1 %v19405_v40 }
 0x834   : > { %18108 = vmatpush3.bf16.msra.mxu1 %v19406_v44 }
 0x835   : > { %18109 = vmatprep.subr.bf16.mxu1 %v19407_v55 }
 0x838   : > { %18110 = vmatpush3.bf16.msra.mxu1 %v19408_v17  ;;  %v19446_v17 = vld [vmem:[%s26253_s5 + $0xdb0] sm:$0xff]  }
 0x839   : > { %18111 = vmatprep.subr.bf16.mxu1 %v19409_v2 }
 0x83c   : > { %18112 = vmatpush3.bf16.msra.mxu1 %v19410_v51  ;;  %v19447_v51 = vld [vmem:[%s26253_s5 + $0xdf8] sm:$0xff]  }
 0x83d   : > { %18113 = vmatprep.subr.bf16.mxu1 %v19411_v41 }
 0x83e   : > { %v17965_v30 = vpop.f32.mrb[136].mxu1 }
 0x83f   : > { %v17966_v22 = vpop.f32.mrb[137].mxu1 }
 0x840   : > { %v17967_v63 = vadd.f32 %v17966_v22, %v17965_v30  ;;  %v17968_v53 = vpop.f32.mrb[138].mxu1  ;;  %18114 = vmatpush3.bf16.msra.mxu1 %v19412_v1  ;;  %v19448_v1 = vld [vmem:[%s26253_s5 + $0xdb8] sm:$0xff]   ;;  %v19450_v30 = vld [vmem:[%s26253_s5 + $0xe00] sm:$0xff]   ;;  %v10252_v22 = vcombine.high %v24787_v54, %v27076_v21  ;;  %v19454_v21 = vld [vmem:[%s26253_s5 + $0xe10] sm:$0xff]  }
 0x841   : > { %v17969_v29 = vpop.f32.mrb[139].mxu1  ;;  %18115 = vmatprep.subr.bf16.mxu1 %v19413_v58  ;;  %v19449_v58 = vld [vmem:[%s26253_s5 + $0xe40] sm:$0xff]   ;;  %v19452_v53 = vld [vmem:[%s26253_s5 + $0xe08] sm:$0xff]  }
 0x842   : > { %v15181_v10 = vadd.f32 %v17967_v63, %v15141_v20  ;;  %v19440_v20 = vld [vmem:[%s26253_s5 + $0xd98] sm:$0xff]   ;;  %v19451_v63 = vld [vmem:[%s26253_s5 + $0xe48] sm:$0xff]   ;;  %v19457_v29 = vld [vmem:[%s26253_s5 + $0xe60] sm:$0xff]  }
 0x844   : > { %18116 = vmatpush3.bf16.msra.mxu1 %v19414_v24  ;;  %v19453_v24 = vld [vmem:[%s26253_s5 + $0xe50] sm:$0xff]  }
 0x845   : > { %18117 = vmatprep.subr.bf16.mxu1 %v19415_v26  ;;  %v19458_v26 = vld [vmem:[%s26253_s5 + $0xe20] sm:$0xff]  }
 0x848   : > { %18118 = vmatpush3.bf16.msra.mxu1 %v19416_v14  ;;  %v19460_v14 = vld [vmem:[%s26253_s5 + $0xe28] sm:$0xff]  }
 0x849   : > { %18125 = vmatprep.subr.bf16.mxu1 %v19417_v4  ;;  %v19461_v4 = vld [vmem:[%s26253_s5 + $0xe70] sm:$0xff]  }
 0x84b   : > { %15459 = vmatmul.mubr.bf16.vlgmr.msra.gmra.mrb[164].mxu1 %v10251_v7 }
 0x84c   : > { %18126 = vmatpush3.bf16.msra.mxu1 %v19418_v39  ;;  %15498 = vmatprep.mubr.bf16.mxu1 %v24768_v38  ;;  %v19439_v38 = vld [vmem:[%s26253_s5 + $0xdd8] sm:$0xff]  }
 0x84d   : > { %18127 = vmatprep.subr.bf16.mxu1 %v19419_v52 }
 0x850   : > { %18128 = vmatpush3.bf16.msra.mxu1 %v19420_v13 }
 0x851   : > { %18129 = vmatprep.subr.bf16.mxu1 %v19421_v49  ;;  %v19462_v49 = vld [vmem:[%s26253_s5 + $0xe30] sm:$0xff]  }
 0x854   : > { %18130 = vmatpush3.bf16.msra.mxu1 %v19422_v11 }
 0x855   : > { %18131 = vmatprep.subr.bf16.mxu1 %v19423_v62  ;;  %v19463_v62 = vld [vmem:[%s26253_s5 + $0xe78] sm:$0xff]  }
 0x858   : > { %18132 = vmatpush3.bf16.msra.mxu1 %v19424_v35 }
 0x859   : > { %18133 = vmatprep.subr.bf16.mxu1 %v19425_v33  ;;  %v19464_v33 = vld [vmem:[%s26253_s5 + $0xe38] sm:$0xff]  }
 0x85c   : > { %18134 = vmatpush3.bf16.msra.mxu1 %v19426_v50  ;;  %v19465_v50 = vld [vmem:[%s26253_s5 + $0xf40] sm:$0xff]  }
 0x85d   : > { %18135 = vmatprep.subr.bf16.mxu1 %v19427_v37  ;;  %v19466_v37 = vld [vmem:[%s26253_s5 + $0xf00] sm:$0xff]  }
 0x85e   : > { %v17987_v43 = vpop.f32.mrb[140].mxu1 }
 0x85f   : > { %v17988_v23 = vpop.f32.mrb[141].mxu1 }
 0x860   : > { %v17989_v12 = vadd.f32 %v17988_v23, %v17987_v43  ;;  %v17990_v31 = vpop.f32.mrb[142].mxu1  ;;  %18136 = vmatpush3.bf16.msra.mxu1 %v19428_v42  ;;  %v19467_v42 = vld [vmem:[%s26253_s5 + $0xf48] sm:$0xff]   ;;  %v19469_v43 = vld [vmem:[%s26253_s5 + $0xf50] sm:$0xff]  }
 0x861   : > { %v17991_v48 = vpop.f32.mrb[143].mxu1  ;;  %18137 = vmatprep.subr.bf16.mxu1 %v19429_v15  ;;  %v19468_v15 = vld [vmem:[%s26253_s5 + $0xf08] sm:$0xff]   ;;  %v19470_v23 = vld [vmem:[%s26253_s5 + $0xf10] sm:$0xff]   ;;  %v19474_v31 = vld [vmem:[%s26253_s5 + $0xf20] sm:$0xff]  }
 0x862   : > { %v15221_v59 = vadd.f32 %v17989_v12, %v15181_v10  ;;  %v19459_v10 = vld [vmem:[%s26253_s5 + $0xe68] sm:$0xff]   ;;  %v19473_v12 = vld [vmem:[%s26253_s5 + $0xf60] sm:$0xff]  }
 0x863   : > { %v19476_v48 = vld [vmem:[%s26253_s5 + $0xf28] sm:$0xff]  }
 0x864   : > { %18138 = vmatpush3.bf16.msra.mxu1 %v19430_v16  ;;  %v19475_v16 = vld [vmem:[%s26253_s5 + $0xf68] sm:$0xff]  }
 0x865   : > { %18139 = vmatprep.subr.bf16.mxu1 %v19431_v6  ;;  %v19477_v6 = vld [vmem:[%s26253_s5 + $0xf70] sm:$0xff]  }
 0x868   : > { %18140 = vmatpush3.bf16.msra.mxu1 %v19432_v46 }
 0x869   : > { %18147 = vmatprep.subr.bf16.mxu1 %v19433_v61 }
 0x86b   : > { %15499 = vmatmul.mubr.bf16.vlgmr.msra.gmra.mrb[168].mxu1 %v24787_v54  ;;  %v19455_v54 = vld [vmem:[%s26253_s5 + $0xe58] sm:$0xff]  }
 0x86c   : > { %18148 = vmatpush3.bf16.msra.mxu1 %v19434_v8  ;;  %15538 = vmatprep.mubr.bf16.mxu1 %v10320_v60 }
 0x86d   : > { %18149 = vmatprep.subr.bf16.mxu1 %v19435_v9  ;;  %v19478_v9 = vld [vmem:[%s26253_s5 + $0xf30] sm:$0xff]  }
 0x870   : > { %18150 = vmatpush3.bf16.msra.mxu1 %v19436_v5  ;;  %v19479_v5 = vld [vmem:[%s26253_s5 + $0xf78] sm:$0xff]  }
 0x871   : > { %18151 = vmatprep.subr.bf16.mxu1 %v19437_v32 }
 0x874   : > { %18152 = vmatpush3.bf16.msra.mxu1 %v19438_v25  ;;  %v19480_v25 = vld [vmem:[%s26253_s5 + $0xf38] sm:$0xff]  }
 0x875   : > { %18153 = vmatprep.subr.bf16.mxu1 %v19439_v38 }
 0x878   : > { %18154 = vmatpush3.bf16.msra.mxu1 %v19440_v20 }
 0x879   : > { %18155 = vmatprep.subr.bf16.mxu1 %v19441_v3 }
 0x87c   : > { %18156 = vmatpush3.bf16.msra.mxu1 %v19442_v36 }
 0x87d   : > { %18157 = vmatprep.subr.bf16.mxu1 %v19443_v57 }
 0x87e   : > { %v18009_v34 = vpop.f32.mrb[144].mxu1 }
 0x87f   : > { %v18010_v40 = vpop.f32.mrb[145].mxu1 }
 0x880   : > { %v18011_v44 = vadd.f32 %v18010_v40, %v18009_v34  ;;  %v18012_v55 = vpop.f32.mrb[146].mxu1  ;;  %18158 = vmatpush3.bf16.msra.mxu1 %v19444_v0 }
 0x881   : > { %v18013_v2 = vpop.f32.mrb[147].mxu1  ;;  %18159 = vmatprep.subr.bf16.mxu1 %v19445_v19 }
 0x882   : > { %v15261_v41 = vadd.f32 %v18011_v44, %v15221_v59 }
 0x884   : > { %18160 = vmatpush3.bf16.msra.mxu1 %v19446_v17 }
 0x885   : > { %18161 = vmatprep.subr.bf16.mxu1 %v19447_v51 }
 0x888   : > { %18162 = vmatpush3.bf16.msra.mxu1 %v19448_v1 }
 0x889   : > { %18169 = vmatprep.subr.bf16.mxu1 %v19449_v58 }
 0x88b   : > { %15539 = vmatmul.mubr.bf16.vlgmr.msra.gmra.mrb[172].mxu1 %v10252_v22 }
 0x88c   : > { %18170 = vmatpush3.bf16.msra.mxu1 %v19450_v30  ;;  %15578 = vmatprep.mubr.bf16.mxu1 %v24674_v18  ;;  %v19456_v18 = vld [vmem:[%s26253_s5 + $0xe18] sm:$0xff]  }
 0x88d   : > { %18171 = vmatprep.subr.bf16.mxu1 %v19451_v63 }
 0x890   : > { %18172 = vmatpush3.bf16.msra.mxu1 %v19452_v53 }
 0x891   : > { %18173 = vmatprep.subr.bf16.mxu1 %v19453_v24 }
 0x894   : > { %18174 = vmatpush3.bf16.msra.mxu1 %v19454_v21 }
 0x895   : > { %18175 = vmatprep.subr.bf16.mxu1 %v19455_v54 }
 0x898   : > { %18176 = vmatpush3.bf16.msra.mxu1 %v19456_v18 }
 0x899   : > { %18177 = vmatprep.subr.bf16.mxu1 %v19457_v29 }
 0x89c   : > { %18178 = vmatpush3.bf16.msra.mxu1 %v19458_v26 }
 0x89d   : > { %18179 = vmatprep.subr.bf16.mxu1 %v19459_v10 }
 0x89e   : > { %v18031_v39 = vpop.f32.mrb[148].mxu1 }
 0x89f   : > { %v18032_v7 = vpop.f32.mrb[149].mxu1 }
 0x8a0   : > { %v18033_v52 = vadd.f32 %v18032_v7, %v18031_v39  ;;  %v18034_v13 = vpop.f32.mrb[150].mxu1  ;;  %18180 = vmatpush3.bf16.msra.mxu1 %v19460_v14 }
 0x8a1   : > { %v18035_v11 = vpop.f32.mrb[151].mxu1  ;;  %18181 = vmatprep.subr.bf16.mxu1 %v19461_v4 }
 0x8a2   : > { %v15301_v35 = vadd.f32 %v18033_v52, %v15261_v41 }
 0x8a4   : > { %18182 = vmatpush3.bf16.msra.mxu1 %v19462_v49 }
 0x8a5   : > { %18183 = vmatprep.subr.bf16.mxu1 %v19463_v62 }
 0x8a8   : > { %18184 = vmatpush3.bf16.msra.mxu1 %v19464_v33 }
 0x8a9   : > { %18213 = vmatprep.subr.bf16.mxu1 %v19465_v50 }
 0x8ab   : > { %15579 = vmatmul.mubr.bf16.vlgmr.msra.gmra.mrb[176].mxu1 %v24662_v47  ;;  %v19471_v47 = vld [vmem:[%s26253_s5 + $0xf58] sm:$0xff]  }
 0x8ac   : > { %18214 = vmatpush3.bf16.msra.mxu1 %v19466_v37  ;;  %15658 = vmatprep.mubr.bf16.mxu1 %v24677_v45  ;;  %v19472_v45 = vld [vmem:[%s26253_s5 + $0xf18] sm:$0xff]  }
 0x8ad   : > { %18215 = vmatprep.subr.bf16.mxu1 %v19467_v42 }
 0x8b0   : > { %18216 = vmatpush3.bf16.msra.mxu1 %v19468_v15 }
 0x8b1   : > { %18217 = vmatprep.subr.bf16.mxu1 %v19469_v43 }
 0x8b4   : > { %18218 = vmatpush3.bf16.msra.mxu1 %v19470_v23  ;;  %v17509_v23 = vld [vmem:[%s26255_s7] ss:$0 sm:$0xff] }
 0x8b5   : > { %18219 = vmatprep.subr.bf16.mxu1 %v19471_v47 }
 0x8b8   : > { %18220 = vmatpush3.bf16.msra.mxu1 %v19472_v45 }
 0x8b9   : > { %18221 = vmatprep.subr.bf16.mxu1 %v19473_v12  ;;  %v17510_v12 = vld [vmem:[#allocation3] ss:$0 sm:$0xff] }
 0x8bc   : > { %18222 = vmatpush3.bf16.msra.mxu1 %v19474_v31 }
 0x8bd   : > { %18223 = vmatprep.subr.bf16.mxu1 %v19475_v16 }
 0x8be   : > { %v18053_v59 = vpop.f32.mrb[152].mxu1 }
 0x8bf   : > { %v18054_v46 = vpop.f32.mrb[153].mxu1 }
 0x8c0   : > { %v18055_v61 = vadd.f32 %v18054_v46, %v18053_v59  ;;  %v18056_v8 = vpop.f32.mrb[154].mxu1  ;;  %18224 = vmatpush3.bf16.msra.mxu1 %v19476_v48 }
 0x8c1   : > { %v18057_v60 = vpop.f32.mrb[155].mxu1  ;;  %18225 = vmatprep.subr.bf16.mxu1 %v19477_v6 }
 0x8c2   : > { %v15341_v32 = vadd.f32 %v18055_v61, %v15301_v35 }
 0x8c4   : > { %18226 = vmatpush3.bf16.msra.mxu1 %v19478_v9 }
 0x8c5   : > { %18227 = vmatprep.subr.bf16.mxu1 %v19479_v5 }
 0x8c8   : > { %18228 = vmatpush3.bf16.msra.mxu1 %v19480_v25 }
 0x8cb   : > { %15659 = vmatmul.mubr.bf16.vlgmr.msra.gmra.mrb[180].mxu1 %v24665_v28 }
 0x8de   : > { %v18075_v38 = vpop.f32.mrb[156].mxu1 }
 0x8df   : > { %v18076_v20 = vpop.f32.mrb[157].mxu1 }
 0x8e0   : > { %v18077_v3 = vadd.f32 %v18076_v20, %v18075_v38  ;;  %v18078_v36 = vpop.f32.mrb[158].mxu1 }
 0x8e1   : > { %v18079_v57 = vpop.f32.mrb[159].mxu1 }
 0x8e2   : > { %v15381_v0 = vadd.f32 %v18077_v3, %v15341_v32 }
 0x8fe   : > { %v18097_v19 = vpop.f32.mrb[160].mxu1 }
 0x8ff   : > { %v18098_v34 = vpop.f32.mrb[161].mxu1 }
 0x900   : > { %v18099_v40 = vadd.f32 %v18098_v34, %v18097_v19  ;;  %v18100_v44 = vpop.f32.mrb[162].mxu1 }
 0x901   : > { %v18101_v55 = vpop.f32.mrb[163].mxu1 }
 0x902   : > { %v15421_v17 = vadd.f32 %v18099_v40, %v15381_v0 }
 0x91e   : > { %v18119_v2 = vpop.f32.mrb[164].mxu1 }
 0x91f   : > { %v18120_v51 = vpop.f32.mrb[165].mxu1 }
 0x920   : > { %v18121_v41 = vadd.f32 %v18120_v51, %v18119_v2  ;;  %v18122_v1 = vpop.f32.mrb[166].mxu1 }
 0x921   : > { %v18123_v58 = vpop.f32.mrb[167].mxu1 }
 0x922   : > { %v15461_v30 = vadd.f32 %v18121_v41, %v15421_v17 }
 0x93e   : > { %v18141_v22 = vpop.f32.mrb[168].mxu1 }
 0x93f   : > { %v18142_v28 = vpop.f32.mrb[169].mxu1 }
 0x940   : > { %v18143_v63 = vadd.f32 %v18142_v28, %v18141_v22  ;;  %v18144_v53 = vpop.f32.mrb[170].mxu1 }
 0x941   : > { %v18145_v24 = vpop.f32.mrb[171].mxu1 }
 0x942   : > { %v15501_v21 = vadd.f32 %v18143_v63, %v15461_v30 }
 0x95e   : > { %v18163_v54 = vpop.f32.mrb[172].mxu1 }
 0x95f   : > { %v18164_v18 = vpop.f32.mrb[173].mxu1 }
 0x960   : > { %v18165_v29 = vadd.f32 %v18164_v18, %v18163_v54  ;;  %v18166_v26 = vpop.f32.mrb[174].mxu1 }
 0x961   : > { %v18167_v10 = vpop.f32.mrb[175].mxu1 }
 0x962   : > { %v15541_v14 = vadd.f32 %v18165_v29, %v15501_v21 }
 0x97e   : > { %v18185_v4 = vpop.f32.mrb[176].mxu1 }
 0x97f   : > { %v18186_v39 = vpop.f32.mrb[177].mxu1 }
 0x980   : > { %v18187_v7 = vadd.f32 %v18186_v39, %v18185_v4  ;;  %v18188_v52 = vpop.f32.mrb[178].mxu1 }
 0x981   : > { %v18189_v13 = vpop.f32.mrb[179].mxu1 }
 0x982   : > { %v15581_v49 = vadd.f32 %v18187_v7, %v15541_v14 }
 0x984   : > { %v15621_v11 = vadd.f32 %v25142_v56, %v15581_v49 }
 0x99e   : > { %v18229_v62 = vpop.f32.mrb[180].mxu1 }
 0x99f   : > { %v18230_v35 = vpop.f32.mrb[181].mxu1 }
 0x9a0   : > { %v18231_v33 = vadd.f32 %v18230_v35, %v18229_v62  ;;  %v18232_v50 = vpop.f32.mrb[182].mxu1 }
 0x9a1   : > { %v18233_v37 = vpop.f32.mrb[183].mxu1 }
 0x9a2   : > { %v15661_v42 = vadd.f32 %v18231_v33, %v15621_v11 }
 0x9a4   : > { %v15701_v15 = vadd.f32 %v25198_v27, %v15661_v42 }
 0x9a6   : > { %vm15706_vm6 = vcmp.ge.f32.partialorder %v15701_v15, 0.0  ;;  %v15707_v43 = vmul.f32 0.2, %v15701_v15 }
 0x9a8   : > { %v15708_v47 = vsel %vm15706_vm6, %v15701_v15, %v15707_v43 }
 0x9a9   : > { %v15716_v45 = vmul.f32 %v17509_v23, %v15708_v47 }
 0x9ab   : > { %15717 = vadd.xlane.f32.xlu0 %v15716_v45 }
 0xa38   : > { %v15718_v56 = vpop.xlane.xlu0 %15717 }
 0xa39   : > { %v15726_v31 = vadd.f32 %v17510_v12, %v15718_v56 }
 0xa3b   : > { %15728 = vst.msk [vmem:[%s354_s17] sm:$0xff] %vm15727_vm7, %v15726_v31 }
 0xa3c PF: > { %s21_s11 = sadd.s32 1, %s19499_s11  }
 0xa3d   : > { %p18_p5 = scmp.ge.s32.totalorder %s21_s11, 4  }
 0xa3f   :  { %20 = sbr.rel (!%p18_p5) target bundleno = 3 (0x3), region = 91 }

</bundles_post_ra>
